<compile_context>
chip_gen: v7x
topology: tpu7x:2x2x1
jax: 0.10.0
libtpu: 0.0.40
codegen_flags: <defaults>
</compile_context>

<pallas_src>
import functools

import jax
import jax.numpy as jnp
from jax.experimental import pallas as pl
from jax.experimental.pallas import tpu as pltpu

# --- EncoderConfig defaults ---------------------------------------------------
N_BANDS = 10                       # len(config.bands) == bands_loc.size(0)
N_ANGLES = 3
N_IDX = 5                          # get_spectral_idx -> 5 indices
N_LIN = N_BANDS + N_ANGLES         # 13 "linear" (standardized) input features
IN_FEATS = N_LIN + N_IDX           # 18  (disable_s2_r_idx = False)
HIDDEN = 128                       # first_layer_size / block_layer_sizes
N_RESBLOCKS = 3                    # block_n = [1, 2] -> 3 blocks, depth 2 each
N_LATENT_PARAMS = 2
OUTPUT_SIZE = 12
OUT_FEATS = N_LATENT_PARAMS * OUTPUT_SIZE   # 24
EPS = 1e-4


# --- Pallas kernel ------------------------------------------------------------
def _encoder_kernel(refl_ref, cosang_ref, w0r_ref, w0a_ref, w0s_ref, b0_ref,
                    wres_ref, bres_ref, wout_ref, bout_ref, out_ref):
    refl = refl_ref[...]                       # (TB, 10) raw reflectances, f32
    cos_ang = cosang_ref[...]                  # (TB, 3)  cos(deg2rad(angles)), f32

    # First Linear over the standardized [refl | cos(angles)] features.  The
    # (x - loc) / scale affine has been folded into (w0, b0) offline, so these
    # are two small bf16 dots on the raw streams (f32 accumulation).
    h = jnp.dot(refl.astype(jnp.bfloat16), w0r_ref[...],
                preferred_element_type=jnp.float32)
    h = h + jnp.dot(cos_ang.astype(jnp.bfloat16), w0a_ref[...],
                    preferred_element_type=jnp.float32)

    # Spectral indices from raw reflectances, added as rank-1 updates (VPU) to
    # avoid an in-kernel lane concat.  Divide -> EUP approx reciprocal.
    # TODO(synk): band pairs approximate prosailvae.get_spectral_idx (5
    # normalized-difference indices over the 10-band stack); exact formulas of
    # the original utility may differ.
    def band(i):
        return refl[:, i:i + 1]                # (TB, 1)

    def nd(a, b):
        return (a - b) * pl.reciprocal(a + b + EPS, approx=True)

    b3, b4, b5 = band(1), band(2), band(3)
    b8, b8a, b11, b12 = band(6), band(7), band(8), band(9)
    spec = (nd(b8, b4), nd(b8a, b11), nd(b3, b8), nd(b8, b5), nd(b12, b11))
    w0s = w0s_ref[...]                         # (5, H) f32, not standardized
    for j in range(N_IDX):
        h = h + spec[j] * w0s[j:j + 1, :]      # (TB,1) * (1,H)
    h = jnp.maximum(h + b0_ref[...], 0.0)      # ReLU (f32)

    # EncoderResBlock (depth=2): out = ReLU(Linear(ReLU(Linear(x))) + x)
    # bf16 weights / activations into the MXU, f32 accumulation & elementwise.
    for blk in range(N_RESBLOCKS):
        y = jnp.dot(h.astype(jnp.bfloat16), wres_ref[blk, 0],
                    preferred_element_type=jnp.float32)
        y = jnp.maximum(y + bres_ref[blk, 0], 0.0)
        y = jnp.dot(y.astype(jnp.bfloat16), wres_ref[blk, 1],
                    preferred_element_type=jnp.float32)
        y = y + bres_ref[blk, 1]
        h = jnp.maximum(y + h, 0.0)

    # Final Linear (no last_activation).  Output block is (TB, 24) directly --
    # 24 is the full last dim, so the narrow store is legal and we avoid the
    # 5.3x-inflated padded f32 slab + wrapper slice of the previous version.
    out_ref[...] = (jnp.dot(h.astype(jnp.bfloat16), wout_ref[...],
                            preferred_element_type=jnp.float32)
                    + bout_ref[...])


# --- wrapper ------------------------------------------------------------------
def _round_up(x, m):
    return ((x + m - 1) // m) * m


@functools.partial(jax.jit, static_argnames=("tile_b",))
def prosail_rnn_encode(s2_refl, angles, params, *, tile_b=2048):
    """Equivalent of ProsailRNNEncoder.forward for 2-D (B, C) inputs.

    `params` must come from `prepare_params` (folded / bf16 weights).
    """
    # TODO(synk): 4-D patch input path (batchify_batch_latent) not implemented.
    # TODO(synk): cos(deg2rad) of the tiny (B, 3) angle stream is left as a
    # fused XLA op (guaranteed lowering); everything else runs in the kernel.
    B = s2_refl.shape[0]
    refl = s2_refl.astype(jnp.float32)
    cos_ang = jnp.cos(jnp.deg2rad(angles.astype(jnp.float32)))   # (B, 3)

    # Batch tile: large (per-step overhead ~0.35us amortized) but never
    # over-padding tiny batches.
    tb = _round_up(min(int(tile_b), max(B, 8)), 8)
    # v7x has 2 TensorCores: split large single-step batches into >= 2
    # "parallel" grid steps so both cores get work (no effect on v5e/v6e).
    if B >= 1024 and _round_up(B, tb) == tb:
        tb = _round_up((B + 1) // 2, 8)
    bp = _round_up(B, tb)
    if bp != B:
        refl = jnp.pad(refl, ((0, bp - B), (0, 0)))      # zero rows, dropped below
        cos_ang = jnp.pad(cos_ang, ((0, bp - B), (0, 0)))

    def const_spec(shape):
        return pl.BlockSpec(shape, lambda i, n=len(shape): (0,) * n)

    in_specs = [
        pl.BlockSpec((tb, N_BANDS), lambda i: (i, 0)),    # raw reflectance tile
        pl.BlockSpec((tb, N_ANGLES), lambda i: (i, 0)),   # cos(angles) tile
        const_spec((N_BANDS, HIDDEN)),                    # w0r (folded, bf16)
        const_spec((N_ANGLES, HIDDEN)),                   # w0a (folded, bf16)
        const_spec((N_IDX, HIDDEN)),                      # w0s (f32, rank-1 VPU)
        const_spec((1, HIDDEN)),                          # b0  (folded, f32)
        const_spec((N_RESBLOCKS, 2, HIDDEN, HIDDEN)),     # wres (bf16)
        const_spec((N_RESBLOCKS, 2, 1, HIDDEN)),          # bres (f32)
        const_spec((HIDDEN, OUT_FEATS)),                  # wout (bf16)
        const_spec((1, OUT_FEATS)),                       # bout (f32)
    ]

    out = pl.pallas_call(
        _encoder_kernel,
        out_shape=jax.ShapeDtypeStruct((bp, OUT_FEATS), jnp.float32),
        grid=(bp // tb,),
        in_specs=in_specs,
        out_specs=pl.BlockSpec((tb, OUT_FEATS), lambda i: (i, 0)),
        compiler_params=pltpu.CompilerParams(dimension_semantics=("parallel",)),
    )(refl, cos_ang, params["w0r"], params["w0a"], params["w0s"], params["b0"],
      params["wres"], params["bres"], params["wout"], params["bout"])

    if bp != B:
        out = out[:B]
    return out, angles


# --- one-time weight preparation (fold + bf16) ----------------------------------
def prepare_params(raw):
    """Fold standardization into (w0, b0), split w0 into per-stream blocks and
    cast big matmul weights to bf16.  Pure weight transform; run once."""
    loc = jnp.concatenate([raw["bands_loc"], raw["angles_loc"]], axis=1)        # (1,13)
    scale = jnp.concatenate([raw["bands_scale"], raw["angles_scale"]], axis=1)  # (1,13)
    w0_lin = raw["w0"][:N_LIN] / scale.T                                        # (13,H)
    b0 = raw["b0"] - jnp.dot(loc / scale, raw["w0"][:N_LIN])                    # (1,H)

    return dict(
        w0r=w0_lin[:N_BANDS].astype(jnp.bfloat16),        # (10,H) folded, bf16
        w0a=w0_lin[N_BANDS:].astype(jnp.bfloat16),        # (3,H)  folded, bf16
        w0s=raw["w0"][N_LIN:].astype(jnp.float32),        # (5,H)  f32 (VPU rank-1)
        b0=b0.astype(jnp.float32),
        wres=raw["wres"].astype(jnp.bfloat16),            # (3,2,H,H)
        bres=raw["bres"].astype(jnp.float32),             # (3,2,1,H)
        wout=raw["wout"].astype(jnp.bfloat16),            # (H,24)
        bout=raw["bout"].astype(jnp.float32),             # (1,24)
    )


# --- deterministic parameter init (PyTorch Linear-style uniform) ----------------
def init_params(key):
    keys = jax.random.split(key, 8)

    def linear(k, fan_in, fan_out):
        kw, kb = jax.random.split(k)
        bound = 1.0 / jnp.sqrt(jnp.float32(fan_in))
        w = jax.random.uniform(kw, (fan_in, fan_out), jnp.float32, -bound, bound)
        b = jax.random.uniform(kb, (1, fan_out), jnp.float32, -bound, bound)
        return w, b

    w0, b0 = linear(keys[0], IN_FEATS, HIDDEN)
    wres, bres = [], []
    for blk in range(N_RESBLOCKS):
        ws, bs = [], []
        for lyr in range(2):
            w, b = linear(keys[1 + 2 * blk + lyr], HIDDEN, HIDDEN)
            ws.append(w)
            bs.append(b)
        wres.append(jnp.stack(ws))
        bres.append(jnp.stack(bs))
    wres = jnp.stack(wres)                      # (3, 2, 128, 128)
    bres = jnp.stack(bres)                      # (3, 2, 1, 128)
    wout, bout = linear(keys[7], HIDDEN, OUT_FEATS)

    # io_coeffs standardization parameters (synthetic, deterministic)
    bands_loc = jnp.linspace(0.1, 0.4, N_BANDS, dtype=jnp.float32).reshape(1, -1)
    bands_scale = jnp.linspace(0.2, 0.5, N_BANDS, dtype=jnp.float32).reshape(1, -1)
    angles_loc = jnp.array([[0.5, 0.6, 0.7]], dtype=jnp.float32)
    angles_scale = jnp.array([[0.25, 0.3, 0.35]], dtype=jnp.float32)

    return dict(w0=w0, b0=b0, wres=wres, bres=bres, wout=wout, bout=bout,
                bands_loc=bands_loc, bands_scale=bands_scale,
                angles_loc=angles_loc, angles_scale=angles_scale)


# --- pure-JAX references for verification ---------------------------------------
def _reference_f32(s2_refl, angles, p):
    """Mirrors the original module's math, full f32 / HIGHEST precision."""
    hp = jax.lax.Precision.HIGHEST
    normed_refl = (s2_refl - p["bands_loc"]) / p["bands_scale"]
    normed_ang = (jnp.cos(jnp.deg2rad(angles)) - p["angles_loc"]) / p["angles_scale"]

    def band(i):
        return s2_refl[:, i:i + 1]

    def nd(a, b):
        return (a - b) / (a + b + EPS)

    b3, b4, b5 = band(1), band(2), band(3)
    b8, b8a, b11, b12 = band(6), band(7), band(8), band(9)
    spec = jnp.concatenate(
        [nd(b8, b4), nd(b8a, b11), nd(b3, b8), nd(b8, b5), nd(b12, b11)], axis=-1)

    x = jnp.concatenate([normed_refl, normed_ang, spec], axis=-1)
    h = jax.nn.relu(jnp.dot(x, p["w0"], precision=hp) + p["b0"])
    for blk in range(N_RESBLOCKS):
        y = jax.nn.relu(jnp.dot(h, p["wres"][blk, 0], precision=hp) + p["bres"][blk, 0])
        y = jnp.dot(y, p["wres"][blk, 1], precision=hp) + p["bres"][blk, 1]
        h = jax.nn.relu(y + h)
    out = jnp.dot(h, p["wout"], precision=hp) + p["bout"]
    return out, angles


def _reference_prepared(s2_refl, angles, kp):
    """Same numerics path as the kernel (folded w0, bf16 MXU weights)."""
    refl = s2_refl.astype(jnp.float32)
    cos_ang = jnp.cos(jnp.deg2rad(angles.astype(jnp.float32)))
    h = jnp.dot(refl.astype(jnp.bfloat16), kp["w0r"],
                preferred_element_type=jnp.float32)
    h = h + jnp.dot(cos_ang.astype(jnp.bfloat16), kp["w0a"],
                    preferred_element_type=jnp.float32)

    def band(i):
        return refl[:, i:i + 1]

    def nd(a, b):
        return (a - b) / (a + b + EPS)

    b3, b4, b5 = band(1), band(2), band(3)
    b8, b8a, b11, b12 = band(6), band(7), band(8), band(9)
    spec = (nd(b8, b4), nd(b8a, b11), nd(b3, b8), nd(b8, b5), nd(b12, b11))
    for j in range(N_IDX):
        h = h + spec[j] * kp["w0s"][j:j + 1]
    h = jnp.maximum(h + kp["b0"], 0.0)
    for blk in range(N_RESBLOCKS):
        y = jnp.dot(h.astype(jnp.bfloat16), kp["wres"][blk, 0],
                    preferred_element_type=jnp.float32)
        y = jnp.maximum(y + kp["bres"][blk, 0], 0.0)
        y = jnp.dot(y.astype(jnp.bfloat16), kp["wres"][blk, 1],
                    preferred_element_type=jnp.float32)
        y = y + kp["bres"][blk, 1]
        h = jnp.maximum(y + h, 0.0)
    out = jnp.dot(h.astype(jnp.bfloat16), kp["wout"],
                  preferred_element_type=jnp.float32) + kp["bout"]
    return out, angles


if __name__ == "__main__":
    key = jax.random.PRNGKey(0)
    kp_key, kr, ka = jax.random.split(key, 3)

    B = 300   # small + deliberately ragged batch
    s2_refl = jax.random.uniform(kr, (B, N_BANDS), jnp.float32, 0.0, 1.0)
    angles = jax.random.uniform(ka, (B, N_ANGLES), jnp.float32, 0.0, 80.0)

    raw_params = init_params(kp_key)
    params = prepare_params(raw_params)

    # Default tile (single grid step at this batch size).
    enc_out, ang_out = prosail_rnn_encode(s2_refl, angles, params)
    enc_out = jax.block_until_ready(enc_out)
    assert enc_out.shape == (B, OUT_FEATS)
    assert ang_out.shape == (B, N_ANGLES)

    # Small tile: exercises the batch-padding path and a 3-step grid.
    enc_out_t, _ = prosail_rnn_encode(s2_refl, angles, params, tile_b=128)
    enc_out_t = jax.block_until_ready(enc_out_t)
    err_tile = float(jnp.max(jnp.abs(enc_out - enc_out_t)))
    assert err_tile < 1e-5, f"tiled run mismatch: {err_tile}"

    # Tight check: same numerics (folded w0, bf16 matmul weights, f32 acc).
    ref_bf, _ = _reference_prepared(s2_refl, angles, params)
    err_bf = float(jnp.max(jnp.abs(enc_out - ref_bf)))
    assert err_bf < 1e-2, f"mismatch vs matched-numerics reference: {err_bf}"

    # Semantics check: original-module math in full f32 (bf16 weights => looser tol).
    ref_f32, _ = _reference_f32(s2_refl, angles, raw_params)
    err_f32 = float(jnp.max(jnp.abs(enc_out - ref_f32)))
    assert err_f32 < 5e-2, f"mismatch vs f32 reference: {err_f32}"

    print("KERNEL_OK")
</pallas_src>

<mosaic_0001>
module attributes {stable_mosaic.version = 11 : i64} {
  func.func @_encoder_kernel(%arg0: i32, %arg1: memref<304x10xf32, #tpu.memory_space<vmem>>, %arg2: memref<304x3xf32, #tpu.memory_space<vmem>>, %arg3: memref<10x128xbf16, #tpu.memory_space<vmem>>, %arg4: memref<3x128xbf16, #tpu.memory_space<vmem>>, %arg5: memref<5x128xf32, #tpu.memory_space<vmem>>, %arg6: memref<1x128xf32, #tpu.memory_space<vmem>>, %arg7: memref<3x2x128x128xbf16, #tpu.memory_space<vmem>>, %arg8: memref<3x2x1x128xf32, #tpu.memory_space<vmem>>, %arg9: memref<128x24xbf16, #tpu.memory_space<vmem>>, %arg10: memref<1x24xf32, #tpu.memory_space<vmem>>, %arg11: memref<304x24xf32, #tpu.memory_space<vmem>>) attributes {dimension_semantics = [#tpu.dimension_semantics<parallel>], iteration_bounds = array<i64: 1>, scalar_prefetch = 0 : i64, scratch_operands = 0 : i64, tpu.core_type = #tpu.core_type<tc>, window_params = [{transform_indices = @transform_0, window_bounds = array<i64: 304, 10>}, {transform_indices = @transform_1, window_bounds = array<i64: 304, 3>}, {pipeline_mode = #tpu.pipeline_mode<synchronous>, transform_indices = @transform_2, window_bounds = array<i64: 10, 128>}, {pipeline_mode = #tpu.pipeline_mode<synchronous>, transform_indices = @transform_3, window_bounds = array<i64: 3, 128>}, {pipeline_mode = #tpu.pipeline_mode<synchronous>, transform_indices = @transform_4, window_bounds = array<i64: 5, 128>}, {pipeline_mode = #tpu.pipeline_mode<synchronous>, transform_indices = @transform_5, window_bounds = array<i64: 1, 128>}, {pipeline_mode = #tpu.pipeline_mode<synchronous>, transform_indices = @transform_6, window_bounds = array<i64: 3, 2, 128, 128>}, {pipeline_mode = #tpu.pipeline_mode<synchronous>, transform_indices = @transform_7, window_bounds = array<i64: 3, 2, 1, 128>}, {pipeline_mode = #tpu.pipeline_mode<synchronous>, transform_indices = @transform_8, window_bounds = array<i64: 128, 24>}, {pipeline_mode = #tpu.pipeline_mode<synchronous>, transform_indices = @transform_9, window_bounds = array<i64: 1, 24>}, {transform_indices = @transform_10, window_bounds = array<i64: 304, 24>}]} {
    %c0 = arith.constant 0 : index
    %c0_0 = arith.constant 0 : index
    %0 = vector.load %arg1[%c0, %c0_0] : memref<304x10xf32, #tpu.memory_space<vmem>>, vector<304x10xf32>
    %c0_1 = arith.constant 0 : index
    %c0_2 = arith.constant 0 : index
    %1 = vector.load %arg2[%c0_1, %c0_2] : memref<304x3xf32, #tpu.memory_space<vmem>>, vector<304x3xf32>
    %2 = arith.truncf %0 : vector<304x10xf32> to vector<304x10xbf16>
    %c0_3 = arith.constant 0 : index
    %c0_4 = arith.constant 0 : index
    %3 = vector.load %arg3[%c0_3, %c0_4] : memref<10x128xbf16, #tpu.memory_space<vmem>>, vector<10x128xbf16>
    %cst = arith.constant dense<0.000000e+00> : vector<304x128xf32>
    %4 = tpu.matmul %2, %3, %cst {dimension_numbers = #tpu.dot_dimension_numbers<[1], [0], [0], [1], [0, 0, 1, 1], [], []>} : vector<304x10xbf16>, vector<10x128xbf16>, vector<304x128xf32> -> vector<304x128xf32>
    %5 = arith.truncf %1 : vector<304x3xf32> to vector<304x3xbf16>
    %c0_5 = arith.constant 0 : index
    %c0_6 = arith.constant 0 : index
    %6 = vector.load %arg4[%c0_5, %c0_6] : memref<3x128xbf16, #tpu.memory_space<vmem>>, vector<3x128xbf16>
    %cst_7 = arith.constant dense<0.000000e+00> : vector<304x128xf32>
    %7 = tpu.matmul %5, %6, %cst_7 {dimension_numbers = #tpu.dot_dimension_numbers<[1], [0], [0], [1], [0, 0, 1, 1], [], []>} : vector<304x3xbf16>, vector<3x128xbf16>, vector<304x128xf32> -> vector<304x128xf32>
    %8 = arith.addf %4, %7 : vector<304x128xf32>
    %9 = vector.extract_strided_slice %0 {offsets = [0, 1], sizes = [304, 1], strides = [1, 1]} : vector<304x10xf32> to vector<304x1xf32>
    %10 = vector.extract_strided_slice %0 {offsets = [0, 2], sizes = [304, 1], strides = [1, 1]} : vector<304x10xf32> to vector<304x1xf32>
    %11 = vector.extract_strided_slice %0 {offsets = [0, 3], sizes = [304, 1], strides = [1, 1]} : vector<304x10xf32> to vector<304x1xf32>
    %12 = vector.extract_strided_slice %0 {offsets = [0, 6], sizes = [304, 1], strides = [1, 1]} : vector<304x10xf32> to vector<304x1xf32>
    %13 = vector.extract_strided_slice %0 {offsets = [0, 7], sizes = [304, 1], strides = [1, 1]} : vector<304x10xf32> to vector<304x1xf32>
    %14 = vector.extract_strided_slice %0 {offsets = [0, 8], sizes = [304, 1], strides = [1, 1]} : vector<304x10xf32> to vector<304x1xf32>
    %15 = vector.extract_strided_slice %0 {offsets = [0, 9], sizes = [304, 1], strides = [1, 1]} : vector<304x10xf32> to vector<304x1xf32>
    %16 = arith.subf %12, %10 : vector<304x1xf32>
    %17 = arith.addf %12, %10 : vector<304x1xf32>
    %cst_8 = arith.constant 9.99999974E-5 : f32
    %18 = vector.broadcast %cst_8 : f32 to vector<304x1xf32>
    %19 = arith.addf %17, %18 : vector<304x1xf32>
    %20 = tpu.reciprocal %19 {approx = true} : vector<304x1xf32> -> vector<304x1xf32>
    %21 = arith.mulf %16, %20 : vector<304x1xf32>
    %22 = arith.subf %13, %14 : vector<304x1xf32>
    %23 = arith.addf %13, %14 : vector<304x1xf32>
    %cst_9 = arith.constant 9.99999974E-5 : f32
    %24 = vector.broadcast %cst_9 : f32 to vector<304x1xf32>
    %25 = arith.addf %23, %24 : vector<304x1xf32>
    %26 = tpu.reciprocal %25 {approx = true} : vector<304x1xf32> -> vector<304x1xf32>
    %27 = arith.mulf %22, %26 : vector<304x1xf32>
    %28 = arith.subf %9, %12 : vector<304x1xf32>
    %29 = arith.addf %9, %12 : vector<304x1xf32>
    %cst_10 = arith.constant 9.99999974E-5 : f32
    %30 = vector.broadcast %cst_10 : f32 to vector<304x1xf32>
    %31 = arith.addf %29, %30 : vector<304x1xf32>
    %32 = tpu.reciprocal %31 {approx = true} : vector<304x1xf32> -> vector<304x1xf32>
    %33 = arith.mulf %28, %32 : vector<304x1xf32>
    %34 = arith.subf %12, %11 : vector<304x1xf32>
    %35 = arith.addf %12, %11 : vector<304x1xf32>
    %cst_11 = arith.constant 9.99999974E-5 : f32
    %36 = vector.broadcast %cst_11 : f32 to vector<304x1xf32>
    %37 = arith.addf %35, %36 : vector<304x1xf32>
    %38 = tpu.reciprocal %37 {approx = true} : vector<304x1xf32> -> vector<304x1xf32>
    %39 = arith.mulf %34, %38 : vector<304x1xf32>
    %40 = arith.subf %15, %14 : vector<304x1xf32>
    %41 = arith.addf %15, %14 : vector<304x1xf32>
    %cst_12 = arith.constant 9.99999974E-5 : f32
    %42 = vector.broadcast %cst_12 : f32 to vector<304x1xf32>
    %43 = arith.addf %41, %42 : vector<304x1xf32>
    %44 = tpu.reciprocal %43 {approx = true} : vector<304x1xf32> -> vector<304x1xf32>
    %45 = arith.mulf %40, %44 : vector<304x1xf32>
    %c0_13 = arith.constant 0 : index
    %c0_14 = arith.constant 0 : index
    %46 = vector.load %arg5[%c0_13, %c0_14] : memref<5x128xf32, #tpu.memory_space<vmem>>, vector<5x128xf32>
    %47 = vector.extract_strided_slice %46 {offsets = [0, 0], sizes = [1, 128], strides = [1, 1]} : vector<5x128xf32> to vector<1x128xf32>
    %48 = vector.broadcast %21 : vector<304x1xf32> to vector<304x128xf32>
    %49 = vector.broadcast %47 : vector<1x128xf32> to vector<304x128xf32>
    %50 = arith.mulf %48, %49 : vector<304x128xf32>
    %51 = arith.addf %8, %50 : vector<304x128xf32>
    %52 = vector.extract_strided_slice %46 {offsets = [1, 0], sizes = [1, 128], strides = [1, 1]} : vector<5x128xf32> to vector<1x128xf32>
    %53 = vector.broadcast %27 : vector<304x1xf32> to vector<304x128xf32>
    %54 = vector.broadcast %52 : vector<1x128xf32> to vector<304x128xf32>
    %55 = arith.mulf %53, %54 : vector<304x128xf32>
    %56 = arith.addf %51, %55 : vector<304x128xf32>
    %57 = vector.extract_strided_slice %46 {offsets = [2, 0], sizes = [1, 128], strides = [1, 1]} : vector<5x128xf32> to vector<1x128xf32>
    %58 = vector.broadcast %33 : vector<304x1xf32> to vector<304x128xf32>
    %59 = vector.broadcast %57 : vector<1x128xf32> to vector<304x128xf32>
    %60 = arith.mulf %58, %59 : vector<304x128xf32>
    %61 = arith.addf %56, %60 : vector<304x128xf32>
    %62 = vector.extract_strided_slice %46 {offsets = [3, 0], sizes = [1, 128], strides = [1, 1]} : vector<5x128xf32> to vector<1x128xf32>
    %63 = vector.broadcast %39 : vector<304x1xf32> to vector<304x128xf32>
    %64 = vector.broadcast %62 : vector<1x128xf32> to vector<304x128xf32>
    %65 = arith.mulf %63, %64 : vector<304x128xf32>
    %66 = arith.addf %61, %65 : vector<304x128xf32>
    %67 = vector.extract_strided_slice %46 {offsets = [4, 0], sizes = [1, 128], strides = [1, 1]} : vector<5x128xf32> to vector<1x128xf32>
    %68 = vector.broadcast %45 : vector<304x1xf32> to vector<304x128xf32>
    %69 = vector.broadcast %67 : vector<1x128xf32> to vector<304x128xf32>
    %70 = arith.mulf %68, %69 : vector<304x128xf32>
    %71 = arith.addf %66, %70 : vector<304x128xf32>
    %c0_15 = arith.constant 0 : index
    %c0_16 = arith.constant 0 : index
    %72 = vector.load %arg6[%c0_15, %c0_16] : memref<1x128xf32, #tpu.memory_space<vmem>>, vector<1x128xf32>
    %73 = vector.broadcast %72 : vector<1x128xf32> to vector<304x128xf32>
    %74 = arith.addf %71, %73 : vector<304x128xf32>
    %cst_17 = arith.constant 0.000000e+00 : f32
    %75 = vector.broadcast %cst_17 : f32 to vector<304x128xf32>
    %76 = arith.maximumf %74, %75 : vector<304x128xf32>
    %77 = arith.truncf %76 : vector<304x128xf32> to vector<304x128xbf16>
    %c0_18 = arith.constant 0 : index
    %c0_19 = arith.constant 0 : index
    %c0_20 = arith.constant 0 : index
    %c0_21 = arith.constant 0 : index
    %78 = vector.load %arg7[%c0_18, %c0_19, %c0_20, %c0_21] : memref<3x2x128x128xbf16, #tpu.memory_space<vmem>>, vector<1x1x128x128xbf16>
    %79 = vector.shape_cast %78 : vector<1x1x128x128xbf16> to vector<128x128xbf16>
    %cst_22 = arith.constant dense<0.000000e+00> : vector<304x128xf32>
    %80 = tpu.matmul %77, %79, %cst_22 {dimension_numbers = #tpu.dot_dimension_numbers<[1], [0], [0], [1], [0, 0, 1, 1], [], []>} : vector<304x128xbf16>, vector<128x128xbf16>, vector<304x128xf32> -> vector<304x128xf32>
    %c0_23 = arith.constant 0 : index
    %c0_24 = arith.constant 0 : index
    %c0_25 = arith.constant 0 : index
    %c0_26 = arith.constant 0 : index
    %81 = vector.load %arg8[%c0_23, %c0_24, %c0_25, %c0_26] : memref<3x2x1x128xf32, #tpu.memory_space<vmem>>, vector<1x1x1x128xf32>
    %82 = vector.shape_cast %81 : vector<1x1x1x128xf32> to vector<1x128xf32>
    %83 = vector.broadcast %82 : vector<1x128xf32> to vector<304x128xf32>
    %84 = arith.addf %80, %83 : vector<304x128xf32>
    %cst_27 = arith.constant 0.000000e+00 : f32
    %85 = vector.broadcast %cst_27 : f32 to vector<304x128xf32>
    %86 = arith.maximumf %84, %85 : vector<304x128xf32>
    %87 = arith.truncf %86 : vector<304x128xf32> to vector<304x128xbf16>
    %c0_28 = arith.constant 0 : index
    %c1 = arith.constant 1 : index
    %c0_29 = arith.constant 0 : index
    %c0_30 = arith.constant 0 : index
    %88 = vector.load %arg7[%c0_28, %c1, %c0_29, %c0_30] : memref<3x2x128x128xbf16, #tpu.memory_space<vmem>>, vector<1x1x128x128xbf16>
    %89 = vector.shape_cast %88 : vector<1x1x128x128xbf16> to vector<128x128xbf16>
    %cst_31 = arith.constant dense<0.000000e+00> : vector<304x128xf32>
    %90 = tpu.matmul %87, %89, %cst_31 {dimension_numbers = #tpu.dot_dimension_numbers<[1], [0], [0], [1], [0, 0, 1, 1], [], []>} : vector<304x128xbf16>, vector<128x128xbf16>, vector<304x128xf32> -> vector<304x128xf32>
    %c0_32 = arith.constant 0 : index
    %c1_33 = arith.constant 1 : index
    %c0_34 = arith.constant 0 : index
    %c0_35 = arith.constant 0 : index
    %91 = vector.load %arg8[%c0_32, %c1_33, %c0_34, %c0_35] : memref<3x2x1x128xf32, #tpu.memory_space<vmem>>, vector<1x1x1x128xf32>
    %92 = vector.shape_cast %91 : vector<1x1x1x128xf32> to vector<1x128xf32>
    %93 = vector.broadcast %92 : vector<1x128xf32> to vector<304x128xf32>
    %94 = arith.addf %90, %93 : vector<304x128xf32>
    %95 = arith.addf %94, %76 : vector<304x128xf32>
    %cst_36 = arith.constant 0.000000e+00 : f32
    %96 = vector.broadcast %cst_36 : f32 to vector<304x128xf32>
    %97 = arith.maximumf %95, %96 : vector<304x128xf32>
    %98 = arith.truncf %97 : vector<304x128xf32> to vector<304x128xbf16>
    %c1_37 = arith.constant 1 : index
    %c0_38 = arith.constant 0 : index
    %c0_39 = arith.constant 0 : index
    %c0_40 = arith.constant 0 : index
    %99 = vector.load %arg7[%c1_37, %c0_38, %c0_39, %c0_40] : memref<3x2x128x128xbf16, #tpu.memory_space<vmem>>, vector<1x1x128x128xbf16>
    %100 = vector.shape_cast %99 : vector<1x1x128x128xbf16> to vector<128x128xbf16>
    %cst_41 = arith.constant dense<0.000000e+00> : vector<304x128xf32>
    %101 = tpu.matmul %98, %100, %cst_41 {dimension_numbers = #tpu.dot_dimension_numbers<[1], [0], [0], [1], [0, 0, 1, 1], [], []>} : vector<304x128xbf16>, vector<128x128xbf16>, vector<304x128xf32> -> vector<304x128xf32>
    %c1_42 = arith.constant 1 : index
    %c0_43 = arith.constant 0 : index
    %c0_44 = arith.constant 0 : index
    %c0_45 = arith.constant 0 : index
    %102 = vector.load %arg8[%c1_42, %c0_43, %c0_44, %c0_45] : memref<3x2x1x128xf32, #tpu.memory_space<vmem>>, vector<1x1x1x128xf32>
    %103 = vector.shape_cast %102 : vector<1x1x1x128xf32> to vector<1x128xf32>
    %104 = vector.broadcast %103 : vector<1x128xf32> to vector<304x128xf32>
    %105 = arith.addf %101, %104 : vector<304x128xf32>
    %cst_46 = arith.constant 0.000000e+00 : f32
    %106 = vector.broadcast %cst_46 : f32 to vector<304x128xf32>
    %107 = arith.maximumf %105, %106 : vector<304x128xf32>
    %108 = arith.truncf %107 : vector<304x128xf32> to vector<304x128xbf16>
    %c1_47 = arith.constant 1 : index
    %c1_48 = arith.constant 1 : index
    %c0_49 = arith.constant 0 : index
    %c0_50 = arith.constant 0 : index
    %109 = vector.load %arg7[%c1_47, %c1_48, %c0_49, %c0_50] : memref<3x2x128x128xbf16, #tpu.memory_space<vmem>>, vector<1x1x128x128xbf16>
    %110 = vector.shape_cast %109 : vector<1x1x128x128xbf16> to vector<128x128xbf16>
    %cst_51 = arith.constant dense<0.000000e+00> : vector<304x128xf32>
    %111 = tpu.matmul %108, %110, %cst_51 {dimension_numbers = #tpu.dot_dimension_numbers<[1], [0], [0], [1], [0, 0, 1, 1], [], []>} : vector<304x128xbf16>, vector<128x128xbf16>, vector<304x128xf32> -> vector<304x128xf32>
    %c1_52 = arith.constant 1 : index
    %c1_53 = arith.constant 1 : index
    %c0_54 = arith.constant 0 : index
    %c0_55 = arith.constant 0 : index
    %112 = vector.load %arg8[%c1_52, %c1_53, %c0_54, %c0_55] : memref<3x2x1x128xf32, #tpu.memory_space<vmem>>, vector<1x1x1x128xf32>
    %113 = vector.shape_cast %112 : vector<1x1x1x128xf32> to vector<1x128xf32>
    %114 = vector.broadcast %113 : vector<1x128xf32> to vector<304x128xf32>
    %115 = arith.addf %111, %114 : vector<304x128xf32>
    %116 = arith.addf %115, %97 : vector<304x128xf32>
    %cst_56 = arith.constant 0.000000e+00 : f32
    %117 = vector.broadcast %cst_56 : f32 to vector<304x128xf32>
    %118 = arith.maximumf %116, %117 : vector<304x128xf32>
    %119 = arith.truncf %118 : vector<304x128xf32> to vector<304x128xbf16>
    %c2 = arith.constant 2 : index
    %c0_57 = arith.constant 0 : index
    %c0_58 = arith.constant 0 : index
    %c0_59 = arith.constant 0 : index
    %120 = vector.load %arg7[%c2, %c0_57, %c0_58, %c0_59] : memref<3x2x128x128xbf16, #tpu.memory_space<vmem>>, vector<1x1x128x128xbf16>
    %121 = vector.shape_cast %120 : vector<1x1x128x128xbf16> to vector<128x128xbf16>
    %cst_60 = arith.constant dense<0.000000e+00> : vector<304x128xf32>
    %122 = tpu.matmul %119, %121, %cst_60 {dimension_numbers = #tpu.dot_dimension_numbers<[1], [0], [0], [1], [0, 0, 1, 1], [], []>} : vector<304x128xbf16>, vector<128x128xbf16>, vector<304x128xf32> -> vector<304x128xf32>
    %c2_61 = arith.constant 2 : index
    %c0_62 = arith.constant 0 : index
    %c0_63 = arith.constant 0 : index
    %c0_64 = arith.constant 0 : index
    %123 = vector.load %arg8[%c2_61, %c0_62, %c0_63, %c0_64] : memref<3x2x1x128xf32, #tpu.memory_space<vmem>>, vector<1x1x1x128xf32>
    %124 = vector.shape_cast %123 : vector<1x1x1x128xf32> to vector<1x128xf32>
    %125 = vector.broadcast %124 : vector<1x128xf32> to vector<304x128xf32>
    %126 = arith.addf %122, %125 : vector<304x128xf32>
    %cst_65 = arith.constant 0.000000e+00 : f32
    %127 = vector.broadcast %cst_65 : f32 to vector<304x128xf32>
    %128 = arith.maximumf %126, %127 : vector<304x128xf32>
    %129 = arith.truncf %128 : vector<304x128xf32> to vector<304x128xbf16>
    %c2_66 = arith.constant 2 : index
    %c1_67 = arith.constant 1 : index
    %c0_68 = arith.constant 0 : index
    %c0_69 = arith.constant 0 : index
    %130 = vector.load %arg7[%c2_66, %c1_67, %c0_68, %c0_69] : memref<3x2x128x128xbf16, #tpu.memory_space<vmem>>, vector<1x1x128x128xbf16>
    %131 = vector.shape_cast %130 : vector<1x1x128x128xbf16> to vector<128x128xbf16>
    %cst_70 = arith.constant dense<0.000000e+00> : vector<304x128xf32>
    %132 = tpu.matmul %129, %131, %cst_70 {dimension_numbers = #tpu.dot_dimension_numbers<[1], [0], [0], [1], [0, 0, 1, 1], [], []>} : vector<304x128xbf16>, vector<128x128xbf16>, vector<304x128xf32> -> vector<304x128xf32>
    %c2_71 = arith.constant 2 : index
    %c1_72 = arith.constant 1 : index
    %c0_73 = arith.constant 0 : index
    %c0_74 = arith.constant 0 : index
    %133 = vector.load %arg8[%c2_71, %c1_72, %c0_73, %c0_74] : memref<3x2x1x128xf32, #tpu.memory_space<vmem>>, vector<1x1x1x128xf32>
    %134 = vector.shape_cast %133 : vector<1x1x1x128xf32> to vector<1x128xf32>
    %135 = vector.broadcast %134 : vector<1x128xf32> to vector<304x128xf32>
    %136 = arith.addf %132, %135 : vector<304x128xf32>
    %137 = arith.addf %136, %118 : vector<304x128xf32>
    %cst_75 = arith.constant 0.000000e+00 : f32
    %138 = vector.broadcast %cst_75 : f32 to vector<304x128xf32>
    %139 = arith.maximumf %137, %138 : vector<304x128xf32>
    %140 = arith.truncf %139 : vector<304x128xf32> to vector<304x128xbf16>
    %c0_76 = arith.constant 0 : index
    %c0_77 = arith.constant 0 : index
    %141 = vector.load %arg9[%c0_76, %c0_77] : memref<128x24xbf16, #tpu.memory_space<vmem>>, vector<128x24xbf16>
    %cst_78 = arith.constant dense<0.000000e+00> : vector<304x24xf32>
    %142 = tpu.matmul %140, %141, %cst_78 {dimension_numbers = #tpu.dot_dimension_numbers<[1], [0], [0], [1], [0, 0, 1, 1], [], []>} : vector<304x128xbf16>, vector<128x24xbf16>, vector<304x24xf32> -> vector<304x24xf32>
    %c0_79 = arith.constant 0 : index
    %c0_80 = arith.constant 0 : index
    %143 = vector.load %arg10[%c0_79, %c0_80] : memref<1x24xf32, #tpu.memory_space<vmem>>, vector<1x24xf32>
    %144 = vector.broadcast %143 : vector<1x24xf32> to vector<304x24xf32>
    %145 = arith.addf %142, %144 : vector<304x24xf32>
    %c0_81 = arith.constant 0 : index
    %c0_82 = arith.constant 0 : index
    %146 = vector.load %arg11[%c0_81, %c0_82] : memref<304x24xf32, #tpu.memory_space<vmem>>, vector<304x24xf32>
    tpu.vector_store %arg11[%c0_81, %c0_82], %145 {strides = array<i32>} : memref<304x24xf32, #tpu.memory_space<vmem>>, vector<304x24xf32>,
    return
  }
  func.func @transform_0(%arg0: i32) -> (i32, i32) {
    %c0_i32 = arith.constant 0 : i32
    %c0_i32_0 = arith.constant 0 : i32
    return %arg0, %c0_i32 : i32, i32
  }
  func.func @transform_1(%arg0: i32) -> (i32, i32) {
    %c0_i32 = arith.constant 0 : i32
    %c0_i32_0 = arith.constant 0 : i32
    return %arg0, %c0_i32 : i32, i32
  }
  func.func @transform_2(%arg0: i32) -> (i32, i32) {
    %c0_i32 = arith.constant 0 : i32
    %c0_i32_0 = arith.constant 0 : i32
    %c0_i32_1 = arith.constant 0 : i32
    return %c0_i32, %c0_i32_0 : i32, i32
  }
  func.func @transform_3(%arg0: i32) -> (i32, i32) {
    %c0_i32 = arith.constant 0 : i32
    %c0_i32_0 = arith.constant 0 : i32
    %c0_i32_1 = arith.constant 0 : i32
    return %c0_i32, %c0_i32_0 : i32, i32
  }
  func.func @transform_4(%arg0: i32) -> (i32, i32) {
    %c0_i32 = arith.constant 0 : i32
    %c0_i32_0 = arith.constant 0 : i32
    %c0_i32_1 = arith.constant 0 : i32
    return %c0_i32, %c0_i32_0 : i32, i32
  }
  func.func @transform_5(%arg0: i32) -> (i32, i32) {
    %c0_i32 = arith.constant 0 : i32
    %c0_i32_0 = arith.constant 0 : i32
    %c0_i32_1 = arith.constant 0 : i32
    return %c0_i32, %c0_i32_0 : i32, i32
  }
  func.func @transform_6(%arg0: i32) -> (i32, i32, i32, i32) {
    %c0_i32 = arith.constant 0 : i32
    %c0_i32_0 = arith.constant 0 : i32
    %c0_i32_1 = arith.constant 0 : i32
    %c0_i32_2 = arith.constant 0 : i32
    %c0_i32_3 = arith.constant 0 : i32
    return %c0_i32, %c0_i32_0, %c0_i32_1, %c0_i32_2 : i32, i32, i32, i32
  }
  func.func @transform_7(%arg0: i32) -> (i32, i32, i32, i32) {
    %c0_i32 = arith.constant 0 : i32
    %c0_i32_0 = arith.constant 0 : i32
    %c0_i32_1 = arith.constant 0 : i32
    %c0_i32_2 = arith.constant 0 : i32
    %c0_i32_3 = arith.constant 0 : i32
    return %c0_i32, %c0_i32_0, %c0_i32_1, %c0_i32_2 : i32, i32, i32, i32
  }
  func.func @transform_8(%arg0: i32) -> (i32, i32) {
    %c0_i32 = arith.constant 0 : i32
    %c0_i32_0 = arith.constant 0 : i32
    %c0_i32_1 = arith.constant 0 : i32
    return %c0_i32, %c0_i32_0 : i32, i32
  }
  func.func @transform_9(%arg0: i32) -> (i32, i32) {
    %c0_i32 = arith.constant 0 : i32
    %c0_i32_0 = arith.constant 0 : i32
    %c0_i32_1 = arith.constant 0 : i32
    return %c0_i32, %c0_i32_0 : i32, i32
  }
  func.func @transform_10(%arg0: i32) -> (i32, i32) {
    %c0_i32 = arith.constant 0 : i32
    %c0_i32_0 = arith.constant 0 : i32
    return %arg0, %c0_i32 : i32, i32
  }
}

</mosaic_0001>

<bundles_post_ra>
// kernel: prosail_rnn_encode.1
= control target key start
LH: loop header
LB: loop body
LE: loop exit
PB: predicated region body
PF: predicated region fallthrough
CT: control target
= control target key end

     0   :  { %vm211_vm0 = vcmask 1040384   ;;  %vm212_vm1 = vcmask 1041408   ;;  %v12949_v1 = vmov 0.0   ;;  %v7800_v2 = vmov 65535   ;;  %s7801_s15 = smov 127   ;;  %s7802_s16 = smov 4   ;;  %s12938_s0 = inlined_call_operand.vmem [shape: f32[304,10], index: 0, kind: input, shape index: {}]   ;;  %s12939_s3 = inlined_call_operand.vmem [shape: bf16[3,128], index: 3, kind: input, shape index: {}]   ;;  %s12940_s1 = inlined_call_operand.vmem [shape: f32[304,3], index: 1, kind: input, shape index: {}]   ;;  %s12941_s2 = inlined_call_operand.vmem [shape: bf16[10,128], index: 2, kind: input, shape index: {}]   ;;  %s12942_s6 = inlined_call_operand.vmem [shape: bf16[3,2,128,128], index: 6, kind: input, shape index: {}]   ;;  %s12943_s4 = inlined_call_operand.vmem [shape: f32[5,128], index: 4, kind: input, shape index: {}]   ;;  %s12944_s5 = inlined_call_operand.vmem [shape: f32[1,128], index: 5, kind: input, shape index: {}]   ;;  %s12945_s7 = inlined_call_operand.vmem [shape: f32[3,2,1,128], index: 7, kind: input, shape index: {}]   ;;  %s12946_s8 = inlined_call_operand.vmem [shape: bf16[128,24], index: 8, kind: input, shape index: {}]   ;;  %s12947_s9 = inlined_call_operand.vmem [shape: f32[1,24], index: 9, kind: input, shape index: {}]   ;;  %s12948_s10 = inlined_call_operand.vmem [shape: f32[304,24], index: 10, kind: output, shape index: {}]  }
   0x1   :  { %v7869_v0 = vld [vmem:[%s12938_s0] sm:$0xff]  ;;  %7184 = vmatprep.subr.bf16.mxu1 %v12949_v1  ;;  %v213_v3 = vsel %vm211_vm0, 4294967295, %v7800_v2  ;;  %6384 = vmatprep.subr.bf16.mxu0 %v12949_v1  ;;  %v7883_v6 = vld [vmem:[%s12938_s0 + $0x8] sm:$0xff]  ;;  %vm7803_vm2 = vmmov 0   ;;  %vm153_vm3 = vcmask 23552   ;;  %v96_v11 = vld [vmem:[%s12940_s1 + $0xb0] sm:$0xff] }
   0x2   :  { %997 = vrot.lane.b32.xlu1 %v7869_v0, %s7801_s15  ;;  %693 = vrot.lane.b32.xlu0 %v7869_v0, %s7802_s16  ;;  %v152_v4 = vld [vmem:[%s12939_s3] sm:$0x3]  ;;  %v214_v5 = vsel %vm212_vm1, %v213_v3, 0  ;;  %v95_v9 = vld [vmem:[%s12940_s1 + $0xa8] sm:$0xff]  ;;  %s7804_s28 = smov 123   ;;  %vm466_vm4 = vcmask 1044480   ;;  %v112_v56 = vpack.c.bf16 %v7883_v6, %v7869_v0 }
   0x3   :  { %v216_v7 = vand.u32 %v214_v5, %v152_v4  ;;  %6426 = vmatprep.mubr.msk.bf16.mxu1 %vm7803_vm2, %v12949_v1  ;;  %v94_v8 = vld [vmem:[%s12940_s1 + $0xa0] sm:$0xff]  ;;  %6386 = vmatprep.mubr.msk.bf16.mxu0 %vm7803_vm2, %v12949_v1  ;;  %v97_v12 = vld [vmem:[%s12940_s1 + $0xb8] sm:$0xff]  ;;  %v75_v16 = vld [vmem:[%s12940_s1 + $0x8] sm:$0xff]  ;;  %s7805_s17 = smov 3   ;;  %s7806_s29 = smov 1   ;;  %v12951_v46 = vmov 6  }
   0x4   :  { %v143_v10 = vpack.c.bf16 %v95_v9, %v94_v8  ;;  %v144_v13 = vpack.c.bf16 %v97_v12, %v96_v11  ;;  %v7284_v14 = vld [vmem:[%s12941_s2] sm:$0x1f]   ;;  %v7930_v18 = vld [vmem:[%s12938_s0 + $0x18] sm:$0xff]  ;;  %v7935_v19 = vld [vmem:[%s12938_s0 + $0x10] sm:$0xff]  ;;  %7198 = vset.pattern.permute.xlu1 %v12951_v46  ;;  %v12953_v49 = vmov 1   ;;  %vm408_vm5 = vcmask 80896  }
   0x5   :  { %7185 = vmatpush3.bf16.msra.mxu1 %v216_v7  ;;  %6385 = vmatpush3.bf16.msra.mxu0 %v216_v7  ;;  %v74_v15 = vld [vmem:[%s12940_s1] sm:$0xff]  ;;  %v468_v20 = vsel %vm466_vm4, %v7284_v14, 0  ;;  %v99_v22 = vld [vmem:[%s12940_s1 + $0xc8] sm:$0xff]  ;;  %v76_v23 = vld [vmem:[%s12940_s1 + $0x10] sm:$0xff]  ;;  %v113_v57 = vpack.c.bf16 %v7930_v18, %v7935_v19  ;;  %vm5924_vm6 = vcmask 195584  }
   0x6   :  { %999 = vrot.lane.b32.xlu1 %v7883_v6, %s7801_s15  ;;  %695 = vrot.lane.b32.xlu0 %v7883_v6, %s7802_s16  ;;  %v133_v17 = vpack.c.bf16 %v75_v16, %v74_v15  ;;  %v98_v21 = vld [vmem:[%s12940_s1 + $0xc0] sm:$0xff]  ;;  %v77_v24 = vld [vmem:[%s12940_s1 + $0x18] sm:$0xff] }
   0x7   :  { %6462 = vmatprep.subr.bf16.mxu1 %v12949_v1  ;;  %6540 = vmatprep.subr.bf16.mxu0 %v12949_v1  ;;  %v145_v25 = vpack.c.bf16 %v99_v22, %v98_v21  ;;  %v134_v26 = vpack.c.bf16 %v77_v24, %v76_v23  ;;  %v100_v27 = vld [vmem:[%s12940_s1 + $0xd0] sm:$0xff]  ;;  %v101_v28 = vld [vmem:[%s12940_s1 + $0xd8] sm:$0xff]  ;;  %v102_v30 = vld [vmem:[%s12940_s1 + $0xe0] sm:$0xff] }
   0x8   :  { %6427 = vmatmul.mubr.msk.bf16.vlgmr.msra.gmra.mrb[0].mxu1 %vm153_vm3, %v143_v10  ;;  %6387 = vmatmul.mubr.msk.bf16.vlgmr.msra.gmra.mrb[0].mxu0 %vm153_vm3, %v133_v17  ;;  %v146_v29 = vpack.c.bf16 %v101_v28, %v100_v27  ;;  %v103_v31 = vld [vmem:[%s12940_s1 + $0xe8] sm:$0xff]  ;;  %v8005_v33 = vld [vmem:[%s12938_s0 + $0x20] sm:$0xff]  ;;  %v104_v35 = vld [vmem:[%s12940_s1 + $0xf0] sm:$0xff] }
   0x9   :  { %6430 = vmatprep.mubr.msk.bf16.mxu1 %vm7803_vm2, %v12949_v1  ;;  %6463 = vmatpush3.bf16.msra.mxu1 %v468_v20  ;;  %v8000_v32 = vld [vmem:[%s12938_s0 + $0x28] sm:$0xff]  ;;  %v147_v34 = vpack.c.bf16 %v103_v31, %v102_v30  ;;  %v105_v36 = vld [vmem:[%s12940_s1 + $0xf8] sm:$0xff]  ;;  %v106_v38 = vld [vmem:[%s12940_s1 + $0x100] sm:$0xff] }
   0xa   :  { %1303 = vrot.lane.b32.xlu1 %v7883_v6, %s7804_s28  ;;  %1301 = vrot.lane.b32.xlu0 %v7869_v0, %s7804_s28  ;;  %v148_v37 = vpack.c.bf16 %v105_v36, %v104_v35  ;;  %v107_v39 = vld [vmem:[%s12940_s1 + $0x108] sm:$0xff]  ;;  %v8048_v41 = vld [vmem:[%s12938_s0 + $0x38] sm:$0xff]  ;;  %v114_v58 = vpack.c.bf16 %v8000_v32, %v8005_v33 }
   0xb   :  { %6390 = vmatprep.mubr.msk.bf16.mxu0 %vm7803_vm2, %v12949_v1  ;;  %6632 = vmatprep.subr.bf16.mxu1 %v12949_v1  ;;  %v149_v40 = vpack.c.bf16 %v107_v39, %v106_v38  ;;  %v8053_v42 = vld [vmem:[%s12938_s0 + $0x30] sm:$0xff]  ;;  %v109_v44 = vld [vmem:[%s12940_s1 + $0x118] sm:$0xff]  ;;  %v110_v47 = vld [vmem:[%s12940_s1 + $0x120] sm:$0xff] }
   0xc   :  { %v108_v43 = vld [vmem:[%s12940_s1 + $0x110] sm:$0xff]  ;;  %v111_v48 = vld [vmem:[%s12940_s1 + $0x128] sm:$0xff]  ;;  %7200 = vset.pattern.permute.xlu0 %v12953_v49  ;;  %v78_v50 = vld [vmem:[%s12940_s1 + $0x20] sm:$0xff]  ;;  %v115_v7 = vpack.c.bf16 %v8048_v41, %v8053_v42 }
   0xd   :  { %v150_v45 = vpack.c.bf16 %v109_v44, %v108_v43  ;;  %v79_v51 = vld [vmem:[%s12940_s1 + $0x28] sm:$0xff]  ;;  %v151_v53 = vpack.c.bf16 %v111_v48, %v110_v47  ;;  %v8115_v55 = vld [vmem:[%s12938_s0 + $0x40] sm:$0xff]  ;;  %v8152_v59 = vld [vmem:[%s12938_s0 + $0x58] sm:$0xff] }
   0xe   :  { %1607 = vrot.lane.b32.xlu1 %v7883_v6, %s7805_s17  ;;  %1605 = vrot.lane.b32.xlu0 %v7869_v0, %s7805_s17  ;;  %v135_v52 = vpack.c.bf16 %v79_v51, %v78_v50  ;;  %v8110_v54 = vld [vmem:[%s12938_s0 + $0x48] sm:$0xff]  ;;  %v8157_v60 = vld [vmem:[%s12938_s0 + $0x50] sm:$0xff] }
   0xf   :  { %v8185_v61 = vld [vmem:[%s12938_s0 + $0x68] sm:$0xff]  ;;  %v8190_v62 = vld [vmem:[%s12938_s0 + $0x60] sm:$0xff]  ;;  %v80_v63 = vld [vmem:[%s12940_s1 + $0x30] sm:$0xff] }
  0x10   :  { %6431 = vmatmul.mubr.msk.bf16.gmra.mrb[4].mxu1 %vm153_vm3, %v144_v13  ;;  %6391 = vmatmul.mubr.msk.bf16.gmra.mrb[4].mxu0 %vm153_vm3, %v134_v26  ;;  %v81_v2 = vld [vmem:[%s12940_s1 + $0x38] sm:$0xff]  ;;  %v8254_v17 = vld [vmem:[%s12938_s0 + $0x70] sm:$0xff]  ;;  %v53_v30 = vld [vmem:[%s12938_s0 + $0x88] sm:$0xff] }
  0x11   :  { %6434 = vmatprep.mubr.msk.bf16.mxu1 %vm7803_vm2, %v12949_v1  ;;  %6394 = vmatprep.mubr.msk.bf16.mxu0 %vm7803_vm2, %v12949_v1  ;;  %v136_v5 = vpack.c.bf16 %v81_v2, %v80_v63  ;;  %v8249_v16 = vld [vmem:[%s12938_s0 + $0x78] sm:$0xff]  ;;  %v8302_v31 = vld [vmem:[%s12938_s0 + $0x80] sm:$0xff] }
  0x12   :  { %699 = vrot.lane.b32.xlu1 %v7930_v18, %s7802_s16  ;;  %697 = vrot.lane.b32.xlu0 %v7935_v19, %s7802_s16 }
  0x16   :  { %1911 = vrot.lane.b32.xlu1 %v7883_v6, %s7806_s29  ;;  %1909 = vrot.lane.b32.xlu0 %v7869_v0, %s7806_s29 }
  0x18   :  { %6435 = vmatmul.mubr.msk.bf16.gmra.mrb[8].mxu1 %vm153_vm3, %v145_v25  ;;  %6395 = vmatmul.mubr.msk.bf16.gmra.mrb[8].mxu0 %vm153_vm3, %v135_v52 }
  0x19   :  { %6438 = vmatprep.mubr.msk.bf16.mxu1 %vm7803_vm2, %v12949_v1  ;;  %6398 = vmatprep.mubr.msk.bf16.mxu0 %vm7803_vm2, %v12949_v1 }
  0x1a   :  { %1003 = vrot.lane.b32.xlu1 %v7930_v18, %s7801_s15  ;;  %1001 = vrot.lane.b32.xlu0 %v7935_v19, %s7801_s15 }
  0x1e   :  { %1307 = vrot.lane.b32.xlu1 %v7930_v18, %s7804_s28  ;;  %1305 = vrot.lane.b32.xlu0 %v7935_v19, %s7804_s28 }
  0x20   :  { %6439 = vmatmul.mubr.msk.bf16.gmra.mrb[12].mxu1 %vm153_vm3, %v146_v29  ;;  %6399 = vmatmul.mubr.msk.bf16.gmra.mrb[12].mxu0 %vm153_vm3, %v136_v5 }
  0x21   :  { %6442 = vmatprep.mubr.msk.bf16.mxu1 %vm7803_vm2, %v12949_v1  ;;  %6402 = vmatprep.mubr.msk.bf16.mxu0 %vm7803_vm2, %v12949_v1 }
  0x22   :  { %1611 = vrot.lane.b32.xlu1 %v7930_v18, %s7805_s17  ;;  %1609 = vrot.lane.b32.xlu0 %v7935_v19, %s7805_s17 }
  0x26   :  { %703 = vrot.lane.b32.xlu1 %v8000_v32, %s7802_s16  ;;  %701 = vrot.lane.b32.xlu0 %v8005_v33, %s7802_s16 }
  0x28   :  { %6443 = vmatmul.mubr.msk.bf16.gmra.mrb[16].mxu1 %vm153_vm3, %v147_v34 }
  0x29   :  { %6446 = vmatprep.mubr.msk.bf16.mxu1 %vm7803_vm2, %v12949_v1 }
  0x2a   :  { %1915 = vrot.lane.b32.xlu1 %v7930_v18, %s7806_s29  ;;  %1913 = vrot.lane.b32.xlu0 %v7935_v19, %s7806_s29 }
  0x2e   :  { %1007 = vrot.lane.b32.xlu1 %v8000_v32, %s7801_s15  ;;  %1005 = vrot.lane.b32.xlu0 %v8005_v33, %s7801_s15 }
  0x30   :  { %6447 = vmatmul.mubr.msk.bf16.gmra.mrb[20].mxu1 %vm153_vm3, %v148_v37 }
  0x31   :  { %6450 = vmatprep.mubr.msk.bf16.mxu1 %vm7803_vm2, %v12949_v1 }
  0x32   :  { %1311 = vrot.lane.b32.xlu1 %v8000_v32, %s7804_s28  ;;  %1309 = vrot.lane.b32.xlu0 %v8005_v33, %s7804_s28 }
  0x36   :  { %1615 = vrot.lane.b32.xlu1 %v8000_v32, %s7805_s17  ;;  %1613 = vrot.lane.b32.xlu0 %v8005_v33, %s7805_s17 }
  0x38   :  { %6451 = vmatmul.mubr.msk.bf16.gmra.mrb[24].mxu1 %vm153_vm3, %v149_v40  ;;  %v82_v40 = vld [vmem:[%s12940_s1 + $0x40] sm:$0xff] }
  0x39   :  { %6454 = vmatprep.mubr.msk.bf16.mxu1 %vm7803_vm2, %v12949_v1 }
  0x3a   :  { %707 = vrot.lane.b32.xlu1 %v8048_v41, %s7802_s16  ;;  %705 = vrot.lane.b32.xlu0 %v8053_v42, %s7802_s16 }
  0x3e   :  { %1919 = vrot.lane.b32.xlu1 %v8000_v32, %s7806_s29  ;;  %1917 = vrot.lane.b32.xlu0 %v8005_v33, %s7806_s29 }
  0x40   :  { %6455 = vmatmul.mubr.msk.bf16.gmra.mrb[28].mxu1 %vm153_vm3, %v150_v45  ;;  %v116_v45 = vpack.c.bf16 %v8110_v54, %v8115_v55 }
  0x41   :  { %6458 = vmatprep.mubr.msk.bf16.mxu1 %vm7803_vm2, %v12949_v1 }
  0x42   :  { %1011 = vrot.lane.b32.xlu1 %v8048_v41, %s7801_s15  ;;  %1009 = vrot.lane.b32.xlu0 %v8053_v42, %s7801_s15 }
  0x46   :  { %1315 = vrot.lane.b32.xlu1 %v8048_v41, %s7804_s28  ;;  %1313 = vrot.lane.b32.xlu0 %v8053_v42, %s7804_s28 }
  0x48   :  { %6459 = vmatmul.mubr.msk.bf16.gmra.mrb[32].mxu1 %vm153_vm3, %v151_v53 }
  0x49   :  { %6464 = vmatprep.mubr.msk.bf16.mxu1 %vm7803_vm2, %v12949_v1 }
  0x4a   :  { %1619 = vrot.lane.b32.xlu1 %v8048_v41, %s7805_s17  ;;  %1617 = vrot.lane.b32.xlu0 %v8053_v42, %s7805_s17 }
  0x4e   :  { %711 = vrot.lane.b32.xlu1 %v8110_v54, %s7802_s16  ;;  %709 = vrot.lane.b32.xlu0 %v8115_v55, %s7802_s16 }
  0x50   :  { %6465 = vmatmul.mubr.msk.bf16.vlgmr.msra.gmra.mrb[36].mxu1 %vm408_vm5, %v112_v56 }
  0x51   :  { %6468 = vmatprep.mubr.msk.bf16.mxu1 %vm7803_vm2, %v12949_v1 }
  0x52   :  { %1923 = vrot.lane.b32.xlu1 %v8048_v41, %s7806_s29  ;;  %1921 = vrot.lane.b32.xlu0 %v8053_v42, %s7806_s29  ;;  %v83_v41 = vld [vmem:[%s12940_s1 + $0x48] sm:$0xff] }
  0x53   :  { %v137_v43 = vpack.c.bf16 %v83_v41, %v82_v40 }
  0x55   :  { %6403 = vmatmul.mubr.msk.bf16.gmra.mrb[16].mxu0 %vm153_vm3, %v137_v43 }
  0x56   :  { %1015 = vrot.lane.b32.xlu1 %v8110_v54, %s7801_s15  ;;  %1013 = vrot.lane.b32.xlu0 %v8115_v55, %s7801_s15 }
  0x57   :  { %6406 = vmatprep.mubr.msk.bf16.mxu0 %vm7803_vm2, %v12949_v1 }
  0x58   :  { %6469 = vmatmul.mubr.msk.bf16.gmra.mrb[40].mxu1 %vm408_vm5, %v113_v57  ;;  %v8363_v57 = vld [vmem:[%s12938_s0 + $0x98] sm:$0xff] }
  0x59   :  { %6472 = vmatprep.mubr.msk.bf16.mxu1 %vm7803_vm2, %v12949_v1 }
  0x5a   :  { %1319 = vrot.lane.b32.xlu1 %v8110_v54, %s7804_s28  ;;  %1317 = vrot.lane.b32.xlu0 %v8115_v55, %s7804_s28 }
  0x5e   :  { %1623 = vrot.lane.b32.xlu1 %v8110_v54, %s7805_s17  ;;  %1621 = vrot.lane.b32.xlu0 %v8115_v55, %s7805_s17 }
  0x60   :  { %6473 = vmatmul.mubr.msk.bf16.gmra.mrb[44].mxu1 %vm408_vm5, %v114_v58  ;;  %v8368_v58 = vld [vmem:[%s12938_s0 + $0x90] sm:$0xff] }
  0x61   :  { %6476 = vmatprep.mubr.msk.bf16.mxu1 %vm7803_vm2, %v12949_v1 }
  0x62   :  { %715 = vrot.lane.b32.xlu1 %v8152_v59, %s7802_s16  ;;  %713 = vrot.lane.b32.xlu0 %v8157_v60, %s7802_s16 }
  0x66   :  { %1927 = vrot.lane.b32.xlu1 %v8110_v54, %s7806_s29  ;;  %1925 = vrot.lane.b32.xlu0 %v8115_v55, %s7806_s29 }
  0x68   :  { %6477 = vmatmul.mubr.msk.bf16.gmra.mrb[48].mxu1 %vm408_vm5, %v115_v7 }
  0x69   :  { %6480 = vmatprep.mubr.msk.bf16.mxu1 %vm7803_vm2, %v12949_v1 }
  0x6a   :  { %1019 = vrot.lane.b32.xlu1 %v8152_v59, %s7801_s15  ;;  %1017 = vrot.lane.b32.xlu0 %v8157_v60, %s7801_s15 }
  0x6e   :  { %1323 = vrot.lane.b32.xlu1 %v8152_v59, %s7804_s28  ;;  %1321 = vrot.lane.b32.xlu0 %v8157_v60, %s7804_s28 }
  0x70   :  { %6481 = vmatmul.mubr.msk.bf16.gmra.mrb[52].mxu1 %vm408_vm5, %v116_v45 }
  0x71   :  { %6484 = vmatprep.mubr.msk.bf16.mxu1 %vm7803_vm2, %v12949_v1 }
  0x72   :  { %1627 = vrot.lane.b32.xlu1 %v8152_v59, %s7805_s17  ;;  %1625 = vrot.lane.b32.xlu0 %v8157_v60, %s7805_s17 }
  0x74   :  { %v8198_v3 = vpop.permute.xlu1 %997  ;;  %v8200_v4 = vpop.permute.xlu0 %693 }
  0x75   :  { %13191 = vst [vmem:[#allocation2_spill] sm:$0xff] %v8200_v4  ;;  %v1149_v56 = vadd.f32 %v8198_v3, %v7869_v0 }
  0x76   :  { %719 = vrot.lane.b32.xlu1 %v8185_v61, %s7802_s16  ;;  %717 = vrot.lane.b32.xlu0 %v8190_v62, %s7802_s16 }
  0x77   :  { %v1187_v5 = vadd.f32 0.0001, %v1149_v56 }
  0x78   :  { %v8210_v8 = vpop.permute.xlu1 %999  ;;  %v8212_v9 = vpop.permute.xlu0 %695 }
  0x79   :  { %v846_v44 = vadd.f32 %v8212_v9, %v7883_v6  ;;  %v808_v41 = vsub.f32 %v7883_v6, %v8212_v9 }
  0x7a   :  { %1931 = vrot.lane.b32.xlu1 %v8152_v59, %s7806_s29  ;;  %1929 = vrot.lane.b32.xlu0 %v8157_v60, %s7806_s29 }
  0x7b   :  { %v884_v51 = vadd.f32 0.0001, %v846_v44 }
  0x7c   :  { %v8222_v10 = vpop.permute.xlu1 %1303  ;;  %v8224_v11 = vpop.permute.xlu0 %1301 }
  0x7d   :  { %v1453_v50 = vadd.f32 %v8224_v11, %v7869_v0  ;;  %7341 = vrcp.f32 %v884_v51  ;;  %v1415_v51 = vsub.f32 %v7869_v0, %v8224_v11  ;;  %v1454_v9 = vadd.f32 %v8222_v10, %v7883_v6 }
  0x7e   :  { %1023 = vrot.lane.b32.xlu1 %v8185_v61, %s7801_s15  ;;  %1021 = vrot.lane.b32.xlu0 %v8190_v62, %s7801_s15 }
  0x7f   :  { %v1491_v54 = vadd.f32 0.0001, %v1453_v50  ;;  %v1492_v46 = vadd.f32 0.0001, %v1454_v9 }
  0x80   :  { %v8230_v12 = vpop.permute.xlu1 %1607  ;;  %v8232_v13 = vpop.permute.xlu0 %1605 }
  0x81   :  { %13192 = vst [vmem:[#allocation3_spill] sm:$0xff] %v8230_v12  ;;  %7343 = vrcp.f32 %v1491_v54 }
  0x82   :  { %1327 = vrot.lane.b32.xlu1 %v8185_v61, %s7804_s28  ;;  %1325 = vrot.lane.b32.xlu0 %v8190_v62, %s7804_s28  ;;  %7345 = vrcp.f32 %v1187_v5 }
  0x84   :  { %v8238_v14 = vpop.permute.xlu1 %699  ;;  %v8240_v15 = vpop.permute.xlu0 %697 }
  0x85   :  { %13193 = vst [vmem:[#allocation4_spill] sm:$0xff] %v8240_v15 }
  0x86   :  { %1631 = vrot.lane.b32.xlu1 %v8185_v61, %s7805_s17  ;;  %1629 = vrot.lane.b32.xlu0 %v8190_v62, %s7805_s17 }
  0x87   :  { %v7342_v45 = vpop.eup %7341 }
  0x88   :  { %v8256_v20 = vpop.permute.xlu1 %1911  ;;  %v8258_v21 = vpop.permute.xlu0 %1909  ;;  %v960_v56 = vmul.f32 %v7342_v45, %v808_v41  ;;  %v12958_v41 = vmov 7   ;;  %v8419_v45 = vld [vmem:[%s12938_s0 + $0xa8] sm:$0xff] }
  0x8a   :  { %723 = vrot.lane.b32.xlu1 %v8249_v16, %s7802_s16  ;;  %721 = vrot.lane.b32.xlu0 %v8254_v17, %s7802_s16 }
  0x8c   :  { %v8264_v22 = vpop.permute.xlu1 %1003  ;;  %v8266_v23 = vpop.permute.xlu0 %1001 }
  0x8e   :  { %1935 = vrot.lane.b32.xlu1 %v8185_v61, %s7806_s29  ;;  %1933 = vrot.lane.b32.xlu0 %v8190_v62, %s7806_s29 }
  0x90   :  { %v8272_v24 = vpop.permute.xlu1 %1307  ;;  %v8274_v25 = vpop.permute.xlu0 %1305 }
  0x91   :  { %v1455_v50 = vadd.f32 %v8274_v25, %v7935_v19 }
  0x92   :  { %1027 = vrot.lane.b32.xlu1 %v8249_v16, %s7801_s15  ;;  %1025 = vrot.lane.b32.xlu0 %v8254_v17, %s7801_s15 }
  0x93   :  { %v1493_v1 = vadd.f32 0.0001, %v1455_v50 }
  0x94   :  { %v8280_v26 = vpop.permute.xlu1 %1611  ;;  %v8282_v27 = vpop.permute.xlu0 %1609 }
  0x95   :  { %13194 = vst [vmem:[#allocation5_spill] sm:$0xff] %v8280_v26  ;;  %7347 = vrcp.f32 %v1493_v1  ;;  %v1416_v26 = vsub.f32 %v7883_v6, %v8222_v10  ;;  %v8461_v10 = vld [vmem:[%s12938_s0 + $0xa0] sm:$0xff] }
  0x96   :  { %1331 = vrot.lane.b32.xlu1 %v8249_v16, %s7804_s28  ;;  %1329 = vrot.lane.b32.xlu0 %v8254_v17, %s7804_s28  ;;  %7349 = vrcp.f32 %v1492_v46  ;;  %v1757_v46 = vadd.f32 %v8232_v13, %v7869_v0 }
  0x98   :  { %v8288_v28 = vpop.permute.xlu1 %703  ;;  %v8290_v29 = vpop.permute.xlu0 %701 }
  0x99   :  { %13195 = vst [vmem:[#allocation6_spill] sm:$0xff] %v8290_v29  ;;  %v1111_v29 = vsub.f32 %v7869_v0, %v8198_v3 }
  0x9a   :  { %1635 = vrot.lane.b32.xlu1 %v8249_v16, %s7805_s17  ;;  %1633 = vrot.lane.b32.xlu0 %v8254_v17, %s7805_s17 }
  0x9c   :  { %v8304_v34 = vpop.permute.xlu1 %1915  ;;  %v8306_v35 = vpop.permute.xlu0 %1913 }
  0x9e   :  { %727 = vrot.lane.b32.xlu1 %v53_v30, %s7802_s16  ;;  %725 = vrot.lane.b32.xlu0 %v8302_v31, %s7802_s16 }
  0xa0   :  { %v8311_v36 = vpop.permute.xlu1 %1007  ;;  %v8313_v37 = vpop.permute.xlu0 %1005 }
  0xa2   :  { %1939 = vrot.lane.b32.xlu1 %v8249_v16, %s7806_s29  ;;  %1937 = vrot.lane.b32.xlu0 %v8254_v17, %s7806_s29 }
  0xa4   :  { %v8319_v38 = vpop.permute.xlu1 %1311  ;;  %v8321_v39 = vpop.permute.xlu0 %1309 }
  0xa5   :  { %v1457_v9 = vadd.f32 %v8321_v39, %v8005_v33 }
  0xa6   :  { %1031 = vrot.lane.b32.xlu1 %v53_v30, %s7801_s15  ;;  %1029 = vrot.lane.b32.xlu0 %v8302_v31, %s7801_s15 }
  0xa8   :  { %v8336_v47 = vpop.permute.xlu1 %1615  ;;  %v8338_v48 = vpop.permute.xlu0 %1613 }
  0xa9   :  { %13196 = vst [vmem:[#allocation7_spill] sm:$0xff] %v8336_v47 }
  0xaa   :  { %1335 = vrot.lane.b32.xlu1 %v53_v30, %s7804_s28  ;;  %1333 = vrot.lane.b32.xlu0 %v8302_v31, %s7804_s28 }
  0xac   :  { %v8351_v52 = vpop.permute.xlu1 %707  ;;  %v8353_v53 = vpop.permute.xlu0 %705 }
  0xad   :  { %13197 = vst [vmem:[#allocation8_spill] sm:$0xff] %v8353_v53 }
  0xae   :  { %1639 = vrot.lane.b32.xlu1 %v53_v30, %s7805_s17  ;;  %1637 = vrot.lane.b32.xlu0 %v8302_v31, %s7805_s17 }
  0xb0   :  { %v8370_v63 = vpop.permute.xlu1 %1919  ;;  %v8372_v2 = vpop.permute.xlu0 %1917 }
  0xb2   :  { %731 = vrot.lane.b32.xlu1 %v8363_v57, %s7802_s16  ;;  %729 = vrot.lane.b32.xlu0 %v8368_v58, %s7802_s16 }
  0xb4   :  { %v8378_v7 = vpop.permute.xlu1 %1011  ;;  %v8380_v40 = vpop.permute.xlu0 %1009 }
  0xb6   :  { %1943 = vrot.lane.b32.xlu1 %v53_v30, %s7806_s29  ;;  %1941 = vrot.lane.b32.xlu0 %v8302_v31, %s7806_s29  ;;  %v7344_v30 = vpop.eup %7343 }
  0xb7   :  { %v1567_v11 = vmul.f32 %v7344_v30, %v1415_v51  ;;  %v7346_v47 = vpop.eup %7345 }
  0xb8   :  { %v8387_v43 = vpop.permute.xlu1 %1315  ;;  %v8389_v44 = vpop.permute.xlu0 %1313  ;;  %v1263_v50 = vmul.f32 %v7346_v47, %v1111_v29  ;;  %v1417_v29 = vsub.f32 %v7935_v19, %v8274_v25 }
  0xb9   :  { %v7348_v47 = vpop.eup %7347 }
  0xba   :  { %1035 = vrot.lane.b32.xlu1 %v8363_v57, %s7801_s15  ;;  %1033 = vrot.lane.b32.xlu0 %v8368_v58, %s7801_s15  ;;  %v1569_v25 = vmul.f32 %v7348_v47, %v1417_v29  ;;  %v85_v29 = vld [vmem:[%s12940_s1 + $0x58] sm:$0xff] }
  0xbc   :  { %v8401_v54 = vpop.permute.xlu1 %1619  ;;  %v8403_v5 = vpop.permute.xlu0 %1617 }
  0xbd   :  { %13198 = vst [vmem:[#allocation9_spill] sm:$0xff] %v8401_v54  ;;  %v1495_v54 = vadd.f32 0.0001, %v1457_v9  ;;  %v848_v9 = vadd.f32 %v8238_v14, %v7930_v18 }
  0xbe   :  { %1339 = vrot.lane.b32.xlu0 %v8363_v57, %s7804_s28  ;;  %2221 = vperm.xlu1 %7198, %v960_v56   ;;  %v1795_v56 = vadd.f32 0.0001, %v1757_v46 }
  0xc0   :  { %v8407_v49 = vpop.permute.xlu1 %711  ;;  %v8409_v53 = vpop.permute.xlu0 %709  ;;  %7351 = vrcp.f32 %v1795_v56  ;;  %v886_v56 = vadd.f32 0.0001, %v848_v9  ;;  %v1459_v9 = vadd.f32 %v8389_v44, %v8053_v42 }
  0xc1   :  { %13199 = vst [vmem:[#allocation10_spill] sm:$0xff] %v8407_v49  ;;  %13200 = vst [vmem:[#allocation11_spill] sm:$0xff] %v8409_v53  ;;  %v7350_v53 = vpop.eup %7349  ;;  %7353 = vrcp.f32 %v1495_v54  ;;  %v84_v54 = vld [vmem:[%s12940_s1 + $0x50] sm:$0xff]  ;;  %v1421_v49 = vsub.f32 %v8053_v42, %v8389_v44 }
  0xc2   :  { %1337 = vrot.lane.b32.xlu1 %v8368_v58, %s7804_s28  ;;  %2756 = vperm.xlu0 %7200, %v1567_v11   ;;  %v13203_v11 = vmov 1   ;;  %v1568_v46 = vmul.f32 %v7350_v53, %v1416_v26  ;;  %v138_v47 = vpack.c.bf16 %v85_v29, %v84_v54  ;;  %v13212_v54 = vmov 0.0  }
  0xc3   :  { %7199 = vset.pattern.permute.xlu1 %v12958_v41  ;;  %7355 = vrcp.f32 %v886_v56  ;;  %v2061_v56 = vadd.f32 %v8258_v21, %v7869_v0 }
  0xc4   :  { %v8421_v51 = vpop.permute.xlu1 %1923  ;;  %v8423_v1 = vpop.permute.xlu0 %1921  ;;  %6407 = vmatmul.mubr.msk.bf16.gmra.mrb[20].mxu0 %vm153_vm3, %v138_v47 }
  0xc5   :  { %13201 = vst [vmem:[#allocation12_spill] sm:$0xff] %v8421_v51  ;;  %6410 = vmatprep.mubr.msk.bf16.mxu0 %vm7803_vm2, %v13212_v54 }
  0xc6   :  { %2486 = vperm.xlu1 %7199, %v1263_v50   ;;  %735 = vrot.lane.b32.xlu0 %v8419_v45, %s7802_s16 }
  0xc8   :  { %v8429_v3 = vpop.permute.xlu1 %1015  ;;  %v8431_v30 = vpop.permute.xlu0 %1013 }
  0xc9   :  { %13202 = vst [vmem:[#allocation13_spill] sm:$0xff] %v8431_v30 }
  0xca   :  { %1641 = vrot.lane.b32.xlu1 %v8368_v58, %s7805_s17  ;;  %1947 = vrot.lane.b32.xlu0 %v8363_v57, %s7806_s29 }
  0xcb   :  { %7201 = vset.pattern.permute.xlu1 %v13203_v11 }
  0xcc   :  { %v8442_v50 = vpop.permute.xlu1 %1319  ;;  %v8444_v41 = vpop.permute.xlu0 %1317 }
  0xcd   :  { %13204 = vst [vmem:[#allocation14_spill] sm:$0xff] %v8442_v50  ;;  %13205 = vst [vmem:[#allocation15_spill] sm:$0xff] %v8444_v41  ;;  %v2062_v41 = vadd.f32 %v8256_v20, %v7883_v6 }
  0xce   :  { %1643 = vrot.lane.b32.xlu1 %v8363_v57, %s7805_s17  ;;  %1343 = vrot.lane.b32.xlu0 %v8419_v45, %s7804_s28  ;;  %v8466_v57 = vld [vmem:[%s12938_s0 + $0xb8] sm:$0xff] }
  0xcf   :  { %v2100_v47 = vadd.f32 0.0001, %v2062_v41  ;;  %v1151_v41 = vadd.f32 %v8266_v23, %v7935_v19 }
  0xd0   :  { %v8452_v15 = vpop.permute.xlu1 %1623  ;;  %v8454_v4 = vpop.permute.xlu0 %1621 }
  0xd1   :  { %13206 = vst [vmem:[#allocation16_spill] sm:$0xff] %v8452_v15  ;;  %13207 = vst [vmem:[#allocation17_spill] sm:$0xff] %v8454_v4  ;;  %7357 = vrcp.f32 %v2100_v47  ;;  %v1189_v47 = vadd.f32 0.0001, %v1151_v41 }
  0xd2   :  { %2761 = vperm.xlu1 %7201, %v1568_v46   ;;  %2766 = vperm.xlu0 %7200, %v1569_v25   ;;  %v13210_v25 = vmov 6   ;;  %v117_v46 = vpack.c.bf16 %v8152_v59, %v8157_v60  ;;  %v1419_v59 = vsub.f32 %v8005_v33, %v8321_v39  ;;  %v1497_v39 = vadd.f32 0.0001, %v1459_v9 }
  0xd3   :  { %v2099_v9 = vadd.f32 0.0001, %v2061_v56 }
  0xd4   :  { %v8468_v26 = vpop.permute.xlu1 %715  ;;  %v8470_v53 = vpop.permute.xlu0 %713  ;;  %6485 = vmatmul.mubr.msk.bf16.gmra.mrb[56].mxu1 %vm408_vm5, %v117_v46  ;;  %7359 = vrcp.f32 %v1497_v39 }
  0xd5   :  { %13208 = vst [vmem:[#allocation18_spill] sm:$0xff] %v8468_v26  ;;  %13209 = vst [vmem:[#allocation19_spill] sm:$0xff] %v8470_v53  ;;  %v1719_v53 = vsub.f32 %v7869_v0, %v8232_v13  ;;  %v7352_v26 = vpop.eup %7351  ;;  %6488 = vmatprep.mubr.msk.bf16.mxu1 %vm7803_vm2, %v13212_v54  ;;  %7361 = vrcp.f32 %v2099_v9  ;;  %v2024_v9 = vsub.f32 %v7883_v6, %v8256_v20 }
  0xd6   :  { %733 = vrot.lane.b32.xlu1 %v8461_v10, %s7802_s16  ;;  %739 = vrot.lane.b32.xlu0 %v8466_v57, %s7802_s16  ;;  %v7354_v13 = vpop.eup %7353  ;;  %7363 = vrcp.f32 %v1189_v47 }
  0xd7   :  { %7202 = vset.pattern.permute.xlu1 %v13210_v25  ;;  %v1871_v46 = vmul.f32 %v7352_v26, %v1719_v53  ;;  %v1571_v30 = vmul.f32 %v7354_v13, %v1419_v59  ;;  %v8532_v59 = vld [vmem:[%s12938_s0 + $0xc8] sm:$0xff] }
  0xd8   :  { %v8489_v15 = vpop.permute.xlu1 %1927  ;;  %v8491_v12 = vpop.permute.xlu0 %1925 }
  0xd9   :  { %13211 = vst [vmem:[#allocation20_spill] sm:$0xff] %v8489_v15 }
  0xda   :  { %1945 = vrot.lane.b32.xlu1 %v8368_v58, %s7806_s29  ;;  %1951 = vrot.lane.b32.xlu0 %v8419_v45, %s7806_s29 }
  0xdb   :  { %v8505_v29 = vpop.f32.mrb[0].mxu1 }
  0xdc   :  { %13213 = vst [vmem:[#allocation21_spill] sm:$0xff] %v8505_v29  ;;  %v8509_v15 = vpop.permute.xlu1 %1019  ;;  %v8511_v4 = vpop.permute.xlu0 %1017 }
  0xdd   :  { %13214 = vst [vmem:[#allocation22_spill] sm:$0xff] %v8509_v15  ;;  %13215 = vst [vmem:[#allocation23_spill] sm:$0xff] %v8511_v4  ;;  %v6428_v50 = vpop.f32.mrb[1].mxu1  ;;  %v2065_v4 = vadd.f32 %v8372_v2, %v8005_v33 }
  0xde   :  { %3026 = vperm.xlu1 %7202, %v1871_v46   ;;  %1347 = vrot.lane.b32.xlu0 %v8466_v57, %s7804_s28  ;;  %v8515_v58 = vpop.f32.mrb[2].mxu1  ;;  %v2063_v50 = vadd.f32 %v8306_v35, %v7935_v19 }
  0xdf   :  { %13216 = vst [vmem:[#allocation24_spill] sm:$0xff] %v8515_v58  ;;  %v6429_v29 = vpop.f32.mrb[3].mxu1  ;;  %v7356_v58 = vpop.eup %7355  ;;  %v2103_v51 = vadd.f32 0.0001, %v2065_v4 }
  0xe0   :  { %v8521_v26 = vpop.permute.xlu1 %1323  ;;  %v8523_v53 = vpop.permute.xlu0 %1321  ;;  %v2101_v56 = vadd.f32 0.0001, %v2063_v50 }
  0xe1   :  { %13217 = vst [vmem:[#allocation25_spill] sm:$0xff] %v8521_v26  ;;  %13218 = vst [vmem:[#allocation26_spill] sm:$0xff] %v8523_v53  ;;  %v8536_v29 = vpop.f32.mrb[0].mxu0 }
  0xe2   :  { %1037 = vrot.lane.b32.xlu1 %v8461_v10, %s7801_s15  ;;  %2776 = vperm.xlu0 %7200, %v1571_v30   ;;  %v6388_v26 = vpop.f32.mrb[1].mxu0  ;;  %v810_v30 = vsub.f32 %v7930_v18, %v8238_v14  ;;  %7365 = vrcp.f32 %v2101_v56 }
  0xe3   :  { %v8534_v13 = vpop.f32.mrb[4].mxu1  ;;  %7367 = vrcp.f32 %v2103_v51 }
  0xe4   :  { %13219 = vst [vmem:[#allocation27_spill] sm:$0xff] %v8534_v13  ;;  %v8538_v46 = vpop.permute.xlu1 %1627  ;;  %v8540_v39 = vpop.permute.xlu0 %1625 }
  0xe5   :  { %13220 = vst [vmem:[#allocation28_spill] sm:$0xff] %v8538_v46  ;;  %13221 = vst [vmem:[#allocation29_spill] sm:$0xff] %v8540_v39  ;;  %v6432_v53 = vpop.f32.mrb[5].mxu1  ;;  %v8552_v13 = vpop.f32.mrb[2].mxu0  ;;  %v962_v46 = vmul.f32 %v7356_v58, %v810_v30  ;;  %v1456_v30 = vadd.f32 %v8272_v24, %v7930_v18 }
  0xe6   :  { %1039 = vrot.lane.b32.xlu1 %v8419_v45, %s7801_s15  ;;  %743 = vrot.lane.b32.xlu0 %v8532_v59, %s7802_s16  ;;  %v8550_v41 = vpop.f32.mrb[6].mxu1  ;;  %v6389_v26 = vpop.f32.mrb[3].mxu0 }
  0xe7   :  { %13222 = vst [vmem:[#allocation30_spill] sm:$0xff] %v8550_v41  ;;  %v6433_v53 = vpop.f32.mrb[7].mxu1  ;;  %v7358_v39 = vpop.eup %7357 }
  0xe8   :  { %v8554_v14 = vpop.permute.xlu1 %719  ;;  %v8556_v50 = vpop.permute.xlu0 %717  ;;  %v2176_v44 = vmul.f32 %v7358_v39, %v2024_v9 }
  0xe9   :  { %13223 = vst [vmem:[#allocation31_spill] sm:$0xff] %v8554_v14  ;;  %13224 = vst [vmem:[#allocation32_spill] sm:$0xff] %v8556_v50  ;;  %v7360_v41 = vpop.eup %7359  ;;  %v8566_v47 = vpop.f32.mrb[4].mxu0  ;;  %v12985_v50 = vmov 9   ;;  %v1494_v14 = vadd.f32 0.0001, %v1456_v30 }
  0xea   :  { %2231 = vperm.xlu1 %7202, %v962_v46   ;;  %1955 = vrot.lane.b32.xlu0 %v8466_v57, %s7806_s29  ;;  %v6392_v53 = vpop.f32.mrb[5].mxu0  ;;  %v1573_v26 = vmul.f32 %v7360_v41, %v1421_v49  ;;  %v7362_v51 = vpop.eup %7361  ;;  %v2023_v49 = vsub.f32 %v7869_v0, %v8258_v21  ;;  %v1113_v41 = vsub.f32 %v7935_v19, %v8266_v23  ;;  %v13232_v0 = vmov 7  }
  0xeb   :  { %v8564_v58 = vpop.f32.mrb[8].mxu1  ;;  %v8579_v20 = vpop.f32.mrb[6].mxu0  ;;  %7369 = vrcp.f32 %v1494_v14 }
  0xec   :  { %13225 = vst [vmem:[#allocation33_spill] sm:$0xff] %v8564_v58  ;;  %v8570_v56 = vpop.permute.xlu1 %1931  ;;  %v8572_v4 = vpop.permute.xlu0 %1929  ;;  %v2175_v23 = vmul.f32 %v7362_v51, %v2023_v49 }
  0xed   :  { %13226 = vst [vmem:[#allocation34_spill] sm:$0xff] %v8570_v56  ;;  %v6436_v46 = vpop.f32.mrb[9].mxu1  ;;  %v6393_v56 = vpop.f32.mrb[7].mxu0 }
  0xee   :  { %7203 = vset.pattern.permute.xlu1 %v12985_v50  ;;  %1351 = vrot.lane.b32.xlu0 %v8532_v59, %s7804_s28  ;;  %v8577_v6 = vpop.f32.mrb[10].mxu1  ;;  %v7364_v9 = vpop.eup %7363  ;;  %v2067_v46 = vadd.f32 %v8423_v1, %v8053_v42 }
  0xef   :  { %13227 = vst [vmem:[#allocation35_spill] sm:$0xff] %v8577_v6  ;;  %3301 = vperm.xlu1 %7203, %v2176_v44   ;;  %v6437_v58 = vpop.f32.mrb[11].mxu1  ;;  %v7366_v56 = vpop.eup %7365  ;;  %v1265_v53 = vmul.f32 %v7364_v9, %v1113_v41  ;;  %v13234_v6 = vmov 9  }
  0xf0   :  { %v8581_v15 = vpop.permute.xlu1 %1023  ;;  %v8583_v39 = vpop.permute.xlu0 %1021  ;;  %v2025_v58 = vsub.f32 %v7935_v19, %v8306_v35 }
  0xf1   :  { %13228 = vst [vmem:[#allocation36_spill] sm:$0xff] %v8581_v15  ;;  %13229 = vst [vmem:[#allocation37_spill] sm:$0xff] %v8583_v39  ;;  %v1759_v15 = vadd.f32 %v8282_v27, %v7935_v19 }
  0xf2   :  { %2786 = vperm.xlu0 %7200, %v1573_v26   ;;  %v2105_v26 = vadd.f32 0.0001, %v2067_v46  ;;  %v2177_v39 = vmul.f32 %v7366_v56, %v2025_v58 }
  0xf3   :  { %1341 = vrot.lane.b32.xlu1 %v8461_v10, %s7804_s28  ;;  %v8595_v30 = vpop.f32.mrb[12].mxu1 }
  0xf4   :  { %13230 = vst [vmem:[#allocation38_spill] sm:$0xff] %v8595_v30  ;;  %v8597_v44 = vpop.permute.xlu1 %1327  ;;  %7204 = vset.pattern.permute.xlu1 %v13232_v0  ;;  %v8600_v21 = vpop.permute.xlu0 %1325  ;;  %v2027_v30 = vsub.f32 %v8005_v33, %v8372_v2  ;;  %7371 = vrcp.f32 %v2105_v26  ;;  %v1797_v2 = vadd.f32 0.0001, %v1759_v15 }
  0xf5   :  { %13231 = vst [vmem:[#allocation39_spill] sm:$0xff] %v8597_v44  ;;  %13233 = vst [vmem:[#allocation40_spill] sm:$0xff] %v8600_v21  ;;  %v6440_v50 = vpop.f32.mrb[13].mxu1  ;;  %v7368_v44 = vpop.eup %7367 }
  0xf6   :  { %7213 = vset.pattern.permute.xlu0 %v13234_v6  ;;  %v8603_v35 = vpop.f32.mrb[14].mxu1  ;;  %v2179_v50 = vmul.f32 %v7368_v44, %v2027_v30  ;;  %v7370_v46 = vpop.eup %7369  ;;  %v1418_v30 = vsub.f32 %v7930_v18, %v8272_v24  ;;  %7373 = vrcp.f32 %v1797_v2  ;;  %v8633_v44 = vld [vmem:[%s12938_s0 + $0xd8] sm:$0xff]  ;;  %v2029_v24 = vsub.f32 %v8053_v42, %v8423_v1  ;;  %v8650_v2 = vld [vmem:[%s12938_s0 + $0xb0] sm:$0xff] }
  0xf7   :  { %13235 = vst [vmem:[#allocation41_spill] sm:$0xff] %v8603_v35  ;;  %2496 = vperm.xlu1 %7204, %v1265_v53   ;;  %3296 = vperm.xlu0 %7213, %v2175_v23   ;;  %v6441_v14 = vpop.f32.mrb[15].mxu1  ;;  %v2069_v53 = vadd.f32 %v8491_v12, %v8115_v55 }
  0xf8   :  { %v8609_v21 = vpop.permute.xlu1 %1631  ;;  %v8611_v51 = vpop.permute.xlu0 %1629  ;;  %v1570_v23 = vmul.f32 %v7370_v46, %v1418_v30  ;;  %v850_v14 = vadd.f32 %v8288_v28, %v8000_v32  ;;  %v86_v30 = vld [vmem:[%s12940_s1 + $0x60] sm:$0xff] }
  0xf9   :  { %v2107_v1 = vadd.f32 0.0001, %v2069_v53  ;;  %v118_v53 = vpack.c.bf16 %v8185_v61, %v8190_v62 }
  0xfb   :  { %1645 = vrot.lane.b32.xlu1 %v8461_v10, %s7805_s17  ;;  %3306 = vperm.xlu0 %7213, %v2177_v39   ;;  %v8615_v49 = vpop.f32.mrb[16].mxu1  ;;  %7375 = vrcp.f32 %v2107_v1 }
  0xfc   :  { %13236 = vst [vmem:[#allocation42_spill] sm:$0xff] %v8615_v49  ;;  %v8617_v41 = vpop.permute.xlu1 %723  ;;  %7205 = vset.pattern.permute.xlu1 %v13203_v11  ;;  %v6444_v9 = vpop.f32.mrb[17].mxu1  ;;  %v2064_v49 = vadd.f32 %v8304_v34, %v7930_v18  ;;  %6489 = vmatmul.mubr.msk.bf16.gmra.mrb[60].mxu1 %vm408_vm5, %v118_v53 }
  0xfd   :  { %v8620_v58 = vpop.permute.xlu0 %721  ;;  %v8622_v56 = vpop.f32.mrb[18].mxu1  ;;  %6492 = vmatprep.mubr.msk.bf16.mxu1 %vm7803_vm2, %v13212_v54 }
  0xfe   :  { %13237 = vst [vmem:[#allocation43_spill] sm:$0xff] %v8620_v58  ;;  %13238 = vst [vmem:[#allocation44_spill] sm:$0xff] %v8622_v56  ;;  %v6445_v39 = vpop.f32.mrb[19].mxu1  ;;  %v7372_v26 = vpop.eup %7371  ;;  %v2102_v61 = vadd.f32 0.0001, %v2064_v49  ;;  %v1153_v49 = vadd.f32 %v8313_v37, %v8005_v33 }
  0xff   :  { %1647 = vrot.lane.b32.xlu1 %v8419_v45, %s7805_s17  ;;  %3316 = vperm.xlu0 %7213, %v2179_v50   ;;  %v87_v39 = vld [vmem:[%s12940_s1 + $0x68] sm:$0xff] }
 0x100   :  { %v8628_v15 = vpop.permute.xlu1 %1935 }
 0x101   :  { %v8652_v9 = vpop.permute.xlu0 %1933 }
 0x103   :  { %2771 = vperm.xlu1 %7205, %v1570_v23   ;;  %747 = vrot.lane.b32.xlu0 %v8633_v44, %s7802_s16  ;;  %v8641_v45 = vpop.f32.mrb[20].mxu1  ;;  %v2181_v23 = vmul.f32 %v7372_v26, %v2029_v24  ;;  %v1721_v24 = vsub.f32 %v7935_v19, %v8282_v27 }
 0x104   :  { %13239 = vst [vmem:[#allocation45_spill] sm:$0xff] %v8641_v45  ;;  %v8645_v50 = vpop.permute.xlu1 %1027  ;;  %v6448_v42 = vpop.f32.mrb[21].mxu1 }
 0x105   :  { %v8654_v46 = vpop.f32.mrb[22].mxu1  ;;  %v139_v42 = vpack.c.bf16 %v87_v39, %v86_v30  ;;  %v8677_v26 = vpop.permute.xlu0 %1025 }
 0x106   :  { %13240 = vst [vmem:[#allocation46_spill] sm:$0xff] %v8654_v46  ;;  %v6449_v45 = vpop.f32.mrb[23].mxu1  ;;  %v888_v46 = vadd.f32 0.0001, %v850_v14 }
 0x107   :  { %737 = vrot.lane.b32.xlu1 %v8650_v2, %s7802_s16  ;;  %1959 = vrot.lane.b32.xlu0 %v8532_v59, %s7806_s29  ;;  %v7374_v45 = vpop.eup %7373 }
 0x108   :  { %v8668_v56 = vpop.permute.xlu1 %1331  ;;  %7206 = vset.pattern.permute.xlu1 %v13210_v25  ;;  %6411 = vmatmul.mubr.msk.bf16.gmra.mrb[24].mxu0 %vm153_vm3, %v139_v42  ;;  %7377 = vrcp.f32 %v888_v46  ;;  %v1873_v27 = vmul.f32 %v7374_v45, %v1721_v24  ;;  %v2031_v42 = vsub.f32 %v8115_v55, %v8491_v12  ;;  %v7376_v24 = vpop.eup %7375  ;;  %v812_v55 = vsub.f32 %v8000_v32, %v8288_v28 }
 0x109   :  { %6414 = vmatprep.mubr.msk.bf16.mxu0 %vm7803_vm2, %v13212_v54  ;;  %v8700_v46 = vpop.permute.xlu0 %1329  ;;  %7379 = vrcp.f32 %v2102_v61  ;;  %v1191_v61 = vadd.f32 0.0001, %v1153_v49  ;;  %v8726_v49 = vpop.f32.mrb[8].mxu0 }
 0x10a   :  { %13244 = vst [vmem:[#allocation50_spill] sm:$0xff] %v8700_v46  ;;  %v2183_v12 = vmul.f32 %v7376_v24, %v2031_v42  ;;  %v8737_v24 = vld [vmem:[%s12938_s0 + $0x18] sm:$0xff] }
 0x10b   :  { %1949 = vrot.lane.b32.xlu1 %v8461_v10, %s7806_s29  ;;  %3326 = vperm.xlu0 %7213, %v2181_v23   ;;  %v8685_v18 = vpop.f32.mrb[24].mxu1  ;;  %v8698_v10 = vld [vmem:[%s12938_s0 + $0xe8] sm:$0xff]  ;;  %v2071_v23 = vadd.f32 %v8572_v4, %v8157_v60  ;;  %7381 = vrcp.f32 %v1191_v61 }
 0x10c   :  { %13241 = vst [vmem:[#allocation47_spill] sm:$0xff] %v8685_v18  ;;  %v8687_v19 = vpop.permute.xlu1 %1635  ;;  %v6452_v14 = vpop.f32.mrb[25].mxu1 }
 0x10d   :  { %13242 = vst [vmem:[#allocation48_spill] sm:$0xff] %v8687_v19  ;;  %v8689_v1 = vpop.f32.mrb[26].mxu1 }
 0x10e   :  { %13243 = vst [vmem:[#allocation49_spill] sm:$0xff] %v8689_v1  ;;  %v6453_v30 = vpop.f32.mrb[27].mxu1  ;;  %v8716_v1 = vpop.permute.xlu0 %1633 }
 0x10f   :  { %3036 = vperm.xlu1 %7206, %v1873_v27   ;;  %1355 = vrot.lane.b32.xlu0 %v8633_v44, %s7804_s28  ;;  %v2109_v30 = vadd.f32 0.0001, %v2071_v23 }
 0x110   :  { %v8693_v39 = vpop.permute.xlu1 %727 }
 0x111   :  { %7383 = vrcp.f32 %v2109_v30 }
 0x112   :  { %v7378_v14 = vpop.eup %7377  ;;  %v8741_v61 = vpop.permute.xlu0 %725 }
 0x113   :  { %1041 = vrot.lane.b32.xlu1 %v8650_v2, %s7801_s15  ;;  %751 = vrot.lane.b32.xlu0 %v8698_v10, %s7802_s16  ;;  %v8712_v53 = vpop.f32.mrb[28].mxu1  ;;  %v964_v35 = vmul.f32 %v7378_v14, %v812_v55  ;;  %13248 = vst [vmem:[#allocation54_spill] sm:$0xff] %v8741_v61  ;;  %v1458_v14 = vadd.f32 %v8319_v38, %v8000_v32 }
 0x114   :  { %13245 = vst [vmem:[#allocation51_spill] sm:$0xff] %v8712_v53  ;;  %v8714_v45 = vpop.permute.xlu1 %1939  ;;  %v6456_v27 = vpop.f32.mrb[29].mxu1  ;;  %v1115_v32 = vsub.f32 %v8005_v33, %v8313_v37 }
 0x115   :  { %v8718_v18 = vpop.f32.mrb[30].mxu1  ;;  %v6396_v27 = vpop.f32.mrb[9].mxu0 }
 0x116   :  { %13246 = vst [vmem:[#allocation52_spill] sm:$0xff] %v8718_v18  ;;  %v6457_v53 = vpop.f32.mrb[31].mxu1  ;;  %v7380_v18 = vpop.eup %7379 }
 0x117   :  { %1043 = vrot.lane.b32.xlu1 %v8466_v57, %s7801_s15  ;;  %1963 = vrot.lane.b32.xlu0 %v8633_v44, %s7806_s29  ;;  %v8732_v42 = vpop.f32.mrb[10].mxu0  ;;  %v2026_v53 = vsub.f32 %v8737_v24, %v8304_v34  ;;  %v8753_v34 = vld [vmem:[%s12938_s0 + $0xf8] sm:$0xff] }
 0x118   :  { %v8728_v23 = vpop.permute.xlu1 %1031 }
 0x119   :  { %v2178_v55 = vmul.f32 %v7380_v18, %v2026_v53  ;;  %v2073_v18 = vadd.f32 %v8652_v9, %v8190_v62  ;;  %v7382_v53 = vpop.eup %7381 }
 0x11a   :  { %v1267_v37 = vmul.f32 %v7382_v53, %v1115_v32 }
 0x11b   :  { %2241 = vperm.xlu1 %7206, %v964_v35   ;;  %3336 = vperm.xlu0 %7213, %v2183_v12   ;;  %v8730_v28 = vpop.f32.mrb[32].mxu1  ;;  %v6397_v35 = vpop.f32.mrb[11].mxu0 }
 0x11c   :  { %13247 = vst [vmem:[#allocation53_spill] sm:$0xff] %v8730_v28  ;;  %v6460_v30 = vpop.f32.mrb[33].mxu1  ;;  %v1496_v28 = vadd.f32 0.0001, %v1458_v14  ;;  %v8755_v46 = vpop.permute.xlu1 %1335 }
 0x11d   :  { %v8745_v12 = vpop.f32.mrb[34].mxu1  ;;  %v2033_v30 = vsub.f32 %v8157_v60, %v8572_v4  ;;  %v8763_v35 = vpop.permute.xlu0 %1937 }
 0x11e   :  { %13249 = vst [vmem:[#allocation55_spill] sm:$0xff] %v8745_v12  ;;  %v6461_v27 = vpop.f32.mrb[35].mxu1  ;;  %7385 = vrcp.f32 %v1496_v28  ;;  %v2111_v12 = vadd.f32 0.0001, %v2073_v18 }
 0x11f   :  { %7207 = vset.pattern.permute.xlu1 %v13234_v6  ;;  %1359 = vrot.lane.b32.xlu0 %v8698_v10, %s7804_s28  ;;  %v7384_v27 = vpop.eup %7383 }
 0x120   :  { %3311 = vperm.xlu1 %7207, %v2178_v55   ;;  %v2185_v4 = vmul.f32 %v7384_v27, %v2033_v30  ;;  %v8773_v61 = vpop.permute.xlu1 %1639  ;;  %7387 = vrcp.f32 %v2111_v12 }
 0x121   :  { %13251 = vst [vmem:[#allocation57_spill] sm:$0xff] %v8773_v61  ;;  %v8787_v32 = vpop.permute.xlu0 %1029 }
 0x123   :  { %755 = vrot.lane.b32.xlu0 %v8753_v34, %s7802_s16  ;;  %v504_v55 = vpop.f32.mrb[36].mxu1 }
 0x124   :  { %1345 = vrot.lane.b32.xlu1 %v8650_v2, %s7804_s28  ;;  %v8770_v14 = vadd.f32 %v504_v55, %v8536_v29  ;;  %v6466_v33 = vpop.f32.mrb[37].mxu1  ;;  %v8783_v29 = vld [vmem:[%s12938_s0 + $0x20] sm:$0xff]  ;;  %v8794_v53 = vpop.permute.xlu1 %731 }
 0x125   :  { %7208 = vset.pattern.permute.xlu1 %v13232_v0  ;;  %v507_v60 = vpop.f32.mrb[38].mxu1  ;;  %v1761_v28 = vadd.f32 %v8783_v29, %v8338_v48  ;;  %v8797_v33 = vpop.permute.xlu0 %1333 }
 0x126   :  { %13250 = vst [vmem:[#allocation56_spill] sm:$0xff] %v8770_v14  ;;  %v8778_v19 = vadd.f32 %v507_v60, %v8552_v13  ;;  %v6467_v58 = vpop.f32.mrb[39].mxu1  ;;  %13254 = vst [vmem:[#allocation60_spill] sm:$0xff] %v8797_v33 }
 0x127   :  { %1967 = vrot.lane.b32.xlu0 %v8698_v10, %s7806_s29  ;;  %v1799_v58 = vadd.f32 0.0001, %v1761_v28  ;;  %v2075_v28 = vadd.f32 %v8763_v35, %v8254_v17 }
 0x128   :  { %13252 = vst [vmem:[#allocation58_spill] sm:$0xff] %v8778_v19  ;;  %2506 = vperm.xlu1 %7208, %v1267_v37   ;;  %v7386_v27 = vpop.eup %7385 }
 0x129   :  { %7389 = vrcp.f32 %v1799_v58  ;;  %v8832_v58 = vld [vmem:[%s12938_s0 + $0x38] sm:$0xff] }
 0x12b   :  { %3346 = vperm.xlu0 %7213, %v2185_v4   ;;  %v512_v18 = vpop.f32.mrb[40].mxu1  ;;  %v8816_v4 = vld [vmem:[%s12938_s0 + $0x108] sm:$0xff] }
 0x12c   :  { %1649 = vrot.lane.b32.xlu1 %v8650_v2, %s7805_s17  ;;  %v8792_v13 = vadd.f32 %v512_v18, %v8566_v47  ;;  %v6470_v30 = vpop.f32.mrb[41].mxu1  ;;  %v8807_v47 = vld [vmem:[%s12938_s0 + $0x28] sm:$0xff]  ;;  %v2035_v18 = vsub.f32 %v8190_v62, %v8652_v9  ;;  %v852_v62 = vadd.f32 %v8832_v58, %v8351_v52  ;;  %v8836_v9 = vpop.permute.xlu0 %1637 }
 0x12d   :  { %7209 = vset.pattern.permute.xlu1 %v13203_v11  ;;  %v515_v55 = vpop.f32.mrb[42].mxu1  ;;  %v1420_v60 = vsub.f32 %v8807_v47, %v8319_v38  ;;  %v8822_v30 = vpop.permute.xlu1 %1943 }
 0x12e   :  { %13253 = vst [vmem:[#allocation59_spill] sm:$0xff] %v8792_v13  ;;  %v8802_v12 = vadd.f32 %v515_v55, %v8579_v20  ;;  %v6471_v37 = vpop.f32.mrb[43].mxu1  ;;  %v89_v13 = vld [vmem:[%s12940_s1 + $0x78] sm:$0xff] }
 0x12f   :  { %1363 = vrot.lane.b32.xlu0 %v8753_v34, %s7804_s28  ;;  %v1572_v20 = vmul.f32 %v7386_v27, %v1420_v60  ;;  %v8841_v27 = vld [vmem:[%s12938_s0 + $0xc0] sm:$0xff] }
 0x130   :  { %13255 = vst [vmem:[#allocation61_spill] sm:$0xff] %v8802_v12  ;;  %1651 = vrot.lane.b32.xlu1 %v8466_v57, %s7805_s17  ;;  %v7388_v57 = vpop.eup %7387 }
 0x133   :  { %759 = vrot.lane.b32.xlu0 %v8816_v4, %s7802_s16  ;;  %v520_v38 = vpop.f32.mrb[44].mxu1 }
 0x134   :  { %2781 = vperm.xlu1 %7209, %v1572_v20   ;;  %v8827_v55 = vadd.f32 %v520_v38, %v8726_v49  ;;  %v6474_v37 = vpop.f32.mrb[45].mxu1  ;;  %v2113_v20 = vadd.f32 0.0001, %v2075_v28 }
 0x135   :  { %v523_v60 = vpop.f32.mrb[46].mxu1  ;;  %v2187_v37 = vmul.f32 %v7388_v57, %v2035_v18  ;;  %v8858_v18 = vpop.permute.xlu1 %1035  ;;  %v2066_v57 = vadd.f32 %v8807_v47, %v8370_v63 }
 0x136   :  { %13256 = vst [vmem:[#allocation62_spill] sm:$0xff] %v8827_v55  ;;  %v8844_v49 = vadd.f32 %v523_v60, %v8732_v42  ;;  %v6475_v38 = vpop.f32.mrb[47].mxu1  ;;  %v88_v55 = vld [vmem:[%s12940_s1 + $0x70] sm:$0xff]  ;;  %v119_v42 = vpack.c.bf16 %v8249_v16, %v8254_v17  ;;  %v890_v60 = vadd.f32 0.0001, %v852_v62  ;;  %7391 = vrcp.f32 %v2113_v20  ;;  %v8882_v62 = vld [vmem:[%s12938_s0 + $0x118] sm:$0xff] }
 0x137   :  { %1971 = vrot.lane.b32.xlu0 %v8753_v34, %s7806_s29  ;;  %v140_v28 = vpack.c.bf16 %v89_v13, %v88_v55  ;;  %v1723_v38 = vsub.f32 %v8783_v29, %v8338_v48  ;;  %v7390_v13 = vpop.eup %7389  ;;  %v8867_v55 = vpop.permute.xlu0 %729  ;;  %v2104_v48 = vadd.f32 0.0001, %v2066_v57  ;;  %v8887_v20 = vld [vmem:[%s12938_s0 + $0x30] sm:$0xff]  ;;  %v2037_v57 = vsub.f32 %v8254_v17, %v8763_v35  ;;  %v8914_v17 = vld [vmem:[%s12938_s0 + $0x8] sm:$0xff] }
 0x138   :  { %13257 = vst [vmem:[#allocation63_spill] sm:$0xff] %v8844_v49  ;;  %741 = vrot.lane.b32.xlu1 %v8841_v27, %s7802_s16  ;;  %6493 = vmatmul.mubr.msk.bf16.gmra.mrb[64].mxu1 %vm408_vm5, %v119_v42  ;;  %13258 = vst [vmem:[#allocation64_spill] sm:$0xff] %v8867_v55  ;;  %7393 = vrcp.f32 %v890_v60  ;;  %v1150_v35 = vadd.f32 %v8914_v17, %v8210_v8  ;;  %v1152_v55 = vadd.f32 %v8737_v24, %v8264_v22 }
 0x139   :  { %7210 = vset.pattern.permute.xlu1 %v13210_v25  ;;  %6415 = vmatmul.mubr.msk.bf16.gmra.mrb[28].mxu0 %vm153_vm3, %v140_v28  ;;  %v1875_v29 = vmul.f32 %v7390_v13, %v1723_v38  ;;  %7395 = vrcp.f32 %v2104_v48  ;;  %v814_v48 = vsub.f32 %v8832_v58, %v8351_v52 }
 0x13a   :  { %6418 = vmatprep.mubr.msk.bf16.mxu0 %vm7803_vm2, %v13212_v54  ;;  %6496 = vmatprep.mubr.msk.bf16.mxu1 %vm7803_vm2, %v13212_v54  ;;  %v1188_v33 = vadd.f32 0.0001, %v1150_v35  ;;  %v8936_v35 = vld [vmem:[%s12938_s0 + $0x128] sm:$0xff] }
 0x13b   :  { %3356 = vperm.xlu0 %7213, %v2187_v37   ;;  %v1155_v37 = vadd.f32 %v8887_v20, %v8380_v40  ;;  %v8891_v28 = vpop.permute.xlu0 %1941 }
 0x13c   :  { %1953 = vrot.lane.b32.xlu1 %v8650_v2, %s7806_s29  ;;  %v2077_v60 = vadd.f32 %v8891_v28, %v8302_v31 }
 0x13d   :  { %v8875_v16 = vpop.permute.xlu1 %2221  ;;  %v1193_v13 = vadd.f32 0.0001, %v1155_v37 }
 0x13e   :  { %13259 = vst [vmem:[#allocation65_spill] sm:$0xff] %v8875_v16  ;;  %v2115_v49 = vadd.f32 0.0001, %v2077_v60 }
 0x13f   :  { %1367 = vrot.lane.b32.xlu0 %v8816_v4, %s7804_s28  ;;  %7397 = vrcp.f32 %v1193_v13  ;;  %v2028_v13 = vsub.f32 %v8807_v47, %v8370_v63  ;;  %v1190_v63 = vadd.f32 0.0001, %v1152_v55  ;;  %v1156_v55 = vadd.f32 %v8832_v58, %v8378_v7 }
 0x140   :  { %3046 = vperm.xlu1 %7210, %v1875_v29   ;;  %v7392_v38 = vpop.eup %7391  ;;  %7399 = vrcp.f32 %v2115_v49 }
 0x141   :  { %v8893_v42 = vpop.permute.xlu1 %1337  ;;  %v2189_v12 = vmul.f32 %v7392_v38, %v2037_v57  ;;  %v276_v57 = vpop.f32.mrb[12].mxu0  ;;  %7401 = vrcp.f32 %v1188_v33 }
 0x142   :  { %13260 = vst [vmem:[#allocation66_spill] sm:$0xff] %v8893_v42  ;;  %v7394_v14 = vpop.eup %7393  ;;  %v528_v38 = vpop.f32.mrb[48].mxu1  ;;  %7403 = vrcp.f32 %v1190_v63 }
 0x143   :  { %763 = vrot.lane.b32.xlu0 %v8882_v62, %s7802_s16  ;;  %v966_v60 = vmul.f32 %v7394_v14, %v814_v48  ;;  %v6400_v52 = vpop.f32.mrb[13].mxu0  ;;  %v7396_v19 = vpop.eup %7395 }
 0x144   :  { %1045 = vrot.lane.b32.xlu1 %v8841_v27, %s7801_s15  ;;  %v279_v16 = vpop.f32.mrb[14].mxu0  ;;  %v2180_v48 = vmul.f32 %v7396_v19, %v2028_v13  ;;  %v1117_v52 = vsub.f32 %v8887_v20, %v8380_v40  ;;  %v2039_v13 = vsub.f32 %v8302_v31, %v8891_v28  ;;  %v8957_v31 = vadd.f32 %v528_v38, %v276_v57 }
 0x145   :  { %v8903_v29 = vpop.permute.xlu1 %2486  ;;  %v6401_v49 = vpop.f32.mrb[15].mxu0  ;;  %v1194_v28 = vadd.f32 0.0001, %v1156_v55  ;;  %v1112_v57 = vsub.f32 %v8914_v17, %v8210_v8 }
 0x146   :  { %13261 = vst [vmem:[#allocation67_spill] sm:$0xff] %v8903_v29  ;;  %v6478_v29 = vpop.f32.mrb[49].mxu1  ;;  %13267 = vst [vmem:[#allocation73_spill] sm:$0xff] %v8957_v31  ;;  %v13271_v31 = vld [vmem:[#allocation36_spill] sm:$0xff] }
 0x147   :  { %1975 = vrot.lane.b32.xlu0 %v8816_v4, %s7806_s29  ;;  %v531_v42 = vpop.f32.mrb[50].mxu1 }
 0x148   :  { %1047 = vrot.lane.b32.xlu1 %v8532_v59, %s7801_s15  ;;  %v8926_v14 = vadd.f32 %v531_v42, %v279_v16  ;;  %v6479_v29 = vpop.f32.mrb[51].mxu1  ;;  %v1154_v16 = vadd.f32 %v8807_v47, %v8311_v36 }
 0x149   :  { %v8918_v37 = vpop.permute.xlu1 %1641  ;;  %v7398_v19 = vpop.eup %7397 }
 0x14a   :  { %13262 = vst [vmem:[#allocation68_spill] sm:$0xff] %v8918_v37  ;;  %13264 = vst [vmem:[#allocation70_spill] sm:$0xff] %v8926_v14  ;;  %v7400_v49 = vpop.eup %7399  ;;  %v1192_v33 = vadd.f32 0.0001, %v1154_v16  ;;  %v1269_v40 = vmul.f32 %v7398_v19, %v1117_v52  ;;  %v8975_v52 = vld [vmem:[%s12938_s0 + $0x58] sm:$0xff] }
 0x14b   :  { %3366 = vperm.xlu0 %7213, %v2189_v12   ;;  %v1460_v12 = vadd.f32 %v8832_v58, %v8387_v43  ;;  %v7402_v19 = vpop.eup %7401 }
 0x14c   :  { %2251 = vperm.xlu1 %7210, %v966_v60   ;;  %v1264_v55 = vmul.f32 %v7402_v19, %v1112_v57  ;;  %v7404_v8 = vpop.eup %7403 }
 0x14d   :  { %v8924_v61 = vpop.permute.xlu1 %1643  ;;  %v1498_v60 = vadd.f32 0.0001, %v1460_v12  ;;  %v2191_v12 = vmul.f32 %v7400_v49, %v2039_v13  ;;  %v13269_v13 = vld [vmem:[#allocation22_spill] sm:$0xff] }
 0x14e   :  { %13263 = vst [vmem:[#allocation69_spill] sm:$0xff] %v8924_v61  ;;  %v1160_v49 = vadd.f32 %v8975_v52, %v13269_v13 }
 0x14f   :  { %1371 = vrot.lane.b32.xlu0 %v8882_v62, %s7804_s28  ;;  %7405 = vrcp.f32 %v1498_v60  ;;  %v1763_v60 = vadd.f32 %v8887_v20, %v8403_v5 }
 0x150   :  { %7211 = vset.pattern.permute.xlu1 %v13234_v6  ;;  %7407 = vrcp.f32 %v1192_v33  ;;  %v1198_v19 = vadd.f32 0.0001, %v1160_v49 }
 0x151   :  { %v8940_v42 = vpop.permute.xlu1 %2761  ;;  %3321 = vperm.xlu1 %7211, %v2180_v48   ;;  %v8962_v48 = vld [vmem:[%s12938_s0 + $0x48] sm:$0xff]  ;;  %7409 = vrcp.f32 %v1194_v28  ;;  %v1114_v28 = vsub.f32 %v8737_v24, %v8264_v22 }
 0x152   :  { %13265 = vst [vmem:[#allocation71_spill] sm:$0xff] %v8940_v42  ;;  %v1158_v63 = vadd.f32 %v8962_v48, %v8429_v3  ;;  %v1116_v42 = vsub.f32 %v8807_v47, %v8311_v36  ;;  %v9016_v36 = vld [vmem:[%s12938_s0 + $0xd0] sm:$0xff] }
 0x153   :  { %767 = vrot.lane.b32.xlu0 %v8936_v35, %s7802_s16  ;;  %v1266_v22 = vmul.f32 %v7404_v8, %v1114_v28  ;;  %v90_v8 = vld [vmem:[%s12940_s1 + $0x80] sm:$0xff] }
 0x154   :  { %v1196_v38 = vadd.f32 0.0001, %v1158_v63  ;;  %v8990_v63 = vld [vmem:[%s12938_s0 + $0x68] sm:$0xff] }
 0x155   :  { %v8950_v29 = vpop.permute.xlu1 %733  ;;  %1349 = vrot.lane.b32.xlu1 %v8841_v27, %s7804_s28  ;;  %v1162_v14 = vadd.f32 %v8990_v63, %v13271_v31 }
 0x156   :  { %13266 = vst [vmem:[#allocation72_spill] sm:$0xff] %v8950_v29  ;;  %7212 = vset.pattern.permute.xlu1 %v13232_v0  ;;  %7411 = vrcp.f32 %v1196_v38 }
 0x157   :  { %1979 = vrot.lane.b32.xlu0 %v8882_v62, %s7806_s29 }
 0x159   :  { %v8966_v16 = vpop.permute.xlu1 %1945  ;;  %2516 = vperm.xlu1 %7212, %v1269_v40   ;;  %v1801_v40 = vadd.f32 0.0001, %v1763_v60  ;;  %v1422_v60 = vsub.f32 %v8832_v58, %v8387_v43  ;;  %v9005_v43 = vld [vmem:[%s12938_s0 + $0x78] sm:$0xff] }
 0x15a   :  { %13268 = vst [vmem:[#allocation74_spill] sm:$0xff] %v8966_v16  ;;  %v1200_v16 = vadd.f32 0.0001, %v1162_v14  ;;  %v1164_v38 = vadd.f32 %v9005_v43, %v8645_v50  ;;  %v1118_v14 = vsub.f32 %v8832_v58, %v8378_v7 }
 0x15b   :  { %3376 = vperm.xlu0 %7213, %v2191_v12   ;;  %v7406_v12 = vpop.eup %7405  ;;  %7413 = vrcp.f32 %v1801_v40 }
 0x15c   :  { %v7408_v24 = vpop.eup %7407  ;;  %7415 = vrcp.f32 %v1198_v19 }
 0x15d   :  { %v8979_v33 = vpop.permute.xlu1 %3026  ;;  %1653 = vrot.lane.b32.xlu1 %v8841_v27, %s7805_s17  ;;  %v7410_v47 = vpop.eup %7409  ;;  %7417 = vrcp.f32 %v1200_v16 }
 0x15e   :  { %13270 = vst [vmem:[#allocation22_spill] sm:$0xff] %v8979_v33  ;;  %7214 = vset.pattern.permute.xlu1 %v13203_v11  ;;  %v1574_v33 = vmul.f32 %v7406_v12, %v1422_v60  ;;  %v9029_v12 = vld [vmem:[%s12938_s0 + $0x88] sm:$0xff]  ;;  %v9040_v60 = vld [vmem:[%s12938_s0 + $0x80] sm:$0xff] }
 0x15f   :  { %7236 = vset.pattern.permute.xlu0 %v13232_v0  ;;  %v1166_v28 = vadd.f32 %v9029_v12, %v8728_v23  ;;  %v120_v19 = vpack.c.bf16 %v9029_v12, %v9040_v60 }
 0x160   :  { %2491 = vperm.xlu0 %7236, %v1264_v55   ;;  %v13273_v55 = vld [vmem:[#allocation10_spill] sm:$0xff] }
 0x161   :  { %v8996_v57 = vpop.permute.xlu1 %1037  ;;  %1655 = vrot.lane.b32.xlu1 %v8532_v59, %s7805_s17  ;;  %v1268_v59 = vmul.f32 %v7408_v24, %v1116_v42  ;;  %v854_v40 = vadd.f32 %v8962_v48, %v13273_v55  ;;  %v91_v42 = vld [vmem:[%s12940_s1 + $0x88] sm:$0xff]  ;;  %6497 = vmatmul.mubr.msk.bf16.gmra.mrb[68].mxu1 %vm408_vm5, %v120_v19  ;;  %v1122_v19 = vsub.f32 %v8975_v52, %v13269_v13  ;;  %v9077_v13 = vld [vmem:[%s12938_s0 + $0x40] sm:$0xff] }
 0x162   :  { %13272 = vst [vmem:[#allocation36_spill] sm:$0xff] %v8996_v57  ;;  %v141_v16 = vpack.c.bf16 %v91_v42, %v90_v8  ;;  %v1725_v57 = vsub.f32 %v8887_v20, %v8403_v5  ;;  %v1120_v42 = vsub.f32 %v8962_v48, %v8429_v3  ;;  %6500 = vmatprep.mubr.msk.bf16.mxu1 %vm7803_vm2, %v13212_v54  ;;  %v9059_v20 = vpop.permute.xlu0 %1033 }
 0x163   :  { %v892_v24 = vadd.f32 0.0001, %v854_v40  ;;  %v1204_v40 = vadd.f32 0.0001, %v1166_v28 }
 0x164   :  { %2501 = vperm.xlu0 %7236, %v1266_v22   ;;  %v1270_v22 = vmul.f32 %v7410_v47, %v1118_v14  ;;  %6419 = vmatmul.mubr.msk.bf16.gmra.mrb[32].mxu0 %vm153_vm3, %v141_v16 }
 0x165   :  { %v9009_v49 = vpop.permute.xlu1 %1039  ;;  %2791 = vperm.xlu1 %7214, %v1574_v33   ;;  %v1202_v33 = vadd.f32 0.0001, %v1164_v38  ;;  %v7412_v38 = vpop.eup %7411  ;;  %6422 = vmatprep.mubr.msk.bf16.mxu0 %vm7803_vm2, %v13212_v54 }
 0x166   :  { %v7414_v8 = vpop.eup %7413  ;;  %v1272_v5 = vmul.f32 %v7412_v38, %v1120_v42  ;;  %v9083_v42 = vpop.permute.xlu0 %1339 }
 0x167   :  { %7419 = vrcp.f32 %v1202_v33  ;;  %v7416_v14 = vpop.eup %7415  ;;  %v1877_v16 = vmul.f32 %v7414_v8, %v1725_v57  ;;  %v9068_v33 = vld [vmem:[%s12938_s0 + $0x98] sm:$0xff]  ;;  %v1124_v8 = vsub.f32 %v8990_v63, %v13271_v31  ;;  %v816_v31 = vsub.f32 %v8962_v48, %v13273_v55  ;;  %v284_v55 = vpop.f32.mrb[16].mxu0 }
 0x168   :  { %2511 = vperm.xlu0 %7236, %v1268_v59   ;;  %v13275_v59 = vld [vmem:[#allocation12_spill] sm:$0xff]  ;;  %7421 = vrcp.f32 %v892_v24  ;;  %v1168_v28 = vadd.f32 %v9068_v33, %v8858_v18  ;;  %v1274_v24 = vmul.f32 %v7416_v14, %v1122_v19  ;;  %v13278_v57 = vld [vmem:[#allocation13_spill] sm:$0xff] }
 0x169   :  { %v9033_v7 = vpop.permute.xlu1 %2231  ;;  %745 = vrot.lane.b32.xlu1 %v9016_v36, %s7802_s16  ;;  %7423 = vrcp.f32 %v1204_v40  ;;  %13279 = vst [vmem:[#allocation13_spill] sm:$0xff] %v9083_v42 }
 0x16a   :  { %13274 = vst [vmem:[#allocation10_spill] sm:$0xff] %v9033_v7  ;;  %7215 = vset.pattern.permute.xlu1 %v13210_v25  ;;  %v2068_v7 = vadd.f32 %v8832_v58, %v13275_v59  ;;  %v1206_v40 = vadd.f32 0.0001, %v1168_v28  ;;  %v9096_v28 = vld [vmem:[%s12938_s0 + $0xa8] sm:$0xff] }
 0x16c   :  { %2521 = vperm.xlu0 %7236, %v1270_v22   ;;  %v2106_v3 = vadd.f32 0.0001, %v2068_v7  ;;  %v7418_v22 = vpop.eup %7417  ;;  %v1157_v7 = vadd.f32 %v9077_v13, %v13278_v57 }
 0x16d   :  { %1957 = vrot.lane.b32.xlu1 %v8841_v27, %s7806_s29 }
 0x16e   :  { %v9061_v47 = vpop.permute.xlu1 %3301  ;;  %7425 = vrcp.f32 %v2106_v3 }
 0x16f   :  { %13276 = vst [vmem:[#allocation12_spill] sm:$0xff] %v9061_v47  ;;  %v1126_v47 = vsub.f32 %v9005_v43, %v8645_v50  ;;  %7427 = vrcp.f32 %v1206_v40  ;;  %v1128_v40 = vsub.f32 %v9029_v12, %v8728_v23 }
 0x170   :  { %2531 = vperm.xlu0 %7236, %v1272_v5   ;;  %v1276_v5 = vmul.f32 %v7418_v22, %v1124_v8  ;;  %v1170_v22 = vadd.f32 %v9096_v28, %v9009_v49 }
 0x171   :  { %3056 = vperm.xlu1 %7215, %v1877_v16   ;;  %v7420_v3 = vpop.eup %7419  ;;  %v1195_v16 = vadd.f32 0.0001, %v1157_v7  ;;  %v9102_v7 = vpop.permute.xlu0 %2756 }
 0x172   :  { %v9072_v38 = vpop.permute.xlu1 %1341  ;;  %v7422_v19 = vpop.eup %7421  ;;  %13281 = vst [vmem:[#allocation77_spill] sm:$0xff] %v9102_v7  ;;  %v1208_v37 = vadd.f32 0.0001, %v1170_v22 }
 0x173   :  { %13277 = vst [vmem:[#allocation75_spill] sm:$0xff] %v9072_v38  ;;  %v7424_v8 = vpop.eup %7423  ;;  %7429 = vrcp.f32 %v1195_v16  ;;  %v6404_v38 = vpop.f32.mrb[17].mxu0 }
 0x174   :  { %2541 = vperm.xlu0 %7236, %v1274_v24   ;;  %v1278_v24 = vmul.f32 %v7420_v3, %v1126_v47  ;;  %v287_v42 = vpop.f32.mrb[18].mxu0  ;;  %v2030_v47 = vsub.f32 %v8832_v58, %v13275_v59  ;;  %v1280_v3 = vmul.f32 %v7424_v8, %v1128_v40  ;;  %7431 = vrcp.f32 %v1208_v37 }
 0x175   :  { %1049 = vrot.lane.b32.xlu1 %v9016_v36, %s7801_s15  ;;  %v1119_v8 = vsub.f32 %v9077_v13, %v13278_v57 }
 0x176   :  { %v9087_v14 = vpop.permute.xlu1 %2496 }
 0x177   :  { %13280 = vst [vmem:[#allocation76_spill] sm:$0xff] %v9087_v14  ;;  %v536_v14 = vpop.f32.mrb[52].mxu1 }
 0x178   :  { %2551 = vperm.xlu0 %7236, %v1276_v5   ;;  %v968_v5 = vmul.f32 %v7422_v19, %v816_v31  ;;  %v7426_v29 = vpop.eup %7425  ;;  %v6482_v61 = vpop.f32.mrb[53].mxu1  ;;  %v13284_v19 = vld [vmem:[#allocation14_spill] sm:$0xff]  ;;  %v9134_v57 = vadd.f32 %v536_v14, %v284_v55 }
 0x179   :  { %1051 = vrot.lane.b32.xlu1 %v8633_v44, %s7801_s15  ;;  %v1462_v16 = vadd.f32 %v8962_v48, %v13284_v19  ;;  %v539_v31 = vpop.f32.mrb[54].mxu1  ;;  %v2182_v23 = vmul.f32 %v7426_v29, %v2030_v47  ;;  %v7428_v58 = vpop.eup %7427  ;;  %v1130_v29 = vsub.f32 %v9068_v33, %v8858_v18 }
 0x17a   :  { %v9104_v50 = vpop.permute.xlu1 %1645  ;;  %v9116_v38 = vadd.f32 %v539_v31, %v287_v42  ;;  %v6483_v22 = vpop.f32.mrb[55].mxu1  ;;  %13290 = vst [vmem:[#allocation84_spill] sm:$0xff] %v9134_v57 }
 0x17b   :  { %13282 = vst [vmem:[#allocation78_spill] sm:$0xff] %v9104_v50  ;;  %v6405_v50 = vpop.f32.mrb[19].mxu0  ;;  %v1500_v59 = vadd.f32 0.0001, %v1462_v16 }
 0x17c   :  { %2561 = vperm.xlu0 %7236, %v1278_v24   ;;  %v9114_v24 = vpop.permute.xlu0 %735  ;;  %13286 = vst [vmem:[#allocation80_spill] sm:$0xff] %v9116_v38  ;;  %v1282_v50 = vmul.f32 %v7428_v58, %v1130_v29 }
 0x17d   :  { %2261 = vperm.xlu1 %7215, %v968_v5   ;;  %13285 = vst [vmem:[#allocation14_spill] sm:$0xff] %v9114_v24  ;;  %v7430_v42 = vpop.eup %7429  ;;  %7433 = vrcp.f32 %v1500_v59  ;;  %v1424_v59 = vsub.f32 %v8962_v48, %v13284_v19 }
 0x17e   :  { %v9110_v7 = vpop.permute.xlu1 %1647  ;;  %v1271_v40 = vmul.f32 %v7430_v42, %v1119_v8  ;;  %v7432_v47 = vpop.eup %7431 }
 0x17f   :  { %13283 = vst [vmem:[#allocation79_spill] sm:$0xff] %v9110_v7 }
 0x180   :  { %2571 = vperm.xlu0 %7236, %v1280_v3   ;;  %v9127_v5 = vpop.permute.xlu0 %1947  ;;  %v13292_v3 = vld [vmem:[#allocation17_spill] sm:$0xff] }
 0x181   :  { %7216 = vset.pattern.permute.xlu1 %v13234_v6  ;;  %13288 = vst [vmem:[#allocation82_spill] sm:$0xff] %v9127_v5  ;;  %v1765_v16 = vadd.f32 %v9077_v13, %v13292_v3  ;;  %v1727_v38 = vsub.f32 %v9077_v13, %v13292_v3 }
 0x182   :  { %v9119_v61 = vpop.permute.xlu1 %2771  ;;  %3331 = vperm.xlu1 %7216, %v2182_v23   ;;  %v1132_v23 = vsub.f32 %v9096_v28, %v9009_v49 }
 0x183   :  { %13287 = vst [vmem:[#allocation81_spill] sm:$0xff] %v9119_v61  ;;  %v1803_v14 = vadd.f32 0.0001, %v1765_v16  ;;  %v92_v16 = vld [vmem:[%s12940_s1 + $0x90] sm:$0xff] }
 0x184   :  { %1375 = vrot.lane.b32.xlu0 %v8936_v35, %s7804_s28  ;;  %v9140_v31 = vpop.permute.xlu0 %1343  ;;  %v1284_v22 = vmul.f32 %v7432_v47, %v1132_v23  ;;  %v9166_v47 = vld [vmem:[%s12938_s0 + $0xe0] sm:$0xff] }
 0x185   :  { %13293 = vst [vmem:[#allocation17_spill] sm:$0xff] %v9140_v31  ;;  %7435 = vrcp.f32 %v1803_v14  ;;  %v7736_v14 = vld [vmem:[%s12938_s0 + $0x90] sm:$0xff] }
 0x186   :  { %v9129_v37 = vpop.permute.xlu1 %737  ;;  %1353 = vrot.lane.b32.xlu1 %v9016_v36, %s7804_s28 }
 0x187   :  { %13289 = vst [vmem:[#allocation83_spill] sm:$0xff] %v9129_v37  ;;  %7217 = vset.pattern.permute.xlu1 %v13232_v0  ;;  %v7434_v55 = vpop.eup %7433  ;;  %v2076_v37 = vadd.f32 %v9005_v43, %v8714_v45 }
 0x188   :  { %2581 = vperm.xlu0 %7236, %v1282_v50   ;;  %v9153_v8 = vpop.permute.xlu0 %2766  ;;  %v1576_v29 = vmul.f32 %v7434_v55, %v1424_v59  ;;  %v13298_v50 = vld [vmem:[#allocation18_spill] sm:$0xff]  ;;  %v121_v55 = vpack.c.bf16 %v9068_v33, %v7736_v14  ;;  %v9206_v14 = vld [vmem:[%s12938_s0 + $0x50] sm:$0xff] }
 0x189   :  { %13295 = vst [vmem:[#allocation87_spill] sm:$0xff] %v9153_v8 }
 0x18a   :  { %v9136_v18 = vpop.permute.xlu1 %1949  ;;  %2526 = vperm.xlu1 %7217, %v1271_v40   ;;  %v856_v40 = vadd.f32 %v8975_v52, %v13298_v50  ;;  %6501 = vmatmul.mubr.msk.bf16.gmra.mrb[72].mxu1 %vm408_vm5, %v121_v55  ;;  %v13304_v55 = vld [vmem:[#allocation23_spill] sm:$0xff] }
 0x18b   :  { %13291 = vst [vmem:[#allocation85_spill] sm:$0xff] %v9136_v18  ;;  %6504 = vmatprep.mubr.msk.bf16.mxu1 %vm7803_vm2, %v13212_v54 }
 0x18c   :  { %1983 = vrot.lane.b32.xlu0 %v8936_v35, %s7806_s29  ;;  %v9168_v19 = vpop.permute.xlu0 %739  ;;  %v894_v59 = vadd.f32 0.0001, %v856_v40 }
 0x18e   :  { %v9146_v58 = vpop.permute.xlu1 %3036  ;;  %1657 = vrot.lane.b32.xlu1 %v9016_v36, %s7805_s17  ;;  %7437 = vrcp.f32 %v894_v59 }
 0x18f   :  { %13294 = vst [vmem:[#allocation86_spill] sm:$0xff] %v9146_v58  ;;  %7218 = vset.pattern.permute.xlu1 %v13203_v11  ;;  %v1159_v58 = vadd.f32 %v9206_v14, %v13304_v55 }
 0x190   :  { %2591 = vperm.xlu0 %7236, %v1284_v22   ;;  %v9195_v33 = vpop.permute.xlu0 %1951 }
 0x192   :  { %v9155_v49 = vpop.permute.xlu1 %1041  ;;  %1659 = vrot.lane.b32.xlu1 %v8633_v44, %s7805_s17  ;;  %v93_v44 = vld [vmem:[%s12940_s1 + $0x98] sm:$0xff] }
 0x193   :  { %13296 = vst [vmem:[#allocation88_spill] sm:$0xff] %v9155_v49  ;;  %v142_v22 = vpack.c.bf16 %v93_v44, %v92_v16  ;;  %v7436_v16 = vpop.eup %7435 }
 0x194   :  { %v1879_v44 = vmul.f32 %v7436_v16, %v1727_v38  ;;  %v1197_v38 = vadd.f32 0.0001, %v1159_v58  ;;  %v818_v16 = vsub.f32 %v8975_v52, %v13298_v50 }
 0x195   :  { %6423 = vmatmul.mubr.msk.bf16.gmra.mrb[36].mxu0 %vm153_vm3, %v142_v22 }
 0x196   :  { %v9159_v42 = vpop.permute.xlu1 %1043  ;;  %2801 = vperm.xlu1 %7218, %v1576_v29   ;;  %v13300_v29 = vld [vmem:[#allocation20_spill] sm:$0xff]  ;;  %6556 = vmatprep.mubr.msk.bf16.mxu0 %vm7803_vm2, %v13212_v54 }
 0x197   :  { %13297 = vst [vmem:[#allocation89_spill] sm:$0xff] %v9159_v42  ;;  %v2070_v57 = vadd.f32 %v8962_v48, %v13300_v29  ;;  %13301 = vst [vmem:[#allocation20_spill] sm:$0xff] %v9195_v33  ;;  %v2032_v50 = vsub.f32 %v8962_v48, %v13300_v29  ;;  %v13311_v33 = vld [vmem:[#allocation25_spill] sm:$0xff] }
 0x199   :  { %v2108_v3 = vadd.f32 0.0001, %v2070_v57  ;;  %v7438_v57 = vpop.eup %7437 }
 0x19a   :  { %v9176_v23 = vpop.permute.xlu1 %2241  ;;  %749 = vrot.lane.b32.xlu1 %v9166_v47, %s7802_s16  ;;  %v970_v61 = vmul.f32 %v7438_v57, %v818_v16  ;;  %v7739_v16 = vld [vmem:[%s12938_s0 + $0xb8] sm:$0xff] }
 0x19b   :  { %13299 = vst [vmem:[#allocation18_spill] sm:$0xff] %v9176_v23  ;;  %7219 = vset.pattern.permute.xlu1 %v13210_v25  ;;  %7439 = vrcp.f32 %v2108_v3  ;;  %v9210_v23 = vpop.permute.xlu0 %1347 }
 0x19c   :  { %13305 = vst [vmem:[#allocation23_spill] sm:$0xff] %v9210_v23  ;;  %7441 = vrcp.f32 %v1197_v38 }
 0x19e   :  { %1961 = vrot.lane.b32.xlu1 %v9016_v36, %s7806_s29 }
 0x19f   :  { %v9199_v40 = vpop.permute.xlu1 %3311  ;;  %v9218_v3 = vpop.permute.xlu0 %2776 }
 0x1a0   :  { %13302 = vst [vmem:[#allocation90_spill] sm:$0xff] %v9199_v40  ;;  %13307 = vst [vmem:[#allocation93_spill] sm:$0xff] %v9218_v3  ;;  %v292_v40 = vpop.f32.mrb[20].mxu0 }
 0x1a2   :  { %3066 = vperm.xlu1 %7219, %v1879_v44  }
 0x1a3   :  { %v9201_v22 = vpop.permute.xlu1 %1345  ;;  %v9236_v57 = vpop.permute.xlu0 %743 }
 0x1a4   :  { %13303 = vst [vmem:[#allocation91_spill] sm:$0xff] %v9201_v22  ;;  %v6408_v22 = vpop.f32.mrb[21].mxu0  ;;  %13312 = vst [vmem:[#allocation25_spill] sm:$0xff] %v9236_v57 }
 0x1a5   :  { %v295_v49 = vpop.f32.mrb[22].mxu0  ;;  %v7738_v22 = vld [vmem:[%s12938_s0 + $0xa0] sm:$0xff] }
 0x1a6   :  { %1053 = vrot.lane.b32.xlu1 %v9166_v47, %s7801_s15  ;;  %v6409_v23 = vpop.f32.mrb[23].mxu0 }
 0x1a7   :  { %v9214_v59 = vpop.permute.xlu1 %2506  ;;  %v544_v8 = vpop.f32.mrb[56].mxu1  ;;  %v1121_v23 = vsub.f32 %v9206_v14, %v13304_v55 }
 0x1a8   :  { %13306 = vst [vmem:[#allocation92_spill] sm:$0xff] %v9214_v59  ;;  %v6486_v42 = vpop.f32.mrb[57].mxu1  ;;  %v7440_v59 = vpop.eup %7439 }
 0x1a9   :  { %v547_v58 = vpop.f32.mrb[58].mxu1  ;;  %v122_v42 = vpack.c.bf16 %v9096_v28, %v7738_v22  ;;  %v7442_v29 = vpop.eup %7441  ;;  %v13318_v22 = vld [vmem:[#allocation29_spill] sm:$0xff] }
 0x1aa   :  { %1055 = vrot.lane.b32.xlu1 %v8698_v10, %s7801_s15  ;;  %v9228_v3 = vadd.f32 %v547_v58, %v295_v49  ;;  %v6487_v38 = vpop.f32.mrb[59].mxu1  ;;  %v9246_v28 = vpop.permute.xlu0 %1955  ;;  %v1273_v58 = vmul.f32 %v7442_v29, %v1121_v23  ;;  %v1426_v23 = vsub.f32 %v8975_v52, %v13311_v33 }
 0x1ab   :  { %v9222_v44 = vpop.permute.xlu1 %1649  ;;  %6505 = vmatmul.mubr.msk.bf16.gmra.mrb[76].mxu1 %vm408_vm5, %v122_v42  ;;  %13314 = vst [vmem:[#allocation98_spill] sm:$0xff] %v9246_v28  ;;  %v1767_v42 = vadd.f32 %v9206_v14, %v13318_v22  ;;  %v13378_v28 = vld [vmem:[#allocation9_spill] sm:$0xff] }
 0x1ac   :  { %13308 = vst [vmem:[#allocation94_spill] sm:$0xff] %v9222_v44  ;;  %13310 = vst [vmem:[#allocation96_spill] sm:$0xff] %v9228_v3  ;;  %v1464_v44 = vadd.f32 %v8975_v52, %v13311_v33  ;;  %6508 = vmatprep.mubr.msk.bf16.mxu1 %vm7803_vm2, %v13212_v54  ;;  %v9293_v33 = vld [vmem:[%s12938_s0 + $0xf0] sm:$0xff] }
 0x1ae   :  { %2271 = vperm.xlu1 %7219, %v970_v61   ;;  %v2184_v61 = vmul.f32 %v7440_v59, %v2032_v50  ;;  %v1502_v49 = vadd.f32 0.0001, %v1464_v44  ;;  %v123_v44 = vpack.c.bf16 %v7739_v16, %v8650_v2  ;;  %v9257_v50 = vadd.f32 %v544_v8, %v292_v40  ;;  %v9266_v38 = vpop.permute.xlu0 %1351  ;;  %v7740_v8 = vld [vmem:[%s12938_s0 + $0xc8] sm:$0xff] }
 0x1af   :  { %v9226_v18 = vpop.permute.xlu1 %1651  ;;  %13319 = vst [vmem:[#allocation29_spill] sm:$0xff] %v9266_v38  ;;  %v1805_v2 = vadd.f32 0.0001, %v1767_v42  ;;  %v124_v40 = vpack.c.bf16 %v7740_v8, %v8841_v27  ;;  %v13323_v27 = vld [vmem:[#allocation31_spill] sm:$0xff]  ;;  %v9560_v38 = vld [vmem:[%s12938_s0 + $0x38] sm:$0xff] }
 0x1b0   :  { %13309 = vst [vmem:[#allocation95_spill] sm:$0xff] %v9226_v18  ;;  %7443 = vrcp.f32 %v1502_v49  ;;  %13316 = vst [vmem:[#allocation100_spill] sm:$0xff] %v9257_v50  ;;  %v858_v42 = vadd.f32 %v8990_v63, %v13323_v27  ;;  %v7741_v50 = vld [vmem:[%s12938_s0 + $0xd8] sm:$0xff]  ;;  %v1764_v57 = vadd.f32 %v9560_v38, %v13378_v28 }
 0x1b1   :  { %7445 = vrcp.f32 %v1805_v2  ;;  %v125_v3 = vpack.c.bf16 %v7741_v50, %v9016_v36  ;;  %v1729_v50 = vsub.f32 %v9206_v14, %v13318_v22  ;;  %v13330_v22 = vld [vmem:[#allocation37_spill] sm:$0xff] }
 0x1b2   :  { %7220 = vset.pattern.permute.xlu1 %v13234_v6  ;;  %v9280_v29 = vpop.permute.xlu0 %2786  ;;  %v9586_v18 = vadd.f32 0.0001, %v1764_v57 }
 0x1b3   :  { %v9240_v48 = vpop.permute.xlu1 %2781  ;;  %3341 = vperm.xlu1 %7220, %v2184_v61   ;;  %6509 = vmatmul.mubr.msk.bf16.gmra.mrb[80].mxu1 %vm408_vm5, %v123_v44  ;;  %13321 = vst [vmem:[#allocation103_spill] sm:$0xff] %v9280_v29 }
 0x1b4   :  { %13313 = vst [vmem:[#allocation97_spill] sm:$0xff] %v9240_v48  ;;  %6512 = vmatprep.mubr.msk.bf16.mxu1 %vm7803_vm2, %v13212_v54  ;;  %v9324_v48 = vld [vmem:[%s12938_s0 + $0x60] sm:$0xff] }
 0x1b7   :  { %v9248_v59 = vpop.permute.xlu1 %741  ;;  %1357 = vrot.lane.b32.xlu1 %v9166_v47, %s7804_s28 }
 0x1b8   :  { %13315 = vst [vmem:[#allocation99_spill] sm:$0xff] %v9248_v59  ;;  %7221 = vset.pattern.permute.xlu1 %v13232_v0 }
 0x1ba   :  { %v7444_v49 = vpop.eup %7443 }
 0x1bb   :  { %v9260_v55 = vpop.permute.xlu1 %1953  ;;  %2536 = vperm.xlu1 %7221, %v1273_v58   ;;  %6513 = vmatmul.mubr.msk.bf16.gmra.mrb[84].mxu1 %vm408_vm5, %v124_v40  ;;  %v1578_v44 = vmul.f32 %v7444_v49, %v1426_v23  ;;  %v896_v23 = vadd.f32 0.0001, %v858_v42 }
 0x1bc   :  { %13317 = vst [vmem:[#allocation101_spill] sm:$0xff] %v9260_v55  ;;  %6516 = vmatprep.mubr.msk.bf16.mxu1 %vm7803_vm2, %v13212_v54 }
 0x1bf   :  { %v9268_v61 = vpop.permute.xlu1 %3046  ;;  %1661 = vrot.lane.b32.xlu1 %v9166_v47, %s7805_s17 }
 0x1c0   :  { %13320 = vst [vmem:[#allocation102_spill] sm:$0xff] %v9268_v61  ;;  %7222 = vset.pattern.permute.xlu1 %v13203_v11  ;;  %v9299_v61 = vpop.permute.xlu0 %3296 }
 0x1c1   :  { %13324 = vst [vmem:[#allocation31_spill] sm:$0xff] %v9299_v61 }
 0x1c3   :  { %v9282_v16 = vpop.permute.xlu1 %1045  ;;  %1663 = vrot.lane.b32.xlu1 %v8698_v10, %s7805_s17  ;;  %6517 = vmatmul.mubr.msk.bf16.gmra.mrb[88].mxu1 %vm408_vm5, %v125_v3 }
 0x1c4   :  { %13322 = vst [vmem:[#allocation104_spill] sm:$0xff] %v9282_v16  ;;  %6520 = vmatprep.mubr.msk.bf16.mxu1 %vm7803_vm2, %v13212_v54  ;;  %v9313_v3 = vpop.permute.xlu0 %3306  ;;  %v1161_v16 = vadd.f32 %v9324_v48, %v13330_v22 }
 0x1c7   :  { %v1048_v58 = vpop.permute.xlu1 %1047  ;;  %2811 = vperm.xlu1 %7222, %v1578_v44   ;;  %v13326_v44 = vld [vmem:[#allocation34_spill] sm:$0xff] }
 0x1c8   :  { %v1174_v40 = vadd.f32 %v7740_v8, %v1048_v58  ;;  %v2072_v36 = vadd.f32 %v8975_v52, %v13326_v44  ;;  %13327 = vst [vmem:[#allocation34_spill] sm:$0xff] %v9313_v3  ;;  %v9328_v3 = vpop.permute.xlu0 %3316  ;;  %v1136_v61 = vsub.f32 %v7740_v8, %v1048_v58 }
 0x1c9   :  { %13331 = vst [vmem:[#allocation37_spill] sm:$0xff] %v9328_v3  ;;  %v2034_v3 = vsub.f32 %v8975_v52, %v13326_v44  ;;  %v127_v52 = vpack.c.bf16 %v8753_v34, %v9293_v33 }
 0x1ca   :  { %v1212_v2 = vadd.f32 0.0001, %v1174_v40  ;;  %v7446_v40 = vpop.eup %7445  ;;  %v2110_v55 = vadd.f32 0.0001, %v2072_v36 }
 0x1cb   :  { %v9302_v49 = vpop.permute.xlu1 %2251  ;;  %753 = vrot.lane.b32.xlu1 %v9293_v33, %s7802_s16  ;;  %v1881_v42 = vmul.f32 %v7446_v40, %v1729_v50  ;;  %v1199_v50 = vadd.f32 0.0001, %v1161_v16  ;;  %v820_v40 = vsub.f32 %v8990_v63, %v13323_v27 }
 0x1cc   :  { %13325 = vst [vmem:[#allocation105_spill] sm:$0xff] %v9302_v49  ;;  %7447 = vrcp.f32 %v1212_v2  ;;  %7223 = vset.pattern.permute.xlu1 %v13210_v25 }
 0x1cd   :  { %7449 = vrcp.f32 %v896_v23 }
 0x1ce   :  { %7451 = vrcp.f32 %v2110_v55 }
 0x1cf   :  { %1965 = vrot.lane.b32.xlu1 %v9166_v47, %s7806_s29  ;;  %7453 = vrcp.f32 %v1199_v50  ;;  %v13337_v50 = vld [vmem:[#allocation39_spill] sm:$0xff] }
 0x1d0   :  { %v9317_v49 = vpop.permute.xlu1 %3321 }
 0x1d1   :  { %13328 = vst [vmem:[#allocation106_spill] sm:$0xff] %v9317_v49 }
 0x1d3   :  { %3076 = vperm.xlu1 %7223, %v1881_v42   ;;  %v9336_v42 = vpop.permute.xlu0 %747 }
 0x1d4   :  { %v9319_v2 = vpop.permute.xlu1 %1349  ;;  %13333 = vst [vmem:[#allocation109_spill] sm:$0xff] %v9336_v42 }
 0x1d5   :  { %13329 = vst [vmem:[#allocation107_spill] sm:$0xff] %v9319_v2 }
 0x1d6   :  { %v7448_v23 = vpop.eup %7447 }
 0x1d7   :  { %v1288_v29 = vmul.f32 %v7448_v23, %v1136_v61  ;;  %1057 = vrot.lane.b32.xlu1 %v9293_v33, %s7801_s15  ;;  %v7450_v55 = vpop.eup %7449  ;;  %v126_v61 = vpack.c.bf16 %v8698_v10, %v9166_v47  ;;  %v552_v23 = vpop.f32.mrb[60].mxu1 }
 0x1d8   :  { %v9332_v36 = vpop.permute.xlu1 %2516  ;;  %v972_v58 = vmul.f32 %v7450_v55, %v820_v40  ;;  %v7452_v27 = vpop.eup %7451  ;;  %v1466_v55 = vadd.f32 %v8990_v63, %v13337_v50 }
 0x1d9   :  { %13332 = vst [vmem:[#allocation108_spill] sm:$0xff] %v9332_v36  ;;  %2611 = vperm.xlu0 %7236, %v1288_v29   ;;  %v6490_v29 = vpop.f32.mrb[61].mxu1  ;;  %6521 = vmatmul.mubr.msk.bf16.gmra.mrb[92].mxu1 %vm408_vm5, %v126_v61  ;;  %v9355_v61 = vpop.permute.xlu0 %1959 }
 0x1da   :  { %v555_v2 = vpop.f32.mrb[62].mxu1  ;;  %6524 = vmatprep.mubr.msk.bf16.mxu1 %vm7803_vm2, %v13212_v54  ;;  %13338 = vst [vmem:[#allocation39_spill] sm:$0xff] %v9355_v61  ;;  %v1504_v44 = vadd.f32 0.0001, %v1466_v55  ;;  %v1769_v55 = vadd.f32 %v9324_v48, %v8611_v51  ;;  %v13377_v61 = vld [vmem:[#allocation8_spill] sm:$0xff] }
 0x1db   :  { %1059 = vrot.lane.b32.xlu1 %v8753_v34, %s7801_s15  ;;  %v300_v8 = vpop.f32.mrb[24].mxu0  ;;  %v6491_v40 = vpop.f32.mrb[63].mxu1 }
 0x1dc   :  { %v9340_v49 = vpop.permute.xlu1 %1653  ;;  %v6412_v16 = vpop.f32.mrb[25].mxu0  ;;  %7455 = vrcp.f32 %v1504_v44 }
 0x1dd   :  { %13334 = vst [vmem:[#allocation110_spill] sm:$0xff] %v9340_v49  ;;  %v303_v36 = vpop.f32.mrb[26].mxu0  ;;  %v2186_v16 = vmul.f32 %v7452_v27, %v2034_v3  ;;  %v9367_v3 = vpop.permute.xlu0 %3326 }
 0x1de   :  { %v9351_v10 = vadd.f32 %v555_v2, %v303_v36  ;;  %v6413_v47 = vpop.f32.mrb[27].mxu0  ;;  %v1123_v2 = vsub.f32 %v9324_v48, %v13330_v22  ;;  %v7454_v36 = vpop.eup %7453  ;;  %13340 = vst [vmem:[#allocation114_spill] sm:$0xff] %v9367_v3  ;;  %v9553_v3 = vld [vmem:[%s12938_s0 + $0x30] sm:$0xff] }
 0x1df   :  { %2281 = vperm.xlu1 %7223, %v972_v58   ;;  %v9374_v47 = vadd.f32 %v552_v23, %v300_v8  ;;  %v1428_v8 = vsub.f32 %v8990_v63, %v13337_v50 }
 0x1e0   :  { %v9349_v59 = vpop.permute.xlu1 %1655  ;;  %13336 = vst [vmem:[#allocation112_spill] sm:$0xff] %v9351_v10  ;;  %v1275_v27 = vmul.f32 %v7454_v36, %v1123_v2 }
 0x1e1   :  { %13335 = vst [vmem:[#allocation111_spill] sm:$0xff] %v9349_v59  ;;  %6525 = vmatmul.mubr.msk.bf16.gmra.mrb[96].mxu1 %vm408_vm5, %v127_v52  ;;  %13342 = vst [vmem:[#allocation116_spill] sm:$0xff] %v9374_v47  ;;  %v9380_v40 = vpop.permute.xlu0 %1355  ;;  %v1807_v52 = vadd.f32 0.0001, %v1769_v55  ;;  %v860_v55 = vadd.f32 %v9005_v43, %v8617_v41  ;;  %v9402_v47 = vld [vmem:[%s12938_s0 + $0x100] sm:$0xff] }
 0x1e2   :  { %6528 = vmatprep.mubr.msk.bf16.mxu1 %vm7803_vm2, %v13212_v54  ;;  %13344 = vst [vmem:[#allocation118_spill] sm:$0xff] %v9380_v40 }
 0x1e3   :  { %7224 = vset.pattern.permute.xlu1 %v13234_v6  ;;  %7457 = vrcp.f32 %v1807_v52  ;;  %v2074_v52 = vadd.f32 %v8990_v63, %v8628_v15 }
 0x1e4   :  { %v9358_v58 = vpop.permute.xlu1 %2791  ;;  %3351 = vperm.xlu1 %7224, %v2186_v16  }
 0x1e5   :  { %13339 = vst [vmem:[#allocation113_spill] sm:$0xff] %v9358_v58  ;;  %v9389_v23 = vpop.permute.xlu0 %751  ;;  %v2112_v10 = vadd.f32 0.0001, %v2074_v52  ;;  %v13375_v58 = vld [vmem:[#allocation7_spill] sm:$0xff] }
 0x1e6   :  { %v7456_v44 = vpop.eup %7455  ;;  %13346 = vst [vmem:[#allocation120_spill] sm:$0xff] %v9389_v23 }
 0x1e7   :  { %v1580_v36 = vmul.f32 %v7456_v44, %v1428_v8  ;;  %v1731_v44 = vsub.f32 %v9324_v48, %v8611_v51 }
 0x1e8   :  { %v9369_v29 = vpop.permute.xlu1 %745  ;;  %1361 = vrot.lane.b32.xlu1 %v9293_v33, %s7804_s28 }
 0x1e9   :  { %13341 = vst [vmem:[#allocation115_spill] sm:$0xff] %v9369_v29  ;;  %7225 = vset.pattern.permute.xlu1 %v13232_v0  ;;  %v9404_v50 = vpop.permute.xlu0 %1963 }
 0x1ea   :  { %13349 = vst [vmem:[#allocation123_spill] sm:$0xff] %v9404_v50 }
 0x1ec   :  { %v9376_v22 = vpop.permute.xlu1 %1957  ;;  %2546 = vperm.xlu1 %7225, %v1275_v27  }
 0x1ed   :  { %13343 = vst [vmem:[#allocation117_spill] sm:$0xff] %v9376_v22  ;;  %v7458_v8 = vpop.eup %7457 }
 0x1ee   :  { %v1883_v40 = vmul.f32 %v7458_v8, %v1731_v44 }
 0x1f0   :  { %v9382_v16 = vpop.permute.xlu1 %3056  ;;  %1665 = vrot.lane.b32.xlu1 %v9293_v33, %s7805_s17 }
 0x1f1   :  { %13345 = vst [vmem:[#allocation119_spill] sm:$0xff] %v9382_v16  ;;  %7226 = vset.pattern.permute.xlu1 %v13203_v11 }
 0x1f4   :  { %v9391_v2 = vpop.permute.xlu1 %1049  ;;  %1667 = vrot.lane.b32.xlu1 %v8753_v34, %s7805_s17  ;;  %v898_v34 = vadd.f32 0.0001, %v860_v55 }
 0x1f5   :  { %13347 = vst [vmem:[#allocation121_spill] sm:$0xff] %v9391_v2 }
 0x1f6   :  { %7459 = vrcp.f32 %v898_v34 }
 0x1f7   :  { %7461 = vrcp.f32 %v2112_v10  ;;  %v822_v10 = vsub.f32 %v9005_v43, %v8617_v41  ;;  %v2036_v41 = vsub.f32 %v8990_v63, %v8628_v15 }
 0x1f8   :  { %v9395_v27 = vpop.permute.xlu1 %1051  ;;  %2821 = vperm.xlu1 %7226, %v1580_v36   ;;  %v9415_v36 = vpop.permute.xlu0 %3336 }
 0x1f9   :  { %13348 = vst [vmem:[#allocation122_spill] sm:$0xff] %v9395_v27  ;;  %13351 = vst [vmem:[#allocation125_spill] sm:$0xff] %v9415_v36  ;;  %v9426_v27 = vld [vmem:[%s12938_s0 + $0x70] sm:$0xff] }
 0x1fa   :  { %v1163_v51 = vadd.f32 %v9426_v27, %v8677_v26  ;;  %v1125_v15 = vsub.f32 %v9426_v27, %v8677_v26  ;;  %v1771_v26 = vadd.f32 %v9426_v27, %v8716_v1 }
 0x1fc   :  { %v9406_v23 = vpop.permute.xlu1 %2261  ;;  %757 = vrot.lane.b32.xlu1 %v9402_v47, %s7802_s16  ;;  %v9430_v36 = vpop.permute.xlu0 %1359  ;;  %v1201_v34 = vadd.f32 0.0001, %v1163_v51 }
 0x1fd   :  { %13350 = vst [vmem:[#allocation124_spill] sm:$0xff] %v9406_v23  ;;  %7227 = vset.pattern.permute.xlu1 %v13210_v25  ;;  %13354 = vst [vmem:[#allocation128_spill] sm:$0xff] %v9430_v36 }
 0x1fe   :  { %7463 = vrcp.f32 %v1201_v34 }
 0x200   :  { %1969 = vrot.lane.b32.xlu1 %v9293_v33, %s7806_s29  ;;  %v9438_v52 = vpop.permute.xlu0 %755 }
 0x201   :  { %v9419_v50 = vpop.permute.xlu1 %3331  ;;  %13356 = vst [vmem:[#allocation130_spill] sm:$0xff] %v9438_v52 }
 0x202   :  { %13352 = vst [vmem:[#allocation126_spill] sm:$0xff] %v9419_v50 }
 0x204   :  { %3086 = vperm.xlu1 %7227, %v1883_v40   ;;  %v7460_v40 = vpop.eup %7459 }
 0x205   :  { %v9421_v55 = vpop.permute.xlu1 %1353  ;;  %v974_v2 = vmul.f32 %v7460_v40, %v822_v10  ;;  %v7462_v22 = vpop.eup %7461 }
 0x206   :  { %13353 = vst [vmem:[#allocation127_spill] sm:$0xff] %v9421_v55  ;;  %v2188_v34 = vmul.f32 %v7462_v22, %v2036_v41  ;;  %v9452_v10 = vpop.permute.xlu0 %1967  ;;  %v851_v55 = vadd.f32 %v9553_v3, %v13377_v61 }
 0x207   :  { %13360 = vst [vmem:[#allocation134_spill] sm:$0xff] %v9452_v10 }
 0x208   :  { %1061 = vrot.lane.b32.xlu1 %v9402_v47, %s7801_s15  ;;  %v7464_v63 = vpop.eup %7463  ;;  %v9584_v24 = vadd.f32 0.0001, %v851_v55 }
 0x209   :  { %v9434_v33 = vpop.permute.xlu1 %2526  ;;  %v1277_v22 = vmul.f32 %v7464_v63, %v1125_v15 }
 0x20a   :  { %13355 = vst [vmem:[#allocation129_spill] sm:$0xff] %v9434_v33 }
 0x20b   :  { %v560_v36 = vpop.f32.mrb[64].mxu1 }
 0x20c   :  { %1063 = vrot.lane.b32.xlu1 %v8816_v4, %s7801_s15  ;;  %v308_v8 = vpop.f32.mrb[28].mxu0  ;;  %v6494_v16 = vpop.f32.mrb[65].mxu1 }
 0x20d   :  { %v9442_v44 = vpop.permute.xlu1 %1657  ;;  %v6416_v50 = vpop.f32.mrb[29].mxu0 }
 0x20e   :  { %13357 = vst [vmem:[#allocation131_spill] sm:$0xff] %v9442_v44  ;;  %v311_v51 = vpop.f32.mrb[30].mxu0  ;;  %v563_v33 = vpop.f32.mrb[66].mxu1  ;;  %v1468_v44 = vadd.f32 %v9005_v43, %v8668_v56 }
 0x20f   :  { %v9448_v23 = vadd.f32 %v563_v33, %v311_v51  ;;  %v6417_v4 = vpop.f32.mrb[31].mxu0  ;;  %v6495_v40 = vpop.f32.mrb[67].mxu1  ;;  %v9466_v51 = vadd.f32 %v560_v36, %v308_v8  ;;  %v1809_v36 = vadd.f32 0.0001, %v1771_v26 }
 0x210   :  { %2291 = vperm.xlu1 %7227, %v974_v2   ;;  %v1506_v2 = vadd.f32 0.0001, %v1468_v44  ;;  %v9459_v50 = vpop.permute.xlu0 %3346  ;;  %v7744_v44 = vld [vmem:[%s12938_s0 + $0x108] sm:$0xff] }
 0x211   :  { %v9446_v29 = vpop.permute.xlu1 %1659  ;;  %13359 = vst [vmem:[#allocation133_spill] sm:$0xff] %v9448_v23  ;;  %13362 = vst [vmem:[#allocation136_spill] sm:$0xff] %v9459_v50  ;;  %v128_v4 = vpack.c.bf16 %v7744_v44, %v9402_v47  ;;  %v13370_v50 = vld [vmem:[#allocation3_spill] sm:$0xff]  ;;  %v13374_v23 = vld [vmem:[#allocation6_spill] sm:$0xff] }
 0x212   :  { %13358 = vst [vmem:[#allocation132_spill] sm:$0xff] %v9446_v29  ;;  %7465 = vrcp.f32 %v1506_v2  ;;  %13364 = vst [vmem:[#allocation138_spill] sm:$0xff] %v9466_v51  ;;  %v1430_v2 = vsub.f32 %v9005_v43, %v8668_v56  ;;  %v1758_v56 = vadd.f32 %v8914_v17, %v13370_v50  ;;  %v13372_v17 = vld [vmem:[#allocation4_spill] sm:$0xff]  ;;  %v9573_v29 = vld [vmem:[%s12938_s0 + $0x120] sm:$0xff] }
 0x213   :  { %6529 = vmatmul.mubr.msk.bf16.gmra.mrb[100].mxu1 %vm408_vm5, %v128_v4  ;;  %7467 = vrcp.f32 %v1809_v36  ;;  %v130_v43 = vpack.c.bf16 %v8936_v35, %v9573_v29  ;;  %v7285_v35 = vld [vmem:[%s12942_s6] sm:$0xff]  }
 0x214   :  { %7228 = vset.pattern.permute.xlu1 %v13234_v6  ;;  %v9476_v40 = vpop.permute.xlu0 %1363  ;;  %6532 = vmatprep.mubr.msk.bf16.mxu1 %vm7803_vm2, %v13212_v54  ;;  %v1796_v7 = vadd.f32 0.0001, %v1758_v56 }
 0x215   :  { %v9455_v16 = vpop.permute.xlu1 %2801  ;;  %3361 = vperm.xlu1 %7228, %v2188_v34   ;;  %13366 = vst [vmem:[#allocation140_spill] sm:$0xff] %v9476_v40  ;;  %6541 = vmatpush3.bf16.msra.mxu0 %v7285_v35 }
 0x216   :  { %13361 = vst [vmem:[#allocation135_spill] sm:$0xff] %v9455_v16  ;;  %6542 = vmatprep.subr.bf16.mxu0 %v13212_v54 }
 0x218   :  { %v9488_v15 = vpop.permute.xlu0 %759 }
 0x219   :  { %v9461_v33 = vpop.permute.xlu1 %749  ;;  %1365 = vrot.lane.b32.xlu1 %v9402_v47, %s7804_s28  ;;  %13368 = vst [vmem:[#allocation142_spill] sm:$0xff] %v9488_v15 }
 0x21a   :  { %13363 = vst [vmem:[#allocation137_spill] sm:$0xff] %v9461_v33  ;;  %7229 = vset.pattern.permute.xlu1 %v13232_v0  ;;  %v9537_v33 = vld [vmem:[%s12938_s0 + $0x20] sm:$0xff] }
 0x21b   :  { %v849_v16 = vadd.f32 %v9537_v33, %v13374_v23 }
 0x21c   :  { %v7466_v8 = vpop.eup %7465  ;;  %v9548_v10 = vpop.permute.xlu0 %1971 }
 0x21d   :  { %v9468_v41 = vpop.permute.xlu1 %1961  ;;  %2556 = vperm.xlu1 %7229, %v1277_v22   ;;  %v9496_v22 = vld [vmem:[%s12938_s0 + $0x110] sm:$0xff]  ;;  %v1582_v4 = vmul.f32 %v7466_v8, %v1430_v2  ;;  %v862_v8 = vadd.f32 %v9029_v12, %v8693_v39  ;;  %v7747_v2 = vld [vmem:[%s12938_s0 + $0xe8] sm:$0xff]  ;;  %13376 = vst [vmem:[#allocation3_spill] sm:$0xff] %v9548_v10  ;;  %v7468_v49 = vpop.eup %7467 }
 0x21e   :  { %13365 = vst [vmem:[#allocation139_spill] sm:$0xff] %v9468_v41  ;;  %v129_v26 = vpack.c.bf16 %v8882_v62, %v9496_v22  ;;  %v9517_v62 = vld [vmem:[%s12938_s0 + $0x10] sm:$0xff]  ;;  %v9544_v41 = vld [vmem:[%s12938_s0 + $0x28] sm:$0xff] }
 0x21f   :  { %v847_v36 = vadd.f32 %v9517_v62, %v13372_v17  ;;  %v1762_v59 = vadd.f32 %v9544_v41, %v13375_v58  ;;  %v900_v5 = vadd.f32 0.0001, %v862_v8 }
 0x220   :  { %6533 = vmatmul.mubr.msk.bf16.gmra.mrb[104].mxu1 %vm408_vm5, %v129_v26 }
 0x221   :  { %v9479_v34 = vpop.permute.xlu1 %3066  ;;  %1669 = vrot.lane.b32.xlu1 %v9402_v47, %s7805_s17  ;;  %6536 = vmatprep.mubr.msk.bf16.mxu1 %vm7803_vm2, %v13212_v54  ;;  %v885_v42 = vadd.f32 0.0001, %v847_v36  ;;  %v2114_v36 = vadd.f32 0.0001, %v2076_v37  ;;  %v1165_v37 = vadd.f32 %v9040_v60, %v8787_v32  ;;  %v7287_v60 = vld [vmem:[%s12942_s6 + $0x10] sm:$0xff]  }
 0x222   :  { %13367 = vst [vmem:[#allocation141_spill] sm:$0xff] %v9479_v34  ;;  %7230 = vset.pattern.permute.xlu1 %v13203_v11  ;;  %v9506_v34 = vld [vmem:[%s12938_s0] sm:$0xff] }
 0x225   :  { %v9490_v63 = vpop.permute.xlu1 %1053  ;;  %1671 = vrot.lane.b32.xlu1 %v7744_v44, %s7805_s17  ;;  %v13371_v44 = vld [vmem:[#allocation2_spill] sm:$0xff] }
 0x226   :  { %13369 = vst [vmem:[#allocation143_spill] sm:$0xff] %v9490_v63  ;;  %v845_v15 = vadd.f32 %v9506_v34, %v13371_v44  ;;  %v13373_v63 = vld [vmem:[#allocation5_spill] sm:$0xff] }
 0x228   :  { %v883_v31 = vadd.f32 0.0001, %v845_v15  ;;  %v9578_v15 = vadd.f32 0.0001, %v849_v16  ;;  %6537 = vmatmul.mubr.msk.bf16.gmra.mrb[108].mxu1 %vm408_vm5, %v130_v43 }
 0x229   :  { %v9510_v40 = vpop.permute.xlu1 %1055  ;;  %2831 = vperm.xlu1 %7230, %v1582_v4   ;;  %v9530_v4 = vld [vmem:[%s12938_s0 + $0x18] sm:$0xff]  ;;  %6648 = vmatprep.mubr.msk.bf16.mxu1 %vm7803_vm2, %v13212_v54 }
 0x22a   :  { %v1178_v26 = vadd.f32 %v7747_v2, %v9510_v40  ;;  %v1760_v51 = vadd.f32 %v9530_v4, %v13373_v63 }
 0x22c   :  { %v1216_v10 = vadd.f32 0.0001, %v1178_v26  ;;  %v1798_v56 = vadd.f32 0.0001, %v1760_v51  ;;  %v9580_v26 = vadd.f32 0.0001, %v1762_v59 }
 0x22d   :  { %v9566_v52 = vpop.permute.xlu1 %2271  ;;  %761 = vrot.lane.b32.xlu1 %v9496_v22, %s7802_s16 }
 0x22e   :  { %13379 = vst [vmem:[#allocation2_spill] sm:$0xff] %v9566_v52  ;;  %7469 = vrcp.f32 %v1216_v10  ;;  %7231 = vset.pattern.permute.xlu1 %v13210_v25  ;;  %v1733_v52 = vsub.f32 %v9426_v27, %v8716_v1  ;;  %v9589_v10 = vpop.permute.xlu0 %3356 }
 0x22f   :  { %7471 = vrcp.f32 %v883_v31  ;;  %13380 = vst [vmem:[#allocation4_spill] sm:$0xff] %v9589_v10  ;;  %v7286_v31 = vld [vmem:[%s12942_s6 + $0x8] sm:$0xff]  }
 0x230   :  { %7473 = vrcp.f32 %v900_v5  ;;  %v1885_v57 = vmul.f32 %v7468_v49, %v1733_v52  ;;  %v1140_v5 = vsub.f32 %v7747_v2, %v9510_v40  ;;  %6543 = vmatpush3.bf16.msra.mxu0 %v7286_v31  ;;  %v807_v52 = vsub.f32 %v9506_v34, %v13371_v44  ;;  %v9631_v34 = vld [vmem:[%s12938_s0 + $0x118] sm:$0xff] }
 0x231   :  { %1973 = vrot.lane.b32.xlu1 %v9402_v47, %s7806_s29  ;;  %7475 = vrcp.f32 %v1796_v7  ;;  %6544 = vmatprep.subr.bf16.mxu0 %v13212_v54  ;;  %v1203_v7 = vadd.f32 0.0001, %v1165_v37  ;;  %v824_v2 = vsub.f32 %v9029_v12, %v8693_v39  ;;  %v7288_v44 = vld [vmem:[%s12942_s6 + $0x18] sm:$0xff]   ;;  %v7754_v37 = vld [vmem:[%s12938_s0 + $0x8] sm:$0xff] }
 0x232   :  { %v9598_v1 = vpop.permute.xlu1 %3341  ;;  %7477 = vrcp.f32 %v2114_v36  ;;  %v9608_v47 = vpop.permute.xlu0 %1367  ;;  %v1720_v31 = vsub.f32 %v7754_v37, %v13370_v50 }
 0x233   :  { %13381 = vst [vmem:[#allocation5_spill] sm:$0xff] %v9598_v1  ;;  %13383 = vst [vmem:[#allocation7_spill] sm:$0xff] %v9608_v47  ;;  %7479 = vrcp.f32 %v885_v42  ;;  %v13385_v42 = vld [vmem:[#allocation11_spill] sm:$0xff] }
 0x234   :  { %6545 = vmatpush3.bf16.msra.mxu0 %v7287_v60  ;;  %7481 = vrcp.f32 %v1798_v56  ;;  %v853_v8 = vadd.f32 %v9077_v13, %v13385_v42  ;;  %v568_v35 = vpop.f32.mrb[68].mxu1  ;;  %v9654_v60 = vld [vmem:[%s12938_s0 + $0x88] sm:$0xff] }
 0x235   :  { %3096 = vperm.xlu1 %7231, %v1885_v57   ;;  %6546 = vmatprep.subr.bf16.mxu0 %v13212_v54  ;;  %7483 = vrcp.f32 %v1203_v7  ;;  %v13427_v1 = vld [vmem:[#allocation95_spill] sm:$0xff] }
 0x236   :  { %v9606_v59 = vpop.permute.xlu1 %1357  ;;  %v9626_v43 = vpop.permute.xlu0 %763  ;;  %7485 = vrcp.f32 %v9578_v15  ;;  %v9649_v7 = vadd.f32 0.0001, %v853_v8  ;;  %v809_v15 = vsub.f32 %v9517_v62, %v13372_v17  ;;  %v9666_v8 = vld [vmem:[%s12938_s0 + $0x78] sm:$0xff]  ;;  %v9679_v62 = vld [vmem:[%s12938_s0 + $0x48] sm:$0xff]  ;;  %v13389_v17 = vld [vmem:[#allocation16_spill] sm:$0xff] }
 0x237   :  { %13382 = vst [vmem:[#allocation6_spill] sm:$0xff] %v9606_v59  ;;  %13386 = vst [vmem:[#allocation9_spill] sm:$0xff] %v9626_v43  ;;  %v9640_v13 = vpop.f32.mrb[32].mxu0  ;;  %7487 = vrcp.f32 %v9580_v26 }
 0x238   :  { %v7470_v49 = vpop.eup %7469  ;;  %v6420_v57 = vpop.f32.mrb[33].mxu0  ;;  %6547 = vmatpush3.bf16.msra.mxu0 %v7288_v44  ;;  %v2038_v44 = vsub.f32 %v9666_v8, %v8714_v45  ;;  %v1766_v45 = vadd.f32 %v9679_v62, %v13389_v17  ;;  %7489 = vrcp.f32 %v9584_v24 }
 0x239   :  { %v1292_v55 = vmul.f32 %v7470_v49, %v1140_v5  ;;  %1065 = vrot.lane.b32.xlu1 %v9496_v22, %s7801_s15  ;;  %v7472_v51 = vpop.eup %7471  ;;  %v6498_v5 = vpop.f32.mrb[69].mxu1  ;;  %6548 = vmatprep.subr.bf16.mxu0 %v13212_v54 }
 0x23a   :  { %v9619_v16 = vpop.permute.xlu1 %2536  ;;  %v7474_v40 = vpop.eup %7473  ;;  %v959_v56 = vmul.f32 %v7472_v51, %v807_v52  ;;  %v1470_v52 = vadd.f32 %v9654_v60, %v8755_v46  ;;  %v7289_v51 = vld [vmem:[%s12942_s6 + $0x20] sm:$0xff]  }
 0x23b   :  { %13384 = vst [vmem:[#allocation8_spill] sm:$0xff] %v9619_v16  ;;  %2631 = vperm.xlu0 %7236, %v1292_v55   ;;  %v7476_v39 = vpop.eup %7475  ;;  %v976_v12 = vmul.f32 %v7474_v40, %v824_v2  ;;  %v319_v49 = vpop.f32.mrb[34].mxu0 }
 0x23c   :  { %v7478_v55 = vpop.eup %7477  ;;  %v571_v50 = vpop.f32.mrb[70].mxu1  ;;  %v1872_v2 = vmul.f32 %v7476_v39, %v1720_v31  ;;  %6549 = vmatpush3.bf16.msra.mxu0 %v7289_v51  ;;  %v1508_v39 = vadd.f32 0.0001, %v1470_v52  ;;  %v1722_v51 = vsub.f32 %v9530_v4, %v13373_v63  ;;  %v9696_v52 = vld [vmem:[%s12938_s0 + $0x80] sm:$0xff]  ;;  %v811_v63 = vsub.f32 %v9537_v33, %v13374_v23 }
 0x23d   :  { %1067 = vrot.lane.b32.xlu1 %v9631_v34, %s7801_s15  ;;  %v6421_v40 = vpop.f32.mrb[35].mxu0  ;;  %v6499_v57 = vpop.f32.mrb[71].mxu1  ;;  %v2190_v5 = vmul.f32 %v7478_v55, %v2038_v44  ;;  %6550 = vmatprep.subr.bf16.mxu0 %v13212_v54  ;;  %v13392_v44 = vld [vmem:[#allocation19_spill] sm:$0xff]  ;;  %v1773_v33 = vadd.f32 %v9696_v52, %v8836_v9 }
 0x23e   :  { %v9638_v36 = vpop.permute.xlu1 %1661  ;;  %v7480_v37 = vpop.eup %7479  ;;  %v1127_v40 = vsub.f32 %v9696_v52, %v8787_v32  ;;  %v855_v57 = vadd.f32 %v9206_v14, %v13392_v44  ;;  %v7291_v32 = vld [vmem:[%s12942_s6 + $0x30] sm:$0xff]   ;;  %7491 = vrcp.f32 %v1508_v39 }
 0x23f   :  { %7259 = vset.pattern.permute.xlu0 %v13210_v25  ;;  %v9683_v31 = vpop.permute.xlu0 %1975  ;;  %v961_v55 = vmul.f32 %v7480_v37, %v809_v15  ;;  %v7482_v26 = vpop.eup %7481  ;;  %v1804_v15 = vadd.f32 0.0001, %v1766_v45  ;;  %v9717_v45 = vadd.f32 %v568_v35, %v9640_v13  ;;  %7493 = vrcp.f32 %v9586_v18 }
 0x240   :  { %2216 = vperm.xlu0 %7259, %v959_v56   ;;  %13390 = vst [vmem:[#allocation16_spill] sm:$0xff] %v9683_v31  ;;  %v1874_v37 = vmul.f32 %v7482_v26, %v1722_v51  ;;  %v893_v23 = vadd.f32 0.0001, %v855_v57  ;;  %v1724_v13 = vsub.f32 %v9544_v41, %v13375_v58  ;;  %7495 = vrcp.f32 %v9649_v7  ;;  %v9744_v41 = vld [vmem:[%s12938_s0 + $0x58] sm:$0xff]  ;;  %v13399_v7 = vld [vmem:[#allocation28_spill] sm:$0xff] }
 0x241   :  { %2301 = vperm.xlu1 %7231, %v976_v12   ;;  %v9672_v12 = vadd.f32 %v571_v50, %v319_v49  ;;  %v7290_v49 = vld [vmem:[%s12942_s6 + $0x28] sm:$0xff]   ;;  %13395 = vst [vmem:[#allocation147_spill] sm:$0xff] %v9717_v45  ;;  %v1811_v18 = vadd.f32 0.0001, %v1773_v33  ;;  %7497 = vrcp.f32 %v1804_v15  ;;  %v13450_v31 = vld [vmem:[#allocation17_spill] sm:$0xff] }
 0x242   :  { %v9670_v56 = vpop.permute.xlu1 %1663  ;;  %6551 = vmatpush3.bf16.msra.mxu0 %v7290_v49 }
 0x243   :  { %13387 = vst [vmem:[#allocation11_spill] sm:$0xff] %v9670_v56  ;;  %13388 = vst [vmem:[#allocation144_spill] sm:$0xff] %v9672_v12  ;;  %6552 = vmatprep.subr.bf16.mxu0 %v13212_v54  ;;  %v9713_v24 = vpop.permute.xlu0 %3366  ;;  %7499 = vrcp.f32 %v1811_v18 }
 0x244   :  { %3031 = vperm.xlu0 %7259, %v1872_v2   ;;  %v7484_v2 = vpop.eup %7483  ;;  %13394 = vst [vmem:[#allocation146_spill] sm:$0xff] %v9713_v24  ;;  %7501 = vrcp.f32 %v893_v23 }
 0x245   :  { %7232 = vset.pattern.permute.xlu1 %v13234_v6  ;;  %v1279_v14 = vmul.f32 %v7484_v2, %v1127_v40  ;;  %v813_v40 = vsub.f32 %v9553_v3, %v13377_v61  ;;  %v1432_v3 = vsub.f32 %v9654_v60, %v8755_v46 }
 0x246   :  { %v9689_v50 = vpop.permute.xlu1 %2811  ;;  %3371 = vperm.xlu1 %7232, %v2190_v5   ;;  %v7486_v5 = vpop.eup %7485  ;;  %6553 = vmatpush3.bf16.msra.mxu0 %v7291_v32 }
 0x247   :  { %13391 = vst [vmem:[#allocation145_spill] sm:$0xff] %v9689_v50  ;;  %6554 = vmatprep.subr.bf16.mxu0 %v13212_v54  ;;  %v963_v49 = vmul.f32 %v7486_v5, %v811_v63  ;;  %v7488_v26 = vpop.eup %7487  ;;  %v9731_v35 = vpop.permute.xlu0 %1371  ;;  %v1726_v5 = vsub.f32 %v9560_v38, %v13378_v28  ;;  %v9772_v38 = vld [vmem:[%s12938_s0 + $0x98] sm:$0xff] }
 0x248   :  { %2226 = vperm.xlu0 %7259, %v961_v55   ;;  %v7292_v55 = vld [vmem:[%s12942_s6 + $0x38] sm:$0xff]   ;;  %13397 = vst [vmem:[#allocation149_spill] sm:$0xff] %v9731_v35  ;;  %v1876_v51 = vmul.f32 %v7488_v26, %v1724_v13  ;;  %v7490_v57 = vpop.eup %7489  ;;  %v9763_v26 = vld [vmem:[%s12938_s0 + $0x40] sm:$0xff]  ;;  %v864_v23 = vadd.f32 %v9772_v38, %v8794_v53 }
 0x249   :  { %v7492_v58 = vpop.eup %7491  ;;  %v965_v61 = vmul.f32 %v7490_v57, %v813_v40  ;;  %v13448_v50 = vld [vmem:[#allocation21_spill] sm:$0xff] }
 0x24a   :  { %v9706_v4 = vpop.permute.xlu1 %753  ;;  %1369 = vrot.lane.b32.xlu1 %v9496_v22, %s7804_s28  ;;  %6555 = vmatpush3.bf16.msra.mxu0 %v7292_v55  ;;  %v7494_v32 = vpop.eup %7493 }
 0x24b   :  { %13393 = vst [vmem:[#allocation19_spill] sm:$0xff] %v9706_v4  ;;  %7233 = vset.pattern.permute.xlu1 %v13232_v0  ;;  %6724 = vmatprep.subr.bf16.mxu0 %v13212_v54  ;;  %v9754_v15 = vpop.permute.xlu0 %767  ;;  %v1878_v46 = vmul.f32 %v7494_v32, %v1726_v5  ;;  %v7496_v28 = vpop.eup %7495  ;;  %v2078_v32 = vadd.f32 %v9654_v60, %v8822_v30 }
 0x24c   :  { %3041 = vperm.xlu0 %7259, %v1874_v37   ;;  %v1768_v37 = vadd.f32 %v9744_v41, %v13399_v7  ;;  %13401 = vst [vmem:[#allocation151_spill] sm:$0xff] %v9754_v15  ;;  %v1735_v5 = vsub.f32 %v9696_v52, %v8836_v9 }
 0x24e   :  { %v9723_v39 = vpop.permute.xlu1 %1965  ;;  %2566 = vperm.xlu1 %7233, %v1279_v14   ;;  %v1584_v14 = vmul.f32 %v7492_v58, %v1432_v3  ;;  %v1806_v33 = vadd.f32 0.0001, %v1768_v37  ;;  %v7498_v37 = vpop.eup %7497  ;;  %v1728_v3 = vsub.f32 %v9679_v62, %v13389_v17 }
 0x24f   :  { %13396 = vst [vmem:[#allocation148_spill] sm:$0xff] %v9723_v39  ;;  %v9783_v40 = vpop.permute.xlu0 %1979 }
 0x250   :  { %2236 = vperm.xlu0 %7259, %v963_v49   ;;  %v13402_v49 = vld [vmem:[#allocation32_spill] sm:$0xff]  ;;  %7503 = vrcp.f32 %v1806_v33  ;;  %13404 = vst [vmem:[#allocation152_spill] sm:$0xff] %v9783_v40 }
 0x251   :  { %v857_v55 = vadd.f32 %v9324_v48, %v13402_v49 }
 0x252   :  { %v9736_v2 = vpop.permute.xlu1 %3076  ;;  %1673 = vrot.lane.b32.xlu1 %v9496_v22, %s7805_s17 }
 0x253   :  { %13398 = vst [vmem:[#allocation150_spill] sm:$0xff] %v9736_v2  ;;  %7234 = vset.pattern.permute.xlu1 %v13203_v11  ;;  %v895_v18 = vadd.f32 0.0001, %v857_v55  ;;  %v13406_v55 = vld [vmem:[#allocation43_spill] sm:$0xff]  ;;  %v9807_v17 = vpop.permute.xlu0 %3376 }
 0x254   :  { %3051 = vperm.xlu0 %7259, %v1876_v51   ;;  %v9779_v51 = vld [vmem:[%s12938_s0 + $0x68] sm:$0xff]  ;;  %13407 = vst [vmem:[#allocation43_spill] sm:$0xff] %v9807_v17  ;;  %v821_v10 = vsub.f32 %v9426_v27, %v13406_v55 }
 0x255   :  { %7505 = vrcp.f32 %v895_v18  ;;  %v2116_v18 = vadd.f32 0.0001, %v2078_v32  ;;  %v1730_v32 = vsub.f32 %v9744_v41, %v13399_v7 }
 0x256   :  { %v9750_v63 = vpop.permute.xlu1 %1057  ;;  %1675 = vrot.lane.b32.xlu1 %v9631_v34, %s7805_s17  ;;  %v815_v34 = vsub.f32 %v9763_v26, %v13385_v42  ;;  %v1770_v42 = vadd.f32 %v9779_v51, %v8609_v21 }
 0x257   :  { %13400 = vst [vmem:[#allocation28_spill] sm:$0xff] %v9750_v63 }
 0x258   :  { %2246 = vperm.xlu0 %7259, %v965_v61   ;;  %v967_v57 = vmul.f32 %v7496_v28, %v815_v34  ;;  %v902_v61 = vadd.f32 0.0001, %v864_v23  ;;  %v1808_v33 = vadd.f32 0.0001, %v1770_v42  ;;  %v1880_v34 = vmul.f32 %v7498_v37, %v1728_v3  ;;  %v9801_v28 = vld [vmem:[%s12938_s0 + $0x50] sm:$0xff] }
 0x259   :  { %v817_v62 = vsub.f32 %v9801_v28, %v13392_v44  ;;  %v13409_v37 = vld [vmem:[#allocation48_spill] sm:$0xff] }
 0x25a   :  { %v9767_v13 = vpop.permute.xlu1 %1059  ;;  %2841 = vperm.xlu1 %7234, %v1584_v14   ;;  %v7500_v14 = vpop.eup %7499  ;;  %7507 = vrcp.f32 %v902_v61  ;;  %v1772_v3 = vadd.f32 %v9666_v8, %v13409_v37 }
 0x25b   :  { %13403 = vst [vmem:[#allocation32_spill] sm:$0xff] %v9767_v13  ;;  %v7502_v9 = vpop.eup %7501  ;;  %v1887_v42 = vmul.f32 %v7500_v14, %v1735_v5  ;;  %7509 = vrcp.f32 %v1808_v33  ;;  %v13410_v14 = vld [vmem:[#allocation54_spill] sm:$0xff] }
 0x25c   :  { %3061 = vperm.xlu0 %7259, %v1878_v46   ;;  %v859_v46 = vadd.f32 %v9426_v27, %v13406_v55  ;;  %v969_v40 = vmul.f32 %v7502_v9, %v817_v62  ;;  %v7504_v44 = vpop.eup %7503  ;;  %7511 = vrcp.f32 %v2116_v18  ;;  %v1810_v5 = vadd.f32 0.0001, %v1772_v3  ;;  %v13417_v55 = vld [vmem:[#allocation69_spill] sm:$0xff] }
 0x25d   :  { %v861_v33 = vadd.f32 %v9696_v52, %v13410_v14  ;;  %v819_v62 = vsub.f32 %v9324_v48, %v13402_v49  ;;  %v826_v3 = vsub.f32 %v9772_v38, %v8794_v53  ;;  %v9841_v48 = vld [vmem:[%s12938_s0 + $0x128] sm:$0xff] }
 0x25e   :  { %v9785_v58 = vpop.permute.xlu1 %2281  ;;  %765 = vrot.lane.b32.xlu1 %v9573_v29, %s7802_s16 }
 0x25f   :  { %13405 = vst [vmem:[#allocation153_spill] sm:$0xff] %v9785_v58  ;;  %7235 = vset.pattern.permute.xlu1 %v13210_v25  ;;  %v7506_v9 = vpop.eup %7505  ;;  %v899_v7 = vadd.f32 0.0001, %v861_v33  ;;  %v576_v33 = vpop.f32.mrb[72].mxu1 }
 0x260   :  { %2256 = vperm.xlu0 %7259, %v967_v57   ;;  %v897_v57 = vadd.f32 0.0001, %v859_v46  ;;  %v9826_v46 = vpop.permute.xlu0 %2491  ;;  %v6502_v24 = vpop.f32.mrb[73].mxu1 }
 0x262   :  { %1977 = vrot.lane.b32.xlu1 %v9496_v22, %s7806_s29  ;;  %v9816_v22 = vld [vmem:[%s12938_s0 + $0x90] sm:$0xff]  ;;  %7513 = vrcp.f32 %v897_v57  ;;  %v971_v57 = vmul.f32 %v7506_v9, %v819_v62 }
 0x263   :  { %v9809_v23 = vpop.permute.xlu1 %3351  ;;  %v1167_v61 = vadd.f32 %v9816_v22, %v9059_v20  ;;  %7515 = vrcp.f32 %v1810_v5  ;;  %v13414_v62 = vld [vmem:[#allocation64_spill] sm:$0xff] }
 0x264   :  { %13408 = vst [vmem:[#allocation154_spill] sm:$0xff] %v9809_v23  ;;  %3071 = vperm.xlu0 %7259, %v1880_v34   ;;  %v1882_v34 = vmul.f32 %v7504_v44, %v1730_v32  ;;  %v7508_v41 = vpop.eup %7507  ;;  %v9845_v44 = vpop.permute.xlu0 %2501  ;;  %v1732_v32 = vsub.f32 %v9779_v51, %v8609_v21  ;;  %v863_v9 = vadd.f32 %v9816_v22, %v13414_v62 }
 0x265   :  { %v7510_v49 = vpop.eup %7509  ;;  %v978_v5 = vmul.f32 %v7508_v41, %v826_v3  ;;  %v2040_v51 = vsub.f32 %v9654_v60, %v8822_v30 }
 0x266   :  { %3106 = vperm.xlu1 %7235, %v1887_v42   ;;  %v1205_v42 = vadd.f32 0.0001, %v1167_v61  ;;  %v7512_v47 = vpop.eup %7511  ;;  %v901_v27 = vadd.f32 0.0001, %v863_v9 }
 0x267   :  { %v9820_v15 = vpop.permute.xlu1 %1361  ;;  %v2192_v3 = vmul.f32 %v7512_v47, %v2040_v51 }
 0x268   :  { %2266 = vperm.xlu0 %7259, %v969_v40   ;;  %v13412_v40 = vld [vmem:[#allocation57_spill] sm:$0xff]  ;;  %7517 = vrcp.f32 %v1205_v42  ;;  %v324_v53 = vpop.f32.mrb[36].mxu0  ;;  %v1884_v42 = vmul.f32 %v7510_v49, %v1732_v32  ;;  %v1776_v49 = vadd.f32 %v9772_v38, %v13417_v55  ;;  %v9865_v32 = vpop.permute.xlu0 %2511 }
 0x269   :  { %v1774_v18 = vadd.f32 %v9654_v60, %v13412_v40  ;;  %7519 = vrcp.f32 %v899_v7  ;;  %v6424_v17 = vpop.f32.mrb[37].mxu0  ;;  %13418 = vst [vmem:[#allocation64_spill] sm:$0xff] %v9865_v32 }
 0x26a   :  { %1069 = vrot.lane.b32.xlu1 %v9573_v29, %s7801_s15  ;;  %v327_v23 = vpop.f32.mrb[38].mxu0 }
 0x26b   :  { %v9832_v35 = vpop.permute.xlu1 %2546  ;;  %v6425_v17 = vpop.f32.mrb[39].mxu0 }
 0x26c   :  { %13411 = vst [vmem:[#allocation48_spill] sm:$0xff] %v9832_v35  ;;  %3081 = vperm.xlu0 %7259, %v1882_v34   ;;  %v1812_v34 = vadd.f32 0.0001, %v1774_v18  ;;  %v579_v35 = vpop.f32.mrb[74].mxu1  ;;  %v7514_v21 = vpop.eup %7513 }
 0x26d   :  { %v9859_v7 = vadd.f32 %v579_v35, %v327_v23  ;;  %v6503_v18 = vpop.f32.mrb[75].mxu1  ;;  %v7516_v30 = vpop.eup %7515  ;;  %v1734_v23 = vsub.f32 %v9666_v8, %v13409_v37  ;;  %v823_v8 = vsub.f32 %v9696_v52, %v13410_v14  ;;  %v9895_v14 = vld [vmem:[%s12938_s0 + $0xb8] sm:$0xff] }
 0x26e   :  { %1071 = vrot.lane.b32.xlu1 %v9841_v48, %s7801_s15  ;;  %7521 = vrcp.f32 %v1812_v34  ;;  %v1129_v34 = vsub.f32 %v9816_v22, %v9059_v20  ;;  %v9883_v17 = vpop.permute.xlu0 %2521 }
 0x26f   :  { %v9847_v61 = vpop.permute.xlu1 %1665  ;;  %13415 = vst [vmem:[#allocation57_spill] sm:$0xff] %v9859_v7  ;;  %7523 = vrcp.f32 %v901_v27  ;;  %v1886_v18 = vmul.f32 %v7516_v30, %v1734_v23  ;;  %13421 = vst [vmem:[#allocation69_spill] sm:$0xff] %v9883_v17  ;;  %v9899_v30 = vadd.f32 %v576_v33, %v324_v53 }
 0x270   :  { %13413 = vst [vmem:[#allocation54_spill] sm:$0xff] %v9847_v61  ;;  %2276 = vperm.xlu0 %7259, %v971_v57   ;;  %v13416_v57 = vld [vmem:[#allocation13_spill] sm:$0xff]  ;;  %v1738_v61 = vsub.f32 %v9772_v38, %v13417_v55 }
 0x271   :  { %v1472_v24 = vadd.f32 %v9772_v38, %v13416_v57 }
 0x272   :  { %2311 = vperm.xlu1 %7235, %v978_v5   ;;  %v973_v5 = vmul.f32 %v7514_v21, %v821_v10  ;;  %v7518_v9 = vpop.eup %7517  ;;  %v9877_v10 = vld [vmem:[%s12938_s0 + $0xa0] sm:$0xff]  ;;  %v9909_v53 = vpop.permute.xlu0 %2531 }
 0x273   :  { %v9857_v41 = vpop.permute.xlu1 %1667  ;;  %v1510_v47 = vadd.f32 0.0001, %v1472_v24  ;;  %v13420_v21 = vld [vmem:[#allocation78_spill] sm:$0xff]  ;;  %v7520_v37 = vpop.eup %7519  ;;  %v1281_v24 = vmul.f32 %v7518_v9, %v1129_v34  ;;  %v1736_v9 = vsub.f32 %v9654_v60, %v13412_v40  ;;  %v9920_v60 = vld [vmem:[%s12938_s0 + $0xa8] sm:$0xff] }
 0x274   :  { %3091 = vperm.xlu0 %7259, %v1884_v42   ;;  %v1814_v42 = vadd.f32 0.0001, %v1776_v49  ;;  %v1777_v51 = vadd.f32 %v9877_v10, %v13420_v21  ;;  %v868_v49 = vadd.f32 %v9895_v14, %v9168_v19  ;;  %v975_v23 = vmul.f32 %v7520_v37, %v823_v8  ;;  %v13430_v40 = vld [vmem:[#allocation14_spill] sm:$0xff] }
 0x275   :  { %7525 = vrcp.f32 %v1510_v47  ;;  %v825_v8 = vsub.f32 %v9816_v22, %v13414_v62  ;;  %v1434_v62 = vsub.f32 %v9772_v38, %v13416_v57  ;;  %v13434_v57 = vld [vmem:[#allocation82_spill] sm:$0xff]  ;;  %v828_v45 = vsub.f32 %v9920_v60, %v13430_v40 }
 0x276   :  { %7237 = vset.pattern.permute.xlu1 %v13234_v6  ;;  %7527 = vrcp.f32 %v1814_v42  ;;  %v906_v16 = vadd.f32 0.0001, %v868_v49 }
 0x277   :  { %v9868_v35 = vpop.permute.xlu1 %2821  ;;  %3381 = vperm.xlu1 %7237, %v2192_v3   ;;  %v13423_v3 = vld [vmem:[#allocation68_spill] sm:$0xff] }
 0x278   :  { %13419 = vst [vmem:[#allocation13_spill] sm:$0xff] %v9868_v35  ;;  %2286 = vperm.xlu0 %7259, %v973_v5   ;;  %v1775_v27 = vadd.f32 %v9816_v22, %v13423_v3  ;;  %v1815_v5 = vadd.f32 0.0001, %v1777_v51  ;;  %13424 = vst [vmem:[#allocation68_spill] sm:$0xff] %v9899_v30  ;;  %v7522_v34 = vpop.eup %7521  ;;  %v1780_v51 = vadd.f32 %v9895_v14, %v13427_v1 }
 0x279   :  { %v1888_v33 = vmul.f32 %v7522_v34, %v1736_v9  ;;  %v7524_v37 = vpop.eup %7523  ;;  %v13431_v34 = vld [vmem:[#allocation110_spill] sm:$0xff] }
 0x27a   :  { %v1813_v42 = vadd.f32 0.0001, %v1775_v27  ;;  %7529 = vrcp.f32 %v1815_v5  ;;  %v866_v27 = vadd.f32 %v9920_v60, %v13430_v40  ;;  %v1818_v5 = vadd.f32 0.0001, %v1780_v51 }
 0x27b   :  { %v9885_v20 = vpop.permute.xlu1 %757  ;;  %1373 = vrot.lane.b32.xlu1 %v9573_v29, %s7804_s28  ;;  %v2080_v51 = vadd.f32 %v9772_v38, %v13434_v57 }
 0x27c   :  { %13422 = vst [vmem:[#allocation78_spill] sm:$0xff] %v9885_v20  ;;  %3101 = vperm.xlu0 %7259, %v1886_v18   ;;  %7238 = vset.pattern.permute.xlu1 %v13232_v0  ;;  %v13426_v18 = vld [vmem:[#allocation72_spill] sm:$0xff]  ;;  %7531 = vrcp.f32 %v1813_v42  ;;  %v977_v20 = vmul.f32 %v7524_v37, %v825_v8  ;;  %v9947_v8 = vld [vmem:[%s12938_s0 + $0xd8] sm:$0xff] }
 0x27d   :  { %v865_v2 = vadd.f32 %v9877_v10, %v13426_v18  ;;  %13428 = vst [vmem:[#allocation72_spill] sm:$0xff] %v9909_v53  ;;  %7533 = vrcp.f32 %v906_v16  ;;  %v904_v16 = vadd.f32 0.0001, %v866_v27  ;;  %v13435_v37 = vld [vmem:[#allocation109_spill] sm:$0xff]  ;;  %v2118_v55 = vadd.f32 0.0001, %v2080_v51 }
 0x27e   :  { %v13463_v53 = vld [vmem:[#allocation33_spill] sm:$0xff] }
 0x27f   :  { %v9901_v47 = vpop.permute.xlu1 %1969  ;;  %2576 = vperm.xlu1 %7238, %v1281_v24   ;;  %v903_v49 = vadd.f32 0.0001, %v865_v2  ;;  %v9934_v2 = vpop.permute.xlu0 %2541 }
 0x280   :  { %13425 = vst [vmem:[#allocation155_spill] sm:$0xff] %v9901_v47  ;;  %2296 = vperm.xlu0 %7259, %v975_v23   ;;  %v9930_v23 = vld [vmem:[%s12938_s0 + $0xc0] sm:$0xff]  ;;  %13432 = vst [vmem:[#allocation14_spill] sm:$0xff] %v9934_v2 }
 0x281   :  { %v1781_v9 = vadd.f32 %v9930_v23, %v13431_v34  ;;  %7535 = vrcp.f32 %v903_v49 }
 0x282   :  { %7537 = vrcp.f32 %v1818_v5 }
 0x283   :  { %v9913_v24 = vpop.permute.xlu1 %3086  ;;  %1677 = vrot.lane.b32.xlu1 %v9573_v29, %s7805_s17  ;;  %7539 = vrcp.f32 %v904_v16  ;;  %v9955_v49 = vpop.permute.xlu0 %2551 }
 0x284   :  { %13429 = vst [vmem:[#allocation95_spill] sm:$0xff] %v9913_v24  ;;  %3111 = vperm.xlu0 %7259, %v1888_v33   ;;  %7239 = vset.pattern.permute.xlu1 %v13203_v11  ;;  %v7526_v24 = vpop.eup %7525  ;;  %13437 = vst [vmem:[#allocation109_spill] sm:$0xff] %v9955_v49  ;;  %v584_v16 = vpop.f32.mrb[76].mxu1  ;;  %v13446_v49 = vld [vmem:[#allocation30_spill] sm:$0xff] }
 0x285   :  { %v7528_v42 = vpop.eup %7527  ;;  %v1586_v13 = vmul.f32 %v7526_v24, %v1434_v62  ;;  %v13438_v62 = vld [vmem:[#allocation132_spill] sm:$0xff]  ;;  %v10006_v40 = vadd.f32 %v584_v16, %v13448_v50  ;;  %v2042_v50 = vsub.f32 %v9772_v38, %v13434_v57 }
 0x286   :  { %v1890_v27 = vmul.f32 %v7528_v42, %v1738_v61  ;;  %v7530_v63 = vpop.eup %7529  ;;  %v1784_v4 = vadd.f32 %v9947_v8, %v13438_v62  ;;  %v830_v61 = vsub.f32 %v9895_v14, %v9168_v19  ;;  %v13454_v38 = vld [vmem:[#allocation40_spill] sm:$0xff] }
 0x287   :  { %v9936_v33 = vpop.permute.xlu1 %1061  ;;  %1679 = vrot.lane.b32.xlu1 %v9841_v48, %s7805_s17  ;;  %v1819_v48 = vadd.f32 0.0001, %v1781_v9  ;;  %v7532_v5 = vpop.eup %7531  ;;  %v13439_v9 = vld [vmem:[#allocation36_spill] sm:$0xff] }
 0x288   :  { %13433 = vst [vmem:[#allocation110_spill] sm:$0xff] %v9936_v33  ;;  %2306 = vperm.xlu0 %7259, %v977_v20   ;;  %v872_v33 = vadd.f32 %v9947_v8, %v13435_v37  ;;  %v1739_v20 = vsub.f32 %v9877_v10, %v13420_v21  ;;  %v7534_v51 = vpop.eup %7533  ;;  %v1737_v21 = vsub.f32 %v9816_v22, %v13423_v3  ;;  %v9992_v7 = vpop.permute.xlu0 %2561 }
 0x289   :  { %7541 = vrcp.f32 %v1819_v48  ;;  %v6506_v48 = vpop.f32.mrb[77].mxu1  ;;  %13443 = vst [vmem:[#allocation36_spill] sm:$0xff] %v9992_v7 }
 0x28a   :  { %v910_v24 = vadd.f32 0.0001, %v872_v33  ;;  %v1891_v42 = vmul.f32 %v7530_v63, %v1739_v20  ;;  %7543 = vrcp.f32 %v2118_v55  ;;  %v9970_v19 = vpop.f32.mrb[78].mxu1  ;;  %v1822_v63 = vadd.f32 0.0001, %v1784_v4  ;;  %v9975_v20 = vld [vmem:[%s12938_s0 + $0xe0] sm:$0xff] }
 0x28b   :  { %v9951_v39 = vpop.permute.xlu1 %1063  ;;  %2851 = vperm.xlu1 %7239, %v1586_v13   ;;  %v1169_v13 = vadd.f32 %v9877_v10, %v13439_v9  ;;  %v1785_v3 = vadd.f32 %v9975_v20, %v9638_v36  ;;  %v6507_v56 = vpop.f32.mrb[79].mxu1  ;;  %v982_v48 = vmul.f32 %v7534_v51, %v830_v61  ;;  %v827_v4 = vsub.f32 %v9877_v10, %v13426_v18 }
 0x28c   :  { %13436 = vst [vmem:[#allocation82_spill] sm:$0xff] %v9951_v39  ;;  %3121 = vperm.xlu0 %7259, %v1890_v27   ;;  %v1889_v27 = vmul.f32 %v7532_v5, %v1737_v21  ;;  %7545 = vrcp.f32 %v910_v24  ;;  %v9981_v30 = vpop.f32.mrb[80].mxu1  ;;  %v9988_v24 = vld [vmem:[%s12938_s0 + $0xf8] sm:$0xff]  ;;  %v13442_v21 = vld [vmem:[#allocation130_spill] sm:$0xff]  ;;  %v1742_v18 = vsub.f32 %v9895_v14, %v13427_v1  ;;  %v2404_v1 = vlaneseq  ;;  %v10018_v16 = vpop.permute.xlu0 %2571 }
 0x28d   :  { %v1207_v55 = vadd.f32 0.0001, %v1169_v13  ;;  %v876_v56 = vadd.f32 %v9988_v24, %v13442_v21  ;;  %v6510_v61 = vpop.f32.mrb[81].mxu1  ;;  %v13444_v13 = vld [vmem:[#allocation15_spill] sm:$0xff]  ;;  %7547 = vrcp.f32 %v1822_v63  ;;  %v1823_v35 = vadd.f32 0.0001, %v1785_v3 }
 0x28e   :  { %v1461_v51 = vadd.f32 %v9763_v26, %v13444_v13  ;;  %v595_v43 = vpop.f32.mrb[82].mxu1  ;;  %13449 = vst [vmem:[#allocation15_spill] sm:$0xff] %v10006_v40  ;;  %v13451_v3 = vld [vmem:[#allocation26_spill] sm:$0xff]  ;;  %13453 = vst [vmem:[#allocation21_spill] sm:$0xff] %v10018_v16  ;;  %v13461_v16 = vld [vmem:[#allocation27_spill] sm:$0xff] }
 0x28f   :  { %v9965_v33 = vpop.permute.xlu1 %2291  ;;  %1981 = vrot.lane.b32.xlu1 %v9573_v29, %s7806_s29  ;;  %v7536_v29 = vpop.eup %7535  ;;  %v10003_v7 = vadd.f32 %v595_v43, %v13446_v49  ;;  %7549 = vrcp.f32 %v1207_v55  ;;  %v1463_v43 = vadd.f32 %v9801_v28, %v13451_v3  ;;  %v1743_v49 = vsub.f32 %v9930_v23, %v13431_v34 }
 0x290   :  { %13440 = vst [vmem:[#allocation132_spill] sm:$0xff] %v9965_v33  ;;  %3126 = vperm.xlu0 %7259, %v1891_v42   ;;  %7240 = vset.pattern.permute.xlu1 %v13210_v25  ;;  %v13441_v42 = vld [vmem:[#allocation75_spill] sm:$0xff]  ;;  %v7538_v5 = vpop.eup %7537  ;;  %v979_v33 = vmul.f32 %v7536_v29, %v827_v4  ;;  %v1499_v63 = vadd.f32 0.0001, %v1461_v51  ;;  %7551 = vrcp.f32 %v1823_v35  ;;  %v10031_v35 = vshrl.u32 %v2404_v1, 7  ;;  %v13458_v1 = vld [vmem:[#allocation24_spill] sm:$0xff] }
 0x291   :  { %v1473_v59 = vadd.f32 %v9877_v10, %v13441_v42  ;;  %13447 = vst [vmem:[#allocation130_spill] sm:$0xff] %v10003_v7  ;;  %v7540_v61 = vpop.eup %7539  ;;  %v1894_v58 = vmul.f32 %v7538_v5, %v1742_v18  ;;  %v834_v5 = vsub.f32 %v9947_v8, %v13435_v37  ;;  %v13455_v37 = vld [vmem:[#allocation50_spill] sm:$0xff]  ;;  %v13456_v18 = vld [vmem:[#allocation79_spill] sm:$0xff]  ;;  %v10052_v47 = vadd.f32 %v9981_v30, %v13461_v16 }
 0x293   :  { %3116 = vperm.xlu1 %7240, %v1889_v27   ;;  %v6511_v27 = vpop.f32.mrb[83].mxu1  ;;  %v1511_v39 = vadd.f32 0.0001, %v1473_v59  ;;  %v7542_v2 = vpop.eup %7541  ;;  %v980_v59 = vmul.f32 %v7540_v61, %v828_v45  ;;  %v10027_v45 = vld [vmem:[%s12938_s0 + $0x60] sm:$0xff]  ;;  %13462 = vst [vmem:[#allocation40_spill] sm:$0xff] %v10052_v47 }
 0x294   :  { %v10000_v12 = vpop.permute.xlu1 %3361  ;;  %2331 = vperm.xlu0 %7259, %v982_v48   ;;  %v1474_v48 = vadd.f32 %v9920_v60, %v13450_v31  ;;  %v7544_v55 = vpop.eup %7543  ;;  %v1895_v4 = vmul.f32 %v7542_v2, %v1743_v49  ;;  %v10036_v2 = vld [vmem:[%s12938_s0 + $0x70] sm:$0xff]  ;;  %v1778_v27 = vadd.f32 %v9920_v60, %v13456_v18 }
 0x295   :  { %13445 = vst [vmem:[#allocation75_spill] sm:$0xff] %v10000_v12  ;;  %v914_v12 = vadd.f32 0.0001, %v876_v56  ;;  %7553 = vrcp.f32 %v1511_v39  ;;  %v600_v34 = vpop.f32.mrb[84].mxu1  ;;  %v1467_v51 = vadd.f32 %v10036_v2, %v13455_v37  ;;  %v13460_v49 = vld [vmem:[#allocation60_spill] sm:$0xff] }
 0x296   :  { %v7546_v56 = vpop.eup %7545  ;;  %v1512_v57 = vadd.f32 0.0001, %v1474_v48  ;;  %v6514_v39 = vpop.f32.mrb[85].mxu1 }
 0x297   :  { %2316 = vperm.xlu1 %7240, %v979_v33   ;;  %v1788_v33 = vadd.f32 %v9988_v24, %v9857_v41  ;;  %7555 = vrcp.f32 %v914_v12  ;;  %v10046_v12 = vadd.f32 %v9970_v19, %v13458_v1  ;;  %v603_v48 = vpop.f32.mrb[86].mxu1  ;;  %v2194_v39 = vmul.f32 %v7544_v55, %v2042_v50  ;;  %v7548_v1 = vpop.eup %7547 }
 0x298   :  { %v10014_v29 = vpop.permute.xlu1 %1365  ;;  %3141 = vperm.xlu0 %7259, %v1894_v58   ;;  %v1465_v58 = vadd.f32 %v10027_v45, %v13454_v38  ;;  %7557 = vrcp.f32 %v1499_v63  ;;  %v1501_v63 = vadd.f32 0.0001, %v1463_v43  ;;  %v6515_v40 = vpop.f32.mrb[87].mxu1  ;;  %v986_v7 = vmul.f32 %v7546_v56, %v834_v5  ;;  %v10070_v5 = vld [vmem:[%s12938_s0 + $0xb0] sm:$0xff] }
 0x299   :  { %13452 = vst [vmem:[#allocation30_spill] sm:$0xff] %v10014_v29  ;;  %13459 = vst [vmem:[#allocation26_spill] sm:$0xff] %v10046_v12  ;;  %v1826_v29 = vadd.f32 0.0001, %v1788_v33  ;;  %v608_v19 = vpop.f32.mrb[88].mxu1  ;;  %7559 = vrcp.f32 %v1512_v57  ;;  %v10061_v50 = vpop.permute.xlu0 %1375  ;;  %v13468_v40 = vld [vmem:[#allocation38_spill] sm:$0xff] }
 0x29a   :  { %v1503_v43 = vadd.f32 0.0001, %v1465_v58  ;;  %13467 = vst [vmem:[#allocation24_spill] sm:$0xff] %v10061_v50  ;;  %v10065_v33 = vadd.f32 %v608_v19, %v13468_v40  ;;  %v6518_v30 = vpop.f32.mrb[89].mxu1  ;;  %v7550_v16 = vpop.eup %7549  ;;  %v1816_v55 = vadd.f32 0.0001, %v1778_v27  ;;  %v1746_v58 = vsub.f32 %v9947_v8, %v13438_v62 }
 0x29b   :  { %2321 = vperm.xlu1 %7240, %v980_v59   ;;  %v1469_v59 = vadd.f32 %v9696_v52, %v13460_v49  ;;  %v1131_v27 = vsub.f32 %v9877_v10, %v13439_v9  ;;  %7561 = vrcp.f32 %v1826_v29  ;;  %v13473_v19 = vld [vmem:[#allocation41_spill] sm:$0xff] }
 0x29c   :  { %v10042_v61 = vpop.permute.xlu1 %2556  ;;  %3146 = vperm.xlu0 %7259, %v1895_v4   ;;  %v13465_v4 = vld [vmem:[#allocation35_spill] sm:$0xff]  ;;  %13469 = vst [vmem:[#allocation60_spill] sm:$0xff] %v10065_v33  ;;  %7563 = vrcp.f32 %v1501_v63  ;;  %v13475_v33 = vld [vmem:[#allocation74_spill] sm:$0xff]  ;;  %v1898_v62 = vmul.f32 %v7548_v1, %v1746_v58  ;;  %v838_v63 = vsub.f32 %v9988_v24, %v13442_v21  ;;  %v2676_v58 = vsub.s32 1, %v10031_v35 }
 0x29d   :  { %13457 = vst [vmem:[#allocation17_spill] sm:$0xff] %v10042_v61  ;;  %v10055_v61 = vadd.f32 %v600_v34, %v13463_v53  ;;  %v10058_v54 = vadd.f32 %v603_v48, %v13465_v4  ;;  %v1505_v53 = vadd.f32 0.0001, %v1467_v51  ;;  %v13470_v34 = vld [vmem:[#allocation83_spill] sm:$0xff]  ;;  %v611_v48 = vpop.f32.mrb[90].mxu1  ;;  %v13472_v4 = vld [vmem:[#allocation66_spill] sm:$0xff]  ;;  %v2079_v8 = vadd.f32 %v9816_v22, %v13475_v33 }
 0x29e   :  { %v867_v56 = vadd.f32 %v10070_v5, %v13470_v34  ;;  %v1471_v51 = vadd.f32 %v9816_v22, %v13472_v4  ;;  %v10083_v40 = vadd.f32 %v611_v48, %v13473_v19  ;;  %v6519_v30 = vpop.f32.mrb[91].mxu1  ;;  %v1507_v12 = vadd.f32 0.0001, %v1469_v59 }
 0x29f   :  { %13464 = vst [vmem:[#allocation50_spill] sm:$0xff] %v10055_v61  ;;  %13466 = vst [vmem:[#allocation79_spill] sm:$0xff] %v10058_v54  ;;  %7241 = vset.pattern.permute.xlu1 %v13234_v6  ;;  %7565 = vrcp.f32 %v1503_v43  ;;  %v13477_v54 = vld [vmem:[#allocation23_spill] sm:$0xff]  ;;  %v1283_v9 = vmul.f32 %v7550_v16, %v1131_v27  ;;  %v1747_v59 = vsub.f32 %v9975_v20, %v9638_v36  ;;  %v13479_v16 = vld [vmem:[#allocation85_spill] sm:$0xff]  ;;  %v2117_v20 = vadd.f32 0.0001, %v2079_v8 }
 0x2a0   :  { %v10076_v57 = vpop.permute.xlu1 %1669  ;;  %3391 = vperm.xlu1 %7241, %v2194_v39   ;;  %2351 = vperm.xlu0 %7259, %v986_v7   ;;  %13474 = vst [vmem:[#allocation33_spill] sm:$0xff] %v10083_v40  ;;  %v7552_v39 = vpop.eup %7551  ;;  %v13476_v7 = vld [vmem:[#allocation20_spill] sm:$0xff]  ;;  %v1476_v61 = vadd.f32 %v9895_v14, %v13477_v54  ;;  %7567 = vrcp.f32 %v1816_v55  ;;  %v905_v48 = vadd.f32 0.0001, %v867_v56  ;;  %v1509_v43 = vadd.f32 0.0001, %v1471_v51 }
 0x2a1   :  { %13471 = vst [vmem:[#allocation27_spill] sm:$0xff] %v10076_v57  ;;  %v2082_v50 = vadd.f32 %v9920_v60, %v13476_v7  ;;  %v7554_v29 = vpop.eup %7553  ;;  %7569 = vrcp.f32 %v1505_v53  ;;  %v2081_v55 = vadd.f32 %v9877_v10, %v13479_v16  ;;  %v10106_v36 = vld [vmem:[%s12943_s4] sm:$0x1f]  ;;  %v1435_v21 = vsub.f32 %v9877_v10, %v13441_v42  ;;  %v10110_v53 = vpop.permute.xlu0 %2581 }
 0x2a2   :  { %v7556_v1 = vpop.eup %7555  ;;  %7571 = vrcp.f32 %v1507_v12  ;;  %13480 = vst [vmem:[#allocation38_spill] sm:$0xff] %v10110_v53  ;;  %v1899_v51 = vmul.f32 %v7552_v39, %v1747_v59  ;;  %v1436_v27 = vsub.f32 %v9920_v60, %v13450_v31  ;;  %v10117_v12 = vld [vmem:[%s12938_s0 + $0xc8] sm:$0xff]  ;;  %v13483_v59 = vsub.s32 0, %v10031_v35 }
 0x2a3   :  { %v10101_v56 = vpop.eup %7557  ;;  %v2120_v30 = vadd.f32 0.0001, %v2082_v50  ;;  %v1587_v8 = vmul.f32 %v7554_v29, %v1435_v21  ;;  %7573 = vrcp.f32 %v905_v48  ;;  %v2119_v40 = vadd.f32 0.0001, %v2081_v55  ;;  %v13486_v55 = vld [vmem:[#allocation29_spill] sm:$0xff] }
 0x2a4   :  { %v10095_v19 = vpop.permute.xlu1 %1671  ;;  %7242 = vset.pattern.permute.xlu1 %v13232_v0  ;;  %3161 = vperm.xlu0 %7259, %v1898_v62   ;;  %v1514_v62 = vadd.f32 0.0001, %v1476_v61  ;;  %v7560_v39 = vpop.eup %7559  ;;  %v10126_v31 = vrot.slane %v10106_v36, %v13483_v59  ;;  %7575 = vrcp.f32 %v1509_v43  ;;  %v13484_v61 = vld [vmem:[#allocation98_spill] sm:$0xff]  ;;  %v2946_v29 = vsub.s32 2, %v10031_v35 }
 0x2a5   :  { %13478 = vst [vmem:[#allocation35_spill] sm:$0xff] %v10095_v19  ;;  %2586 = vperm.xlu1 %7242, %v1283_v9   ;;  %v13481_v9 = vld [vmem:[#allocation25_spill] sm:$0xff]  ;;  %v990_v19 = vmul.f32 %v7556_v1, %v838_v63  ;;  %v2084_v50 = vadd.f32 %v9895_v14, %v13484_v61  ;;  %v10133_v48 = vrot.slane %v10106_v36, %v2676_v58  ;;  %7577 = vrcp.f32 %v2117_v20  ;;  %v13485_v63 = vld [vmem:[#allocation88_spill] sm:$0xff]  ;;  %v7562_v21 = vpop.eup %7561  ;;  %v10142_v57 = vpop.permute.xlu0 %1983 }
 0x2a6   :  { %v870_v47 = vadd.f32 %v10117_v12, %v13481_v9  ;;  %v1171_v1 = vadd.f32 %v10070_v5, %v13485_v63  ;;  %v1423_v43 = vsub.f32 %v9763_v26, %v13444_v13  ;;  %7579 = vrcp.f32 %v2120_v30  ;;  %v7564_v53 = vpop.eup %7563  ;;  %13487 = vst [vmem:[#allocation66_spill] sm:$0xff] %v10142_v57 }
 0x2a7   :  { %v1478_v59 = vadd.f32 %v10117_v12, %v13486_v55  ;;  %7581 = vrcp.f32 %v1514_v62  ;;  %v1750_v20 = vsub.f32 %v9988_v24, %v9857_v41  ;;  %v1425_v26 = vsub.f32 %v9801_v28, %v13451_v3  ;;  %v13489_v62 = vld [vmem:[#allocation89_spill] sm:$0xff] }
 0x2a8   :  { %v10121_v42 = vpop.permute.xlu1 %2831  ;;  %3166 = vperm.xlu0 %7259, %v1899_v51   ;;  %v3216_v51 = vsub.s32 3, %v10031_v35  ;;  %v908_v58 = vadd.f32 0.0001, %v870_v47  ;;  %v2122_v13 = vadd.f32 0.0001, %v2084_v50  ;;  %v3486_v30 = vsub.s32 4, %v10031_v35 }
 0x2a9   :  { %13482 = vst [vmem:[#allocation83_spill] sm:$0xff] %v10121_v42  ;;  %7243 = vset.pattern.permute.xlu1 %v13203_v11  ;;  %v1588_v42 = vmul.f32 %v7560_v39, %v1436_v27  ;;  %v7566_v17 = vpop.eup %7565  ;;  %7583 = vrcp.f32 %v2119_v40  ;;  %v1427_v47 = vsub.f32 %v10027_v45, %v13454_v38  ;;  %v1209_v27 = vadd.f32 0.0001, %v1171_v1  ;;  %v13490_v50 = vld [vmem:[#allocation65_spill] sm:$0xff] }
 0x2aa   :  { %2856 = vperm.xlu1 %7243, %v1587_v8   ;;  %v7568_v32 = vpop.eup %7567  ;;  %v1172_v39 = vadd.f32 %v9895_v14, %v13489_v62  ;;  %v1902_v41 = vmul.f32 %v7562_v21, %v1750_v20  ;;  %v1431_v28 = vsub.f32 %v9696_v52, %v13460_v49  ;;  %v1516_v3 = vadd.f32 0.0001, %v1478_v59  ;;  %v10177_v59 = vpop.permute.xlu0 %2591 }
 0x2ab   :  { %v7570_v24 = vpop.eup %7569  ;;  %v1740_v35 = vsub.f32 %v9920_v60, %v13456_v18  ;;  %v2409_v45 = vmul.f32 %v10126_v31, %v13490_v50  ;;  %v10164_v38 = vrot.slane %v10106_v36, %v2946_v29  ;;  %7585 = vrcp.f32 %v908_v58  ;;  %13492 = vst [vmem:[#allocation20_spill] sm:$0xff] %v10177_v59 }
 0x2ac   :  { %v10146_v8 = vpop.permute.xlu1 %761  ;;  %2371 = vperm.xlu0 %7259, %v990_v19   ;;  %v1429_v19 = vsub.f32 %v10036_v2, %v13455_v37  ;;  %v7572_v40 = vpop.eup %7571  ;;  %v1575_v52 = vmul.f32 %v10101_v56, %v1423_v43  ;;  %7587 = vrcp.f32 %v2122_v13  ;;  %v10173_v2 = vrot.slane %v10106_v36, %v3486_v30  ;;  %v13494_v43 = vld [vmem:[#allocation77_spill] sm:$0xff]  ;;  %v13495_v13 = vld [vmem:[#allocation91_spill] sm:$0xff] }
 0x2ad   :  { %13488 = vst [vmem:[#allocation41_spill] sm:$0xff] %v10146_v8  ;;  %v1892_v37 = vmul.f32 %v7568_v32, %v1740_v35  ;;  %v7574_v18 = vpop.eup %7573  ;;  %v1577_v49 = vmul.f32 %v7564_v53, %v1425_v26  ;;  %v10175_v21 = vmul.f32 %v7566_v17, %v1427_v47  ;;  %7589 = vrcp.f32 %v1209_v27  ;;  %v13497_v27 = vld [vmem:[#allocation67_spill] sm:$0xff] }
 0x2ae   :  { %2861 = vperm.xlu1 %7243, %v1588_v42   ;;  %v10167_v42 = vrot.slane %v10106_v36, %v3216_v51  ;;  %v1210_v29 = vadd.f32 0.0001, %v1172_v39  ;;  %v7576_v51 = vpop.eup %7575  ;;  %v10180_v58 = vmul.f32 %v7570_v24, %v1429_v19  ;;  %v10182_v20 = vmul.f32 %v7572_v40, %v1431_v28  ;;  %v13493_v36 = vld [vmem:[#allocation58_spill] sm:$0xff] }
 0x2af   :  { %7591 = vrcp.f32 %v1516_v3  ;;  %v829_v56 = vsub.f32 %v10070_v5, %v13470_v34  ;;  %v7578_v32 = vpop.eup %7577  ;;  %v10187_v17 = vadd.f32 %v2409_v45, %v13493_v36  ;;  %v1433_v53 = vsub.f32 %v9816_v22, %v13472_v4  ;;  %v13498_v4 = vld [vmem:[#allocation10_spill] sm:$0xff]  ;;  %v10214_v45 = vpop.permute.xlu0 %2611 }
 0x2b0   :  { %v10169_v1 = vpop.permute.xlu1 %1973  ;;  %3181 = vperm.xlu0 %7259, %v1902_v41   ;;  %v10193_v26 = vmul.f32 %v10164_v38, %v13494_v43  ;;  %v1475_v30 = vadd.f32 %v10070_v5, %v13495_v13  ;;  %v7580_v34 = vpop.eup %7579  ;;  %v10202_v39 = vmul.f32 %v10133_v48, %v13497_v27  ;;  %v2044_v41 = vsub.f32 %v9920_v60, %v13476_v7  ;;  %v13499_v40 = vld [vmem:[#allocation94_spill] sm:$0xff]  ;;  %v13501_v60 = vld [vmem:[#allocation71_spill] sm:$0xff] }
 0x2b1   :  { %13491 = vst [vmem:[#allocation74_spill] sm:$0xff] %v10169_v1  ;;  %v2411_v24 = vmul.f32 %v10126_v31, %v13498_v4  ;;  %v981_v19 = vmul.f32 %v7574_v18, %v829_v56  ;;  %v7582_v28 = vpop.eup %7581  ;;  %v10208_v3 = vmul.f32 %v7576_v51, %v1433_v53  ;;  %v1438_v35 = vsub.f32 %v9895_v14, %v13477_v54  ;;  %v13502_v18 = vld [vmem:[#allocation87_spill] sm:$0xff]  ;;  %v13503_v54 = vld [vmem:[#allocation22_spill] sm:$0xff]  ;;  %v13504_v53 = vld [vmem:[#allocation93_spill] sm:$0xff] }
 0x2b2   :  { %7244 = vset.pattern.permute.xlu1 %v13210_v25  ;;  %7593 = vrcp.f32 %v1210_v29  ;;  %v1779_v50 = vadd.f32 %v10070_v5, %v13499_v40  ;;  %13500 = vst [vmem:[#allocation85_spill] sm:$0xff] %v10214_v45  ;;  %v10218_v7 = vmul.f32 %v10164_v38, %v13501_v60  ;;  %v2041_v51 = vsub.f32 %v9816_v22, %v13475_v33  ;;  %v13516_v1 = vld [vmem:[#allocation103_spill] sm:$0xff] }
 0x2b3   :  { %3131 = vperm.xlu1 %7244, %v1892_v37   ;;  %v616_v37 = vpop.f32.mrb[92].mxu1  ;;  %v7584_v36 = vpop.eup %7583  ;;  %v10228_v29 = vmul.f32 %v10167_v42, %v13503_v54  ;;  %v10232_v43 = vmul.f32 %v10164_v38, %v13504_v53  ;;  %v832_v27 = vsub.f32 %v10117_v12, %v13481_v9  ;;  %v2043_v4 = vsub.f32 %v9877_v10, %v13479_v16 }
 0x2b4   :  { %v10197_v47 = vpop.permute.xlu1 %3096  ;;  %7266 = vset.pattern.permute.xlu0 %v13203_v11  ;;  %v6522_v56 = vpop.f32.mrb[93].mxu1  ;;  %v1513_v60 = vadd.f32 0.0001, %v1475_v30  ;;  %v10240_v33 = vmul.f32 %v7578_v32, %v2041_v51  ;;  %v10242_v54 = vmul.f32 %v7580_v34, %v2044_v41  ;;  %v2046_v53 = vsub.f32 %v9895_v14, %v13484_v61  ;;  %v10254_v32 = vld [vmem:[%s12938_s0 + $0xd0] sm:$0xff]  ;;  %v13508_v30 = vld [vmem:[#allocation127_spill] sm:$0xff] }
 0x2b5   :  { %13496 = vst [vmem:[#allocation23_spill] sm:$0xff] %v10197_v47  ;;  %2796 = vperm.xlu0 %7266, %v1575_v52   ;;  %v10222_v52 = vmul.f32 %v10164_v38, %v13502_v18  ;;  %v619_v22 = vpop.f32.mrb[94].mxu1  ;;  %v7586_v9 = vpop.eup %7585  ;;  %v10249_v59 = vmul.f32 %v7582_v28, %v1438_v35  ;;  %v2195_v10 = vmul.f32 %v7584_v36, %v2043_v4  ;;  %v1817_v16 = vadd.f32 0.0001, %v1779_v50  ;;  %v13511_v35 = vld [vmem:[#allocation42_spill] sm:$0xff] }
 0x2b6   :  { %13506 = vst [vmem:[#allocation98_spill] sm:$0xff] %v10242_v54  ;;  %v6523_v45 = vpop.f32.mrb[95].mxu1  ;;  %v1479_v34 = vadd.f32 %v10254_v32, %v13508_v30  ;;  %v7588_v51 = vpop.eup %7587  ;;  %v1440_v61 = vsub.f32 %v10117_v12, %v13486_v55  ;;  %v10266_v50 = vadd.f32 %v616_v37, %v13511_v35  ;;  %v10277_v55 = vmul.f32 %v10164_v38, %v13516_v1  ;;  %v13519_v1 = vld [vmem:[#allocation46_spill] sm:$0xff] }
 0x2b7   :  { %2326 = vperm.xlu1 %7244, %v981_v19   ;;  %v13507_v19 = vld [vmem:[#allocation61_spill] sm:$0xff]  ;;  %v13513_v45 = vld [vmem:[#allocation44_spill] sm:$0xff]  ;;  %7595 = vrcp.f32 %v1513_v60  ;;  %v2679_v8 = vmul.f32 %v10133_v48, %v9826_v46  ;;  %v10283_v35 = vmul.f32 %v7586_v9, %v832_v27 }
 0x2b8   :  { %v10238_v18 = vpop.permute.xlu1 %1065  ;;  %v10245_v56 = vadd.f32 %v2411_v24, %v13507_v19  ;;  %v624_v24 = vpop.f32.mrb[96].mxu1  ;;  %13512 = vst [vmem:[#allocation29_spill] sm:$0xff] %v10266_v50  ;;  %v10269_v36 = vadd.f32 %v619_v22, %v13513_v45  ;;  %v13518_v45 = vld [vmem:[#allocation76_spill] sm:$0xff]  ;;  %7597 = vrcp.f32 %v1817_v16  ;;  %v1517_v27 = vadd.f32 0.0001, %v1479_v34  ;;  %v13524_v16 = vld [vmem:[#allocation34_spill] sm:$0xff] }
 0x2b9   :  { %13505 = vst [vmem:[#allocation25_spill] sm:$0xff] %v10238_v18  ;;  %2806 = vperm.xlu0 %7266, %v1577_v49   ;;  %v13510_v49 = vld [vmem:[#allocation99_spill] sm:$0xff]  ;;  %v6526_v4 = vpop.f32.mrb[97].mxu1  ;;  %v7590_v19 = vpop.eup %7589  ;;  %v13515_v18 = vld [vmem:[#allocation12_spill] sm:$0xff]  ;;  %v10315_v34 = vmul.f32 %v10173_v2, %v13524_v16 }
 0x2ba   :  { %v10258_v41 = vpop.permute.xlu0 %2631  ;;  %v869_v28 = vadd.f32 %v9930_v23, %v13510_v49  ;;  %13514 = vst [vmem:[#allocation89_spill] sm:$0xff] %v10269_v36  ;;  %v627_v37 = vpop.f32.mrb[98].mxu1  ;;  %v10287_v4 = vmul.f32 %v10133_v48, %v13518_v45  ;;  %v13521_v36 = vld [vmem:[#allocation31_spill] sm:$0xff]  ;;  %v10302_v9 = vld [vmem:[%s12938_s0 + $0xf0] sm:$0xff]  ;;  %v10306_v45 = vmul.f32 %v7588_v51, %v2046_v53  ;;  %v13526_v53 = vld [vmem:[#allocation37_spill] sm:$0xff]  ;;  %7599 = vrcp.f32 %v1517_v27 }
 0x2bb   :  { %13509 = vst [vmem:[#allocation88_spill] sm:$0xff] %v10258_v41  ;;  %7245 = vset.pattern.permute.xlu1 %v13234_v6  ;;  %v10273_v41 = vmul.f32 %v10173_v2, %v13515_v18  ;;  %v7592_v22 = vpop.eup %7591  ;;  %v1133_v18 = vsub.f32 %v10070_v5, %v13485_v63  ;;  %v10293_v60 = vadd.f32 %v627_v37, %v13519_v1  ;;  %v6527_v46 = vpop.f32.mrb[99].mxu1 }
 0x2bc   :  { %v10281_v47 = vpop.permute.xlu1 %1067  ;;  %3396 = vperm.xlu1 %7245, %v2195_v10   ;;  %v10297_v10 = vmul.f32 %v10173_v2, %v13521_v36  ;;  %v1483_v63 = vadd.f32 %v10302_v9, %v9820_v15  ;;  %v907_v37 = vadd.f32 0.0001, %v869_v28  ;;  %v13522_v46 = vld [vmem:[#allocation45_spill] sm:$0xff]  ;;  %v7594_v36 = vpop.eup %7593  ;;  %v10324_v51 = vmul.f32 %v10173_v2, %v13526_v53 }
 0x2bd   :  { %13517 = vst [vmem:[#allocation65_spill] sm:$0xff] %v10281_v47  ;;  %2816 = vperm.xlu0 %7266, %v10175_v21   ;;  %13520 = vst [vmem:[#allocation58_spill] sm:$0xff] %v10293_v60  ;;  %v1285_v21 = vmul.f32 %v7590_v19, %v1133_v18  ;;  %v10309_v50 = vadd.f32 %v624_v24, %v13522_v46  ;;  %v10311_v47 = vmul.f32 %v7592_v22, %v1440_v61  ;;  %v13527_v24 = vld [vmem:[#allocation81_spill] sm:$0xff]  ;;  %v13529_v22 = vld [vmem:[#allocation56_spill] sm:$0xff] }
 0x2be   :  { %v2717_v60 = vadd.f32 %v2679_v8, %v10187_v17  ;;  %v10328_v61 = vmul.f32 %v10164_v38, %v13527_v24  ;;  %v1134_v28 = vsub.f32 %v9895_v14, %v13489_v62  ;;  %v13528_v8 = vld [vmem:[#allocation18_spill] sm:$0xff]  ;;  %v1521_v19 = vadd.f32 0.0001, %v1483_v63  ;;  %v13531_v62 = vld [vmem:[#allocation104_spill] sm:$0xff] }
 0x2bf   :  { %v2217_v1 = vpop.permute.xlu0 %2216  ;;  %13523 = vst [vmem:[#allocation77_spill] sm:$0xff] %v10309_v50  ;;  %v2413_v17 = vmul.f32 %v10126_v31, %v13528_v8  ;;  %7601 = vrcp.f32 %v907_v37  ;;  %v13533_v8 = vld [vmem:[#allocation86_spill] sm:$0xff]  ;;  %v2681_v37 = vmul.f32 %v10133_v48, %v9845_v44  ;;  %v13537_v46 = vld [vmem:[#allocation92_spill] sm:$0xff] }
 0x2c0   :  { %v2408_v57 = vmul.f32 %v10126_v31, %v2217_v1  ;;  %v10319_v54 = vpop.permute.xlu1 %2301  ;;  %7246 = vset.pattern.permute.xlu1 %v13232_v0  ;;  %v13530_v1 = vld [vmem:[#allocation39_spill] sm:$0xff]  ;;  %v1286_v53 = vmul.f32 %v7594_v36, %v1134_v28  ;;  %v2987_v27 = vadd.f32 %v10218_v7, %v2717_v60  ;;  %7603 = vrcp.f32 %v1521_v19 }
 0x2c1   :  { %13525 = vst [vmem:[#allocation91_spill] sm:$0xff] %v10319_v54  ;;  %2596 = vperm.xlu1 %7246, %v1285_v21   ;;  %2826 = vperm.xlu0 %7266, %v10180_v58   ;;  %v10340_v16 = vadd.f32 %v10117_v12, %v13530_v1  ;;  %v1173_v58 = vadd.f32 %v9930_v23, %v13531_v62  ;;  %v13535_v7 = vld [vmem:[#allocation63_spill] sm:$0xff]  ;;  %v13540_v54 = vld [vmem:[#allocation97_spill] sm:$0xff] }
 0x2c2   :  { %v2446_v18 = vadd.f32 %v2408_v57, %v13529_v22  ;;  %v13532_v57 = vld [vmem:[#allocation114_spill] sm:$0xff]  ;;  %v10353_v22 = vmul.f32 %v10167_v42, %v13533_v8  ;;  %v2451_v60 = vadd.f32 %v2413_v17, %v13535_v7  ;;  %v1437_v8 = vsub.f32 %v10070_v5, %v13495_v13 }
 0x2c3   :  { %v3032_v14 = vpop.permute.xlu0 %3031  ;;  %v10349_v24 = vmul.f32 %v10173_v2, %v13532_v57  ;;  %v10368_v44 = vmul.f32 %v10133_v48, %v13537_v46  ;;  %v13539_v17 = vld [vmem:[#allocation134_spill] sm:$0xff]  ;;  %v2719_v50 = vadd.f32 %v2681_v37, %v10245_v56  ;;  %v831_v56 = vsub.f32 %v9930_v23, %v13510_v49  ;;  %v13543_v37 = vld [vmem:[#allocation101_spill] sm:$0xff] }
 0x2c4   :  { %v2716_v21 = vadd.f32 %v10202_v39, %v2446_v18  ;;  %v3219_v63 = vmul.f32 %v10167_v42, %v3032_v14  ;;  %v7596_v39 = vpop.eup %7595  ;;  %v13536_v14 = vld [vmem:[#allocation90_spill] sm:$0xff] }
 0x2c5   :  { %v10357_v36 = vpop.permute.xlu1 %3371  ;;  %2601 = vperm.xlu1 %7246, %v1286_v53   ;;  %2836 = vperm.xlu0 %7266, %v10182_v20   ;;  %v3491_v57 = vmul.f32 %v10173_v2, %v13536_v14  ;;  %v10373_v20 = vld [vmem:[%s12938_s0 + $0xe8] sm:$0xff]  ;;  %v7598_v13 = vpop.eup %7597  ;;  %v1589_v7 = vmul.f32 %v7596_v39, %v1437_v8  ;;  %v1741_v14 = vsub.f32 %v10070_v5, %v13499_v40 }
 0x2c6   :  { %13534 = vst [vmem:[#allocation67_spill] sm:$0xff] %v10357_v36  ;;  %v2986_v28 = vadd.f32 %v10193_v26, %v2716_v21  ;;  %v3257_v18 = vadd.f32 %v3219_v63, %v2987_v27  ;;  %13538 = vst [vmem:[#allocation10_spill] sm:$0xff] %v10373_v20  ;;  %v10377_v19 = vadd.f32 %v10373_v20, %v13539_v17  ;;  %v10382_v26 = vld [vmem:[%s12944_s5] ss:$0 sm:$0xff]  ;;  %v1211_v21 = vadd.f32 0.0001, %v1173_v58  ;;  %v7600_v8 = vpop.eup %7599 }
 0x2c7   :  { %v2227_v53 = vpop.permute.xlu0 %2226  ;;  %v2953_v58 = vmul.f32 %v10164_v38, %v13540_v54  ;;  %v13542_v39 = vld [vmem:[#allocation59_spill] sm:$0xff]  ;;  %v1893_v40 = vmul.f32 %v7598_v13, %v1741_v14  ;;  %v2989_v14 = vadd.f32 %v10328_v61, %v2719_v50 }
 0x2c8   :  { %v3256_v46 = vadd.f32 %v10228_v29, %v2986_v28  ;;  %v3527_v27 = vadd.f32 %v10273_v41, %v3257_v18  ;;  %v2410_v63 = vmul.f32 %v10126_v31, %v2227_v53  ;;  %v2083_v18 = vadd.f32 %v10070_v5, %v13543_v37  ;;  %v13544_v53 = vld [vmem:[#allocation64_spill] sm:$0xff] }
 0x2c9   :  { %v10390_v36 = vpop.permute.xlu1 %1369  ;;  %7247 = vset.pattern.permute.xlu1 %v13203_v11  ;;  %2846 = vperm.xlu0 %7266, %v10208_v3   ;;  %v10409_v3 = vld [vmem:[%s12938_s0 + $0x110] sm:$0xff]  ;;  %7605 = vrcp.f32 %v1211_v21  ;;  %v13547_v21 = vld [vmem:[#allocation107_spill] sm:$0xff] }
 0x2ca   :  { %v3526_v29 = vadd.f32 %v10297_v10, %v3256_v46  ;;  %v10398_v41 = vadd.f32 %v10382_v26, %v3527_v27  ;;  %v2448_v28 = vadd.f32 %v2410_v63, %v13542_v39  ;;  %2871 = vperm.xlu1 %7247, %v10249_v59   ;;  %v1487_v54 = vadd.f32 %v10409_v3, %v10390_v36  ;;  %v7602_v46 = vpop.eup %7601 }
 0x2cb   :  { %v3042_v10 = vpop.permute.xlu0 %3041  ;;  %v2683_v59 = vmul.f32 %v10133_v48, %v13544_v53  ;;  %v1441_v27 = vsub.f32 %v10254_v32, %v13508_v30  ;;  %v1477_v53 = vadd.f32 %v9930_v23, %v13547_v21  ;;  %v2121_v30 = vadd.f32 0.0001, %v2083_v18 }
 0x2cc   :  { %13541 = vst [vmem:[#allocation94_spill] sm:$0xff] %v10398_v41  ;;  %v10416_v13 = vadd.f32 %v10382_v26, %v3526_v29  ;;  %v2718_v49 = vadd.f32 %v10287_v4, %v2448_v28  ;;  %v1525_v63 = vadd.f32 0.0001, %v1487_v54  ;;  %v3221_v39 = vmul.f32 %v10167_v42, %v3042_v10  ;;  %v7604_v54 = vpop.eup %7603 }
 0x2cd   :  { %v10423_v20 = vpop.permute.xlu1 %2566  ;;  %2866 = vperm.xlu0 %7266, %v1589_v7   ;;  %v13082_v17 = vmax.f32 %v10398_v41, 0.0  ;;  %v1593_v28 = vmul.f32 %v7600_v8, %v1441_v27  ;;  %v2721_v10 = vadd.f32 %v2683_v59, %v2451_v60  ;;  %v1445_v8 = vsub.f32 %v10302_v9, %v9820_v15  ;;  %v13550_v59 = vld [vmem:[#allocation111_spill] sm:$0xff] }
 0x2ce   :  { %13545 = vst [vmem:[#allocation71_spill] sm:$0xff] %v10416_v13  ;;  %13546 = vst [vmem:[#allocation87_spill] sm:$0xff] %v10423_v20  ;;  %v13085_v29 = vmax.f32 %v10416_v13, 0.0  ;;  %v2988_v4 = vadd.f32 %v10222_v52, %v2718_v49  ;;  %7248 = vset.pattern.permute.xlu1 %v13210_v25  ;;  %7607 = vrcp.f32 %v1525_v63  ;;  %v3259_v50 = vadd.f32 %v3221_v39, %v2989_v14  ;;  %v13548_v49 = vld [vmem:[#allocation105_spill] sm:$0xff]  ;;  %v13551_v14 = vld [vmem:[#allocation62_spill] sm:$0xff] }
 0x2cf   :  { %3136 = vperm.xlu1 %7248, %v1893_v40   ;;  %v2237_v61 = vpop.permute.xlu0 %2236  ;;  %v983_v52 = vmul.f32 %v7602_v46, %v831_v56  ;;  %v2415_v18 = vmul.f32 %v10126_v31, %v13548_v49  ;;  %v1515_v60 = vadd.f32 0.0001, %v1477_v53  ;;  %v1782_v63 = vadd.f32 %v10117_v12, %v13550_v59  ;;  %v13552_v46 = vld [vmem:[#allocation69_spill] sm:$0xff]  ;;  %v13614_v13 = vld [vmem:[#allocation83_spill] sm:$0xff] }
 0x2d0   :  { %v3647_v7 = vpack.c.bf16 %v13082_v17, %v13085_v29  ;;  %v3258_v20 = vadd.f32 %v10353_v22, %v2988_v4  ;;  %v2412_v1 = vmul.f32 %v10126_v31, %v2237_v61  ;;  %v3529_v40 = vadd.f32 %v3491_v57, %v3259_v50 }
 0x2d1   :  { %v10441_v27 = vpop.permute.xlu1 %1673  ;;  %2886 = vperm.xlu0 %7266, %v1593_v28   ;;  %v2124_v56 = vadd.f32 0.0001, %v10340_v16  ;;  %v2685_v4 = vmul.f32 %v10133_v48, %v13552_v46  ;;  %v1597_v61 = vmul.f32 %v7604_v54, %v1445_v8  ;;  %v13553_v57 = vmov 0.0   ;;  %v13556_v16 = vld [vmem:[#allocation102_spill] sm:$0xff] }
 0x2d2   :  { %13549 = vst [vmem:[#allocation22_spill] sm:$0xff] %v10441_v27  ;;  %v2450_v39 = vadd.f32 %v2412_v1, %v13551_v14  ;;  %6557 = vmatmul.mubr.bf16.vlgmr.msra.gmra.mrb[40].mxu0 %v3647_v7  ;;  %v3528_v22 = vadd.f32 %v10315_v34, %v3258_v20  ;;  %v10453_v53 = vadd.f32 %v10382_v26, %v3529_v40  ;;  %7609 = vrcp.f32 %v2121_v30  ;;  %v13557_v7 = vld [vmem:[#allocation70_spill] sm:$0xff] }
 0x2d3   :  { %2336 = vperm.xlu1 %7248, %v983_v52   ;;  %v3052_v15 = vpop.permute.xlu0 %3051  ;;  %6560 = vmatprep.mubr.msk.bf16.mxu0 %vm7803_vm2, %v13553_v57  ;;  %v2991_v1 = vadd.f32 %v2953_v58, %v2721_v10  ;;  %v3222_v20 = vmul.f32 %v10167_v42, %v13556_v16  ;;  %v1135_v54 = vsub.f32 %v9930_v23, %v13531_v62  ;;  %v7606_v8 = vpop.eup %7605  ;;  %7611 = vrcp.f32 %v1515_v60  ;;  %v13559_v16 = vld [vmem:[#allocation108_spill] sm:$0xff] }
 0x2d4   :  { %13554 = vst [vmem:[#allocation93_spill] sm:$0xff] %v10453_v53  ;;  %v2720_v28 = vadd.f32 %v10368_v44, %v2450_v39  ;;  %v3223_v50 = vmul.f32 %v10167_v42, %v3052_v15  ;;  %v10458_v34 = vadd.f32 %v10382_v26, %v3528_v22  ;;  %v2453_v52 = vadd.f32 %v2415_v18, %v13557_v7  ;;  %v13558_v44 = vld [vmem:[#allocation106_spill] sm:$0xff] }
 0x2d5   :  { %v10465_v49 = vpop.permute.xlu1 %1675  ;;  %2906 = vperm.xlu0 %7266, %v1597_v61   ;;  %v3493_v58 = vmul.f32 %v10173_v2, %v13558_v44  ;;  %v1820_v30 = vadd.f32 0.0001, %v1782_v63  ;;  %v13080_v18 = vmax.f32 %v10453_v53, 0.0  ;;  %v1449_v22 = vsub.f32 %v10409_v3, %v10390_v36  ;;  %v13560_v63 = vld [vmem:[#allocation113_spill] sm:$0xff]  ;;  %v13600_v53 = vld [vmem:[#allocation132_spill] sm:$0xff] }
 0x2d6   :  { %13555 = vst [vmem:[#allocation61_spill] sm:$0xff] %v10458_v34  ;;  %v2990_v10 = vadd.f32 %v10232_v43, %v2720_v28  ;;  %v3261_v40 = vadd.f32 %v3223_v50, %v2991_v1  ;;  %v2723_v14 = vadd.f32 %v2685_v4, %v2453_v52  ;;  %v13081_v62 = vmax.f32 %v10458_v34, 0.0  ;;  %v13562_v50 = vld [vmem:[#allocation139_spill] sm:$0xff]  ;;  %v13563_v52 = vld [vmem:[#allocation73_spill] sm:$0xff] }
 0x2d7   :  { %2341 = vperm.xlu1 %7248, %v10283_v35   ;;  %v2247_v39 = vpop.permute.xlu0 %2246  ;;  %v2684_v43 = vmul.f32 %v10133_v48, %v13559_v16  ;;  %v2955_v4 = vmul.f32 %v10164_v38, %v13560_v63  ;;  %v13561_v35 = vld [vmem:[#allocation124_spill] sm:$0xff]  ;;  %7613 = vrcp.f32 %v2124_v56  ;;  %v1744_v29 = vsub.f32 %v10117_v12, %v13550_v59 }
 0x2d8   :  { %v3260_v46 = vadd.f32 %v3222_v20, %v2990_v10  ;;  %v3531_v61 = vadd.f32 %v3493_v58, %v3261_v40  ;;  %v2414_v15 = vmul.f32 %v10126_v31, %v2247_v39  ;;  %v7608_v60 = vpop.eup %7607  ;;  %v2417_v28 = vmul.f32 %v10126_v31, %v13561_v35  ;;  %v13564_v40 = vld [vmem:[#allocation115_spill] sm:$0xff] }
 0x2d9   :  { %v10482_v1 = vpop.permute.xlu1 %2841  ;;  %v3648_v36 = vpack.c.bf16 %v13080_v18, %v13081_v62  ;;  %v2087_v20 = vadd.f32 %v10254_v32, %v13562_v50  ;;  %v1601_v7 = vmul.f32 %v7608_v60, %v1449_v22  ;;  %v1287_v10 = vmul.f32 %v7606_v8, %v1135_v54  ;;  %v13567_v54 = vld [vmem:[#allocation119_spill] sm:$0xff] }
 0x2da   :  { %v2452_v44 = vadd.f32 %v2414_v15, %v13563_v52  ;;  %v3530_v58 = vadd.f32 %v10324_v51, %v3260_v46  ;;  %v871_v39 = vadd.f32 %v10254_v32, %v13564_v40  ;;  %v10496_v63 = vadd.f32 %v10382_v26, %v3531_v61  ;;  %v13566_v51 = vld [vmem:[#allocation117_spill] sm:$0xff]  ;;  %v13568_v46 = vld [vmem:[#allocation80_spill] sm:$0xff] }
 0x2db   :  { %6561 = vmatmul.mubr.bf16.gmra.mrb[44].mxu0 %v3648_v36  ;;  %7249 = vset.pattern.permute.xlu1 %v13234_v6  ;;  %v3062_v16 = vpop.permute.xlu0 %3061  ;;  %7615 = vrcp.f32 %v1820_v30  ;;  %v2993_v22 = vadd.f32 %v2955_v4, %v2723_v14  ;;  %v2085_v56 = vadd.f32 %v9930_v23, %v13566_v51  ;;  %v3224_v8 = vmul.f32 %v10167_v42, %v13567_v54  ;;  %v13571_v14 = vld [vmem:[#allocation126_spill] sm:$0xff]  ;;  %v13572_v52 = vld [vmem:[#allocation72_spill] sm:$0xff] }
 0x2dc   :  { %13565 = vst [vmem:[#allocation127_spill] sm:$0xff] %v10496_v63  ;;  %v2722_v35 = vadd.f32 %v2684_v43, %v2452_v44  ;;  %2926 = vperm.xlu0 %7266, %v1601_v7   ;;  %v3225_v15 = vmul.f32 %v10167_v42, %v3062_v16  ;;  %3411 = vperm.xlu1 %7249, %v10306_v45   ;;  %v2125_v45 = vadd.f32 0.0001, %v2087_v20  ;;  %v7610_v7 = vpop.eup %7609  ;;  %v909_v62 = vadd.f32 0.0001, %v871_v39 }
 0x2dd   :  { %v2455_v60 = vadd.f32 %v2417_v28, %v13568_v46  ;;  %v10505_v36 = vpop.permute.xlu1 %765  ;;  %6564 = vmatprep.mubr.msk.bf16.mxu0 %vm7803_vm2, %v13553_v57  ;;  %v10510_v30 = vadd.f32 %v10382_v26, %v3530_v58  ;;  %v3495_v61 = vmul.f32 %v10173_v2, %v13571_v14  ;;  %v2687_v44 = vmul.f32 %v10133_v48, %v13572_v52  ;;  %v13573_v28 = vld [vmem:[#allocation135_spill] sm:$0xff]  ;;  %v7612_v18 = vpop.eup %7611 }
 0x2de   :  { %13569 = vst [vmem:[#allocation99_spill] sm:$0xff] %v10505_v36  ;;  %v2992_v43 = vadd.f32 %v10277_v55, %v2722_v35  ;;  %v3263_v4 = vadd.f32 %v3225_v15, %v2993_v22  ;;  %v2957_v16 = vmul.f32 %v10164_v38, %v13573_v28  ;;  %v13083_v58 = vmax.f32 %v10496_v63, 0.0 }
 0x2df   :  { %13570 = vst [vmem:[#allocation42_spill] sm:$0xff] %v10510_v30  ;;  %v2257_v54 = vpop.permute.xlu0 %2256  ;;  %v13084_v46 = vmax.f32 %v10510_v30, 0.0  ;;  %v2128_v20 = vadd.f32 0.0001, %v10377_v19  ;;  %v1439_v35 = vsub.f32 %v9930_v23, %v13547_v21  ;;  %v2725_v22 = vadd.f32 %v2687_v44, %v2455_v60  ;;  %v13577_v21 = vld [vmem:[#allocation16_spill] sm:$0xff] }
 0x2e0   :  { %v3262_v17 = vadd.f32 %v3224_v8, %v2992_v43  ;;  %v3533_v14 = vadd.f32 %v3495_v61, %v3263_v4  ;;  %7273 = vset.pattern.permute.xlu0 %v13234_v6  ;;  %v2416_v55 = vmul.f32 %v10126_v31, %v2257_v54  ;;  %7250 = vset.pattern.permute.xlu1 %v13232_v0  ;;  %7617 = vrcp.f32 %v2125_v45  ;;  %v13574_v8 = vld [vmem:[#allocation2_spill] sm:$0xff]  ;;  %v13575_v43 = vld [vmem:[#allocation155_spill] sm:$0xff]  ;;  %v13576_v4 = vld [vmem:[#allocation84_spill] sm:$0xff] }
 0x2e1   :  { %3386 = vperm.xlu0 %7273, %v10240_v33   ;;  %v10528_v15 = vpop.permute.xlu1 %1977  ;;  %2606 = vperm.xlu1 %7250, %v1287_v10   ;;  %v3649_v39 = vpack.c.bf16 %v13083_v58, %v13084_v46  ;;  %v2419_v61 = vmul.f32 %v10126_v31, %v13574_v8  ;;  %v2091_v19 = vadd.f32 %v10302_v9, %v13575_v43  ;;  %v10544_v33 = vld [vmem:[%s12938_s0 + $0x108] sm:$0xff]  ;;  %7619 = vrcp.f32 %v909_v62  ;;  %v7614_v8 = vpop.eup %7613  ;;  %v13584_v46 = vld [vmem:[#allocation14_spill] sm:$0xff] }
 0x2e2   :  { %v10539_v23 = vadd.f32 %v2416_v55, %v13576_v4  ;;  %v2094_v10 = vadd.f32 %v10544_v33, %v13577_v21  ;;  %v1591_v60 = vmul.f32 %v7612_v18, %v1439_v35  ;;  %v3532_v52 = vadd.f32 %v10349_v24, %v3262_v17  ;;  %v13579_v18 = vld [vmem:[#allocation121_spill] sm:$0xff] }
 0x2e3   :  { %6565 = vmatmul.mubr.bf16.gmra.mrb[48].mxu0 %v3649_v39  ;;  %v3072_v45 = vpop.permute.xlu0 %3071  ;;  %v10550_v44 = vadd.f32 %v10382_v26, %v3533_v14  ;;  %v2123_v28 = vadd.f32 0.0001, %v2085_v56  ;;  %v2995_v54 = vadd.f32 %v2957_v16, %v2725_v22  ;;  %v2045_v4 = vsub.f32 %v10070_v5, %v13543_v37  ;;  %v13580_v39 = vld [vmem:[#allocation98_spill] sm:$0xff]  ;;  %v13583_v56 = vld [vmem:[#allocation96_spill] sm:$0xff] }
 0x2e4   :  { %v3227_v55 = vmul.f32 %v10167_v42, %v3072_v45  ;;  %6568 = vmatprep.mubr.msk.bf16.mxu0 %vm7803_vm2, %v13553_v57  ;;  %v1175_v35 = vadd.f32 %v10254_v32, %v13579_v18  ;;  %v10564_v17 = vadd.f32 %v10382_v26, %v3532_v52  ;;  %7621 = vrcp.f32 %v2128_v20  ;;  %v13585_v52 = vld [vmem:[#allocation145_spill] sm:$0xff] }
 0x2e5   :  { %13578 = vst [vmem:[#allocation44_spill] sm:$0xff] %v10550_v44  ;;  %3401 = vperm.xlu0 %7273, %v13580_v39   ;;  %v10560_v24 = vpop.permute.xlu1 %3106  ;;  %7251 = vset.pattern.permute.xlu1 %v13203_v11  ;;  %v7616_v62 = vpop.eup %7615  ;;  %v2457_v16 = vadd.f32 %v2419_v61, %v13583_v56  ;;  %v2129_v14 = vadd.f32 0.0001, %v2091_v19  ;;  %v2197_v5 = vmul.f32 %v7610_v7, %v2045_v4  ;;  %v2132_v37 = vadd.f32 0.0001, %v2094_v10  ;;  %v10579_v7 = vld [vmem:[%s12938_s0 + $0xd8] sm:$0xff] }
 0x2e6   :  { %13581 = vst [vmem:[#allocation12_spill] sm:$0xff] %v10560_v24  ;;  %13582 = vst [vmem:[#allocation103_spill] sm:$0xff] %v10564_v17  ;;  %v10567_v22 = vadd.f32 %v3227_v55, %v2995_v54  ;;  %2876 = vperm.xlu1 %7251, %v1591_v60   ;;  %v13088_v39 = vmax.f32 %v10564_v17, 0.0  ;;  %v13087_v58 = vmax.f32 %v10550_v44, 0.0  ;;  %7623 = vrcp.f32 %v2123_v28  ;;  %v13586_v10 = vld [vmem:[#allocation122_spill] sm:$0xff]  ;;  %v13587_v54 = vld [vmem:[#allocation153_spill] sm:$0xff] }
 0x2e7   :  { %v2267_v45 = vpop.permute.xlu0 %2266  ;;  %v2689_v26 = vmul.f32 %v10133_v48, %v13584_v46  ;;  %v2959_v20 = vmul.f32 %v10164_v38, %v13585_v52  ;;  %v1213_v19 = vadd.f32 0.0001, %v1175_v35  ;;  %v1176_v60 = vadd.f32 %v10579_v7, %v13586_v10  ;;  %v13589_v56 = vld [vmem:[#allocation100_spill] sm:$0xff]  ;;  %v13590_v52 = vld [vmem:[#allocation39_spill] sm:$0xff]  ;;  %v13599_v17 = vld [vmem:[#allocation13_spill] sm:$0xff] }
 0x2e8   :  { %v2418_v61 = vmul.f32 %v10126_v31, %v2267_v45  ;;  %v2421_v28 = vmul.f32 %v10126_v31, %v13587_v54  ;;  %v3650_v46 = vpack.c.bf16 %v13087_v58, %v13088_v39  ;;  %7625 = vrcp.f32 %v2129_v14 }
 0x2e9   :  { %3406 = vperm.xlu0 %7273, %v2197_v5   ;;  %v10585_v55 = vpop.permute.xlu1 %1069  ;;  %v2727_v4 = vadd.f32 %v2689_v26, %v2457_v16  ;;  %v2095_v35 = vadd.f32 %v10409_v3, %v10528_v15  ;;  %v13591_v5 = vsub.f32 %v10117_v12, %v13590_v52  ;;  %v13592_v16 = vld [vmem:[#allocation118_spill] sm:$0xff]  ;;  %7627 = vrcp.f32 %v2132_v37  ;;  %v13593_v52 = vld [vmem:[#allocation112_spill] sm:$0xff] }
 0x2ea   :  { %13588 = vst [vmem:[#allocation76_spill] sm:$0xff] %v10585_v55  ;;  %v10594_v45 = vadd.f32 %v2418_v61, %v13589_v56  ;;  %2881 = vperm.xlu1 %7251, %v10311_v47   ;;  %v7618_v58 = vpop.eup %7617  ;;  %v1480_v14 = vadd.f32 %v10579_v7, %v13592_v16  ;;  %v1896_v47 = vmul.f32 %v7616_v62, %v1744_v29  ;;  %v1214_v56 = vadd.f32 0.0001, %v1176_v60  ;;  %v13596_v29 = vld [vmem:[#allocation134_spill] sm:$0xff]  ;;  %v13617_v55 = vld [vmem:[#allocation91_spill] sm:$0xff] }
 0x2eb   :  { %v2200_v54 = vmul.f32 %v7614_v8, %v13591_v5  ;;  %6569 = vmatmul.mubr.bf16.gmra.mrb[52].mxu0 %v3650_v46  ;;  %v3082_v44 = vpop.permute.xlu0 %3081  ;;  %v2997_v26 = vadd.f32 %v2959_v20, %v2727_v4  ;;  %v2049_v8 = vsub.f32 %v10254_v32, %v13562_v50  ;;  %v2459_v12 = vadd.f32 %v2421_v28, %v13593_v52  ;;  %v7620_v46 = vpop.eup %7619  ;;  %v13594_v5 = vld [vmem:[#allocation82_spill] sm:$0xff]  ;;  %v13598_v28 = vld [vmem:[#allocation109_spill] sm:$0xff] }
 0x2ec   :  { %v3229_v61 = vmul.f32 %v10167_v42, %v3082_v44  ;;  %6572 = vmatprep.mubr.msk.bf16.mxu0 %vm7803_vm2, %v13553_v57  ;;  %7629 = vrcp.f32 %v1213_v19  ;;  %v1182_v37 = vadd.f32 %v10544_v33, %v13594_v5  ;;  %v2133_v20 = vadd.f32 0.0001, %v2095_v35  ;;  %v13597_v62 = vld [vmem:[#allocation10_spill] sm:$0xff] }
 0x2ed   :  { %3421 = vperm.xlu0 %7273, %v2200_v54   ;;  %v10610_v59 = vpop.permute.xlu1 %1071  ;;  %v2052_v60 = vsub.f32 %v13597_v62, %v13596_v29  ;;  %v833_v50 = vsub.f32 %v10254_v32, %v13564_v40  ;;  %v2691_v4 = vmul.f32 %v10133_v48, %v13598_v28  ;;  %v2201_v54 = vmul.f32 %v7618_v58, %v2049_v8 }
 0x2ee   :  { %v10614_v44 = vadd.f32 %v3229_v61, %v2997_v26  ;;  %7252 = vset.pattern.permute.xlu1 %v13210_v25  ;;  %v7622_v52 = vpop.eup %7621  ;;  %v1518_v39 = vadd.f32 0.0001, %v1480_v14  ;;  %v2961_v35 = vmul.f32 %v10164_v38, %v13599_v17  ;;  %7631 = vrcp.f32 %v1214_v56  ;;  %v7783_v17 = vld [vmem:[%s12938_s0 + $0xc0] sm:$0xff] }
 0x2ef   :  { %3151 = vperm.xlu1 %7252, %v1896_v47   ;;  %v2277_v19 = vpop.permute.xlu0 %2276  ;;  %v985_v61 = vmul.f32 %v7620_v46, %v833_v50  ;;  %v2729_v63 = vadd.f32 %v2691_v4, %v2459_v12  ;;  %v1220_v30 = vadd.f32 0.0001, %v1182_v37  ;;  %v2423_v58 = vmul.f32 %v10126_v31, %v13600_v53  ;;  %v13601_v47 = vld [vmem:[#allocation116_spill] sm:$0xff]  ;;  %v10640_v12 = vld [vmem:[%s12938_s0 + $0x128] sm:$0xff]  ;;  %v632_v4 = vpop.f32.mrb[100].mxu1 }
 0x2f0   :  { %13595 = vst [vmem:[#allocation46_spill] sm:$0xff] %v10614_v44  ;;  %v2420_v26 = vmul.f32 %v10126_v31, %v2277_v19  ;;  %v7624_v40 = vpop.eup %7623  ;;  %7633 = vrcp.f32 %v2133_v20  ;;  %v2204_v14 = vmul.f32 %v7622_v52, %v2052_v60  ;;  %v2047_v56 = vsub.f32 %v7783_v17, %v13566_v51  ;;  %v13603_v20 = vld [vmem:[#allocation131_spill] sm:$0xff] }
 0x2f1   :  { %3426 = vperm.xlu0 %7273, %v2201_v54   ;;  %v10626_v29 = vpop.permute.xlu1 %2311  ;;  %v1186_v46 = vadd.f32 %v10640_v12, %v10610_v59  ;;  %7635 = vrcp.f32 %v1518_v39  ;;  %v1783_v60 = vadd.f32 %v10254_v32, %v13603_v20  ;;  %v2999_v50 = vadd.f32 %v2961_v35, %v2729_v63  ;;  %v13604_v52 = vld [vmem:[#allocation47_spill] sm:$0xff]  ;;  %v13607_v63 = vld [vmem:[#allocation133_spill] sm:$0xff] }
 0x2f2   :  { %v10631_v8 = vadd.f32 %v2420_v26, %v13601_v47  ;;  %v7626_v37 = vpop.eup %7625  ;;  %v2056_v51 = vsub.f32 %v10544_v33, %v13577_v21  ;;  %v2199_v54 = vmul.f32 %v7624_v40, %v2047_v56  ;;  %v2053_v19 = vsub.f32 %v10302_v9, %v13575_v43  ;;  %v13606_v47 = vld [vmem:[#allocation36_spill] sm:$0xff]  ;;  %v10664_v43 = vld [vmem:[%s12938_s0 + $0xe0] sm:$0xff]  ;;  %v13610_v40 = vld [vmem:[#allocation137_spill] sm:$0xff] }
 0x2f3   :  { %2346 = vperm.xlu1 %7252, %v985_v61   ;;  %v3092_v53 = vpop.permute.xlu0 %3091  ;;  %v10652_v26 = vadd.f32 %v632_v4, %v13604_v52  ;;  %v6530_v61 = vpop.f32.mrb[101].mxu1  ;;  %v2693_v17 = vmul.f32 %v10133_v48, %v13606_v47  ;;  %7637 = vrcp.f32 %v1220_v30  ;;  %v2461_v35 = vadd.f32 %v2423_v58, %v13607_v63  ;;  %v13611_v52 = vld [vmem:[#allocation49_spill] sm:$0xff]  ;;  %v10675_v47 = vld [vmem:[%s12938_s0 + $0x100] sm:$0xff]  ;;  %v13613_v63 = vld [vmem:[#allocation27_spill] sm:$0xff] }
 0x2f4   :  { %13602 = vst [vmem:[#allocation31_spill] sm:$0xff] %v10631_v8  ;;  %v3231_v28 = vmul.f32 %v10167_v42, %v3092_v53  ;;  %v7628_v39 = vpop.eup %7627  ;;  %v635_v21 = vpop.f32.mrb[102].mxu1  ;;  %v2205_v56 = vmul.f32 %v7626_v37, %v2053_v19  ;;  %v1224_v4 = vadd.f32 0.0001, %v1186_v46  ;;  %v1821_v61 = vadd.f32 0.0001, %v1783_v60 }
 0x2f5   :  { %3441 = vperm.xlu0 %7273, %v2204_v14   ;;  %13605 = vst [vmem:[#allocation45_spill] sm:$0xff] %v10652_v26  ;;  %v873_v14 = vadd.f32 %v10664_v43, %v13610_v40  ;;  %v10670_v58 = vadd.f32 %v635_v21, %v13611_v52  ;;  %v1789_v41 = vadd.f32 %v10675_v47, %v13613_v63  ;;  %v13615_v19 = vld [vmem:[#allocation120_spill] sm:$0xff]  ;;  %v10687_v60 = vld [vmem:[%s12938_s0 + $0x118] sm:$0xff] }
 0x2f6   :  { %v10657_v53 = vadd.f32 %v3231_v28, %v2999_v50  ;;  %v10659_v34 = vpop.permute.xlu1 %3381  ;;  %v6531_v50 = vpop.f32.mrb[103].mxu1  ;;  %v2963_v46 = vmul.f32 %v10164_v38, %v13614_v13  ;;  %v874_v21 = vadd.f32 %v13597_v62, %v13615_v19  ;;  %v13616_v52 = vld [vmem:[#allocation9_spill] sm:$0xff]  ;;  %v1137_v26 = vsub.f32 %v10254_v32, %v13579_v18 }
 0x2f7   :  { %13609 = vst [vmem:[#allocation37_spill] sm:$0xff] %v10659_v34  ;;  %7253 = vset.pattern.permute.xlu1 %v13234_v6  ;;  %v2287_v30 = vpop.permute.xlu0 %2286  ;;  %13612 = vst [vmem:[#allocation81_spill] sm:$0xff] %v10670_v58  ;;  %v7630_v28 = vpop.eup %7629  ;;  %v880_v50 = vadd.f32 %v10687_v60, %v13616_v52  ;;  %v2208_v58 = vmul.f32 %v7628_v39, %v2056_v51  ;;  %v2731_v13 = vadd.f32 %v2693_v17, %v2461_v35 }
 0x2f8   :  { %13608 = vst [vmem:[#allocation34_spill] sm:$0xff] %v10657_v53  ;;  %v2422_v37 = vmul.f32 %v10126_v31, %v2287_v30  ;;  %3416 = vperm.xlu1 %7253, %v2199_v54   ;;  %v2425_v54 = vmul.f32 %v10126_v31, %v13617_v55  ;;  %v13618_v30 = vld [vmem:[#allocation138_spill] sm:$0xff]  ;;  %v7632_v34 = vpop.eup %7631  ;;  %v1289_v24 = vmul.f32 %v7630_v28, %v1137_v26  ;;  %v911_v44 = vadd.f32 0.0001, %v873_v14  ;;  %v640_v55 = vpop.f32.mrb[104].mxu1 }
 0x2f9   :  { %3446 = vperm.xlu0 %7273, %v2205_v56   ;;  %v1138_v53 = vsub.f32 %v10579_v7, %v13586_v10  ;;  %7639 = vrcp.f32 %v1224_v4  ;;  %v1827_v51 = vadd.f32 0.0001, %v1789_v41  ;;  %v3001_v39 = vadd.f32 %v2963_v46, %v2731_v13  ;;  %v6534_v14 = vpop.f32.mrb[105].mxu1  ;;  %v13620_v41 = vld [vmem:[#allocation144_spill] sm:$0xff] }
 0x2fa   :  { %v10696_v36 = vadd.f32 %v2422_v37, %v13618_v30  ;;  %v10698_v27 = vpop.permute.xlu1 %1373  ;;  %v7634_v18 = vpop.eup %7633  ;;  %7641 = vrcp.f32 %v1821_v61  ;;  %v1442_v35 = vsub.f32 %v10579_v7, %v13592_v16  ;;  %v912_v56 = vadd.f32 0.0001, %v874_v21  ;;  %v13621_v37 = vld [vmem:[#allocation51_spill] sm:$0xff] }
 0x2fb   :  { %13619 = vst [vmem:[#allocation18_spill] sm:$0xff] %v10698_v27  ;;  %v3102_v8 = vpop.permute.xlu0 %3101  ;;  %v918_v26 = vadd.f32 0.0001, %v880_v50  ;;  %v2057_v10 = vsub.f32 %v10409_v3, %v10528_v15  ;;  %v7636_v4 = vpop.eup %7635  ;;  %v1290_v28 = vmul.f32 %v7632_v34, %v1138_v53  ;;  %v2463_v61 = vadd.f32 %v2425_v54, %v13620_v41  ;;  %v13625_v50 = vld [vmem:[#allocation21_spill] sm:$0xff]  ;;  %v13627_v14 = vld [vmem:[#allocation147_spill] sm:$0xff] }
 0x2fc   :  { %v3233_v17 = vmul.f32 %v10167_v42, %v3102_v8  ;;  %7254 = vset.pattern.permute.xlu1 %v13232_v0  ;;  %v10714_v13 = vadd.f32 %v640_v55, %v13621_v37  ;;  %v643_v16 = vpop.f32.mrb[106].mxu1  ;;  %7643 = vrcp.f32 %v911_v44  ;;  %v1792_v21 = vadd.f32 %v10687_v60, %v10465_v49  ;;  %v13626_v44 = vld [vmem:[#allocation123_spill] sm:$0xff] }
 0x2fd   :  { %3461 = vperm.xlu0 %7273, %v2208_v58   ;;  %2616 = vperm.xlu1 %7254, %v1289_v24   ;;  %v2209_v3 = vmul.f32 %v7634_v18, %v2057_v10  ;;  %v13623_v24 = vld [vmem:[#allocation52_spill] sm:$0xff]  ;;  %v6535_v34 = vpop.f32.mrb[107].mxu1  ;;  %v7638_v53 = vpop.eup %7637  ;;  %v2695_v54 = vmul.f32 %v10133_v48, %v13625_v50  ;;  %7645 = vrcp.f32 %v1827_v51  ;;  %v2965_v30 = vmul.f32 %v10164_v38, %v10482_v1  ;;  %v13632_v50 = vld [vmem:[#allocation143_spill] sm:$0xff] }
 0x2fe   :  { %v10709_v46 = vadd.f32 %v3233_v17, %v3001_v39  ;;  %v10711_v8 = vpop.permute.xlu1 %2576  ;;  %13622 = vst [vmem:[#allocation56_spill] sm:$0xff] %v10714_v13  ;;  %v10719_v58 = vadd.f32 %v643_v16, %v13623_v24  ;;  %v2088_v17 = vadd.f32 %v10579_v7, %v13626_v44  ;;  %v1144_v18 = vsub.f32 %v10544_v33, %v13594_v5  ;;  %v648_v24 = vpop.f32.mrb[108].mxu1  ;;  %v10740_v5 = vld [vmem:[%s12938_s0 + $0x120] sm:$0xff] }
 0x2ff   :  { %v2297_v15 = vpop.permute.xlu0 %2296  ;;  %v1594_v55 = vmul.f32 %v7636_v4, %v1442_v35  ;;  %7647 = vrcp.f32 %v912_v56  ;;  %v2733_v10 = vadd.f32 %v2695_v54, %v2463_v61  ;;  %v1830_v37 = vadd.f32 0.0001, %v1792_v21  ;;  %13628 = vst [vmem:[#allocation114_spill] sm:$0xff] %v10740_v5  ;;  %v13629_v4 = vld [vmem:[#allocation53_spill] sm:$0xff] }
 0x300   :  { %13624 = vst [vmem:[#allocation104_spill] sm:$0xff] %v10719_v58  ;;  %v2424_v39 = vmul.f32 %v10126_v31, %v2297_v15  ;;  %7649 = vrcp.f32 %v918_v26  ;;  %v1296_v1 = vmul.f32 %v7638_v53, %v1144_v18  ;;  %v2427_v16 = vmul.f32 %v10126_v31, %v10626_v29  ;;  %v13631_v29 = vld [vmem:[#allocation66_spill] sm:$0xff] }
 0x301   :  { %3466 = vperm.xlu0 %7273, %v2209_v3   ;;  %2621 = vperm.xlu1 %7254, %v1290_v28   ;;  %v3003_v34 = vadd.f32 %v2965_v30, %v2733_v10  ;;  %v10746_v26 = vadd.f32 %v648_v24, %v13629_v4  ;;  %v6538_v28 = vpop.f32.mrb[109].mxu1  ;;  %v2126_v21 = vadd.f32 0.0001, %v2088_v17  ;;  %v2098_v3 = vadd.f32 %v10640_v12, %v13631_v29  ;;  %v13635_v4 = vld [vmem:[#allocation55_spill] sm:$0xff] }
 0x302   :  { %v10731_v41 = vadd.f32 %v2424_v39, %v13627_v14  ;;  %v10733_v51 = vpop.permute.xlu1 %1677  ;;  %v1177_v54 = vadd.f32 %v10664_v43, %v13632_v50  ;;  %v1148_v30 = vsub.f32 %v10640_v12, %v10610_v59  ;;  %v651_v17 = vpop.f32.mrb[110].mxu1  ;;  %v1745_v10 = vsub.f32 %v10254_v32, %v13603_v20  ;;  %v13634_v14 = vld [vmem:[#allocation57_spill] sm:$0xff] }
 0x303   :  { %v3112_v15 = vpop.permute.xlu0 %3111  ;;  %v1793_v35 = vadd.f32 %v10740_v5, %v10733_v51  ;;  %13630 = vst [vmem:[#allocation86_spill] sm:$0xff] %v10746_v26  ;;  %v7640_v61 = vpop.eup %7639  ;;  %v10764_v28 = vadd.f32 %v651_v17, %v13635_v4  ;;  %7651 = vrcp.f32 %v1830_v37  ;;  %v2136_v32 = vadd.f32 0.0001, %v2098_v3  ;;  %v13638_v17 = vld [vmem:[#allocation68_spill] sm:$0xff] }
 0x304   :  { %v3235_v56 = vmul.f32 %v10167_v42, %v3112_v15  ;;  %v7642_v53 = vpop.eup %7641  ;;  %v2465_v15 = vadd.f32 %v2427_v16, %v13634_v14  ;;  %v6539_v26 = vpop.f32.mrb[111].mxu1  ;;  %v1300_v58 = vmul.f32 %v7640_v61, %v1148_v30  ;;  %7653 = vrcp.f32 %v2126_v21 }
 0x305   :  { %7276 = vset.pattern.permute.xlu0 %v13232_v0  ;;  %7255 = vset.pattern.permute.xlu1 %v13203_v11  ;;  %13636 = vst [vmem:[#allocation90_spill] sm:$0xff] %v10764_v28  ;;  %v1831_v59 = vadd.f32 0.0001, %v1793_v35  ;;  %v1897_v13 = vmul.f32 %v7642_v53, %v1745_v10  ;;  %v835_v20 = vsub.f32 %v10664_v43, %v13610_v40  ;;  %v1215_v16 = vadd.f32 0.0001, %v1177_v54  ;;  %v13639_v35 = vld [vmem:[#allocation6_spill] sm:$0xff] }
 0x306   :  { %v10756_v39 = vadd.f32 %v3235_v56, %v3003_v34  ;;  %2651 = vperm.xlu0 %7276, %v1296_v1   ;;  %v10758_v18 = vpop.permute.xlu1 %1679  ;;  %2891 = vperm.xlu1 %7255, %v1594_v55   ;;  %v7644_v1 = vpop.eup %7643  ;;  %v13637_v56 = vld [vmem:[#allocation38_spill] sm:$0xff]  ;;  %v1481_v26 = vadd.f32 %v10664_v43, %v13639_v35  ;;  %v1751_v61 = vsub.f32 %v10675_v47, %v13613_v63 }
 0x307   :  { %13633 = vst [vmem:[#allocation63_spill] sm:$0xff] %v10758_v18  ;;  %v2307_v24 = vpop.permute.xlu0 %2306  ;;  %v2697_v55 = vmul.f32 %v10133_v48, %v13637_v56  ;;  %v7646_v18 = vpop.eup %7645  ;;  %v836_v54 = vsub.f32 %v13597_v62, %v13615_v19  ;;  %7655 = vrcp.f32 %v1831_v59  ;;  %v842_v10 = vsub.f32 %v10687_v60, %v13616_v52  ;;  %v13641_v19 = vld [vmem:[#allocation128_spill] sm:$0xff] }
 0x308   :  { %v2426_v34 = vmul.f32 %v10126_v31, %v2307_v24  ;;  %v987_v24 = vmul.f32 %v7644_v1, %v835_v20  ;;  %v1903_v4 = vmul.f32 %v7646_v18, %v1751_v61  ;;  %7657 = vrcp.f32 %v1215_v16 }
 0x309   :  { %v2735_v21 = vadd.f32 %v2697_v55, %v2465_v15  ;;  %v7648_v40 = vpop.eup %7647  ;;  %v1482_v15 = vadd.f32 %v13597_v62, %v13641_v19  ;;  %7659 = vrcp.f32 %v2136_v32  ;;  %v1519_v59 = vadd.f32 0.0001, %v1481_v26  ;;  %v7294_v32 = vld [vmem:[%s12942_s6 + $0x48] sm:$0xff]  }
 0x30a   :  { %v10772_v14 = vadd.f32 %v2426_v34, %v13638_v17  ;;  %2671 = vperm.xlu0 %7276, %v1300_v58   ;;  %v2852_v37 = vpop.permute.xlu1 %2851  ;;  %7256 = vset.pattern.permute.xlu1 %v13210_v25  ;;  %v7650_v30 = vpop.eup %7649  ;;  %v988_v18 = vmul.f32 %v7648_v40, %v836_v54  ;;  %v2050_v20 = vsub.f32 %v10579_v7, %v13626_v44  ;;  %v13643_v54 = vld [vmem:[#allocation130_spill] sm:$0xff] }
 0x30b   :  { %v2967_v3 = vmul.f32 %v10164_v38, %v2852_v37  ;;  %3156 = vperm.xlu1 %7256, %v1897_v13   ;;  %v3122_v53 = vpop.permute.xlu0 %3121  ;;  %v7293_v13 = vld [vmem:[%s12942_s6 + $0x40] sm:$0xff]   ;;  %v994_v1 = vmul.f32 %v7650_v30, %v842_v10  ;;  %v1520_v37 = vadd.f32 0.0001, %v1482_v15  ;;  %7661 = vrcp.f32 %v1519_v59  ;;  %v13644_v15 = vld [vmem:[#allocation19_spill] sm:$0xff] }
 0x30c   :  { %v3237_v58 = vmul.f32 %v10167_v42, %v3122_v53  ;;  %6633 = vmatpush3.bf16.msra.mxu1 %v7293_v13  ;;  %v1754_v26 = vsub.f32 %v10687_v60, %v10465_v49  ;;  %v7295_v49 = vld [vmem:[%s12942_s6 + $0x50] sm:$0xff]   ;;  %v1755_v10 = vsub.f32 %v10740_v5, %v10733_v51  ;;  %v875_v59 = vadd.f32 %v10302_v9, %v13644_v15 }
 0x30d   :  { %v3005_v34 = vadd.f32 %v2967_v3, %v2735_v21  ;;  %6634 = vmatprep.subr.bf16.mxu1 %v13553_v57  ;;  %v7652_v55 = vpop.eup %7651  ;;  %v13642_v21 = vld [vmem:[#allocation11_spill] sm:$0xff]  ;;  %7663 = vrcp.f32 %v1520_v37 }
 0x30e   :  { %7279 = vset.pattern.permute.xlu0 %v13210_v25  ;;  %v10786_v63 = vpop.permute.xlu1 %1981  ;;  %v7654_v17 = vpop.eup %7653  ;;  %v1786_v3 = vadd.f32 %v13597_v62, %v13642_v21  ;;  %v1906_v44 = vmul.f32 %v7652_v55, %v1754_v26  ;;  %v1443_v26 = vsub.f32 %v10664_v43, %v13639_v35 }
 0x30f   :  { %13640 = vst [vmem:[#allocation92_spill] sm:$0xff] %v10786_v63  ;;  %v10793_v56 = vadd.f32 %v3237_v58, %v3005_v34  ;;  %3186 = vperm.xlu0 %7279, %v1903_v4   ;;  %2356 = vperm.xlu1 %7256, %v987_v24   ;;  %v10795_v52 = vpop.permute.xlu0 %3126  ;;  %v2202_v40 = vmul.f32 %v7654_v17, %v2050_v20  ;;  %v7296_v20 = vld [vmem:[%s12942_s6 + $0x58] sm:$0xff]   ;;  %v13646_v17 = vld [vmem:[#allocation148_spill] sm:$0xff] }
 0x310   :  { %6635 = vmatpush3.bf16.msra.mxu1 %v7294_v32  ;;  %v2060_v34 = vsub.f32 %v10640_v12, %v13631_v29  ;;  %v1824_v13 = vadd.f32 0.0001, %v1786_v3  ;;  %v913_v32 = vadd.f32 0.0001, %v875_v59  ;;  %v2089_v37 = vadd.f32 %v10664_v43, %v13646_v17 }
 0x311   :  { %6636 = vmatprep.subr.bf16.mxu1 %v13553_v57  ;;  %v7656_v53 = vpop.eup %7655 }
 0x312   :  { %v10800_v16 = vpop.permute.xlu1 %3116  ;;  %v7658_v4 = vpop.eup %7657  ;;  %v1907_v51 = vmul.f32 %v7656_v53, %v1755_v10  ;;  %7665 = vrcp.f32 %v1824_v13  ;;  %v2127_v35 = vadd.f32 0.0001, %v2089_v37  ;;  %v13647_v10 = vld [vmem:[#allocation28_spill] sm:$0xff]  ;;  %v7298_v13 = vld [vmem:[%s12942_s6 + $0x68] sm:$0xff]  }
 0x313   :  { %2391 = vperm.xlu0 %7279, %v994_v1   ;;  %2361 = vperm.xlu1 %7256, %v988_v18   ;;  %v2332_v61 = vpop.permute.xlu0 %2331  ;;  %v7660_v18 = vpop.eup %7659  ;;  %v1139_v1 = vsub.f32 %v10664_v43, %v13632_v50  ;;  %7667 = vrcp.f32 %v913_v32 }
 0x314   :  { %v2431_v7 = vmul.f32 %v10126_v31, %v2332_v61  ;;  %6637 = vmatpush3.bf16.msra.mxu1 %v7295_v49  ;;  %v2212_v9 = vmul.f32 %v7660_v18, %v2060_v34  ;;  %v7297_v61 = vld [vmem:[%s12942_s6 + $0x60] sm:$0xff]   ;;  %v10856_v49 = vld [vmem:[%s12938_s0 + $0xf0] sm:$0xff]  ;;  %7669 = vrcp.f32 %v2127_v35 }
 0x315   :  { %6638 = vmatprep.subr.bf16.mxu1 %v13553_v57  ;;  %v1291_v12 = vmul.f32 %v7658_v4, %v1139_v1  ;;  %v7662_v50 = vpop.eup %7661  ;;  %v13648_v4 = vld [vmem:[#allocation33_spill] sm:$0xff] }
 0x316   :  { %v10812_v58 = vadd.f32 %v2431_v7, %v13643_v54  ;;  %v2317_v30 = vpop.permute.xlu1 %2316  ;;  %v1595_v53 = vmul.f32 %v7662_v50, %v1443_v26  ;;  %v1748_v26 = vsub.f32 %v13597_v62, %v13642_v21  ;;  %v13654_v21 = vld [vmem:[#allocation140_spill] sm:$0xff] }
 0x317   :  { %3201 = vperm.xlu0 %7279, %v1906_v44   ;;  %7257 = vset.pattern.permute.xlu1 %v13234_v6  ;;  %v10820_v24 = vpop.permute.xlu0 %3141  ;;  %v1444_v44 = vsub.f32 %v13597_v62, %v13641_v19  ;;  %v7664_v54 = vpop.eup %7663  ;;  %v1179_v19 = vadd.f32 %v10856_v49, %v13647_v10  ;;  %v2428_v1 = vmul.f32 %v10126_v31, %v2317_v30  ;;  %v7299_v30 = vld [vmem:[%s12942_s6 + $0x70] sm:$0xff]   ;;  %v7300_v62 = vld [vmem:[%s12942_s6 + $0x78] sm:$0xff]  }
 0x318   :  { %3431 = vperm.xlu1 %7257, %v2202_v40   ;;  %6639 = vmatpush3.bf16.msra.mxu1 %v7296_v20  ;;  %v10872_v20 = vld [vmem:[%s12938_s0 + $0xf8] sm:$0xff] }
 0x319   :  { %6640 = vmatprep.subr.bf16.mxu1 %v13553_v57  ;;  %v1596_v18 = vmul.f32 %v7664_v54, %v1444_v44  ;;  %v1217_v50 = vadd.f32 0.0001, %v1179_v19 }
 0x31a   :  { %v10829_v55 = vpop.permute.xlu1 %2321 }
 0x31b   :  { %3206 = vperm.xlu0 %7279, %v1907_v51   ;;  %v10834_v29 = vpop.permute.xlu0 %3146  ;;  %7671 = vrcp.f32 %v1217_v50 }
 0x31c   :  { %13645 = vst [vmem:[#allocation97_spill] sm:$0xff] %v10834_v29  ;;  %7258 = vset.pattern.permute.xlu1 %v13232_v0  ;;  %6641 = vmatpush3.bf16.msra.mxu1 %v7297_v61  ;;  %v7666_v32 = vpop.eup %7665 }
 0x31d   :  { %2626 = vperm.xlu1 %7258, %v1291_v12   ;;  %6642 = vmatprep.subr.bf16.mxu1 %v13553_v57  ;;  %v13651_v12 = vld [vmem:[#allocation32_spill] sm:$0xff]  ;;  %v7668_v35 = vpop.eup %7667 }
 0x31f   :  { %v10845_v3 = vpop.permute.xlu1 %3391  ;;  %v2352_v7 = vpop.permute.xlu0 %2351  ;;  %7283 = vset.pattern.permute.xlu0 %v13234_v6 }
 0x320   :  { %v2435_v40 = vmul.f32 %v10126_v31, %v2352_v7  ;;  %3481 = vperm.xlu0 %7283, %v2212_v9   ;;  %6643 = vmatpush3.bf16.msra.mxu1 %v7298_v13  ;;  %v1180_v9 = vadd.f32 %v10872_v20, %v13651_v12  ;;  %v13653_v7 = vld [vmem:[#allocation15_spill] sm:$0xff]  ;;  %v1484_v13 = vadd.f32 %v10872_v20, %v13654_v21 }
 0x321   :  { %7260 = vset.pattern.permute.xlu1 %v13203_v11  ;;  %6644 = vmatprep.subr.bf16.mxu1 %v13553_v57  ;;  %v2466_v44 = vadd.f32 %v2428_v1, %v13653_v7 }
 0x322   :  { %v10861_v34 = vadd.f32 %v2435_v40, %v13648_v4  ;;  %2896 = vperm.xlu1 %7260, %v1595_v53   ;;  %v1900_v53 = vmul.f32 %v7666_v32, %v1748_v26  ;;  %v1218_v40 = vadd.f32 0.0001, %v1180_v9  ;;  %v13655_v26 = vld [vmem:[#allocation58_spill] sm:$0xff] }
 0x323   :  { %v10866_v59 = vpop.permute.xlu0 %3161 }
 0x324   :  { %13649 = vst [vmem:[#allocation59_spill] sm:$0xff] %v10861_v34  ;;  %13650 = vst [vmem:[#allocation101_spill] sm:$0xff] %v10866_v59  ;;  %v2587_v51 = vpop.permute.xlu1 %2586  ;;  %6645 = vmatpush3.bf16.msra.mxu1 %v7299_v30  ;;  %7673 = vrcp.f32 %v1218_v40  ;;  %v2051_v40 = vsub.f32 %v10664_v43, %v13646_v17  ;;  %v1141_v43 = vsub.f32 %v10856_v49, %v13647_v10  ;;  %v13675_v59 = vld [vmem:[#allocation46_spill] sm:$0xff] }
 0x325   :  { %v2698_v37 = vmul.f32 %v10133_v48, %v2587_v51  ;;  %6646 = vmatprep.subr.bf16.mxu1 %v13553_v57  ;;  %v3238_v51 = vmul.f32 %v10167_v42, %v10795_v52 }
 0x326   :  { %2901 = vperm.xlu1 %7260, %v1596_v18   ;;  %v837_v18 = vsub.f32 %v10856_v49, %v13644_v15  ;;  %v7670_v15 = vpop.eup %7669 }
 0x327   :  { %v10883_v61 = vpop.permute.xlu0 %3166  ;;  %v2736_v19 = vadd.f32 %v2698_v37, %v2466_v44  ;;  %v1522_v44 = vadd.f32 0.0001, %v1484_v13 }
 0x328   :  { %13652 = vst [vmem:[#allocation64_spill] sm:$0xff] %v10883_v61  ;;  %6647 = vmatpush3.bf16.msra.mxu1 %v7300_v62  ;;  %v989_v50 = vmul.f32 %v7668_v35, %v837_v18  ;;  %v2203_v35 = vmul.f32 %v7670_v15, %v2051_v40  ;;  %v13662_v15 = vld [vmem:[#allocation142_spill] sm:$0xff]  ;;  %v13665_v61 = vld [vmem:[#allocation125_spill] sm:$0xff] }
 0x329   :  { %v2857_v54 = vpop.permute.xlu1 %2856  ;;  %6816 = vmatprep.subr.bf16.mxu1 %v13553_v57  ;;  %7675 = vrcp.f32 %v1522_v44  ;;  %v878_v44 = vadd.f32 %v10544_v33, %v13662_v15 }
 0x32a   :  { %v2968_v4 = vmul.f32 %v10164_v38, %v2857_v54  ;;  %7261 = vset.pattern.permute.xlu1 %v13210_v25 }
 0x32b   :  { %3171 = vperm.xlu1 %7261, %v1900_v53   ;;  %v2372_v1 = vpop.permute.xlu0 %2371  ;;  %v13657_v53 = vld [vmem:[#allocation54_spill] sm:$0xff] }
 0x32c   :  { %v3006_v9 = vadd.f32 %v2968_v4, %v2736_v19  ;;  %v2439_v32 = vmul.f32 %v10126_v31, %v2372_v1  ;;  %v1787_v52 = vadd.f32 %v10856_v49, %v13657_v53  ;;  %v13659_v4 = vld [vmem:[#allocation129_spill] sm:$0xff]  ;;  %v13660_v1 = vld [vmem:[#allocation78_spill] sm:$0xff] }
 0x32d   :  { %v10899_v37 = vpop.permute.xlu1 %2861  ;;  %v2686_v62 = vmul.f32 %v10133_v48, %v13659_v4  ;;  %v877_v13 = vadd.f32 %v10675_v47, %v13660_v1  ;;  %v13664_v4 = vld [vmem:[#allocation8_spill] sm:$0xff] }
 0x32e   :  { %v10902_v30 = vadd.f32 %v3238_v51, %v3006_v9  ;;  %v10905_v7 = vadd.f32 %v2439_v32, %v13655_v26  ;;  %v1825_v18 = vadd.f32 0.0001, %v1787_v52  ;;  %v7672_v51 = vpop.eup %7671  ;;  %v13661_v9 = vld [vmem:[#allocation5_spill] sm:$0xff]  ;;  %v2688_v28 = vmul.f32 %v10133_v48, %v13664_v4 }
 0x32f   :  { %2366 = vperm.xlu1 %7261, %v989_v50   ;;  %v10909_v54 = vpop.permute.xlu0 %3181  ;;  %v3497_v32 = vmul.f32 %v10173_v2, %v13661_v9  ;;  %v2724_v17 = vadd.f32 %v2686_v62, %v10539_v23  ;;  %v13663_v52 = vld [vmem:[#allocation141_spill] sm:$0xff]  ;;  %v915_v10 = vadd.f32 0.0001, %v877_v13  ;;  %v1142_v62 = vsub.f32 %v10872_v20, %v13651_v12  ;;  %v10947_v12 = vld [vmem:[%s12944_s5] ss:$0 sm:$0xff] }
 0x330   :  { %13656 = vst [vmem:[#allocation107_spill] sm:$0xff] %v10905_v7  ;;  %13658 = vst [vmem:[#allocation105_spill] sm:$0xff] %v10909_v54  ;;  %v3226_v40 = vmul.f32 %v10167_v42, %v13663_v52  ;;  %v7674_v54 = vpop.eup %7673  ;;  %v1293_v7 = vmul.f32 %v7672_v51, %v1141_v43  ;;  %7677 = vrcp.f32 %v1825_v18  ;;  %v3496_v52 = vmul.f32 %v10173_v2, %v13665_v61  ;;  %v13666_v51 = vld [vmem:[#allocation150_spill] sm:$0xff]  ;;  %v13668_v61 = vld [vmem:[#allocation48_spill] sm:$0xff] }
 0x331   :  { %v3535_v9 = vadd.f32 %v3497_v32, %v10567_v22  ;;  %v2726_v4 = vadd.f32 %v2688_v28, %v10594_v45  ;;  %v916_v32 = vadd.f32 0.0001, %v878_v44  ;;  %v3228_v18 = vmul.f32 %v10167_v42, %v13666_v51 }
 0x332   :  { %v10913_v19 = vpop.permute.xlu1 %3131  ;;  %v1294_v13 = vmul.f32 %v7674_v54, %v1142_v62  ;;  %7679 = vrcp.f32 %v915_v10  ;;  %v1446_v54 = vsub.f32 %v10872_v20, %v13654_v21  ;;  %v13671_v62 = vld [vmem:[#allocation154_spill] sm:$0xff]  ;;  %v13672_v10 = vld [vmem:[#allocation31_spill] sm:$0xff] }
 0x333   :  { %7262 = vset.pattern.permute.xlu1 %v13234_v6  ;;  %v10950_v43 = vadd.f32 %v10947_v12, %v3535_v9  ;;  %v3499_v9 = vmul.f32 %v10173_v2, %v13671_v62  ;;  %v7676_v51 = vpop.eup %7675  ;;  %7681 = vrcp.f32 %v916_v32 }
 0x334   :  { %3436 = vperm.xlu1 %7262, %v2203_v35   ;;  %v2797_v50 = vpop.permute.xlu0 %2796 }
 0x335   :  { %v2956_v26 = vmul.f32 %v10164_v38, %v2797_v50  ;;  %13667 = vst [vmem:[#allocation111_spill] sm:$0xff] %v10950_v43  ;;  %v3537_v34 = vadd.f32 %v3499_v9, %v13675_v59 }
 0x336   :  { %v10933_v35 = vpop.permute.xlu1 %2326 }
 0x337   :  { %v2994_v23 = vadd.f32 %v2956_v26, %v2724_v17  ;;  %v2690_v17 = vmul.f32 %v10133_v48, %v13668_v61  ;;  %v13669_v26 = vld [vmem:[#allocation136_spill] sm:$0xff] }
 0x338   :  { %7263 = vset.pattern.permute.xlu1 %v13232_v0  ;;  %v2807_v50 = vpop.permute.xlu0 %2806  ;;  %v3498_v44 = vmul.f32 %v10173_v2, %v13669_v26  ;;  %v13104_v26 = vmax.f32 %v10950_v43, 0.0 }
 0x339   :  { %v3264_v63 = vadd.f32 %v3226_v40, %v2994_v23  ;;  %v2958_v22 = vmul.f32 %v10164_v38, %v2807_v50  ;;  %2636 = vperm.xlu1 %7263, %v1293_v7   ;;  %v13670_v40 = vld [vmem:[#allocation3_spill] sm:$0xff] }
 0x33a   :  { %v2092_v23 = vadd.f32 %v10872_v20, %v13670_v40 }
 0x33b   :  { %v3534_v45 = vadd.f32 %v3496_v52, %v3264_v63  ;;  %v2996_v28 = vadd.f32 %v2958_v22, %v2726_v4  ;;  %v10954_v7 = vpop.permute.xlu1 %3396  ;;  %v2728_v63 = vadd.f32 %v2690_v17, %v13672_v10  ;;  %v13674_v22 = vld [vmem:[#allocation95_spill] sm:$0xff] }
 0x33c   :  { %v2817_v50 = vpop.permute.xlu0 %2816  ;;  %v3230_v21 = vmul.f32 %v10167_v42, %v13674_v22  ;;  %v2130_v17 = vadd.f32 0.0001, %v2092_v23 }
 0x33d   :  { %v3266_v61 = vadd.f32 %v3228_v18, %v2996_v28  ;;  %v2960_v52 = vmul.f32 %v10164_v38, %v2817_v50  ;;  %2641 = vperm.xlu1 %7263, %v1294_v13   ;;  %v10967_v4 = vadd.f32 %v10947_v12, %v3534_v45  ;;  %v1598_v28 = vmul.f32 %v7676_v51, %v1446_v54  ;;  %v7678_v50 = vpop.eup %7677  ;;  %v13676_v45 = vld [vmem:[#allocation17_spill] sm:$0xff]  ;;  %v13677_v54 = vld [vmem:[#allocation110_spill] sm:$0xff] }
 0x33e   :  { %v2692_v32 = vmul.f32 %v10133_v48, %v13676_v45  ;;  %v1181_v23 = vadd.f32 %v10675_v47, %v13677_v54  ;;  %7683 = vrcp.f32 %v2130_v17 }
 0x33f   :  { %13673 = vst [vmem:[#allocation62_spill] sm:$0xff] %v10967_v4  ;;  %v3536_v62 = vadd.f32 %v3498_v44, %v3266_v61  ;;  %v2998_v27 = vadd.f32 %v2960_v52, %v2728_v63  ;;  %v13105_v18 = vmax.f32 %v10967_v4, 0.0  ;;  %v1749_v44 = vsub.f32 %v10856_v49, %v13657_v53  ;;  %v7680_v53 = vpop.eup %7679 }
 0x340   :  { %v10974_v10 = vpop.permute.xlu1 %2596  ;;  %v2827_v13 = vpop.permute.xlu0 %2826  ;;  %v2730_v61 = vadd.f32 %v2692_v32, %v10696_v36  ;;  %v10995_v63 = vadd.f32 %v10947_v12, %v3537_v34  ;;  %v13680_v36 = vld [vmem:[#allocation7_spill] sm:$0xff]  ;;  %v839_v34 = vsub.f32 %v10675_v47, %v13660_v1  ;;  %v1219_v17 = vadd.f32 0.0001, %v1181_v23 }
 0x341   :  { %v3268_v5 = vadd.f32 %v3230_v21, %v2998_v27  ;;  %v2962_v22 = vmul.f32 %v10164_v38, %v2827_v13  ;;  %7264 = vset.pattern.permute.xlu1 %v13203_v11  ;;  %v3651_v59 = vpack.c.bf16 %v13104_v26, %v13105_v18  ;;  %v10989_v9 = vadd.f32 %v10947_v12, %v3536_v62  ;;  %v13678_v27 = vld [vmem:[#allocation4_spill] sm:$0xff]  ;;  %v13682_v26 = vld [vmem:[#allocation23_spill] sm:$0xff] }
 0x342   :  { %2911 = vperm.xlu1 %7264, %v1598_v28   ;;  %v3500_v51 = vmul.f32 %v10173_v2, %v13678_v27  ;;  %v1901_v52 = vmul.f32 %v7678_v50, %v1749_v44  ;;  %v13679_v28 = vld [vmem:[#allocation75_spill] sm:$0xff]  ;;  %v1486_v32 = vadd.f32 %v10544_v33, %v13680_v36  ;;  %v840_v1 = vsub.f32 %v10544_v33, %v13662_v15 }
 0x343   :  { %6573 = vmatmul.mubr.bf16.gmra.mrb[56].mxu0 %v3651_v59  ;;  %v3501_v62 = vmul.f32 %v10173_v2, %v13679_v28  ;;  %v3000_v45 = vadd.f32 %v2962_v22, %v2730_v61  ;;  %v13681_v59 = vld [vmem:[#allocation30_spill] sm:$0xff]  ;;  %v13110_v61 = vmax.f32 %v10995_v63, 0.0  ;;  %v7682_v28 = vpop.eup %7681  ;;  %v991_v23 = vmul.f32 %v7680_v53, %v839_v34  ;;  %v13684_v18 = vld [vmem:[#allocation87_spill] sm:$0xff] }
 0x344   :  { %v2602_v21 = vpop.permute.xlu1 %2601  ;;  %v2837_v49 = vpop.permute.xlu0 %2836  ;;  %6576 = vmatprep.mubr.msk.bf16.mxu0 %vm7803_vm2, %v13553_v57  ;;  %v3538_v13 = vadd.f32 %v3500_v51, %v3268_v5  ;;  %v1485_v44 = vadd.f32 %v10675_v47, %v13681_v59  ;;  %v3232_v5 = vmul.f32 %v10167_v42, %v13682_v26  ;;  %v13683_v22 = vld [vmem:[#allocation34_spill] sm:$0xff]  ;;  %v13685_v26 = vmax.f32 %v10989_v9, 0.0 }
 0x345   :  { %v2701_v50 = vmul.f32 %v10133_v48, %v2602_v21  ;;  %v3539_v51 = vadd.f32 %v3501_v62, %v13683_v22  ;;  %v2694_v21 = vmul.f32 %v10133_v48, %v13684_v18  ;;  %v2964_v4 = vmul.f32 %v10164_v38, %v2837_v49  ;;  %v13686_v53 = vld [vmem:[#allocation146_spill] sm:$0xff] }
 0x346   :  { %7265 = vset.pattern.permute.xlu1 %v13210_v25  ;;  %v3270_v43 = vadd.f32 %v3232_v5, %v3000_v45  ;;  %v11026_v62 = vadd.f32 %v10947_v12, %v3538_v13  ;;  %v1524_v22 = vadd.f32 0.0001, %v1486_v32  ;;  %7685 = vrcp.f32 %v1219_v17  ;;  %v13687_v13 = vld [vmem:[#allocation35_spill] sm:$0xff] }
 0x347   :  { %3176 = vperm.xlu1 %7265, %v1901_v52   ;;  %v3652_v52 = vpack.c.bf16 %v13110_v61, %v13685_v26  ;;  %v2739_v15 = vadd.f32 %v2701_v50, %v10812_v58  ;;  %v3502_v45 = vmul.f32 %v10173_v2, %v13686_v53  ;;  %v1523_v34 = vadd.f32 0.0001, %v1485_v44  ;;  %v13688_v50 = vld [vmem:[#allocation67_spill] sm:$0xff] }
 0x348   :  { %v11018_v27 = vpop.permute.xlu0 %2846  ;;  %v2732_v49 = vadd.f32 %v2694_v21, %v10731_v41  ;;  %v11034_v5 = vadd.f32 %v10947_v12, %v3539_v51  ;;  %v992_v26 = vmul.f32 %v7682_v28, %v840_v1  ;;  %v1790_v32 = vadd.f32 %v10544_v33, %v13687_v13  ;;  %v7684_v28 = vpop.eup %7683  ;;  %v13689_v21 = vld [vmem:[#allocation12_spill] sm:$0xff] }
 0x349   :  { %v2872_v29 = vpop.permute.xlu1 %2871  ;;  %v3241_v58 = vmul.f32 %v10167_v42, %v10820_v24  ;;  %v3503_v41 = vmul.f32 %v10173_v2, %v13688_v50  ;;  %v3540_v44 = vadd.f32 %v3502_v45, %v3270_v43  ;;  %v13109_v51 = vmax.f32 %v11026_v62, 0.0 }
 0x34a   :  { %v2971_v18 = vmul.f32 %v10164_v38, %v2872_v29  ;;  %v2054_v33 = vsub.f32 %v10872_v20, %v13670_v40  ;;  %7687 = vrcp.f32 %v1524_v22  ;;  %v13108_v43 = vmax.f32 %v11034_v5, 0.0 }
 0x34b   :  { %2376 = vperm.xlu1 %7265, %v991_v23   ;;  %6577 = vmatmul.mubr.bf16.gmra.mrb[60].mxu0 %v3652_v52  ;;  %v3002_v23 = vadd.f32 %v2964_v4, %v2732_v49  ;;  %7689 = vrcp.f32 %v1523_v34  ;;  %v3234_v52 = vmul.f32 %v10167_v42, %v13689_v21  ;;  %v1828_v4 = vadd.f32 0.0001, %v1790_v32  ;;  %v13690_v34 = vld [vmem:[#allocation43_spill] sm:$0xff] }
 0x34c   :  { %v3009_v17 = vadd.f32 %v2971_v18, %v2739_v15  ;;  %v11040_v29 = vpop.permute.xlu0 %2866  ;;  %6580 = vmatprep.mubr.msk.bf16.mxu0 %vm7803_vm2, %v13553_v57  ;;  %v3541_v15 = vadd.f32 %v3503_v41, %v10709_v46  ;;  %v3653_v20 = vpack.c.bf16 %v13108_v43, %v13109_v51  ;;  %v11064_v40 = vadd.f32 %v10947_v12, %v3540_v44  ;;  %v13693_v41 = vld [vmem:[#allocation37_spill] sm:$0xff] }
 0x34d   :  { %v3272_v18 = vadd.f32 %v3234_v52, %v3002_v23  ;;  %v2206_v22 = vmul.f32 %v7684_v28, %v2054_v33  ;;  %v3504_v46 = vmul.f32 %v10173_v2, %v13690_v34  ;;  %v1143_v32 = vsub.f32 %v10675_v47, %v13677_v54  ;;  %v13694_v54 = vld [vmem:[#allocation74_spill] sm:$0xff]  ;;  %v7793_v52 = vld [vmem:[%s12938_s0 + $0x108] sm:$0xff] }
 0x34e   :  { %v11049_v1 = vpop.permute.xlu1 %3136  ;;  %v11051_v24 = vadd.f32 %v3241_v58, %v3009_v17  ;;  %v11072_v49 = vadd.f32 %v10947_v12, %v3541_v15  ;;  %v11079_v58 = vld [vmem:[%s12938_s0 + $0x110] sm:$0xff]  ;;  %v13692_v17 = vld [vmem:[#allocation41_spill] sm:$0xff]  ;;  %7691 = vrcp.f32 %v1828_v4  ;;  %v3505_v44 = vmul.f32 %v10173_v2, %v13693_v41 }
 0x34f   :  { %2381 = vperm.xlu1 %7265, %v992_v26   ;;  %v879_v50 = vadd.f32 %v11079_v58, %v13692_v17  ;;  %v3542_v23 = vadd.f32 %v3504_v46, %v3272_v18  ;;  %v13112_v28 = vmax.f32 %v11064_v40, 0.0  ;;  %v2093_v33 = vadd.f32 %v10675_v47, %v13694_v54 }
 0x350   :  { %v11057_v53 = vpop.permute.xlu0 %2886  ;;  %13691 = vst [vmem:[#allocation69_spill] sm:$0xff] %v11072_v49  ;;  %v7686_v26 = vpop.eup %7685  ;;  %v1448_v15 = vsub.f32 %v7793_v52, %v13680_v36  ;;  %v3543_v4 = vadd.f32 %v3505_v44, %v10756_v39  ;;  %v13111_v18 = vmax.f32 %v11072_v49, 0.0  ;;  %v2429_v41 = vmul.f32 %v10126_v31, %v10829_v55 }
 0x351   :  { %v917_v46 = vadd.f32 0.0001, %v879_v50  ;;  %v3507_v43 = vmul.f32 %v10173_v2, %v10845_v3  ;;  %v2696_v36 = vmul.f32 %v10133_v48, %v10711_v8  ;;  %v2966_v39 = vmul.f32 %v10164_v38, %v11018_v27  ;;  %v13695_v50 = vld [vmem:[#allocation25_spill] sm:$0xff] }
 0x352   :  { %v11066_v45 = vpop.permute.xlu1 %2336  ;;  %v11114_v55 = vadd.f32 %v10947_v12, %v3542_v23  ;;  %v1447_v3 = vsub.f32 %v10675_v47, %v13681_v59  ;;  %v1183_v44 = vadd.f32 %v11079_v58, %v13695_v50  ;;  %v13697_v59 = vld [vmem:[#allocation149_spill] sm:$0xff] }
 0x353   :  { %7267 = vset.pattern.permute.xlu1 %v13234_v6  ;;  %6581 = vmatmul.mubr.bf16.gmra.mrb[64].mxu0 %v3653_v20  ;;  %v1295_v20 = vmul.f32 %v7686_v26, %v1143_v32  ;;  %v3654_v26 = vpack.c.bf16 %v13111_v18, %v13112_v28  ;;  %v2131_v32 = vadd.f32 0.0001, %v2093_v33  ;;  %v2734_v61 = vadd.f32 %v2696_v36, %v10772_v14  ;;  %v13696_v28 = vld [vmem:[#allocation26_spill] sm:$0xff]  ;;  %v13698_v33 = vld [vmem:[#allocation20_spill] sm:$0xff] }
 0x354   :  { %3451 = vperm.xlu1 %7267, %v2206_v22   ;;  %6584 = vmatprep.mubr.msk.bf16.mxu0 %vm7803_vm2, %v13553_v57  ;;  %v11097_v22 = vpop.permute.xlu0 %2906  ;;  %v7688_v34 = vpop.eup %7687  ;;  %v11126_v18 = vadd.f32 %v10947_v12, %v3543_v4  ;;  %7693 = vrcp.f32 %v917_v46  ;;  %v2467_v49 = vadd.f32 %v2429_v41, %v13696_v28  ;;  %v3545_v47 = vadd.f32 %v3507_v43, %v10793_v56  ;;  %v13699_v56 = vld [vmem:[#allocation65_spill] sm:$0xff] }
 0x355   :  { %v7690_v51 = vpop.eup %7689  ;;  %v1600_v8 = vmul.f32 %v7688_v34, %v1448_v15  ;;  %v11134_v14 = vadd.f32 %v10687_v60, %v13697_v59  ;;  %v2699_v15 = vmul.f32 %v10133_v48, %v13698_v33  ;;  %v3004_v34 = vadd.f32 %v2966_v39, %v2734_v61 }
 0x356   :  { %v11090_v21 = vpop.permute.xlu1 %2341  ;;  %v1599_v23 = vmul.f32 %v7690_v51, %v1447_v3  ;;  %v3625_v51 = vmax.f32 %v11114_v55, 0.0  ;;  %v1752_v4 = vsub.f32 %v7793_v52, %v13687_v13  ;;  %7695 = vrcp.f32 %v2131_v32 }
 0x357   :  { %v1221_v28 = vadd.f32 0.0001, %v1183_v44  ;;  %v1184_v43 = vadd.f32 %v10687_v60, %v13699_v56  ;;  %v3236_v41 = vmul.f32 %v10167_v42, %v10800_v16  ;;  %v2969_v36 = vmul.f32 %v10164_v38, %v10899_v37 }
 0x358   :  { %7268 = vset.pattern.permute.xlu1 %v13232_v0  ;;  %v7692_v46 = vpop.eup %7691  ;;  %v2430_v61 = vmul.f32 %v10126_v31, %v10933_v35  ;;  %v3626_v39 = vmax.f32 %v11126_v18, 0.0  ;;  %v11151_v13 = vadd.f32 %v10947_v12, %v3545_v47  ;;  %v2737_v52 = vadd.f32 %v2699_v15, %v2467_v49 }
 0x359   :  { %2646 = vperm.xlu1 %7268, %v1295_v20   ;;  %v3239_v60 = vmul.f32 %v10167_v42, %v10913_v19  ;;  %v2700_v37 = vmul.f32 %v10133_v48, %v10974_v10  ;;  %v3274_v32 = vadd.f32 %v3236_v41, %v3004_v34  ;;  %v1904_v49 = vmul.f32 %v7692_v46, %v1752_v4  ;;  %v13700_v10 = vld [vmem:[#allocation40_spill] sm:$0xff]  ;;  %v13701_v4 = vld [vmem:[#allocation50_spill] sm:$0xff] }
 0x35a   :  { %v3655_v44 = vpack.c.bf16 %v3626_v39, %v3625_v51  ;;  %v841_v19 = vsub.f32 %v11079_v58, %v13692_v17  ;;  %v3007_v47 = vadd.f32 %v2969_v36, %v2737_v52  ;;  %v2468_v33 = vadd.f32 %v2430_v61, %v13700_v10 }
 0x35b   :  { %v11121_v27 = vpop.permute.xlu0 %2926  ;;  %v11123_v20 = vpop.permute.xlu1 %3411  ;;  %6585 = vmatmul.mubr.bf16.gmra.mrb[68].mxu0 %v3654_v26  ;;  %v2432_v26 = vmul.f32 %v10126_v31, %v11066_v45  ;;  %v3508_v45 = vmul.f32 %v10173_v2, %v10954_v7  ;;  %v2970_v15 = vmul.f32 %v10164_v38, %v11040_v29  ;;  %7697 = vrcp.f32 %v1221_v28 }
 0x35c   :  { %6588 = vmatprep.mubr.msk.bf16.mxu0 %vm7803_vm2, %v13553_v57  ;;  %v1222_v41 = vadd.f32 0.0001, %v1184_v43  ;;  %v3628_v7 = vmax.f32 %v11151_v13, 0.0  ;;  %v3277_v17 = vadd.f32 %v3239_v60, %v3007_v47  ;;  %v2433_v43 = vmul.f32 %v10126_v31, %v11090_v21  ;;  %v13702_v47 = vld [vmem:[#allocation97_spill] sm:$0xff] }
 0x35d   :  { %7269 = vset.pattern.permute.xlu1 %v13203_v11  ;;  %v2470_v46 = vadd.f32 %v2432_v26, %v13701_v4  ;;  %v3546_v28 = vadd.f32 %v3508_v45, %v10902_v30  ;;  %v3240_v60 = vmul.f32 %v10167_v42, %v11049_v1  ;;  %v3242_v30 = vmul.f32 %v10167_v42, %v13702_v47 }
 0x35e   :  { %2916 = vperm.xlu1 %7269, %v1599_v23   ;;  %v7694_v52 = vpop.eup %7693  ;;  %7699 = vrcp.f32 %v1222_v41  ;;  %v7794_v41 = vld [vmem:[%s12938_s0 + $0x100] sm:$0xff] }
 0x35f   :  { %v993_v21 = vmul.f32 %v7694_v52, %v841_v19  ;;  %v13705_v52 = vld [vmem:[#allocation22_spill] sm:$0xff] }
 0x360   :  { %v3387_v3 = vpop.permute.xlu0 %3386  ;;  %v2607_v16 = vpop.permute.xlu1 %2606 }
 0x361   :  { %v3506_v35 = vmul.f32 %v10173_v2, %v3387_v3  ;;  %v2702_v23 = vmul.f32 %v10133_v48, %v2607_v16 }
 0x362   :  { %2921 = vperm.xlu1 %7269, %v1600_v8   ;;  %v2738_v8 = vadd.f32 %v2700_v37, %v2468_v33 }
 0x363   :  { %v3544_v34 = vadd.f32 %v3506_v35, %v3274_v32  ;;  %6589 = vmatmul.mubr.bf16.gmra.mrb[72].mxu0 %v3655_v44  ;;  %v2740_v26 = vadd.f32 %v2702_v23, %v2470_v46  ;;  %v7696_v44 = vpop.eup %7695  ;;  %v1526_v46 = vadd.f32 0.0001, %v11134_v14  ;;  %v1791_v14 = vadd.f32 %v11079_v58, %v13705_v52 }
 0x364   :  { %v3402_v3 = vpop.permute.xlu0 %3401  ;;  %6592 = vmatprep.mubr.msk.bf16.mxu0 %vm7803_vm2, %v13553_v57  ;;  %v3008_v32 = vadd.f32 %v2970_v15, %v2738_v8  ;;  %v13704_v8 = vld [vmem:[#allocation85_spill] sm:$0xff] }
 0x365   :  { %v11177_v36 = vadd.f32 %v10947_v12, %v3544_v34  ;;  %v3509_v61 = vmul.f32 %v10173_v2, %v3402_v3  ;;  %v2877_v29 = vpop.permute.xlu1 %2876  ;;  %v11201_v3 = vadd.f32 %v10947_v12, %v3546_v28  ;;  %7701 = vrcp.f32 %v1526_v46 }
 0x366   :  { %v2972_v16 = vmul.f32 %v10164_v38, %v2877_v29  ;;  %7270 = vset.pattern.permute.xlu1 %v13210_v25  ;;  %v3278_v19 = vadd.f32 %v3240_v60, %v3008_v32  ;;  %v2055_v29 = vsub.f32 %v7794_v41, %v13694_v54 }
 0x367   :  { %v3627_v37 = vmax.f32 %v11177_v36, 0.0  ;;  %v3547_v35 = vadd.f32 %v3509_v61, %v3277_v17  ;;  %3191 = vperm.xlu1 %7270, %v1904_v49   ;;  %v13703_v49 = vld [vmem:[#allocation79_spill] sm:$0xff]  ;;  %v3511_v17 = vmul.f32 %v10173_v2, %v11123_v20  ;;  %v2703_v61 = vmul.f32 %v10133_v48, %v13704_v8 }
 0x368   :  { %v3010_v45 = vadd.f32 %v2972_v16, %v2740_v26  ;;  %v3407_v10 = vpop.permute.xlu0 %3406  ;;  %v2471_v34 = vadd.f32 %v2433_v43, %v13703_v49  ;;  %v7698_v26 = vpop.eup %7697  ;;  %v2207_v16 = vmul.f32 %v7696_v44, %v2055_v29  ;;  %v3629_v47 = vmax.f32 %v11201_v3, 0.0  ;;  %v13708_v8 = vld [vmem:[#allocation151_spill] sm:$0xff] }
 0x369   :  { %v11191_v23 = vadd.f32 %v10947_v12, %v3547_v35  ;;  %v3510_v33 = vmul.f32 %v10173_v2, %v3407_v10  ;;  %v2882_v15 = vpop.permute.xlu1 %2881  ;;  %v3656_v1 = vpack.c.bf16 %v3628_v7, %v3627_v37  ;;  %v3549_v35 = vadd.f32 %v3511_v17, %v11051_v24  ;;  %v13707_v10 = vld [vmem:[#allocation114_spill] sm:$0xff]  ;;  %v7700_v17 = vpop.eup %7699 }
 0x36a   :  { %v3280_v4 = vadd.f32 %v3242_v30, %v3010_v45  ;;  %v2973_v28 = vmul.f32 %v10164_v38, %v2882_v15  ;;  %v2741_v32 = vadd.f32 %v2703_v61, %v2471_v34  ;;  %v1829_v30 = vadd.f32 0.0001, %v1791_v14  ;;  %v13706_v45 = vld [vmem:[#allocation99_spill] sm:$0xff]  ;;  %v11251_v14 = vld [vmem:[%s12938_s0 + $0x118] sm:$0xff] }
 0x36b   :  { %2386 = vperm.xlu1 %7270, %v993_v21   ;;  %6593 = vmatmul.mubr.bf16.gmra.mrb[76].mxu0 %v3656_v1  ;;  %v13118_v20 = vmax.f32 %v11191_v23, 0.0  ;;  %v3548_v43 = vadd.f32 %v3510_v33, %v3278_v19  ;;  %v881_v21 = vadd.f32 %v13707_v10, %v13706_v45  ;;  %v1145_v44 = vsub.f32 %v11079_v58, %v13695_v50  ;;  %v11240_v50 = vld [vmem:[%s12938_s0 + $0x128] sm:$0xff] }
 0x36c   :  { %6596 = vmatprep.mubr.msk.bf16.mxu0 %vm7803_vm2, %v13553_v57  ;;  %v3011_v15 = vadd.f32 %v2973_v28, %v2741_v32  ;;  %v3422_v1 = vpop.permute.xlu0 %3421  ;;  %v11235_v19 = vadd.f32 %v10947_v12, %v3549_v35  ;;  %v882_v61 = vadd.f32 %v11240_v50, %v13708_v8  ;;  %7703 = vrcp.f32 %v1829_v30 }
 0x36d   :  { %v11226_v33 = vadd.f32 %v10947_v12, %v3548_v43  ;;  %v3657_v24 = vpack.c.bf16 %v13118_v20, %v3629_v47  ;;  %v1297_v46 = vmul.f32 %v7698_v26, %v1145_v44  ;;  %v919_v41 = vadd.f32 0.0001, %v881_v21 }
 0x36e   :  { %v3152_v60 = vpop.permute.xlu1 %3151  ;;  %v3513_v29 = vmul.f32 %v10173_v2, %v3422_v1  ;;  %v1146_v28 = vsub.f32 %v11251_v14, %v13699_v56  ;;  %v13116_v32 = vmax.f32 %v11235_v19, 0.0  ;;  %v1450_v35 = vsub.f32 %v11251_v14, %v13697_v59 }
 0x36f   :  { %v3243_v54 = vmul.f32 %v10167_v42, %v3152_v60  ;;  %7271 = vset.pattern.permute.xlu1 %v13234_v6  ;;  %v13117_v43 = vmax.f32 %v11226_v33, 0.0  ;;  %7705 = vrcp.f32 %v919_v41  ;;  %v7702_v21 = vpop.eup %7701  ;;  %v13710_v41 = vld [vmem:[#allocation76_spill] sm:$0xff] }
 0x370   :  { %3456 = vperm.xlu1 %7271, %v2207_v16   ;;  %v1298_v16 = vmul.f32 %v7700_v17, %v1146_v28  ;;  %v1602_v59 = vmul.f32 %v7702_v21, %v1450_v35  ;;  %v11290_v21 = vld [vmem:[%s12938_s0 + $0x120] sm:$0xff] }
 0x371   :  { %v3281_v49 = vadd.f32 %v3243_v54, %v3011_v15  ;;  %v920_v54 = vadd.f32 0.0001, %v882_v61  ;;  %v13709_v15 = vld [vmem:[#allocation152_spill] sm:$0xff]  ;;  %v3658_v56 = vpack.c.bf16 %v13116_v32, %v13117_v43 }
 0x372   :  { %v11232_v34 = vpop.permute.xlu1 %2346  ;;  %v2096_v44 = vadd.f32 %v11251_v14, %v13709_v15 }
 0x373   :  { %6597 = vmatmul.mubr.bf16.gmra.mrb[80].mxu0 %v3657_v24  ;;  %v3551_v26 = vadd.f32 %v3513_v29, %v3281_v49  ;;  %7707 = vrcp.f32 %v920_v54 }
 0x374   :  { %7272 = vset.pattern.permute.xlu1 %v13232_v0  ;;  %6600 = vmatprep.mubr.msk.bf16.mxu0 %vm7803_vm2, %v13553_v57  ;;  %v2134_v17 = vadd.f32 0.0001, %v2096_v44 }
 0x375   :  { %2656 = vperm.xlu1 %7272, %v1297_v46   ;;  %v11267_v24 = vadd.f32 %v10947_v12, %v3551_v26  ;;  %v1753_v26 = vsub.f32 %v11079_v58, %v13705_v52  ;;  %v843_v58 = vsub.f32 %v11290_v21, %v13706_v45  ;;  %v13711_v52 = vld [vmem:[#allocation18_spill] sm:$0xff] }
 0x376   :  { %v7704_v61 = vpop.eup %7703  ;;  %7709 = vrcp.f32 %v2134_v17  ;;  %v1489_v44 = vadd.f32 %v11290_v21, %v13711_v52 }
 0x377   :  { %v3417_v60 = vpop.permute.xlu1 %3416  ;;  %v13114_v28 = vmax.f32 %v11267_v24, 0.0  ;;  %v1905_v35 = vmul.f32 %v7704_v61, %v1753_v26  ;;  %v2434_v61 = vmul.f32 %v10126_v31, %v11232_v34  ;;  %v13715_v34 = vld [vmem:[#allocation60_spill] sm:$0xff] }
 0x378   :  { %v3512_v30 = vmul.f32 %v10173_v2, %v3417_v60 }
 0x379   :  { %2661 = vperm.xlu1 %7272, %v1298_v16   ;;  %v7706_v54 = vpop.eup %7705  ;;  %v2472_v32 = vadd.f32 %v2434_v61, %v13715_v34  ;;  %v1147_v61 = vsub.f32 %v11290_v21, %v13710_v41 }
 0x37a   :  { %v3550_v1 = vadd.f32 %v3512_v30, %v3280_v4  ;;  %v1185_v4 = vadd.f32 %v13707_v10, %v13710_v41 }
 0x37b   :  { %6601 = vmatmul.mubr.bf16.gmra.mrb[84].mxu0 %v3658_v56  ;;  %v844_v56 = vsub.f32 %v11240_v50, %v13708_v8 }
 0x37c   :  { %v11270_v49 = vadd.f32 %v10947_v12, %v3550_v1  ;;  %v2617_v46 = vpop.permute.xlu1 %2616  ;;  %6604 = vmatprep.mubr.msk.bf16.mxu0 %vm7803_vm2, %v13553_v57  ;;  %v1223_v30 = vadd.f32 0.0001, %v1185_v4  ;;  %v995_v1 = vmul.f32 %v7706_v54, %v843_v58  ;;  %v13712_v4 = vld [vmem:[#allocation59_spill] sm:$0xff] }
 0x37d   :  { %7274 = vset.pattern.permute.xlu1 %v13203_v11  ;;  %v7708_v17 = vpop.eup %7707  ;;  %v2704_v8 = vmul.f32 %v10133_v48, %v2617_v46  ;;  %v2974_v46 = vmul.f32 %v10164_v38, %v11057_v53 }
 0x37e   :  { %v13115_v29 = vmax.f32 %v11270_v49, 0.0  ;;  %2931 = vperm.xlu1 %7274, %v1602_v59   ;;  %7711 = vrcp.f32 %v1223_v30  ;;  %v996_v58 = vmul.f32 %v7708_v17, %v844_v56  ;;  %v2058_v30 = vsub.f32 %v11251_v14, %v13709_v15 }
 0x37f   :  { %v2742_v20 = vadd.f32 %v2704_v8, %v2472_v32 }
 0x380   :  { %v2622_v16 = vpop.permute.xlu1 %2621  ;;  %v3659_v60 = vpack.c.bf16 %v13114_v28, %v13115_v29  ;;  %v13714_v28 = vld [vmem:[#allocation101_spill] sm:$0xff] }
 0x381   :  { %v2705_v10 = vmul.f32 %v10133_v48, %v2622_v16  ;;  %v13713_v16 = vld [vmem:[#allocation24_spill] sm:$0xff]  ;;  %v3245_v29 = vmul.f32 %v10167_v42, %v13714_v28 }
 0x382   :  { %7275 = vset.pattern.permute.xlu1 %v13210_v25 }
 0x383   :  { %3196 = vperm.xlu1 %7275, %v1905_v35   ;;  %6605 = vmatmul.mubr.bf16.gmra.mrb[88].mxu0 %v3659_v60  ;;  %v2743_v45 = vadd.f32 %v2705_v10, %v13712_v4  ;;  %v1490_v60 = vadd.f32 %v11240_v50, %v13713_v16  ;;  %v1527_v35 = vadd.f32 0.0001, %v1489_v44  ;;  %v13716_v44 = vld [vmem:[#allocation63_spill] sm:$0xff] }
 0x384   :  { %6608 = vmatprep.mubr.msk.bf16.mxu0 %vm7803_vm2, %v13553_v57 }
 0x385   :  { %v2892_v59 = vpop.permute.xlu1 %2891  ;;  %v1528_v43 = vadd.f32 0.0001, %v1490_v60  ;;  %7713 = vrcp.f32 %v1527_v35 }
 0x386   :  { %v2975_v26 = vmul.f32 %v10164_v38, %v2892_v59  ;;  %v7710_v59 = vpop.eup %7709 }
 0x387   :  { %2396 = vperm.xlu1 %7275, %v995_v1   ;;  %v1794_v1 = vadd.f32 %v11240_v50, %v13716_v44  ;;  %v2210_v28 = vmul.f32 %v7710_v59, %v2058_v30  ;;  %7715 = vrcp.f32 %v1528_v43  ;;  %v1452_v30 = vsub.f32 %v11240_v50, %v13713_v16 }
 0x388   :  { %v3013_v54 = vadd.f32 %v2975_v26, %v2743_v45  ;;  %v7712_v14 = vpop.eup %7711  ;;  %v13717_v45 = vld [vmem:[#allocation92_spill] sm:$0xff]  ;;  %v3427_v26 = vpop.permute.xlu0 %3426 }
 0x389   :  { %v1832_v15 = vadd.f32 0.0001, %v1794_v1  ;;  %v2097_v32 = vadd.f32 %v11290_v21, %v13717_v45  ;;  %v1299_v53 = vmul.f32 %v7712_v14, %v1147_v61  ;;  %v3514_v8 = vmul.f32 %v10173_v2, %v3427_v26 }
 0x38a   :  { %v3157_v10 = vpop.permute.xlu1 %3156  ;;  %v3283_v4 = vadd.f32 %v3245_v29, %v3013_v54  ;;  %v3012_v29 = vadd.f32 %v2974_v46, %v2742_v20  ;;  %v1451_v20 = vsub.f32 %v11290_v21, %v13711_v52 }
 0x38b   :  { %2401 = vperm.xlu1 %7275, %v996_v58   ;;  %v3244_v56 = vmul.f32 %v10167_v42, %v3157_v10  ;;  %7717 = vrcp.f32 %v1832_v15  ;;  %v2135_v54 = vadd.f32 0.0001, %v2097_v32 }
 0x38d   :  { %v3282_v60 = vadd.f32 %v3244_v56, %v3012_v29  ;;  %7719 = vrcp.f32 %v2135_v54  ;;  %v13718_v29 = vld [vmem:[#allocation29_spill] sm:$0xff] }
 0x38e   :  { %v2357_v17 = vpop.permute.xlu1 %2356 }
 0x38f   :  { %7277 = vset.pattern.permute.xlu1 %v13234_v6  ;;  %v7714_v43 = vpop.eup %7713  ;;  %v3552_v58 = vadd.f32 %v3514_v8, %v3282_v60  ;;  %v2436_v52 = vmul.f32 %v10126_v31, %v2357_v17 }
 0x390   :  { %3471 = vperm.xlu1 %7277, %v2210_v28   ;;  %v1603_v34 = vmul.f32 %v7714_v43, %v1451_v20 }
 0x391   :  { %v7716_v59 = vpop.eup %7715  ;;  %v2474_v61 = vadd.f32 %v2436_v52, %v13718_v29  ;;  %v13721_v52 = vld [vmem:[#allocation88_spill] sm:$0xff] }
 0x392   :  { %v2362_v35 = vpop.permute.xlu1 %2361  ;;  %v1604_v28 = vmul.f32 %v7716_v59, %v1452_v30  ;;  %v13720_v30 = vld [vmem:[#allocation89_spill] sm:$0xff] }
 0x393   :  { %v2437_v60 = vmul.f32 %v10126_v31, %v2362_v35  ;;  %v13719_v35 = vld [vmem:[#allocation64_spill] sm:$0xff] }
 0x394   :  { %7278 = vset.pattern.permute.xlu1 %v13232_v0  ;;  %v11331_v0 = vadd.f32 %v10947_v12, %v3552_v58  ;;  %v3246_v54 = vmul.f32 %v10167_v42, %v13719_v35 }
 0x395   :  { %2666 = vperm.xlu1 %7278, %v1299_v53   ;;  %v7718_v16 = vpop.eup %7717 }
 0x397   :  { %v3432_v41 = vpop.permute.xlu1 %3431  ;;  %v7720_v43 = vpop.eup %7719 }
 0x398   :  { %v3515_v10 = vmul.f32 %v10173_v2, %v3432_v41 }
 0x399   :  { %7280 = vset.pattern.permute.xlu1 %v13203_v11  ;;  %v3635_v11 = vmax.f32 %v11331_v0, 0.0  ;;  %v11898_v0 = vld [vmem:[%s12945_s7 + $0x2] ss:$0 sm:$0xff] }
 0x39a   :  { %v3553_v1 = vadd.f32 %v3515_v10, %v3283_v4  ;;  %2936 = vperm.xlu1 %7280, %v1603_v34   ;;  %v1756_v4 = vsub.f32 %v11240_v50, %v13716_v44  ;;  %v11353_v50 = vld [vmem:[%s12945_s7] ss:$0 sm:$0xff]  ;;  %v2059_v44 = vsub.f32 %v11290_v21, %v13717_v45  ;;  %v2475_v34 = vadd.f32 %v2437_v60, %v13720_v30  ;;  %v3442_v60 = vpop.permute.xlu0 %3441 }
 0x39b   :  { %v3517_v35 = vmul.f32 %v10173_v2, %v3442_v60 }
 0x39c   :  { %v11335_v46 = vadd.f32 %v10947_v12, %v3553_v1  ;;  %v2627_v56 = vpop.permute.xlu1 %2626  ;;  %v1908_v32 = vmul.f32 %v7718_v16, %v1756_v4  ;;  %v2211_v41 = vmul.f32 %v7720_v43, %v2059_v44 }
 0x39d   :  { %v2706_v15 = vmul.f32 %v10133_v48, %v2627_v56  ;;  %v2707_v56 = vmul.f32 %v10133_v48, %v13721_v52 }
 0x39e   :  { %v3636_v14 = vmax.f32 %v11335_v46, 0.0  ;;  %2941 = vperm.xlu1 %7280, %v1604_v28  }
 0x39f   :  { %v2744_v53 = vadd.f32 %v2706_v15, %v2474_v61  ;;  %v2745_v15 = vadd.f32 %v2707_v56, %v2475_v34 }
 0x3a0   :  { %v3660_v17 = vpack.c.bf16 %v3636_v14, %v3635_v11 }
 0x3a1   :  { %v2897_v26 = vpop.permute.xlu1 %2896 }
 0x3a2   :  { %v2976_v8 = vmul.f32 %v10164_v38, %v2897_v26  ;;  %7281 = vset.pattern.permute.xlu1 %v13210_v25  ;;  %6609 = vmatmul.mubr.bf16.gmra.mrb[92].mxu0 %v3660_v17 }
 0x3a3   :  { %3211 = vperm.xlu1 %7281, %v1908_v32   ;;  %6612 = vmatprep.mubr.msk.bf16.mxu0 %vm7803_vm2, %v13553_v57 }
 0x3a4   :  { %v3014_v20 = vadd.f32 %v2976_v8, %v2744_v53 }
 0x3a5   :  { %v2902_v58 = vpop.permute.xlu1 %2901  ;;  %v3771_v25 = vpop.f32.mrb[40].mxu0 }
 0x3a6   :  { %v3772_v10 = vadd.f32 %v11353_v50, %v3771_v25  ;;  %v6558_v59 = vpop.f32.mrb[41].mxu0  ;;  %v3284_v1 = vadd.f32 %v3246_v54, %v3014_v20  ;;  %v2977_v21 = vmul.f32 %v10164_v38, %v2902_v58 }
 0x3a7   :  { %7282 = vset.pattern.permute.xlu1 %v13234_v6  ;;  %v3774_v28 = vpop.f32.mrb[42].mxu0 }
 0x3a8   :  { %v3775_v45 = vadd.f32 %v11353_v50, %v3774_v28  ;;  %3476 = vperm.xlu1 %7282, %v2211_v41   ;;  %v6559_v16 = vpop.f32.mrb[43].mxu0  ;;  %v3922_v4 = vmax.f32 %v3772_v10, 0.0  ;;  %v3015_v32 = vadd.f32 %v2977_v21, %v2745_v15 }
 0x3aa   :  { %v3923_v29 = vmax.f32 %v3775_v45, 0.0  ;;  %v3172_v61 = vpop.permute.xlu1 %3171 }
 0x3ab   :  { %v3247_v17 = vmul.f32 %v10167_v42, %v3172_v61  ;;  %v13722_v61 = vld [vmem:[#allocation77_spill] sm:$0xff] }
 0x3ac   :  { %v3960_v26 = vpack.c.bf16 %v3923_v29, %v3922_v4 }
 0x3ad   :  { %v3285_v6 = vadd.f32 %v3247_v17, %v3015_v32 }
 0x3ae   :  { %v3779_v53 = vpop.f32.mrb[44].mxu0  ;;  %v2367_v8 = vpop.permute.xlu1 %2366  ;;  %6649 = vmatmul.mubr.bf16.vlgmr.msra.gmra.mrb[112].mxu1 %v3960_v26 }
 0x3af   :  { %v3780_v43 = vadd.f32 %v11353_v50, %v3779_v53  ;;  %v6562_v44 = vpop.f32.mrb[45].mxu0  ;;  %6652 = vmatprep.mubr.msk.bf16.mxu1 %vm7803_vm2, %v13553_v57  ;;  %v3555_v25 = vadd.f32 %v3517_v35, %v3285_v6  ;;  %v2438_v59 = vmul.f32 %v10126_v31, %v2367_v8  ;;  %v2978_v53 = vmul.f32 %v10164_v38, %v11097_v22 }
 0x3b0   :  { %v3782_v54 = vpop.f32.mrb[46].mxu0 }
 0x3b1   :  { %v3783_v20 = vadd.f32 %v11353_v50, %v3782_v54  ;;  %v6563_v58 = vpop.f32.mrb[47].mxu0  ;;  %v3924_v41 = vmax.f32 %v3780_v43, 0.0  ;;  %v11377_v21 = vadd.f32 %v10947_v12, %v3555_v25  ;;  %v2476_v17 = vadd.f32 %v2438_v59, %v13722_v61 }
 0x3b3   :  { %v3925_v30 = vmax.f32 %v3783_v20, 0.0  ;;  %v3437_v34 = vpop.permute.xlu1 %3436  ;;  %v13135_v6 = vmax.f32 %v11377_v21, 0.0 }
 0x3b4   :  { %v3516_v10 = vmul.f32 %v10173_v2, %v3437_v34 }
 0x3b5   :  { %v3961_v28 = vpack.c.bf16 %v3925_v30, %v3924_v41 }
 0x3b6   :  { %v3554_v52 = vadd.f32 %v3516_v10, %v3284_v1  ;;  %v3787_v56 = vpop.f32.mrb[48].mxu0 }
 0x3b7   :  { %v3788_v45 = vadd.f32 %v11353_v50, %v3787_v56  ;;  %v6566_v16 = vpop.f32.mrb[49].mxu0  ;;  %6653 = vmatmul.mubr.bf16.gmra.mrb[116].mxu1 %v3961_v28 }
 0x3b8   :  { %v11381_v15 = vadd.f32 %v10947_v12, %v3554_v52  ;;  %v3790_v4 = vpop.f32.mrb[50].mxu0  ;;  %v2637_v29 = vpop.permute.xlu1 %2636  ;;  %6656 = vmatprep.mubr.msk.bf16.mxu1 %vm7803_vm2, %v13553_v57  ;;  %v13723_v52 = vld [vmem:[#allocation107_spill] sm:$0xff] }
 0x3b9   :  { %v3791_v1 = vadd.f32 %v11353_v50, %v3790_v4  ;;  %v2708_v32 = vmul.f32 %v10133_v48, %v2637_v29  ;;  %v6567_v26 = vpop.f32.mrb[51].mxu0  ;;  %v3926_v8 = vmax.f32 %v3788_v45, 0.0  ;;  %v13724_v29 = vld [vmem:[#allocation105_spill] sm:$0xff] }
 0x3ba   :  { %v3637_v60 = vmax.f32 %v11381_v15, 0.0  ;;  %v3249_v61 = vmul.f32 %v10167_v42, %v13724_v29 }
 0x3bb   :  { %v3927_v43 = vmax.f32 %v3791_v1, 0.0  ;;  %v2746_v44 = vadd.f32 %v2708_v32, %v2476_v17 }
 0x3bc   :  { %v2642_v35 = vpop.permute.xlu1 %2641  ;;  %v3661_v54 = vpack.c.bf16 %v13135_v6, %v3637_v60 }
 0x3bd   :  { %v3962_v20 = vpack.c.bf16 %v3927_v43, %v3926_v8  ;;  %v3016_v58 = vadd.f32 %v2978_v53, %v2746_v44  ;;  %v2709_v25 = vmul.f32 %v10133_v48, %v2642_v35  ;;  %v3447_v43 = vpop.permute.xlu0 %3446 }
 0x3be   :  { %v3795_v41 = vpop.f32.mrb[52].mxu0  ;;  %6613 = vmatmul.mubr.bf16.gmra.mrb[96].mxu0 %v3661_v54  ;;  %v3518_v54 = vmul.f32 %v10173_v2, %v3447_v43 }
 0x3bf   :  { %v3796_v30 = vadd.f32 %v11353_v50, %v3795_v41  ;;  %v6570_v34 = vpop.f32.mrb[53].mxu0  ;;  %6657 = vmatmul.mubr.bf16.gmra.mrb[120].mxu1 %v3962_v20  ;;  %6616 = vmatprep.mubr.msk.bf16.mxu0 %vm7803_vm2, %v13553_v57  ;;  %v2747_v56 = vadd.f32 %v2709_v25, %v13723_v52 }
 0x3c0   :  { %v3798_v22 = vpop.f32.mrb[54].mxu0  ;;  %6660 = vmatprep.mubr.msk.bf16.mxu1 %vm7803_vm2, %v13553_v57 }
 0x3c1   :  { %v3799_v10 = vadd.f32 %v11353_v50, %v3798_v22  ;;  %v6571_v59 = vpop.f32.mrb[55].mxu0  ;;  %v2912_v28 = vpop.permute.xlu1 %2911  ;;  %v3928_v16 = vmax.f32 %v3796_v30, 0.0 }
 0x3c2   :  { %v2979_v45 = vmul.f32 %v10164_v38, %v2912_v28  ;;  %v3462_v25 = vpop.permute.xlu0 %3461 }
 0x3c3   :  { %v3929_v4 = vmax.f32 %v3799_v10, 0.0 }
 0x3c4   :  { %v3017_v17 = vadd.f32 %v2979_v45, %v2747_v56 }
 0x3c5   :  { %v3963_v1 = vpack.c.bf16 %v3929_v4, %v3928_v16 }
 0x3c6   :  { %v3177_v32 = vpop.permute.xlu1 %3176  ;;  %v3287_v26 = vadd.f32 %v3249_v61, %v3017_v17  ;;  %v11418_v28 = vpop.permute.xlu0 %3466  ;;  %v7302_v61 = vld [vmem:[%s12942_s6 + $0x88] sm:$0xff]   ;;  %v13725_v17 = vld [vmem:[#allocation81_spill] sm:$0xff] }
 0x3c7   :  { %6661 = vmatmul.mubr.bf16.gmra.mrb[124].mxu1 %v3963_v1  ;;  %v3248_v53 = vmul.f32 %v10167_v42, %v3177_v32 }
 0x3c8   :  { %6664 = vmatprep.mubr.msk.bf16.mxu1 %vm7803_vm2, %v13553_v57 }
 0x3c9   :  { %v3286_v44 = vadd.f32 %v3248_v53, %v3016_v58 }
 0x3ca   :  { %v2377_v8 = vpop.permute.xlu1 %2376  ;;  %v2652_v4 = vpop.permute.xlu0 %2651 }
 0x3cb   :  { %v3556_v20 = vadd.f32 %v3518_v54, %v3286_v44  ;;  %v2711_v32 = vmul.f32 %v10133_v48, %v2652_v4 }
 0x3cd   :  { %v11413_v22 = vadd.f32 %v10947_v12, %v3556_v20 }
 0x3ce   :  { %v2382_v35 = vpop.permute.xlu1 %2381  ;;  %v11440_v43 = vpop.permute.xlu0 %2671 }
 0x3cf   :  { %v13124_v52 = vmax.f32 %v11413_v22, 0.0  ;;  %v2441_v16 = vmul.f32 %v10126_v31, %v2382_v35 }
 0x3d1   :  { %v2479_v1 = vadd.f32 %v2441_v16, %v13725_v17 }
 0x3d3   :  { %v3452_v41 = vpop.permute.xlu1 %3451  ;;  %v2749_v35 = vadd.f32 %v2711_v32, %v2479_v1 }
 0x3d4   :  { %v3519_v30 = vmul.f32 %v10173_v2, %v3452_v41  ;;  %v13726_v41 = vld [vmem:[#allocation45_spill] sm:$0xff] }
 0x3d6   :  { %v3557_v34 = vadd.f32 %v3519_v30, %v3287_v26  ;;  %v2440_v26 = vmul.f32 %v10126_v31, %v2377_v8 }
 0x3d8   :  { %v11416_v10 = vadd.f32 %v10947_v12, %v3557_v34  ;;  %v2647_v59 = vpop.permute.xlu1 %2646  ;;  %v7301_v12 = vld [vmem:[%s12942_s6 + $0x80] sm:$0xff]   ;;  %v2478_v30 = vadd.f32 %v2440_v26, %v13726_v41 }
 0x3d9   :  { %6725 = vmatpush3.bf16.msra.mxu0 %v7301_v12  ;;  %v2710_v44 = vmul.f32 %v10133_v48, %v2647_v59  ;;  %v3187_v12 = vpop.permute.xlu0 %3186 }
 0x3da   :  { %v13119_v58 = vmax.f32 %v11416_v10, 0.0  ;;  %6726 = vmatprep.subr.bf16.mxu0 %v13553_v57  ;;  %v3250_v59 = vmul.f32 %v10167_v42, %v3187_v12  ;;  %v7304_v12 = vld [vmem:[%s12942_s6 + $0x98] sm:$0xff]  }
 0x3db   :  { %v2748_v16 = vadd.f32 %v2710_v44, %v2478_v30 }
 0x3dc   :  { %v3662_v56 = vpack.c.bf16 %v13119_v58, %v13124_v52 }
 0x3dd   :  { %v2917_v45 = vpop.permute.xlu1 %2916  ;;  %6727 = vmatpush3.bf16.msra.mxu0 %v7302_v61 }
 0x3de   :  { %6617 = vmatmul.mubr.bf16.gmra.mrb[100].mxu0 %v3662_v56  ;;  %6728 = vmatprep.subr.bf16.mxu0 %v13553_v57  ;;  %v2980_v34 = vmul.f32 %v10164_v38, %v2917_v45  ;;  %v11454_v45 = vld [vmem:[%s12944_s5] ss:$0 sm:$0xff] }
 0x3df   :  { %6620 = vmatprep.mubr.msk.bf16.mxu0 %vm7803_vm2, %v13553_v57 }
 0x3e0   :  { %v3018_v61 = vadd.f32 %v2980_v34, %v2748_v16 }
 0x3e1   :  { %v2922_v29 = vpop.permute.xlu1 %2921 }
 0x3e2   :  { %v2981_v53 = vmul.f32 %v10164_v38, %v2922_v29  ;;  %v3521_v29 = vmul.f32 %v10173_v2, %v3462_v25  ;;  %v3288_v32 = vadd.f32 %v3250_v59, %v3018_v61  ;;  %v7306_v59 = vld [vmem:[%s12942_s6 + $0xa8] sm:$0xff]  }
 0x3e4   :  { %v3019_v56 = vadd.f32 %v2981_v53, %v2749_v35  ;;  %v7303_v35 = vld [vmem:[%s12942_s6 + $0x90] sm:$0xff]  }
 0x3e5   :  { %6729 = vmatpush3.bf16.msra.mxu0 %v7303_v35 }
 0x3e6   :  { %v3192_v54 = vpop.permute.xlu1 %3191  ;;  %6730 = vmatprep.subr.bf16.mxu0 %v13553_v57 }
 0x3e7   :  { %v3251_v20 = vmul.f32 %v10167_v42, %v3192_v54 }
 0x3e9   :  { %v3289_v8 = vadd.f32 %v3251_v20, %v3019_v56  ;;  %v13727_v20 = vld [vmem:[#allocation56_spill] sm:$0xff]  ;;  %v2982_v56 = vmul.f32 %v10164_v38, %v11121_v27  ;;  %6731 = vmatpush3.bf16.msra.mxu0 %v7304_v12  ;;  %v7305_v27 = vld [vmem:[%s12942_s6 + $0xa0] sm:$0xff]  }
 0x3ea   :  { %v2387_v4 = vpop.permute.xlu1 %2386  ;;  %6732 = vmatprep.subr.bf16.mxu0 %v13553_v57 }
 0x3eb   :  { %v3559_v17 = vadd.f32 %v3521_v29, %v3289_v8  ;;  %v2442_v54 = vmul.f32 %v10126_v31, %v2387_v4 }
 0x3ed   :  { %v11457_v53 = vadd.f32 %v11454_v45, %v3559_v17  ;;  %v2480_v41 = vadd.f32 %v2442_v54, %v13727_v20  ;;  %6733 = vmatpush3.bf16.msra.mxu0 %v7305_v27  ;;  %v2392_v17 = vpop.permute.xlu0 %2391  ;;  %v7307_v54 = vld [vmem:[%s12942_s6 + $0xb0] sm:$0xff]  }
 0x3ee   :  { %6734 = vmatprep.subr.bf16.mxu0 %v13553_v57  ;;  %v13728_v20 = vld [vmem:[#allocation104_spill] sm:$0xff] }
 0x3ef   :  { %v3457_v1 = vpop.permute.xlu1 %3456  ;;  %v13120_v34 = vmax.f32 %v11457_v53, 0.0 }
 0x3f0   :  { %v3520_v58 = vmul.f32 %v10173_v2, %v3457_v1 }
 0x3f1   :  { %6735 = vmatpush3.bf16.msra.mxu0 %v7306_v59  ;;  %v3202_v27 = vpop.permute.xlu0 %3201 }
 0x3f2   :  { %v3558_v26 = vadd.f32 %v3520_v58, %v3288_v32  ;;  %v2443_v32 = vmul.f32 %v10126_v31, %v2392_v17  ;;  %6736 = vmatprep.subr.bf16.mxu0 %v13553_v57  ;;  %v3253_v17 = vmul.f32 %v10167_v42, %v3202_v27 }
 0x3f4   :  { %v11460_v25 = vadd.f32 %v11454_v45, %v3558_v26  ;;  %v2657_v44 = vpop.permute.xlu1 %2656 }
 0x3f5   :  { %v2712_v58 = vmul.f32 %v10133_v48, %v2657_v44  ;;  %6737 = vmatpush3.bf16.msra.mxu0 %v7307_v54 }
 0x3f6   :  { %v13121_v30 = vmax.f32 %v11460_v25, 0.0  ;;  %6738 = vmatprep.subr.bf16.mxu0 %v13553_v57 }
 0x3f7   :  { %v2750_v16 = vadd.f32 %v2712_v58, %v2480_v41  ;;  %v2481_v41 = vadd.f32 %v2443_v32, %v13728_v20 }
 0x3f8   :  { %v2662_v8 = vpop.permute.xlu1 %2661  ;;  %v3663_v4 = vpack.c.bf16 %v13120_v34, %v13121_v30  ;;  %v3207_v30 = vpop.permute.xlu0 %3206 }
 0x3f9   :  { %v3020_v29 = vadd.f32 %v2982_v56, %v2750_v16  ;;  %v2713_v26 = vmul.f32 %v10133_v48, %v2662_v8  ;;  %v7308_v56 = vld [vmem:[%s12942_s6 + $0xb8] sm:$0xff]   ;;  %v3522_v8 = vmul.f32 %v10173_v2, %v11418_v28 }
 0x3fa   :  { %6621 = vmatmul.mubr.bf16.gmra.mrb[104].mxu0 %v3663_v4 }
 0x3fb   :  { %6624 = vmatprep.mubr.msk.bf16.mxu0 %vm7803_vm2, %v13553_v57  ;;  %v2751_v16 = vadd.f32 %v2713_v26, %v2481_v41  ;;  %6739 = vmatpush3.bf16.msra.mxu0 %v7308_v56 }
 0x3fc   :  { %6908 = vmatprep.subr.bf16.mxu0 %v13553_v57 }
 0x3fd   :  { %v2932_v61 = vpop.permute.xlu1 %2931 }
 0x3fe   :  { %v2983_v58 = vmul.f32 %v10164_v38, %v2932_v61 }
 0x400   :  { %v3021_v59 = vadd.f32 %v2983_v58, %v2751_v16 }
 0x402   :  { %v3197_v1 = vpop.permute.xlu1 %3196  ;;  %v3291_v32 = vadd.f32 %v3253_v17, %v3021_v59 }
 0x403   :  { %v3252_v44 = vmul.f32 %v10167_v42, %v3197_v1 }
 0x405   :  { %v3290_v4 = vadd.f32 %v3252_v44, %v3020_v29 }
 0x406   :  { %v2397_v35 = vpop.permute.xlu1 %2396 }
 0x407   :  { %v3560_v61 = vadd.f32 %v3522_v8, %v3290_v4 }
 0x409   :  { %v11508_v26 = vadd.f32 %v11454_v45, %v3560_v61 }
 0x40a   :  { %v2402_v12 = vpop.permute.xlu1 %2401 }
 0x40b   :  { %v13123_v58 = vmax.f32 %v11508_v26, 0.0  ;;  %v2445_v8 = vmul.f32 %v10126_v31, %v2402_v12 }
 0x40f   :  { %v3472_v1 = vpop.permute.xlu1 %3471 }
 0x410   :  { %v3523_v54 = vmul.f32 %v10173_v2, %v3472_v1 }
 0x412   :  { %v3561_v20 = vadd.f32 %v3523_v54, %v3291_v32  ;;  %v2444_v54 = vmul.f32 %v10126_v31, %v2397_v35 }
 0x414   :  { %v11511_v29 = vadd.f32 %v11454_v45, %v3561_v20  ;;  %v2667_v44 = vpop.permute.xlu1 %2666  ;;  %v13729_v20 = vld [vmem:[#allocation90_spill] sm:$0xff] }
 0x416   :  { %v13122_v28 = vmax.f32 %v11511_v29, 0.0  ;;  %v3803_v41 = vpop.f32.mrb[56].mxu0 }
 0x417   :  { %v3804_v56 = vadd.f32 %v11353_v50, %v3803_v41  ;;  %v6574_v16 = vpop.f32.mrb[57].mxu0  ;;  %v2483_v41 = vadd.f32 %v2445_v8, %v13729_v20 }
 0x418   :  { %v3806_v4 = vpop.f32.mrb[58].mxu0  ;;  %v3664_v27 = vpack.c.bf16 %v13122_v28, %v13123_v58  ;;  %v2714_v28 = vmul.f32 %v10133_v48, %v2667_v44 }
 0x419   :  { %v3807_v59 = vadd.f32 %v11353_v50, %v3806_v4  ;;  %v2937_v17 = vpop.permute.xlu1 %2936  ;;  %v6575_v61 = vpop.f32.mrb[59].mxu0  ;;  %v3930_v1 = vmax.f32 %v3804_v56, 0.0  ;;  %v2715_v4 = vmul.f32 %v10133_v48, %v11440_v43 }
 0x41a   :  { %6625 = vmatmul.mubr.bf16.gmra.mrb[108].mxu0 %v3664_v27  ;;  %v13730_v61 = vld [vmem:[#allocation86_spill] sm:$0xff]  ;;  %v2984_v31 = vmul.f32 %v10164_v38, %v2937_v17 }
 0x41b   :  { %v3931_v32 = vmax.f32 %v3807_v59, 0.0  ;;  %6628 = vmatprep.mubr.msk.bf16.mxu0 %vm7803_vm2, %v13553_v57  ;;  %v2482_v58 = vadd.f32 %v2444_v54, %v13730_v61  ;;  %v2753_v8 = vadd.f32 %v2715_v4, %v2483_v41  ;;  %v3254_v61 = vmul.f32 %v10167_v42, %v3207_v30 }
 0x41d   :  { %v2942_v16 = vpop.permute.xlu1 %2941  ;;  %v3964_v34 = vpack.c.bf16 %v3931_v32, %v3930_v1  ;;  %v3482_v32 = vpop.permute.xlu0 %3481  ;;  %v2752_v48 = vadd.f32 %v2714_v28, %v2482_v58 }
 0x41e   :  { %v3811_v12 = vpop.f32.mrb[60].mxu0  ;;  %v2985_v27 = vmul.f32 %v10164_v38, %v2942_v16  ;;  %v3525_v54 = vmul.f32 %v10173_v2, %v3482_v32 }
 0x41f   :  { %v3812_v56 = vadd.f32 %v11353_v50, %v3811_v12  ;;  %v6578_v59 = vpop.f32.mrb[61].mxu0  ;;  %6665 = vmatmul.mubr.bf16.gmra.mrb[128].mxu1 %v3964_v34 }
 0x420   :  { %v3814_v35 = vpop.f32.mrb[62].mxu0  ;;  %6668 = vmatprep.mubr.msk.bf16.mxu1 %vm7803_vm2, %v13553_v57  ;;  %v3023_v20 = vadd.f32 %v2985_v27, %v2753_v8  ;;  %v3022_v59 = vadd.f32 %v2984_v31, %v2752_v48 }
 0x421   :  { %v3815_v44 = vadd.f32 %v11353_v50, %v3814_v35  ;;  %v6579_v1 = vpop.f32.mrb[63].mxu0  ;;  %v3932_v16 = vmax.f32 %v3812_v56, 0.0 }
 0x422   :  { %v3212_v43 = vpop.permute.xlu1 %3211  ;;  %v3292_v28 = vadd.f32 %v3254_v61, %v3022_v59 }
 0x423   :  { %v3933_v12 = vmax.f32 %v3815_v44, 0.0  ;;  %v3255_v34 = vmul.f32 %v10167_v42, %v3212_v43 }
 0x425   :  { %v3293_v38 = vadd.f32 %v3255_v34, %v3023_v20  ;;  %v3965_v17 = vpack.c.bf16 %v3933_v12, %v3932_v16 }
 0x426   :  { %v3819_v52 = vpop.f32.mrb[64].mxu0 }
 0x427   :  { %v3563_v41 = vadd.f32 %v3525_v54, %v3293_v38  ;;  %v3820_v4 = vadd.f32 %v11353_v50, %v3819_v52  ;;  %v3477_v35 = vpop.permute.xlu1 %3476  ;;  %v6582_v1 = vpop.f32.mrb[65].mxu0  ;;  %6669 = vmatmul.mubr.bf16.gmra.mrb[132].mxu1 %v3965_v17 }
 0x428   :  { %v3524_v58 = vmul.f32 %v10173_v2, %v3477_v35  ;;  %v3822_v27 = vpop.f32.mrb[66].mxu0  ;;  %6672 = vmatprep.mubr.msk.bf16.mxu1 %vm7803_vm2, %v13553_v57 }
 0x429   :  { %v3823_v56 = vadd.f32 %v11353_v50, %v3822_v27  ;;  %v6583_v31 = vpop.f32.mrb[67].mxu0  ;;  %v11545_v42 = vadd.f32 %v11454_v45, %v3563_v41  ;;  %v3934_v30 = vmax.f32 %v3820_v4, 0.0 }
 0x42a   :  { %v3562_v8 = vadd.f32 %v3524_v58, %v3292_v28 }
 0x42b   :  { %v3935_v44 = vmax.f32 %v3823_v56, 0.0  ;;  %v13133_v43 = vmax.f32 %v11545_v42, 0.0 }
 0x42c   :  { %v11548_v52 = vadd.f32 %v11454_v45, %v3562_v8 }
 0x42d   :  { %v3966_v32 = vpack.c.bf16 %v3935_v44, %v3934_v30 }
 0x42e   :  { %v13134_v48 = vmax.f32 %v11548_v52, 0.0  ;;  %v3827_v2 = vpop.f32.mrb[68].mxu0 }
 0x42f   :  { %v3828_v20 = vadd.f32 %v11353_v50, %v3827_v2  ;;  %v6586_v16 = vpop.f32.mrb[69].mxu0  ;;  %6673 = vmatmul.mubr.bf16.gmra.mrb[136].mxu1 %v3966_v32 }
 0x430   :  { %v3830_v12 = vpop.f32.mrb[70].mxu0  ;;  %v3665_v34 = vpack.c.bf16 %v13133_v43, %v13134_v48  ;;  %6676 = vmatprep.mubr.msk.bf16.mxu1 %vm7803_vm2, %v13553_v57 }
 0x431   :  { %v3831_v45 = vadd.f32 %v11353_v50, %v3830_v12  ;;  %v6587_v59 = vpop.f32.mrb[71].mxu0  ;;  %v3936_v54 = vmax.f32 %v3828_v20, 0.0 }
 0x432   :  { %6629 = vmatmul.mubr.bf16.gmra.mrb[112].mxu0 %v3665_v34 }
 0x433   :  { %v3937_v38 = vmax.f32 %v3831_v45, 0.0  ;;  %6740 = vmatprep.mubr.msk.bf16.mxu0 %vm7803_vm2, %v13553_v57 }
 0x435   :  { %v3967_v17 = vpack.c.bf16 %v3937_v38, %v3936_v54 }
 0x436   :  { %v3835_v61 = vpop.f32.mrb[72].mxu0 }
 0x437   :  { %v3836_v41 = vadd.f32 %v11353_v50, %v3835_v61  ;;  %v6590_v4 = vpop.f32.mrb[73].mxu0  ;;  %6677 = vmatmul.mubr.bf16.gmra.mrb[140].mxu1 %v3967_v17 }
 0x438   :  { %v3838_v35 = vpop.f32.mrb[74].mxu0  ;;  %6680 = vmatprep.mubr.msk.bf16.mxu1 %vm7803_vm2, %v13553_v57 }
 0x439   :  { %v3839_v1 = vadd.f32 %v11353_v50, %v3838_v35  ;;  %v6591_v28 = vpop.f32.mrb[75].mxu0  ;;  %v3938_v58 = vmax.f32 %v3836_v41, 0.0 }
 0x43b   :  { %v3939_v27 = vmax.f32 %v3839_v1, 0.0 }
 0x43d   :  { %v3968_v56 = vpack.c.bf16 %v3939_v27, %v3938_v58 }
 0x43e   :  { %v3843_v31 = vpop.f32.mrb[76].mxu0 }
 0x43f   :  { %v3844_v8 = vadd.f32 %v11353_v50, %v3843_v31  ;;  %v6594_v30 = vpop.f32.mrb[77].mxu0  ;;  %6681 = vmatmul.mubr.bf16.gmra.mrb[144].mxu1 %v3968_v56 }
 0x440   :  { %v3846_v44 = vpop.f32.mrb[78].mxu0  ;;  %6684 = vmatprep.mubr.msk.bf16.mxu1 %vm7803_vm2, %v13553_v57 }
 0x441   :  { %v3847_v32 = vadd.f32 %v11353_v50, %v3846_v44  ;;  %v6595_v2 = vpop.f32.mrb[79].mxu0  ;;  %v3940_v20 = vmax.f32 %v3844_v8, 0.0 }
 0x443   :  { %v3941_v16 = vmax.f32 %v3847_v32, 0.0 }
 0x445   :  { %v3969_v12 = vpack.c.bf16 %v3941_v16, %v3940_v20 }
 0x446   :  { %v3851_v34 = vpop.f32.mrb[80].mxu0 }
 0x447   :  { %v3852_v45 = vadd.f32 %v11353_v50, %v3851_v34  ;;  %v6598_v59 = vpop.f32.mrb[81].mxu0  ;;  %6685 = vmatmul.mubr.bf16.gmra.mrb[148].mxu1 %v3969_v12 }
 0x448   :  { %v3854_v54 = vpop.f32.mrb[82].mxu0  ;;  %6688 = vmatprep.mubr.msk.bf16.mxu1 %vm7803_vm2, %v13553_v57 }
 0x449   :  { %v3855_v38 = vadd.f32 %v11353_v50, %v3854_v54  ;;  %v6599_v17 = vpop.f32.mrb[83].mxu0  ;;  %v3942_v61 = vmax.f32 %v3852_v45, 0.0 }
 0x44b   :  { %v3943_v41 = vmax.f32 %v3855_v38, 0.0 }
 0x44d   :  { %v3970_v4 = vpack.c.bf16 %v3943_v41, %v3942_v61 }
 0x44e   :  { %v3859_v35 = vpop.f32.mrb[84].mxu0 }
 0x44f   :  { %v3860_v1 = vadd.f32 %v11353_v50, %v3859_v35  ;;  %v6602_v28 = vpop.f32.mrb[85].mxu0  ;;  %6689 = vmatmul.mubr.bf16.gmra.mrb[152].mxu1 %v3970_v4 }
 0x450   :  { %v3862_v58 = vpop.f32.mrb[86].mxu0  ;;  %6692 = vmatprep.mubr.msk.bf16.mxu1 %vm7803_vm2, %v13553_v57 }
 0x451   :  { %v3863_v27 = vadd.f32 %v11353_v50, %v3862_v58  ;;  %v6603_v56 = vpop.f32.mrb[87].mxu0  ;;  %v3944_v31 = vmax.f32 %v3860_v1, 0.0  ;;  %v11589_v58 = vld [vmem:[%s12945_s7 + $0x1] ss:$0 sm:$0xff] }
 0x453   :  { %v3945_v8 = vmax.f32 %v3863_v27, 0.0 }
 0x455   :  { %v3971_v30 = vpack.c.bf16 %v3945_v8, %v3944_v31 }
 0x456   :  { %v3867_v44 = vpop.f32.mrb[88].mxu0 }
 0x457   :  { %v3868_v32 = vadd.f32 %v11353_v50, %v3867_v44  ;;  %v6606_v2 = vpop.f32.mrb[89].mxu0  ;;  %6693 = vmatmul.mubr.bf16.gmra.mrb[156].mxu1 %v3971_v30  ;;  %v13731_v30 = vld [vmem:[#allocation71_spill] sm:$0xff] }
 0x458   :  { %v3870_v20 = vpop.f32.mrb[90].mxu0  ;;  %6696 = vmatprep.mubr.msk.bf16.mxu1 %vm7803_vm2, %v13553_v57  ;;  %v13732_v44 = vmax.f32 %v13731_v30, 0.0 }
 0x459   :  { %v3871_v16 = vadd.f32 %v11353_v50, %v3870_v20  ;;  %v6607_v12 = vpop.f32.mrb[91].mxu0  ;;  %v3946_v34 = vmax.f32 %v3868_v32, 0.0 }
 0x45b   :  { %v3947_v45 = vmax.f32 %v3871_v16, 0.0  ;;  %v13733_v16 = vld [vmem:[#allocation94_spill] sm:$0xff] }
 0x45c   :  { %v13734_v12 = vmax.f32 %v13733_v16, 0.0 }
 0x45d   :  { %v3972_v59 = vpack.c.bf16 %v3947_v45, %v3946_v34 }
 0x45f   :  { %6697 = vmatmul.mubr.bf16.gmra.mrb[160].mxu1 %v3972_v59 }
 0x460   :  { %6700 = vmatprep.mubr.msk.bf16.mxu1 %vm7803_vm2, %v13553_v57 }
 0x475   :  { %v3875_v54 = vpop.f32.mrb[92].mxu0 }
 0x476   :  { %v3876_v38 = vadd.f32 %v11353_v50, %v3875_v54  ;;  %v6610_v17 = vpop.f32.mrb[93].mxu0 }
 0x477   :  { %v3878_v61 = vpop.f32.mrb[94].mxu0 }
 0x478   :  { %v3879_v41 = vadd.f32 %v11353_v50, %v3878_v61  ;;  %v6611_v4 = vpop.f32.mrb[95].mxu0  ;;  %v3948_v35 = vmax.f32 %v3876_v38, 0.0 }
 0x479   :  { %v13735_v4 = vld [vmem:[#allocation61_spill] sm:$0xff] }
 0x47a   :  { %v3949_v1 = vmax.f32 %v3879_v41, 0.0 }
 0x47c   :  { %v3973_v28 = vpack.c.bf16 %v3949_v1, %v3948_v35  ;;  %v13736_v35 = vmax.f32 %v13735_v4, 0.0 }
 0x47e   :  { %6701 = vmatmul.mubr.bf16.gmra.mrb[164].mxu1 %v3973_v28 }
 0x47f   :  { %6704 = vmatprep.mubr.msk.bf16.mxu1 %vm7803_vm2, %v13553_v57 }
 0x481   :  { %v4086_v27 = vpop.f32.mrb[112].mxu1 }
 0x482   :  { %v4087_v56 = vadd.f32 %v11589_v58, %v4086_v27  ;;  %v6650_v31 = vpop.f32.mrb[113].mxu1 }
 0x483   :  { %v4089_v8 = vpop.f32.mrb[114].mxu1 }
 0x484   :  { %v11596_v32 = vadd.f32 %v4087_v56, %v13732_v44  ;;  %v4090_v2 = vadd.f32 %v11589_v58, %v4089_v8  ;;  %v6651_v20 = vpop.f32.mrb[115].mxu1  ;;  %v13737_v56 = vld [vmem:[#allocation93_spill] sm:$0xff] }
 0x485   :  { %v13738_v31 = vmax.f32 %v13737_v56, 0.0 }
 0x486   :  { %v11601_v34 = vadd.f32 %v4090_v2, %v13734_v12  ;;  %v13132_v45 = vmax.f32 %v11596_v32, 0.0 }
 0x488   :  { %v13125_v59 = vmax.f32 %v11601_v34, 0.0 }
 0x48a   :  { %v4313_v54 = vpack.c.bf16 %v13125_v59, %v13132_v45  ;;  %v4094_v38 = vpop.f32.mrb[116].mxu1  ;;  %v13747_v45 = vld [vmem:[#allocation62_spill] sm:$0xff] }
 0x48b   :  { %v4095_v17 = vadd.f32 %v11589_v58, %v4094_v38  ;;  %v6654_v61 = vpop.f32.mrb[117].mxu1 }
 0x48c   :  { %v4097_v41 = vpop.f32.mrb[118].mxu1  ;;  %6741 = vmatmul.mubr.bf16.vlgmr.msra.gmra.mrb[116].mxu0 %v4313_v54 }
 0x48d   :  { %v11612_v1 = vadd.f32 %v4095_v17, %v13736_v35  ;;  %v4098_v28 = vadd.f32 %v11589_v58, %v4097_v41  ;;  %v6655_v27 = vpop.f32.mrb[119].mxu1  ;;  %6744 = vmatprep.mubr.msk.bf16.mxu0 %vm7803_vm2, %v13553_v57 }
 0x48f   :  { %v11619_v8 = vadd.f32 %v4098_v28, %v13738_v31  ;;  %v13131_v30 = vmax.f32 %v11612_v1, 0.0  ;;  %v13739_v28 = vld [vmem:[#allocation42_spill] sm:$0xff] }
 0x490   :  { %v13740_v27 = vmax.f32 %v13739_v28, 0.0 }
 0x491   :  { %v13126_v44 = vmax.f32 %v11619_v8, 0.0  ;;  %v3883_v2 = vpop.f32.mrb[96].mxu0 }
 0x492   :  { %v3884_v20 = vadd.f32 %v11353_v50, %v3883_v2  ;;  %v4102_v16 = vpop.f32.mrb[120].mxu1  ;;  %v6614_v12 = vpop.f32.mrb[97].mxu0 }
 0x493   :  { %v4103_v54 = vadd.f32 %v11589_v58, %v4102_v16  ;;  %v6658_v38 = vpop.f32.mrb[121].mxu1  ;;  %v3886_v17 = vpop.f32.mrb[98].mxu0  ;;  %v4314_v61 = vpack.c.bf16 %v13126_v44, %v13131_v30 }
 0x494   :  { %v3887_v41 = vadd.f32 %v11353_v50, %v3886_v17  ;;  %v4105_v4 = vpop.f32.mrb[122].mxu1  ;;  %v6615_v35 = vpop.f32.mrb[99].mxu0  ;;  %v3950_v16 = vmax.f32 %v3884_v20, 0.0  ;;  %v13741_v38 = vld [vmem:[#allocation127_spill] sm:$0xff] }
 0x495   :  { %v11632_v56 = vadd.f32 %v4103_v54, %v13740_v27  ;;  %v4106_v31 = vadd.f32 %v11589_v58, %v4105_v4  ;;  %v6659_v2 = vpop.f32.mrb[123].mxu1  ;;  %6745 = vmatmul.mubr.bf16.gmra.mrb[120].mxu0 %v4314_v61  ;;  %v13742_v59 = vmax.f32 %v13741_v38, 0.0  ;;  %v13743_v61 = vld [vmem:[#allocation103_spill] sm:$0xff] }
 0x496   :  { %v3951_v12 = vmax.f32 %v3887_v41, 0.0  ;;  %6748 = vmatprep.mubr.msk.bf16.mxu0 %vm7803_vm2, %v13553_v57  ;;  %v13744_v41 = vmax.f32 %v13743_v61, 0.0 }
 0x497   :  { %v11639_v44 = vadd.f32 %v4106_v31, %v13742_v59  ;;  %v13130_v35 = vmax.f32 %v11632_v56, 0.0 }
 0x498   :  { %v3974_v17 = vpack.c.bf16 %v3951_v12, %v3950_v16  ;;  %v13745_v12 = vld [vmem:[#allocation44_spill] sm:$0xff] }
 0x499   :  { %v13127_v28 = vmax.f32 %v11639_v44, 0.0  ;;  %v13746_v38 = vmax.f32 %v13745_v12, 0.0 }
 0x49a   :  { %v4110_v54 = vpop.f32.mrb[124].mxu1  ;;  %6705 = vmatmul.mubr.bf16.gmra.mrb[168].mxu1 %v3974_v17 }
 0x49b   :  { %v4111_v4 = vadd.f32 %v11589_v58, %v4110_v54  ;;  %v6662_v27 = vpop.f32.mrb[125].mxu1  ;;  %v4315_v20 = vpack.c.bf16 %v13127_v28, %v13130_v35  ;;  %6708 = vmatprep.mubr.msk.bf16.mxu1 %vm7803_vm2, %v13553_v57 }
 0x49c   :  { %v4113_v59 = vpop.f32.mrb[126].mxu1 }
 0x49d   :  { %v11652_v31 = vadd.f32 %v4111_v4, %v13744_v41  ;;  %v4114_v2 = vadd.f32 %v11589_v58, %v4113_v59  ;;  %v6663_v16 = vpop.f32.mrb[127].mxu1  ;;  %6749 = vmatmul.mubr.bf16.gmra.mrb[124].mxu0 %v4315_v20 }
 0x49e   :  { %6752 = vmatprep.mubr.msk.bf16.mxu0 %vm7803_vm2, %v13553_v57 }
 0x49f   :  { %v11659_v17 = vadd.f32 %v4114_v2, %v13746_v38  ;;  %v13129_v54 = vmax.f32 %v11652_v31, 0.0 }
 0x4a1   :  { %v13128_v27 = vmax.f32 %v11659_v17, 0.0 }
 0x4a3   :  { %v4316_v4 = vpack.c.bf16 %v13128_v27, %v13129_v54  ;;  %v7312_v27 = vld [vmem:[%s12942_s6 + $0xd8] sm:$0xff]  }
 0x4a5   :  { %6753 = vmatmul.mubr.bf16.gmra.mrb[128].mxu0 %v4316_v4  ;;  %v7309_v4 = vld [vmem:[%s12942_s6 + $0xc0] sm:$0xff]  }
 0x4a6   :  { %6756 = vmatprep.mubr.msk.bf16.mxu0 %vm7803_vm2, %v13553_v57  ;;  %6817 = vmatpush3.bf16.msra.mxu1 %v7309_v4 }
 0x4a7   :  { %6818 = vmatprep.subr.bf16.mxu1 %v13553_v57 }
 0x4b1   :  { %v3891_v20 = vpop.f32.mrb[100].mxu0 }
 0x4b2   :  { %v3892_v59 = vadd.f32 %v11353_v50, %v3891_v20  ;;  %v6618_v61 = vpop.f32.mrb[101].mxu0  ;;  %v7310_v20 = vld [vmem:[%s12942_s6 + $0xc8] sm:$0xff]  }
 0x4b3   :  { %v3894_v41 = vpop.f32.mrb[102].mxu0  ;;  %6819 = vmatpush3.bf16.msra.mxu1 %v7310_v20 }
 0x4b4   :  { %v3895_v2 = vadd.f32 %v11353_v50, %v3894_v41  ;;  %v6619_v16 = vpop.f32.mrb[103].mxu0  ;;  %v3952_v12 = vmax.f32 %v3892_v59, 0.0  ;;  %6820 = vmatprep.subr.bf16.mxu1 %v13553_v57 }
 0x4b6   :  { %v3953_v38 = vmax.f32 %v3895_v2, 0.0 }
 0x4b8   :  { %v3975_v28 = vpack.c.bf16 %v3953_v38, %v3952_v12  ;;  %v7311_v12 = vld [vmem:[%s12942_s6 + $0xd0] sm:$0xff]  }
 0x4b9   :  { %6821 = vmatpush3.bf16.msra.mxu1 %v7311_v12 }
 0x4ba   :  { %6709 = vmatmul.mubr.bf16.gmra.mrb[172].mxu1 %v3975_v28  ;;  %6822 = vmatprep.subr.bf16.mxu1 %v13553_v57 }
 0x4bb   :  { %6712 = vmatprep.mubr.msk.bf16.mxu1 %vm7803_vm2, %v13553_v57 }
 0x4bd   :  { %6823 = vmatpush3.bf16.msra.mxu1 %v7312_v27  ;;  %v7315_v27 = vld [vmem:[%s12942_s6 + $0xf0] sm:$0xff]  }
 0x4be   :  { %6824 = vmatprep.subr.bf16.mxu1 %v13553_v57 }
 0x4cd   :  { %v3899_v59 = vpop.f32.mrb[104].mxu0 }
 0x4ce   :  { %v3900_v28 = vadd.f32 %v11353_v50, %v3899_v59  ;;  %v6622_v61 = vpop.f32.mrb[105].mxu0  ;;  %v7313_v59 = vld [vmem:[%s12942_s6 + $0xe0] sm:$0xff]  }
 0x4cf   :  { %v3902_v41 = vpop.f32.mrb[106].mxu0  ;;  %6825 = vmatpush3.bf16.msra.mxu1 %v7313_v59  ;;  %v7316_v61 = vld [vmem:[%s12942_s6 + $0xf8] sm:$0xff]  }
 0x4d0   :  { %v3903_v2 = vadd.f32 %v11353_v50, %v3902_v41  ;;  %v6623_v16 = vpop.f32.mrb[107].mxu0  ;;  %v3954_v38 = vmax.f32 %v3900_v28, 0.0  ;;  %6826 = vmatprep.subr.bf16.mxu1 %v13553_v57  ;;  %v7314_v28 = vld [vmem:[%s12942_s6 + $0xe8] sm:$0xff]  }
 0x4d2   :  { %v3955_v4 = vmax.f32 %v3903_v2, 0.0 }
 0x4d3   :  { %6827 = vmatpush3.bf16.msra.mxu1 %v7314_v28 }
 0x4d4   :  { %v3976_v20 = vpack.c.bf16 %v3955_v4, %v3954_v38  ;;  %6828 = vmatprep.subr.bf16.mxu1 %v13553_v57 }
 0x4d6   :  { %6713 = vmatmul.mubr.bf16.gmra.mrb[176].mxu1 %v3976_v20 }
 0x4d7   :  { %6716 = vmatprep.mubr.msk.bf16.mxu1 %vm7803_vm2, %v13553_v57  ;;  %6829 = vmatpush3.bf16.msra.mxu1 %v7315_v27 }
 0x4d8   :  { %6830 = vmatprep.subr.bf16.mxu1 %v13553_v57 }
 0x4db   :  { %6831 = vmatpush3.bf16.msra.mxu1 %v7316_v61  ;;  %v13748_v61 = vmax.f32 %v13747_v45, 0.0 }
 0x4dc   :  { %7000 = vmatprep.subr.bf16.mxu1 %v13553_v57 }
 0x4ed   :  { %v3907_v41 = vpop.f32.mrb[108].mxu0 }
 0x4ee   :  { %v3908_v2 = vadd.f32 %v11353_v50, %v3907_v41  ;;  %v6626_v16 = vpop.f32.mrb[109].mxu0 }
 0x4ef   :  { %v3910_v12 = vpop.f32.mrb[110].mxu0  ;;  %v13749_v16 = vld [vmem:[#allocation111_spill] sm:$0xff] }
 0x4f0   :  { %v3911_v38 = vadd.f32 %v11353_v50, %v3910_v12  ;;  %v6627_v4 = vpop.f32.mrb[111].mxu0  ;;  %v3956_v20 = vmax.f32 %v3908_v2, 0.0  ;;  %v13750_v6 = vmax.f32 %v13749_v16, 0.0 }
 0x4f2   :  { %v3957_v59 = vmax.f32 %v3911_v38, 0.0  ;;  %v4118_v28 = vpop.f32.mrb[128].mxu1 }
 0x4f3   :  { %v4119_v27 = vadd.f32 %v11589_v58, %v4118_v28  ;;  %v6666_v54 = vpop.f32.mrb[129].mxu1  ;;  %v13752_v28 = vmax.f32 %v10995_v63, 0.0 }
 0x4f4   :  { %v3977_v35 = vpack.c.bf16 %v3957_v59, %v3956_v20  ;;  %v4121_v30 = vpop.f32.mrb[130].mxu1 }
 0x4f5   :  { %v11714_v43 = vadd.f32 %v4119_v27, %v13748_v61  ;;  %v4122_v48 = vadd.f32 %v11589_v58, %v4121_v30  ;;  %v6667_v41 = vpop.f32.mrb[131].mxu1 }
 0x4f6   :  { %6717 = vmatmul.mubr.bf16.gmra.mrb[180].mxu1 %v3977_v35 }
 0x4f7   :  { %v11719_v12 = vadd.f32 %v4122_v48, %v13750_v6  ;;  %6720 = vmatprep.mubr.msk.bf16.mxu1 %vm7803_vm2, %v13553_v57  ;;  %v4283_v2 = vmax.f32 %v11714_v43, 0.0  ;;  %v13751_v6 = vmax.f32 %v10989_v9, 0.0 }
 0x4f9   :  { %v13138_v54 = vmax.f32 %v11719_v12, 0.0 }
 0x4fa   :  { %v4126_v38 = vpop.f32.mrb[132].mxu1 }
 0x4fb   :  { %v4127_v45 = vadd.f32 %v11589_v58, %v4126_v38  ;;  %v6670_v4 = vpop.f32.mrb[133].mxu1  ;;  %v4317_v30 = vpack.c.bf16 %v13138_v54, %v4283_v2 }
 0x4fc   :  { %v4129_v35 = vpop.f32.mrb[134].mxu1 }
 0x4fd   :  { %v11732_v48 = vadd.f32 %v4127_v45, %v13751_v6  ;;  %v4130_v20 = vadd.f32 %v11589_v58, %v4129_v35  ;;  %v6671_v59 = vpop.f32.mrb[135].mxu1  ;;  %6757 = vmatmul.mubr.bf16.gmra.mrb[132].mxu0 %v4317_v30  ;;  %v13753_v30 = vmax.f32 %v11026_v62, 0.0 }
 0x4fe   :  { %6760 = vmatprep.mubr.msk.bf16.mxu0 %vm7803_vm2, %v13553_v57 }
 0x4ff   :  { %v11739_v27 = vadd.f32 %v4130_v20, %v13752_v28  ;;  %v13137_v61 = vmax.f32 %v11732_v48, 0.0 }
 0x501   :  { %v13136_v41 = vmax.f32 %v11739_v27, 0.0 }
 0x502   :  { %v4134_v16 = vpop.f32.mrb[136].mxu1 }
 0x503   :  { %v4135_v9 = vadd.f32 %v11589_v58, %v4134_v16  ;;  %v6674_v38 = vpop.f32.mrb[137].mxu1  ;;  %v4318_v45 = vpack.c.bf16 %v13136_v41, %v13137_v61  ;;  %v13754_v16 = vmax.f32 %v11034_v5, 0.0 }
 0x504   :  { %v4137_v4 = vpop.f32.mrb[138].mxu1 }
 0x505   :  { %v11750_v35 = vadd.f32 %v4135_v9, %v13753_v30  ;;  %v4138_v63 = vadd.f32 %v11589_v58, %v4137_v4  ;;  %v3915_v6 = vpop.f32.mrb[112].mxu0  ;;  %v6675_v20 = vpop.f32.mrb[139].mxu1  ;;  %6761 = vmatmul.mubr.bf16.gmra.mrb[136].mxu0 %v4318_v45 }
 0x506   :  { %v3916_v59 = vadd.f32 %v11353_v50, %v3915_v6  ;;  %v6630_v28 = vpop.f32.mrb[113].mxu0  ;;  %6764 = vmatprep.mubr.msk.bf16.mxu0 %vm7803_vm2, %v13553_v57 }
 0x507   :  { %v11758_v38 = vadd.f32 %v4138_v63, %v13754_v16  ;;  %v3918_v41 = vpop.f32.mrb[114].mxu0  ;;  %v4287_v30 = vmax.f32 %v11750_v35, 0.0 }
 0x508   :  { %v3919_v62 = vadd.f32 %v11353_v50, %v3918_v41  ;;  %v6631_v9 = vpop.f32.mrb[115].mxu0  ;;  %v3958_v20 = vmax.f32 %v3916_v59, 0.0  ;;  %v13755_v50 = vmax.f32 %v11064_v40, 0.0 }
 0x509   :  { %v4288_v4 = vmax.f32 %v11758_v38, 0.0 }
 0x50a   :  { %v3959_v45 = vmax.f32 %v3919_v62, 0.0  ;;  %v4142_v61 = vpop.f32.mrb[140].mxu1 }
 0x50b   :  { %v4143_v6 = vadd.f32 %v11589_v58, %v4142_v61  ;;  %v6678_v28 = vpop.f32.mrb[141].mxu1  ;;  %v4319_v5 = vpack.c.bf16 %v4288_v4, %v4287_v30  ;;  %v13756_v61 = vld [vmem:[#allocation69_spill] sm:$0xff] }
 0x50c   :  { %v3978_v63 = vpack.c.bf16 %v3959_v45, %v3958_v20  ;;  %v4145_v16 = vpop.f32.mrb[142].mxu1  ;;  %v13757_v59 = vmax.f32 %v13756_v61, 0.0 }
 0x50d   :  { %v11770_v41 = vadd.f32 %v4143_v6, %v13755_v50  ;;  %v4146_v9 = vadd.f32 %v11589_v58, %v4145_v16  ;;  %v6679_v54 = vpop.f32.mrb[143].mxu1  ;;  %6765 = vmatmul.mubr.bf16.gmra.mrb[140].mxu0 %v4319_v5 }
 0x50e   :  { %6721 = vmatmul.mubr.bf16.gmra.mrb[184].mxu1 %v3978_v63  ;;  %6768 = vmatprep.mubr.msk.bf16.mxu0 %vm7803_vm2, %v13553_v57 }
 0x50f   :  { %v11777_v62 = vadd.f32 %v4146_v9, %v13757_v59  ;;  %6832 = vmatprep.mubr.msk.bf16.mxu1 %vm7803_vm2, %v13553_v57  ;;  %v4289_v20 = vmax.f32 %v11770_v41, 0.0 }
 0x511   :  { %v4290_v40 = vmax.f32 %v11777_v62, 0.0 }
 0x512   :  { %v4150_v45 = vpop.f32.mrb[144].mxu1 }
 0x513   :  { %v4151_v6 = vadd.f32 %v11589_v58, %v4150_v45  ;;  %v6682_v54 = vpop.f32.mrb[145].mxu1  ;;  %v4320_v28 = vpack.c.bf16 %v4290_v40, %v4289_v20 }
 0x514   :  { %v4153_v5 = vpop.f32.mrb[146].mxu1 }
 0x515   :  { %v11790_v63 = vadd.f32 %v4151_v6, %v3625_v51  ;;  %v4154_v16 = vadd.f32 %v11589_v58, %v4153_v5  ;;  %v6683_v50 = vpop.f32.mrb[147].mxu1  ;;  %6769 = vmatmul.mubr.bf16.gmra.mrb[144].mxu0 %v4320_v28 }
 0x516   :  { %6772 = vmatprep.mubr.msk.bf16.mxu0 %vm7803_vm2, %v13553_v57 }
 0x517   :  { %v11797_v9 = vadd.f32 %v4154_v16, %v3626_v39  ;;  %v4291_v61 = vmax.f32 %v11790_v63, 0.0 }
 0x519   :  { %v13149_v59 = vmax.f32 %v11797_v9, 0.0 }
 0x51a   :  { %v4158_v45 = vpop.f32.mrb[148].mxu1 }
 0x51b   :  { %v4159_v55 = vadd.f32 %v11589_v58, %v4158_v45  ;;  %v6686_v51 = vpop.f32.mrb[149].mxu1  ;;  %v4321_v6 = vpack.c.bf16 %v13149_v59, %v4291_v61 }
 0x51c   :  { %v4161_v54 = vpop.f32.mrb[150].mxu1 }
 0x51d   :  { %v11808_v28 = vadd.f32 %v4159_v55, %v3627_v37  ;;  %v4162_v18 = vadd.f32 %v11589_v58, %v4161_v54  ;;  %v6687_v39 = vpop.f32.mrb[151].mxu1  ;;  %6773 = vmatmul.mubr.bf16.gmra.mrb[148].mxu0 %v4321_v6  ;;  %v13758_v54 = vmax.f32 %v11191_v23, 0.0 }
 0x51e   :  { %6776 = vmatprep.mubr.msk.bf16.mxu0 %vm7803_vm2, %v13553_v57 }
 0x51f   :  { %v11815_v5 = vadd.f32 %v4162_v18, %v3628_v7  ;;  %v13148_v16 = vmax.f32 %v11808_v28, 0.0 }
 0x521   :  { %v13147_v50 = vmax.f32 %v11815_v5, 0.0 }
 0x522   :  { %v4166_v45 = vpop.f32.mrb[152].mxu1 }
 0x523   :  { %v4167_v36 = vadd.f32 %v11589_v58, %v4166_v45  ;;  %v6690_v37 = vpop.f32.mrb[153].mxu1  ;;  %v4322_v55 = vpack.c.bf16 %v13147_v50, %v13148_v16 }
 0x524   :  { %v4169_v51 = vpop.f32.mrb[154].mxu1 }
 0x525   :  { %v11826_v6 = vadd.f32 %v4167_v36, %v3629_v47  ;;  %v4170_v13 = vadd.f32 %v11589_v58, %v4169_v51  ;;  %v6691_v7 = vpop.f32.mrb[155].mxu1  ;;  %6777 = vmatmul.mubr.bf16.gmra.mrb[152].mxu0 %v4322_v55  ;;  %v13759_v51 = vmax.f32 %v11226_v33, 0.0 }
 0x526   :  { %6780 = vmatprep.mubr.msk.bf16.mxu0 %vm7803_vm2, %v13553_v57 }
 0x527   :  { %v11833_v18 = vadd.f32 %v4170_v13, %v13758_v54  ;;  %v13140_v39 = vmax.f32 %v11826_v6, 0.0  ;;  %v13760_v54 = vmax.f32 %v11235_v19, 0.0 }
 0x529   :  { %v13139_v45 = vmax.f32 %v11833_v18, 0.0 }
 0x52a   :  { %v4174_v37 = vpop.f32.mrb[156].mxu1 }
 0x52b   :  { %v4175_v3 = vadd.f32 %v11589_v58, %v4174_v37  ;;  %v6694_v47 = vpop.f32.mrb[157].mxu1  ;;  %v4323_v36 = vpack.c.bf16 %v13139_v45, %v13140_v39 }
 0x52c   :  { %v4177_v55 = vpop.f32.mrb[158].mxu1 }
 0x52d   :  { %v11844_v7 = vadd.f32 %v4175_v3, %v13759_v51  ;;  %v4178_v23 = vadd.f32 %v11589_v58, %v4177_v55  ;;  %v6695_v13 = vpop.f32.mrb[159].mxu1  ;;  %6781 = vmatmul.mubr.bf16.gmra.mrb[156].mxu0 %v4323_v36  ;;  %v13761_v51 = vmax.f32 %v11270_v49, 0.0 }
 0x52e   :  { %6784 = vmatprep.mubr.msk.bf16.mxu0 %vm7803_vm2, %v13553_v57 }
 0x52f   :  { %v11851_v37 = vadd.f32 %v4178_v23, %v13760_v54  ;;  %v13146_v47 = vmax.f32 %v11844_v7, 0.0 }
 0x531   :  { %v13141_v45 = vmax.f32 %v11851_v37, 0.0 }
 0x532   :  { %v4182_v39 = vpop.f32.mrb[160].mxu1 }
 0x533   :  { %v4183_v33 = vadd.f32 %v11589_v58, %v4182_v39  ;;  %v6698_v3 = vpop.f32.mrb[161].mxu1  ;;  %v4324_v36 = vpack.c.bf16 %v13141_v45, %v13146_v47  ;;  %v13762_v39 = vmax.f32 %v11267_v24, 0.0 }
 0x534   :  { %v4185_v55 = vpop.f32.mrb[162].mxu1 }
 0x535   :  { %v11862_v13 = vadd.f32 %v4183_v33, %v13761_v51  ;;  %v4186_v19 = vadd.f32 %v11589_v58, %v4185_v55  ;;  %v6699_v23 = vpop.f32.mrb[163].mxu1  ;;  %6785 = vmatmul.mubr.bf16.gmra.mrb[160].mxu0 %v4324_v36 }
 0x536   :  { %6788 = vmatprep.mubr.msk.bf16.mxu0 %vm7803_vm2, %v13553_v57 }
 0x537   :  { %v11869_v54 = vadd.f32 %v4186_v19, %v13762_v39  ;;  %v13145_v3 = vmax.f32 %v11862_v13, 0.0 }
 0x539   :  { %v13142_v45 = vmax.f32 %v11869_v54, 0.0 }
 0x53b   :  { %v4325_v49 = vpack.c.bf16 %v13142_v45, %v13145_v3 }
 0x53d   :  { %6789 = vmatmul.mubr.bf16.gmra.mrb[164].mxu0 %v4325_v49 }
 0x53e   :  { %6792 = vmatprep.mubr.msk.bf16.mxu0 %vm7803_vm2, %v13553_v57 }
 0x551   :  { %v4190_v33 = vpop.f32.mrb[164].mxu1 }
 0x552   :  { %v4191_v36 = vadd.f32 %v11589_v58, %v4190_v33  ;;  %v6702_v55 = vpop.f32.mrb[165].mxu1 }
 0x553   :  { %v4193_v24 = vpop.f32.mrb[166].mxu1 }
 0x554   :  { %v11882_v51 = vadd.f32 %v4191_v36, %v3635_v11  ;;  %v4194_v19 = vadd.f32 %v11589_v58, %v4193_v24  ;;  %v6703_v23 = vpop.f32.mrb[167].mxu1 }
 0x556   :  { %v11887_v39 = vadd.f32 %v4194_v19, %v3636_v14  ;;  %v13144_v49 = vmax.f32 %v11882_v51, 0.0 }
 0x558   :  { %v13143_v45 = vmax.f32 %v11887_v39, 0.0 }
 0x55a   :  { %v4326_v33 = vpack.c.bf16 %v13143_v45, %v13144_v49 }
 0x55c   :  { %6793 = vmatmul.mubr.bf16.gmra.mrb[168].mxu0 %v4326_v33 }
 0x55d   :  { %6796 = vmatprep.mubr.msk.bf16.mxu0 %vm7803_vm2, %v13553_v57 }
 0x55f   :  { %v4439_v46 = vpop.f32.mrb[116].mxu0 }
 0x560   :  { %v4440_v14 = vadd.f32 %v11898_v0, %v4439_v46  ;;  %v6742_v11 = vpop.f32.mrb[117].mxu0 }
 0x561   :  { %v4442_v36 = vpop.f32.mrb[118].mxu0 }
 0x562   :  { %v4443_v55 = vadd.f32 %v11898_v0, %v4442_v36  ;;  %v6743_v24 = vpop.f32.mrb[119].mxu0  ;;  %v4590_v19 = vmax.f32 %v4440_v14, 0.0 }
 0x564   :  { %v4591_v23 = vmax.f32 %v4443_v55, 0.0 }
 0x566   :  { %v4628_v45 = vpack.c.bf16 %v4591_v23, %v4590_v19 }
 0x568   :  { %v4447_v33 = vpop.f32.mrb[120].mxu0  ;;  %6833 = vmatmul.mubr.bf16.vlgmr.msra.gmra.mrb[188].mxu1 %v4628_v45 }
 0x569   :  { %v4448_v49 = vadd.f32 %v11898_v0, %v4447_v33  ;;  %v6746_v3 = vpop.f32.mrb[121].mxu0  ;;  %6836 = vmatprep.mubr.msk.bf16.mxu1 %vm7803_vm2, %v13553_v57 }
 0x56a   :  { %v4450_v47 = vpop.f32.mrb[122].mxu0 }
 0x56b   :  { %v4451_v50 = vadd.f32 %v11898_v0, %v4450_v47  ;;  %v6747_v46 = vpop.f32.mrb[123].mxu0  ;;  %v4592_v11 = vmax.f32 %v4448_v49, 0.0 }
 0x56d   :  { %v4593_v16 = vmax.f32 %v4451_v50, 0.0  ;;  %v4198_v59 = vpop.f32.mrb[168].mxu1  ;;  %v13763_v50 = vmax.f32 %v11377_v21, 0.0 }
 0x56e   :  { %v4199_v36 = vadd.f32 %v11589_v58, %v4198_v59  ;;  %v6706_v14 = vpop.f32.mrb[169].mxu1 }
 0x56f   :  { %v4629_v55 = vpack.c.bf16 %v4593_v16, %v4592_v11  ;;  %v4201_v24 = vpop.f32.mrb[170].mxu1 }
 0x570   :  { %v11911_v45 = vadd.f32 %v4199_v36, %v3637_v60  ;;  %v4202_v3 = vadd.f32 %v11589_v58, %v4201_v24  ;;  %v4455_v19 = vpop.f32.mrb[124].mxu0  ;;  %v6707_v23 = vpop.f32.mrb[171].mxu1 }
 0x571   :  { %v4456_v33 = vadd.f32 %v11898_v0, %v4455_v19  ;;  %v6750_v47 = vpop.f32.mrb[125].mxu0  ;;  %6837 = vmatmul.mubr.bf16.gmra.mrb[192].mxu1 %v4629_v55 }
 0x572   :  { %v11917_v49 = vadd.f32 %v4202_v3, %v13763_v50  ;;  %v4458_v59 = vpop.f32.mrb[126].mxu0  ;;  %6840 = vmatprep.mubr.msk.bf16.mxu1 %vm7803_vm2, %v13553_v57  ;;  %v13157_v16 = vmax.f32 %v11911_v45, 0.0 }
 0x573   :  { %v4459_v15 = vadd.f32 %v11898_v0, %v4458_v59  ;;  %v6751_v60 = vpop.f32.mrb[127].mxu0  ;;  %v4594_v11 = vmax.f32 %v4456_v33, 0.0 }
 0x574   :  { %v13156_v46 = vmax.f32 %v11917_v49, 0.0 }
 0x575   :  { %v4595_v36 = vmax.f32 %v4459_v15, 0.0 }
 0x576   :  { %v4327_v21 = vpack.c.bf16 %v13156_v46, %v13157_v16 }
 0x577   :  { %v4630_v14 = vpack.c.bf16 %v4595_v36, %v4594_v11 }
 0x578   :  { %v4463_v55 = vpop.f32.mrb[128].mxu0  ;;  %6797 = vmatmul.mubr.bf16.gmra.mrb[172].mxu0 %v4327_v21  ;;  %v13764_v21 = vmax.f32 %v11413_v22, 0.0  ;;  %v7317_v22 = vld [vmem:[%s12942_s6 + $0x100] sm:$0xff]  }
 0x579   :  { %v4464_v24 = vadd.f32 %v11898_v0, %v4463_v55  ;;  %v6754_v3 = vpop.f32.mrb[129].mxu0  ;;  %6841 = vmatmul.mubr.bf16.gmra.mrb[196].mxu1 %v4630_v14  ;;  %6800 = vmatprep.mubr.msk.bf16.mxu0 %vm7803_vm2, %v13553_v57 }
 0x57a   :  { %v4466_v19 = vpop.f32.mrb[130].mxu0  ;;  %6844 = vmatprep.mubr.msk.bf16.mxu1 %vm7803_vm2, %v13553_v57  ;;  %6909 = vmatpush3.bf16.msra.mxu0 %v7317_v22 }
 0x57b   :  { %v4467_v23 = vadd.f32 %v11898_v0, %v4466_v19  ;;  %v6755_v33 = vpop.f32.mrb[131].mxu0  ;;  %v4596_v47 = vmax.f32 %v4464_v24, 0.0  ;;  %v13765_v24 = vmax.f32 %v11416_v10, 0.0  ;;  %v7318_v10 = vld [vmem:[%s12942_s6 + $0x108] sm:$0xff]   ;;  %6910 = vmatprep.subr.bf16.mxu0 %v13553_v57 }
 0x57d   :  { %v4597_v50 = vmax.f32 %v4467_v23, 0.0 }
 0x57e   :  { %6911 = vmatpush3.bf16.msra.mxu0 %v7318_v10 }
 0x57f   :  { %v4631_v59 = vpack.c.bf16 %v4597_v50, %v4596_v47  ;;  %6912 = vmatprep.subr.bf16.mxu0 %v13553_v57 }
 0x581   :  { %6845 = vmatmul.mubr.bf16.gmra.mrb[200].mxu1 %v4631_v59 }
 0x582   :  { %6848 = vmatprep.mubr.msk.bf16.mxu1 %vm7803_vm2, %v13553_v57 }
 0x58d   :  { %v4206_v15 = vpop.f32.mrb[172].mxu1 }
 0x58e   :  { %v4207_v60 = vadd.f32 %v11589_v58, %v4206_v15  ;;  %v6710_v11 = vpop.f32.mrb[173].mxu1 }
 0x58f   :  { %v4209_v36 = vpop.f32.mrb[174].mxu1  ;;  %v13766_v11 = vmax.f32 %v11460_v25, 0.0 }
 0x590   :  { %v11939_v14 = vadd.f32 %v4207_v60, %v13764_v21  ;;  %v4210_v55 = vadd.f32 %v11589_v58, %v4209_v36  ;;  %v6711_v3 = vpop.f32.mrb[175].mxu1 }
 0x591   :  { %v13767_v3 = vmax.f32 %v11457_v53, 0.0  ;;  %v7320_v53 = vld [vmem:[%s12942_s6 + $0x118] sm:$0xff]  }
 0x592   :  { %v11944_v19 = vadd.f32 %v4210_v55, %v13765_v24  ;;  %v13155_v23 = vmax.f32 %v11939_v14, 0.0 }
 0x594   :  { %v13152_v33 = vmax.f32 %v11944_v19, 0.0 }
 0x596   :  { %v4328_v47 = vpack.c.bf16 %v13152_v33, %v13155_v23 }
 0x598   :  { %6801 = vmatmul.mubr.bf16.gmra.mrb[176].mxu0 %v4328_v47  ;;  %v7319_v47 = vld [vmem:[%s12942_s6 + $0x110] sm:$0xff]  }
 0x599   :  { %6804 = vmatprep.mubr.msk.bf16.mxu0 %vm7803_vm2, %v13553_v57  ;;  %6913 = vmatpush3.bf16.msra.mxu0 %v7319_v47  ;;  %v13768_v47 = vmax.f32 %v11508_v26, 0.0 }
 0x59a   :  { %6914 = vmatprep.subr.bf16.mxu0 %v13553_v57 }
 0x59d   :  { %6915 = vmatpush3.bf16.msra.mxu0 %v7320_v53 }
 0x59e   :  { %6916 = vmatprep.subr.bf16.mxu0 %v13553_v57 }
 0x5a9   :  { %v4214_v50 = vpop.f32.mrb[176].mxu1 }
 0x5aa   :  { %v4215_v59 = vadd.f32 %v11589_v58, %v4214_v50  ;;  %v6714_v15 = vpop.f32.mrb[177].mxu1  ;;  %v7321_v50 = vld [vmem:[%s12942_s6 + $0x120] sm:$0xff]  }
 0x5ab   :  { %v4217_v60 = vpop.f32.mrb[178].mxu1  ;;  %6917 = vmatpush3.bf16.msra.mxu0 %v7321_v50  ;;  %v7323_v15 = vld [vmem:[%s12942_s6 + $0x130] sm:$0xff]  }
 0x5ac   :  { %v11965_v36 = vadd.f32 %v4215_v59, %v13766_v11  ;;  %v4218_v21 = vadd.f32 %v11589_v58, %v4217_v60  ;;  %v6715_v55 = vpop.f32.mrb[179].mxu1  ;;  %6918 = vmatprep.subr.bf16.mxu0 %v13553_v57  ;;  %v7322_v59 = vld [vmem:[%s12942_s6 + $0x128] sm:$0xff]   ;;  %v7324_v60 = vld [vmem:[%s12942_s6 + $0x138] sm:$0xff]  }
 0x5ae   :  { %v11970_v24 = vadd.f32 %v4218_v21, %v13767_v3  ;;  %v13151_v22 = vmax.f32 %v11965_v36, 0.0 }
 0x5af   :  { %6919 = vmatpush3.bf16.msra.mxu0 %v7322_v59  ;;  %v13769_v59 = vmax.f32 %v11511_v29, 0.0 }
 0x5b0   :  { %v13150_v10 = vmax.f32 %v11970_v24, 0.0  ;;  %6920 = vmatprep.subr.bf16.mxu0 %v13553_v57 }
 0x5b2   :  { %v4329_v25 = vpack.c.bf16 %v13150_v10, %v13151_v22 }
 0x5b3   :  { %6921 = vmatpush3.bf16.msra.mxu0 %v7323_v15 }
 0x5b4   :  { %6805 = vmatmul.mubr.bf16.gmra.mrb[180].mxu0 %v4329_v25  ;;  %6922 = vmatprep.subr.bf16.mxu0 %v13553_v57 }
 0x5b5   :  { %6808 = vmatprep.mubr.msk.bf16.mxu0 %vm7803_vm2, %v13553_v57 }
 0x5b7   :  { %6923 = vmatpush3.bf16.msra.mxu0 %v7324_v60 }
 0x5b8   :  { %7092 = vmatprep.subr.bf16.mxu0 %v13553_v57 }
 0x5c9   :  { %v4222_v11 = vpop.f32.mrb[180].mxu1 }
 0x5ca   :  { %v4223_v21 = vadd.f32 %v11589_v58, %v4222_v11  ;;  %v6718_v55 = vpop.f32.mrb[181].mxu1 }
 0x5cb   :  { %v4225_v3 = vpop.f32.mrb[182].mxu1 }
 0x5cc   :  { %v12007_v25 = vadd.f32 %v4223_v21, %v13768_v47  ;;  %v4226_v53 = vadd.f32 %v11589_v58, %v4225_v3  ;;  %v6719_v50 = vpop.f32.mrb[183].mxu1 }
 0x5ce   :  { %v12012_v15 = vadd.f32 %v4226_v53, %v13769_v59  ;;  %v13154_v60 = vmax.f32 %v12007_v25, 0.0 }
 0x5d0   :  { %v13153_v10 = vmax.f32 %v12012_v15, 0.0  ;;  %v4471_v22 = vpop.f32.mrb[132].mxu0 }
 0x5d1   :  { %v4472_v11 = vadd.f32 %v11898_v0, %v4471_v22  ;;  %v6758_v55 = vpop.f32.mrb[133].mxu0 }
 0x5d2   :  { %v4474_v33 = vpop.f32.mrb[134].mxu0  ;;  %v4330_v26 = vpack.c.bf16 %v13153_v10, %v13154_v60 }
 0x5d3   :  { %v4475_v21 = vadd.f32 %v11898_v0, %v4474_v33  ;;  %v6759_v3 = vpop.f32.mrb[135].mxu0  ;;  %v4598_v29 = vmax.f32 %v4472_v11, 0.0 }
 0x5d4   :  { %6809 = vmatmul.mubr.bf16.gmra.mrb[184].mxu0 %v4330_v26 }
 0x5d5   :  { %v4599_v47 = vmax.f32 %v4475_v21, 0.0  ;;  %6812 = vmatprep.mubr.msk.bf16.mxu0 %vm7803_vm2, %v13553_v57 }
 0x5d7   :  { %v4632_v53 = vpack.c.bf16 %v4599_v47, %v4598_v29 }
 0x5d8   :  { %v4479_v50 = vpop.f32.mrb[136].mxu0 }
 0x5d9   :  { %v4480_v22 = vadd.f32 %v11898_v0, %v4479_v50  ;;  %v6762_v59 = vpop.f32.mrb[137].mxu0  ;;  %6849 = vmatmul.mubr.bf16.gmra.mrb[204].mxu1 %v4632_v53 }
 0x5da   :  { %v4482_v55 = vpop.f32.mrb[138].mxu0  ;;  %6852 = vmatprep.mubr.msk.bf16.mxu1 %vm7803_vm2, %v13553_v57 }
 0x5db   :  { %v4483_v10 = vadd.f32 %v11898_v0, %v4482_v55  ;;  %v6763_v33 = vpop.f32.mrb[139].mxu0  ;;  %v4600_v3 = vmax.f32 %v4480_v22, 0.0 }
 0x5dd   :  { %v4601_v26 = vmax.f32 %v4483_v10, 0.0  ;;  %v13770_v10 = vmax.f32 %v11548_v52, 0.0 }
 0x5df   :  { %v4633_v11 = vpack.c.bf16 %v4601_v26, %v4600_v3 }
 0x5e0   :  { %v4487_v21 = vpop.f32.mrb[140].mxu0 }
 0x5e1   :  { %v4488_v60 = vadd.f32 %v11898_v0, %v4487_v21  ;;  %v4230_v23 = vpop.f32.mrb[184].mxu1  ;;  %v6766_v29 = vpop.f32.mrb[141].mxu0  ;;  %6853 = vmatmul.mubr.bf16.gmra.mrb[208].mxu1 %v4633_v11 }
 0x5e2   :  { %v4231_v47 = vadd.f32 %v11589_v58, %v4230_v23  ;;  %v6722_v50 = vpop.f32.mrb[185].mxu1  ;;  %v4490_v53 = vpop.f32.mrb[142].mxu0  ;;  %6856 = vmatprep.mubr.msk.bf16.mxu1 %vm7803_vm2, %v13553_v57  ;;  %v13771_v23 = vmax.f32 %v11545_v42, 0.0 }
 0x5e3   :  { %v4491_v59 = vadd.f32 %v11898_v0, %v4490_v53  ;;  %v4233_v55 = vpop.f32.mrb[186].mxu1  ;;  %v6767_v33 = vpop.f32.mrb[143].mxu0  ;;  %v4602_v21 = vmax.f32 %v4488_v60, 0.0 }
 0x5e4   :  { %v12035_v22 = vadd.f32 %v4231_v47, %v13770_v10  ;;  %v4234_v3 = vadd.f32 %v11589_v58, %v4233_v55  ;;  %v6723_v26 = vpop.f32.mrb[187].mxu1 }
 0x5e5   :  { %v4603_v11 = vmax.f32 %v4491_v59, 0.0 }
 0x5e6   :  { %v12040_v29 = vadd.f32 %v4234_v3, %v13771_v23  ;;  %v4311_v46 = vmax.f32 %v12035_v22, 0.0 }
 0x5e7   :  { %v4634_v50 = vpack.c.bf16 %v4603_v11, %v4602_v21 }
 0x5e8   :  { %v13160_v53 = vmax.f32 %v12040_v29, 0.0  ;;  %v4495_v16 = vpop.f32.mrb[144].mxu0 }
 0x5e9   :  { %v4496_v33 = vadd.f32 %v11898_v0, %v4495_v16  ;;  %v6770_v52 = vpop.f32.mrb[145].mxu0  ;;  %6857 = vmatmul.mubr.bf16.gmra.mrb[212].mxu1 %v4634_v50 }
 0x5ea   :  { %v4498_v47 = vpop.f32.mrb[146].mxu0  ;;  %v4331_v58 = vpack.c.bf16 %v13160_v53, %v4311_v46  ;;  %6860 = vmatprep.mubr.msk.bf16.mxu1 %vm7803_vm2, %v13553_v57  ;;  %v13777_v53 = vmax.f32 %v11639_v44, 0.0 }
 0x5eb   :  { %v4499_v42 = vadd.f32 %v11898_v0, %v4498_v47  ;;  %v6771_v60 = vpop.f32.mrb[147].mxu0  ;;  %v4604_v59 = vmax.f32 %v4496_v33, 0.0 }
 0x5ec   :  { %6813 = vmatmul.mubr.bf16.gmra.mrb[188].mxu0 %v4331_v58 }
 0x5ed   :  { %v4605_v55 = vmax.f32 %v4499_v42, 0.0  ;;  %6924 = vmatprep.mubr.msk.bf16.mxu0 %vm7803_vm2, %v13553_v57 }
 0x5ef   :  { %v4635_v16 = vpack.c.bf16 %v4605_v55, %v4604_v59 }
 0x5f0   :  { %v4503_v10 = vpop.f32.mrb[148].mxu0 }
 0x5f1   :  { %v4504_v3 = vadd.f32 %v11898_v0, %v4503_v10  ;;  %v6774_v26 = vpop.f32.mrb[149].mxu0  ;;  %6861 = vmatmul.mubr.bf16.gmra.mrb[216].mxu1 %v4635_v16 }
 0x5f2   :  { %v4506_v21 = vpop.f32.mrb[150].mxu0  ;;  %6864 = vmatprep.mubr.msk.bf16.mxu1 %vm7803_vm2, %v13553_v57 }
 0x5f3   :  { %v4507_v11 = vadd.f32 %v11898_v0, %v4506_v21  ;;  %v6775_v23 = vpop.f32.mrb[151].mxu0  ;;  %v4606_v50 = vmax.f32 %v4504_v3, 0.0 }
 0x5f5   :  { %v4607_v52 = vmax.f32 %v4507_v11, 0.0 }
 0x5f7   :  { %v4636_v33 = vpack.c.bf16 %v4607_v52, %v4606_v50 }
 0x5f8   :  { %v4511_v47 = vpop.f32.mrb[152].mxu0 }
 0x5f9   :  { %v4512_v58 = vadd.f32 %v11898_v0, %v4511_v47  ;;  %v6778_v42 = vpop.f32.mrb[153].mxu0  ;;  %6865 = vmatmul.mubr.bf16.gmra.mrb[220].mxu1 %v4636_v33 }
 0x5fa   :  { %v4514_v60 = vpop.f32.mrb[154].mxu0  ;;  %6868 = vmatprep.mubr.msk.bf16.mxu1 %vm7803_vm2, %v13553_v57 }
 0x5fb   :  { %v4515_v59 = vadd.f32 %v11898_v0, %v4514_v60  ;;  %v6779_v55 = vpop.f32.mrb[155].mxu0  ;;  %v4608_v16 = vmax.f32 %v4512_v58, 0.0 }
 0x5fd   :  { %v4609_v10 = vmax.f32 %v4515_v59, 0.0 }
 0x5ff   :  { %v4637_v26 = vpack.c.bf16 %v4609_v10, %v4608_v16 }
 0x600   :  { %v4519_v21 = vpop.f32.mrb[156].mxu0 }
 0x601   :  { %v4520_v3 = vadd.f32 %v11898_v0, %v4519_v21  ;;  %v6782_v11 = vpop.f32.mrb[157].mxu0  ;;  %6869 = vmatmul.mubr.bf16.gmra.mrb[224].mxu1 %v4637_v26 }
 0x602   :  { %v4522_v23 = vpop.f32.mrb[158].mxu0  ;;  %6872 = vmatprep.mubr.msk.bf16.mxu1 %vm7803_vm2, %v13553_v57 }
 0x603   :  { %v4523_v50 = vadd.f32 %v11898_v0, %v4522_v23  ;;  %v6783_v52 = vpop.f32.mrb[159].mxu0  ;;  %v4610_v33 = vmax.f32 %v4520_v3, 0.0 }
 0x605   :  { %v4611_v47 = vmax.f32 %v4523_v50, 0.0 }
 0x607   :  { %v4638_v42 = vpack.c.bf16 %v4611_v47, %v4610_v33 }
 0x608   :  { %v4527_v60 = vpop.f32.mrb[160].mxu0 }
 0x609   :  { %v4528_v58 = vadd.f32 %v11898_v0, %v4527_v60  ;;  %v6786_v59 = vpop.f32.mrb[161].mxu0  ;;  %6873 = vmatmul.mubr.bf16.gmra.mrb[228].mxu1 %v4638_v42 }
 0x60a   :  { %v4530_v55 = vpop.f32.mrb[162].mxu0  ;;  %6876 = vmatprep.mubr.msk.bf16.mxu1 %vm7803_vm2, %v13553_v57 }
 0x60b   :  { %v4531_v16 = vadd.f32 %v11898_v0, %v4530_v55  ;;  %v6787_v10 = vpop.f32.mrb[163].mxu0  ;;  %v4612_v26 = vmax.f32 %v4528_v58, 0.0 }
 0x60d   :  { %v4613_v21 = vmax.f32 %v4531_v16, 0.0 }
 0x60f   :  { %v4639_v11 = vpack.c.bf16 %v4613_v21, %v4612_v26 }
 0x610   :  { %v4535_v23 = vpop.f32.mrb[164].mxu0 }
 0x611   :  { %v4536_v3 = vadd.f32 %v11898_v0, %v4535_v23  ;;  %v6790_v50 = vpop.f32.mrb[165].mxu0  ;;  %6877 = vmatmul.mubr.bf16.gmra.mrb[232].mxu1 %v4639_v11 }
 0x612   :  { %v4538_v52 = vpop.f32.mrb[166].mxu0  ;;  %6880 = vmatprep.mubr.msk.bf16.mxu1 %vm7803_vm2, %v13553_v57 }
 0x613   :  { %v4539_v33 = vadd.f32 %v11898_v0, %v4538_v52  ;;  %v6791_v47 = vpop.f32.mrb[167].mxu0  ;;  %v4614_v42 = vmax.f32 %v4536_v3, 0.0  ;;  %v12081_v3 = vld [vmem:[%s12945_s7 + $0x3] ss:$0 sm:$0xff] }
 0x615   :  { %v4615_v60 = vmax.f32 %v4539_v33, 0.0 }
 0x617   :  { %v4640_v59 = vpack.c.bf16 %v4615_v60, %v4614_v42  ;;  %v13772_v60 = vmax.f32 %v11596_v32, 0.0 }
 0x619   :  { %6881 = vmatmul.mubr.bf16.gmra.mrb[236].mxu1 %v4640_v59 }
 0x61a   :  { %6884 = vmatprep.mubr.msk.bf16.mxu1 %vm7803_vm2, %v13553_v57 }
 0x62f   :  { %v4543_v58 = vpop.f32.mrb[168].mxu0 }
 0x630   :  { %v4544_v55 = vadd.f32 %v11898_v0, %v4543_v58  ;;  %v6794_v16 = vpop.f32.mrb[169].mxu0 }
 0x631   :  { %v4546_v10 = vpop.f32.mrb[170].mxu0  ;;  %v13773_v16 = vmax.f32 %v11601_v34, 0.0 }
 0x632   :  { %v4547_v26 = vadd.f32 %v11898_v0, %v4546_v10  ;;  %v6795_v21 = vpop.f32.mrb[171].mxu0  ;;  %v4616_v11 = vmax.f32 %v4544_v55, 0.0 }
 0x634   :  { %v4617_v23 = vmax.f32 %v4547_v26, 0.0 }
 0x636   :  { %v4641_v50 = vpack.c.bf16 %v4617_v23, %v4616_v11 }
 0x638   :  { %6885 = vmatmul.mubr.bf16.gmra.mrb[240].mxu1 %v4641_v50 }
 0x639   :  { %6888 = vmatprep.mubr.msk.bf16.mxu1 %vm7803_vm2, %v13553_v57 }
 0x63b   :  { %v4754_v52 = vpop.f32.mrb[188].mxu1 }
 0x63c   :  { %v4755_v33 = vadd.f32 %v12081_v3, %v4754_v52  ;;  %v6834_v47 = vpop.f32.mrb[189].mxu1 }
 0x63d   :  { %v4757_v42 = vpop.f32.mrb[190].mxu1 }
 0x63e   :  { %v12088_v59 = vadd.f32 %v4755_v33, %v13772_v60  ;;  %v4758_v58 = vadd.f32 %v12081_v3, %v4757_v42  ;;  %v6835_v55 = vpop.f32.mrb[191].mxu1  ;;  %v13774_v33 = vmax.f32 %v11612_v1, 0.0  ;;  %v13775_v60 = vmax.f32 %v11619_v8, 0.0 }
 0x640   :  { %v12093_v10 = vadd.f32 %v4758_v58, %v13773_v16  ;;  %v13159_v26 = vmax.f32 %v12088_v59, 0.0 }
 0x642   :  { %v13158_v21 = vmax.f32 %v12093_v10, 0.0 }
 0x644   :  { %v4981_v11 = vpack.c.bf16 %v13158_v21, %v13159_v26  ;;  %v4762_v23 = vpop.f32.mrb[192].mxu1  ;;  %v13776_v21 = vmax.f32 %v11632_v56, 0.0 }
 0x645   :  { %v4763_v32 = vadd.f32 %v12081_v3, %v4762_v23  ;;  %v6838_v50 = vpop.f32.mrb[193].mxu1 }
 0x646   :  { %v4765_v52 = vpop.f32.mrb[194].mxu1  ;;  %6925 = vmatmul.mubr.bf16.vlgmr.msra.gmra.mrb[192].mxu0 %v4981_v11 }
 0x647   :  { %v12104_v34 = vadd.f32 %v4763_v32, %v13774_v33  ;;  %v4766_v47 = vadd.f32 %v12081_v3, %v4765_v52  ;;  %v6839_v42 = vpop.f32.mrb[195].mxu1  ;;  %6928 = vmatprep.mubr.msk.bf16.mxu0 %vm7803_vm2, %v13553_v57 }
 0x649   :  { %v12111_v58 = vadd.f32 %v4766_v47, %v13775_v60  ;;  %v4945_v55 = vmax.f32 %v12104_v34, 0.0 }
 0x64b   :  { %v13161_v16 = vmax.f32 %v12111_v58, 0.0  ;;  %v4551_v23 = vpop.f32.mrb[172].mxu0 }
 0x64c   :  { %v4552_v11 = vadd.f32 %v11898_v0, %v4551_v23  ;;  %v4770_v1 = vpop.f32.mrb[196].mxu1  ;;  %v6798_v32 = vpop.f32.mrb[173].mxu0 }
 0x64d   :  { %v4771_v50 = vadd.f32 %v12081_v3, %v4770_v1  ;;  %v6842_v52 = vpop.f32.mrb[197].mxu1  ;;  %v4554_v33 = vpop.f32.mrb[174].mxu0  ;;  %v4982_v8 = vpack.c.bf16 %v13161_v16, %v4945_v55 }
 0x64e   :  { %v4555_v47 = vadd.f32 %v11898_v0, %v4554_v33  ;;  %v4773_v42 = vpop.f32.mrb[198].mxu1  ;;  %v6799_v60 = vpop.f32.mrb[175].mxu0  ;;  %v4618_v1 = vmax.f32 %v4552_v11, 0.0 }
 0x64f   :  { %v12124_v26 = vadd.f32 %v4771_v50, %v13776_v21  ;;  %v4774_v23 = vadd.f32 %v12081_v3, %v4773_v42  ;;  %v6843_v32 = vpop.f32.mrb[199].mxu1  ;;  %6929 = vmatmul.mubr.bf16.gmra.mrb[196].mxu0 %v4982_v8 }
 0x650   :  { %v4619_v52 = vmax.f32 %v4555_v47, 0.0  ;;  %6932 = vmatprep.mubr.msk.bf16.mxu0 %vm7803_vm2, %v13553_v57  ;;  %v13779_v32 = vmax.f32 %v11659_v17, 0.0 }
 0x651   :  { %v12131_v16 = vadd.f32 %v4774_v23, %v13777_v53  ;;  %v13165_v60 = vmax.f32 %v12124_v26, 0.0  ;;  %v13778_v53 = vmax.f32 %v11652_v31, 0.0 }
 0x652   :  { %v4642_v33 = vpack.c.bf16 %v4619_v52, %v4618_v1 }
 0x653   :  { %v13164_v56 = vmax.f32 %v12131_v16, 0.0 }
 0x654   :  { %v4778_v21 = vpop.f32.mrb[200].mxu1  ;;  %6889 = vmatmul.mubr.bf16.gmra.mrb[244].mxu1 %v4642_v33 }
 0x655   :  { %v4779_v50 = vadd.f32 %v12081_v3, %v4778_v21  ;;  %v6846_v42 = vpop.f32.mrb[201].mxu1  ;;  %v4983_v11 = vpack.c.bf16 %v13164_v56, %v13165_v60  ;;  %6892 = vmatprep.mubr.msk.bf16.mxu1 %vm7803_vm2, %v13553_v57 }
 0x656   :  { %v4781_v44 = vpop.f32.mrb[202].mxu1 }
 0x657   :  { %v12144_v8 = vadd.f32 %v4779_v50, %v13778_v53  ;;  %v4782_v47 = vadd.f32 %v12081_v3, %v4781_v44  ;;  %v6847_v23 = vpop.f32.mrb[203].mxu1  ;;  %6933 = vmatmul.mubr.bf16.gmra.mrb[200].mxu0 %v4983_v11 }
 0x658   :  { %6936 = vmatprep.mubr.msk.bf16.mxu0 %vm7803_vm2, %v13553_v57 }
 0x659   :  { %v12151_v1 = vadd.f32 %v4782_v47, %v13779_v32  ;;  %v13163_v52 = vmax.f32 %v12144_v8, 0.0  ;;  %v7325_v32 = vld [vmem:[%s12942_s6 + $0x140] sm:$0xff]  }
 0x65a   :  { %7001 = vmatpush3.bf16.msra.mxu1 %v7325_v32 }
 0x65b   :  { %v13162_v33 = vmax.f32 %v12151_v1, 0.0  ;;  %7002 = vmatprep.subr.bf16.mxu1 %v13553_v57 }
 0x65d   :  { %v4984_v31 = vpack.c.bf16 %v13162_v33, %v13163_v52 }
 0x65f   :  { %6937 = vmatmul.mubr.bf16.gmra.mrb[204].mxu0 %v4984_v31  ;;  %v7326_v31 = vld [vmem:[%s12942_s6 + $0x148] sm:$0xff]  }
 0x660   :  { %6940 = vmatprep.mubr.msk.bf16.mxu0 %vm7803_vm2, %v13553_v57  ;;  %7003 = vmatpush3.bf16.msra.mxu1 %v7326_v31  ;;  %v7328_v31 = vld [vmem:[%s12942_s6 + $0x158] sm:$0xff]  }
 0x661   :  { %7004 = vmatprep.subr.bf16.mxu1 %v13553_v57 }
 0x66b   :  { %v4559_v21 = vpop.f32.mrb[176].mxu0 }
 0x66c   :  { %v4560_v50 = vadd.f32 %v11898_v0, %v4559_v21  ;;  %v6802_v42 = vpop.f32.mrb[177].mxu0 }
 0x66d   :  { %v4562_v17 = vpop.f32.mrb[178].mxu0 }
 0x66e   :  { %v4563_v11 = vadd.f32 %v11898_v0, %v4562_v17  ;;  %v6803_v44 = vpop.f32.mrb[179].mxu0  ;;  %v4620_v53 = vmax.f32 %v4560_v50, 0.0 }
 0x670   :  { %v4621_v47 = vmax.f32 %v4563_v11, 0.0 }
 0x672   :  { %v4643_v23 = vpack.c.bf16 %v4621_v47, %v4620_v53  ;;  %v7327_v53 = vld [vmem:[%s12942_s6 + $0x150] sm:$0xff]  }
 0x673   :  { %7005 = vmatpush3.bf16.msra.mxu1 %v7327_v53 }
 0x674   :  { %6893 = vmatmul.mubr.bf16.gmra.mrb[248].mxu1 %v4643_v23  ;;  %7006 = vmatprep.subr.bf16.mxu1 %v13553_v57 }
 0x675   :  { %6896 = vmatprep.mubr.msk.bf16.mxu1 %vm7803_vm2, %v13553_v57 }
 0x677   :  { %7007 = vmatpush3.bf16.msra.mxu1 %v7328_v31 }
 0x678   :  { %7008 = vmatprep.subr.bf16.mxu1 %v13553_v57 }
 0x687   :  { %v4567_v21 = vpop.f32.mrb[180].mxu0 }
 0x688   :  { %v4568_v50 = vadd.f32 %v11898_v0, %v4567_v21  ;;  %v6806_v42 = vpop.f32.mrb[181].mxu0  ;;  %v7329_v21 = vld [vmem:[%s12942_s6 + $0x160] sm:$0xff]  }
 0x689   :  { %v4570_v17 = vpop.f32.mrb[182].mxu0  ;;  %7009 = vmatpush3.bf16.msra.mxu1 %v7329_v21  ;;  %v7331_v42 = vld [vmem:[%s12942_s6 + $0x170] sm:$0xff]  }
 0x68a   :  { %v4571_v11 = vadd.f32 %v11898_v0, %v4570_v17  ;;  %v6807_v44 = vpop.f32.mrb[183].mxu0  ;;  %v4622_v47 = vmax.f32 %v4568_v50, 0.0  ;;  %7010 = vmatprep.subr.bf16.mxu1 %v13553_v57  ;;  %v7330_v50 = vld [vmem:[%s12942_s6 + $0x168] sm:$0xff]   ;;  %v7332_v17 = vld [vmem:[%s12942_s6 + $0x178] sm:$0xff]  }
 0x68c   :  { %v4623_v23 = vmax.f32 %v4571_v11, 0.0 }
 0x68d   :  { %7011 = vmatpush3.bf16.msra.mxu1 %v7330_v50 }
 0x68e   :  { %v4644_v32 = vpack.c.bf16 %v4623_v23, %v4622_v47  ;;  %7012 = vmatprep.subr.bf16.mxu1 %v13553_v57 }
 0x690   :  { %6897 = vmatmul.mubr.bf16.gmra.mrb[252].mxu1 %v4644_v32 }
 0x691   :  { %6900 = vmatprep.mubr.msk.bf16.mxu1 %vm7803_vm2, %v13553_v57  ;;  %7013 = vmatpush3.bf16.msra.mxu1 %v7331_v42 }
 0x692   :  { %7014 = vmatprep.subr.bf16.mxu1 %v13553_v57 }
 0x695   :  { %7015 = vmatpush3.bf16.msra.mxu1 %v7332_v17 }
 0x6a7   :  { %v4575_v11 = vpop.f32.mrb[184].mxu0 }
 0x6a8   :  { %v4576_v44 = vadd.f32 %v11898_v0, %v4575_v11  ;;  %v6810_v53 = vpop.f32.mrb[185].mxu0 }
 0x6a9   :  { %v4578_v47 = vpop.f32.mrb[186].mxu0  ;;  %v13780_v53 = vmax.f32 %v11719_v12, 0.0  ;;  %v13781_v12 = vmax.f32 %v11732_v48, 0.0 }
 0x6aa   :  { %v4579_v23 = vadd.f32 %v11898_v0, %v4578_v47  ;;  %v6811_v32 = vpop.f32.mrb[187].mxu0  ;;  %v4624_v31 = vmax.f32 %v4576_v44, 0.0 }
 0x6ac   :  { %v4625_v21 = vmax.f32 %v4579_v23, 0.0  ;;  %v4786_v50 = vpop.f32.mrb[204].mxu1 }
 0x6ad   :  { %v4787_v42 = vadd.f32 %v12081_v3, %v4786_v50  ;;  %v6850_v33 = vpop.f32.mrb[205].mxu1  ;;  %v13782_v50 = vmax.f32 %v11739_v27, 0.0 }
 0x6ae   :  { %v4645_v52 = vpack.c.bf16 %v4625_v21, %v4624_v31  ;;  %v4789_v56 = vpop.f32.mrb[206].mxu1 }
 0x6af   :  { %v12205_v60 = vadd.f32 %v4787_v42, %v4283_v2  ;;  %v4790_v17 = vadd.f32 %v12081_v3, %v4789_v56  ;;  %v6851_v11 = vpop.f32.mrb[207].mxu1 }
 0x6b0   :  { %6901 = vmatmul.mubr.bf16.gmra.mrb[0].mxu1 %v4645_v52 }
 0x6b1   :  { %v12210_v47 = vadd.f32 %v4790_v17, %v13780_v53  ;;  %6904 = vmatprep.mubr.msk.bf16.mxu1 %vm7803_vm2, %v13553_v57  ;;  %v4951_v44 = vmax.f32 %v12205_v60, 0.0 }
 0x6b3   :  { %v4952_v33 = vmax.f32 %v12210_v47, 0.0 }
 0x6b4   :  { %v4794_v23 = vpop.f32.mrb[208].mxu1 }
 0x6b5   :  { %v4795_v43 = vadd.f32 %v12081_v3, %v4794_v23  ;;  %v6854_v2 = vpop.f32.mrb[209].mxu1  ;;  %v4985_v56 = vpack.c.bf16 %v4952_v33, %v4951_v44 }
 0x6b6   :  { %v4797_v52 = vpop.f32.mrb[210].mxu1 }
 0x6b7   :  { %v12223_v32 = vadd.f32 %v4795_v43, %v13781_v12  ;;  %v4798_v31 = vadd.f32 %v12081_v3, %v4797_v52  ;;  %v6855_v21 = vpop.f32.mrb[211].mxu1  ;;  %6941 = vmatmul.mubr.bf16.gmra.mrb[208].mxu0 %v4985_v56 }
 0x6b8   :  { %6944 = vmatprep.mubr.msk.bf16.mxu0 %vm7803_vm2, %v13553_v57 }
 0x6b9   :  { %v12230_v42 = vadd.f32 %v4798_v31, %v13782_v50  ;;  %v4953_v17 = vmax.f32 %v12223_v32, 0.0 }
 0x6bb   :  { %v4954_v11 = vmax.f32 %v12230_v42, 0.0 }
 0x6bc   :  { %v4802_v53 = vpop.f32.mrb[212].mxu1 }
 0x6bd   :  { %v4803_v48 = vadd.f32 %v12081_v3, %v4802_v53  ;;  %v6858_v23 = vpop.f32.mrb[213].mxu1  ;;  %v4986_v43 = vpack.c.bf16 %v4954_v11, %v4953_v17 }
 0x6be   :  { %v4805_v2 = vpop.f32.mrb[214].mxu1 }
 0x6bf   :  { %v12241_v56 = vadd.f32 %v4803_v48, %v4287_v30  ;;  %v4806_v27 = vadd.f32 %v12081_v3, %v4805_v2  ;;  %v4583_v52 = vpop.f32.mrb[188].mxu0  ;;  %v6859_v12 = vpop.f32.mrb[215].mxu1  ;;  %6945 = vmatmul.mubr.bf16.gmra.mrb[212].mxu0 %v4986_v43 }
 0x6c0   :  { %v4584_v31 = vadd.f32 %v11898_v0, %v4583_v52  ;;  %v6814_v21 = vpop.f32.mrb[189].mxu0  ;;  %6948 = vmatprep.mubr.msk.bf16.mxu0 %vm7803_vm2, %v13553_v57 }
 0x6c1   :  { %v12249_v50 = vadd.f32 %v4806_v27, %v4288_v4  ;;  %v4586_v53 = vpop.f32.mrb[190].mxu0  ;;  %v13181_v48 = vmax.f32 %v12241_v56, 0.0  ;;  %v13810_v32 = vmax.f32 %v12241_v56, 0.0 }
 0x6c2   :  { %v4587_v35 = vadd.f32 %v11898_v0, %v4586_v53  ;;  %v6815_v30 = vpop.f32.mrb[191].mxu0  ;;  %v4626_v2 = vmax.f32 %v4584_v31, 0.0 }
 0x6c3   :  { %v13180_v23 = vmax.f32 %v12249_v50, 0.0 }
 0x6c4   :  { %v4627_v43 = vmax.f32 %v4587_v35, 0.0  ;;  %v4810_v12 = vpop.f32.mrb[216].mxu1 }
 0x6c5   :  { %v4811_v52 = vadd.f32 %v12081_v3, %v4810_v12  ;;  %v6862_v21 = vpop.f32.mrb[217].mxu1  ;;  %v4987_v38 = vpack.c.bf16 %v13180_v23, %v13181_v48 }
 0x6c6   :  { %v4646_v4 = vpack.c.bf16 %v4627_v43, %v4626_v2  ;;  %v4813_v27 = vpop.f32.mrb[218].mxu1 }
 0x6c7   :  { %v12261_v0 = vadd.f32 %v4811_v52, %v4289_v20  ;;  %v4814_v53 = vadd.f32 %v12081_v3, %v4813_v27  ;;  %v6863_v30 = vpop.f32.mrb[219].mxu1  ;;  %6949 = vmatmul.mubr.bf16.gmra.mrb[216].mxu0 %v4987_v38  ;;  %v13783_v38 = vmax.f32 %v11797_v9, 0.0 }
 0x6c8   :  { %6905 = vmatmul.mubr.bf16.gmra.mrb[4].mxu1 %v4646_v4  ;;  %6952 = vmatprep.mubr.msk.bf16.mxu0 %vm7803_vm2, %v13553_v57 }
 0x6c9   :  { %v12268_v31 = vadd.f32 %v4814_v53, %v4290_v40  ;;  %7016 = vmatprep.mubr.msk.bf16.mxu1 %vm7803_vm2, %v13553_v57  ;;  %v13179_v35 = vmax.f32 %v12261_v0, 0.0 }
 0x6cb   :  { %v13178_v41 = vmax.f32 %v12268_v31, 0.0 }
 0x6cc   :  { %v4818_v20 = vpop.f32.mrb[220].mxu1 }
 0x6cd   :  { %v4819_v2 = vadd.f32 %v12081_v3, %v4818_v20  ;;  %v6866_v43 = vpop.f32.mrb[221].mxu1  ;;  %v4988_v12 = vpack.c.bf16 %v13178_v41, %v13179_v35 }
 0x6ce   :  { %v4821_v52 = vpop.f32.mrb[222].mxu1  ;;  %v13784_v43 = vmax.f32 %v11808_v28, 0.0 }
 0x6cf   :  { %v12281_v62 = vadd.f32 %v4819_v2, %v4291_v61  ;;  %v4822_v40 = vadd.f32 %v12081_v3, %v4821_v52  ;;  %v6867_v21 = vpop.f32.mrb[223].mxu1  ;;  %6953 = vmatmul.mubr.bf16.gmra.mrb[220].mxu0 %v4988_v12 }
 0x6d0   :  { %6956 = vmatprep.mubr.msk.bf16.mxu0 %vm7803_vm2, %v13553_v57 }
 0x6d1   :  { %v12288_v4 = vadd.f32 %v4822_v40, %v13783_v38  ;;  %v13177_v27 = vmax.f32 %v12281_v62, 0.0  ;;  %v13785_v40 = vmax.f32 %v11815_v5, 0.0 }
 0x6d3   :  { %v13172_v53 = vmax.f32 %v12288_v4, 0.0 }
 0x6d4   :  { %v4826_v30 = vpop.f32.mrb[224].mxu1 }
 0x6d5   :  { %v4827_v63 = vadd.f32 %v12081_v3, %v4826_v30  ;;  %v6870_v61 = vpop.f32.mrb[225].mxu1  ;;  %v4989_v20 = vpack.c.bf16 %v13172_v53, %v13177_v27 }
 0x6d6   :  { %v4829_v2 = vpop.f32.mrb[226].mxu1 }
 0x6d7   :  { %v12299_v12 = vadd.f32 %v4827_v63, %v13784_v43  ;;  %v4830_v9 = vadd.f32 %v12081_v3, %v4829_v2  ;;  %v6871_v52 = vpop.f32.mrb[227].mxu1  ;;  %6957 = vmatmul.mubr.bf16.gmra.mrb[224].mxu0 %v4989_v20  ;;  %v13786_v43 = vmax.f32 %v11826_v6, 0.0 }
 0x6d8   :  { %6960 = vmatprep.mubr.msk.bf16.mxu0 %vm7803_vm2, %v13553_v57 }
 0x6d9   :  { %v12306_v21 = vadd.f32 %v4830_v9, %v13785_v40  ;;  %v13167_v38 = vmax.f32 %v12299_v12, 0.0  ;;  %v13787_v40 = vmax.f32 %v11833_v18, 0.0 }
 0x6db   :  { %v13166_v30 = vmax.f32 %v12306_v21, 0.0 }
 0x6dc   :  { %v4834_v61 = vpop.f32.mrb[228].mxu1 }
 0x6dd   :  { %v4835_v28 = vadd.f32 %v12081_v3, %v4834_v61  ;;  %v6874_v63 = vpop.f32.mrb[229].mxu1  ;;  %v4990_v20 = vpack.c.bf16 %v13166_v30, %v13167_v38 }
 0x6de   :  { %v4837_v2 = vpop.f32.mrb[230].mxu1 }
 0x6df   :  { %v12317_v52 = vadd.f32 %v4835_v28, %v13786_v43  ;;  %v4838_v5 = vadd.f32 %v12081_v3, %v4837_v2  ;;  %v6875_v9 = vpop.f32.mrb[231].mxu1  ;;  %6961 = vmatmul.mubr.bf16.gmra.mrb[228].mxu0 %v4990_v20  ;;  %v13788_v43 = vmax.f32 %v11844_v7, 0.0 }
 0x6e0   :  { %6964 = vmatprep.mubr.msk.bf16.mxu0 %vm7803_vm2, %v13553_v57 }
 0x6e1   :  { %v12324_v61 = vadd.f32 %v4838_v5, %v13787_v40  ;;  %v13169_v63 = vmax.f32 %v12317_v52, 0.0 }
 0x6e3   :  { %v13168_v30 = vmax.f32 %v12324_v61, 0.0 }
 0x6e4   :  { %v4842_v38 = vpop.f32.mrb[232].mxu1 }
 0x6e5   :  { %v4843_v6 = vadd.f32 %v12081_v3, %v4842_v38  ;;  %v6878_v28 = vpop.f32.mrb[233].mxu1  ;;  %v4991_v20 = vpack.c.bf16 %v13168_v30, %v13169_v63  ;;  %v13789_v38 = vmax.f32 %v11851_v37, 0.0 }
 0x6e6   :  { %v4845_v2 = vpop.f32.mrb[234].mxu1 }
 0x6e7   :  { %v12335_v9 = vadd.f32 %v4843_v6, %v13788_v43  ;;  %v4846_v18 = vadd.f32 %v12081_v3, %v4845_v2  ;;  %v6879_v5 = vpop.f32.mrb[235].mxu1  ;;  %6965 = vmatmul.mubr.bf16.gmra.mrb[232].mxu0 %v4991_v20  ;;  %v13790_v43 = vmax.f32 %v11862_v13, 0.0 }
 0x6e8   :  { %6968 = vmatprep.mubr.msk.bf16.mxu0 %vm7803_vm2, %v13553_v57 }
 0x6e9   :  { %v12342_v40 = vadd.f32 %v4846_v18, %v13789_v38  ;;  %v13171_v28 = vmax.f32 %v12335_v9, 0.0 }
 0x6eb   :  { %v13170_v30 = vmax.f32 %v12342_v40, 0.0 }
 0x6ec   :  { %v4850_v63 = vpop.f32.mrb[236].mxu1 }
 0x6ed   :  { %v4851_v7 = vadd.f32 %v12081_v3, %v4850_v63  ;;  %v6882_v6 = vpop.f32.mrb[237].mxu1  ;;  %v4992_v20 = vpack.c.bf16 %v13170_v30, %v13171_v28  ;;  %v13791_v63 = vmax.f32 %v11869_v54, 0.0  ;;  %v13793_v28 = vmax.f32 %v11887_v39, 0.0 }
 0x6ee   :  { %v4853_v2 = vpop.f32.mrb[238].mxu1 }
 0x6ef   :  { %v12353_v5 = vadd.f32 %v4851_v7, %v13790_v43  ;;  %v4854_v37 = vadd.f32 %v12081_v3, %v4853_v2  ;;  %v6883_v18 = vpop.f32.mrb[239].mxu1  ;;  %6969 = vmatmul.mubr.bf16.gmra.mrb[236].mxu0 %v4992_v20  ;;  %v13792_v43 = vmax.f32 %v11882_v51, 0.0  ;;  %v12389_v51 = vld [vmem:[%s12945_s7 + $0x4] ss:$0 sm:$0xff] }
 0x6f0   :  { %6972 = vmatprep.mubr.msk.bf16.mxu0 %vm7803_vm2, %v13553_v57 }
 0x6f1   :  { %v12360_v38 = vadd.f32 %v4854_v37, %v13791_v63  ;;  %v13176_v6 = vmax.f32 %v12353_v5, 0.0 }
 0x6f3   :  { %v13173_v30 = vmax.f32 %v12360_v38, 0.0 }
 0x6f5   :  { %v4993_v13 = vpack.c.bf16 %v13173_v30, %v13176_v6 }
 0x6f7   :  { %6973 = vmatmul.mubr.bf16.gmra.mrb[240].mxu0 %v4993_v13 }
 0x6f8   :  { %6976 = vmatprep.mubr.msk.bf16.mxu0 %vm7803_vm2, %v13553_v57 }
 0x70b   :  { %v4858_v7 = vpop.f32.mrb[240].mxu1 }
 0x70c   :  { %v4859_v20 = vadd.f32 %v12081_v3, %v4858_v7  ;;  %v6886_v2 = vpop.f32.mrb[241].mxu1 }
 0x70d   :  { %v4861_v54 = vpop.f32.mrb[242].mxu1 }
 0x70e   :  { %v12373_v37 = vadd.f32 %v4859_v20, %v13792_v43  ;;  %v4862_v18 = vadd.f32 %v12081_v3, %v4861_v54  ;;  %v6887_v63 = vpop.f32.mrb[243].mxu1 }
 0x710   :  { %v12378_v53 = vadd.f32 %v4862_v18, %v13793_v28  ;;  %v13175_v13 = vmax.f32 %v12373_v37, 0.0 }
 0x712   :  { %v13174_v30 = vmax.f32 %v12378_v53, 0.0 }
 0x714   :  { %v4994_v7 = vpack.c.bf16 %v13174_v30, %v13175_v13 }
 0x716   :  { %6977 = vmatmul.mubr.bf16.gmra.mrb[244].mxu0 %v4994_v7 }
 0x717   :  { %6980 = vmatprep.mubr.msk.bf16.mxu0 %vm7803_vm2, %v13553_v57 }
 0x719   :  { %v5107_v39 = vpop.f32.mrb[192].mxu0 }
 0x71a   :  { %v5108_v28 = vadd.f32 %v12389_v51, %v5107_v39  ;;  %v6926_v20 = vpop.f32.mrb[193].mxu0 }
 0x71b   :  { %v5110_v2 = vpop.f32.mrb[194].mxu0 }
 0x71c   :  { %v5111_v54 = vadd.f32 %v12389_v51, %v5110_v2  ;;  %v6927_v43 = vpop.f32.mrb[195].mxu0  ;;  %v5258_v18 = vmax.f32 %v5108_v28, 0.0 }
 0x71e   :  { %v5259_v63 = vmax.f32 %v5111_v54, 0.0 }
 0x720   :  { %v5296_v30 = vpack.c.bf16 %v5259_v63, %v5258_v18 }
 0x722   :  { %v5115_v7 = vpop.f32.mrb[196].mxu0  ;;  %7017 = vmatmul.mubr.bf16.vlgmr.msra.gmra.mrb[8].mxu1 %v5296_v30  ;;  %v13794_v30 = vmax.f32 %v11911_v45, 0.0 }
 0x723   :  { %v5116_v13 = vadd.f32 %v12389_v51, %v5115_v7  ;;  %v6930_v6 = vpop.f32.mrb[197].mxu0  ;;  %7020 = vmatprep.mubr.msk.bf16.mxu1 %vm7803_vm2, %v13553_v57 }
 0x724   :  { %v5118_v27 = vpop.f32.mrb[198].mxu0 }
 0x725   :  { %v5119_v41 = vadd.f32 %v12389_v51, %v5118_v27  ;;  %v6931_v39 = vpop.f32.mrb[199].mxu0  ;;  %v5260_v20 = vmax.f32 %v5116_v13, 0.0 }
 0x727   :  { %v5261_v35 = vmax.f32 %v5119_v41, 0.0  ;;  %v4866_v23 = vpop.f32.mrb[244].mxu1  ;;  %v13795_v41 = vmax.f32 %v11917_v49, 0.0 }
 0x728   :  { %v4867_v2 = vadd.f32 %v12081_v3, %v4866_v23  ;;  %v6890_v28 = vpop.f32.mrb[245].mxu1 }
 0x729   :  { %v5297_v54 = vpack.c.bf16 %v5261_v35, %v5260_v20  ;;  %v4869_v43 = vpop.f32.mrb[246].mxu1 }
 0x72a   :  { %v12402_v18 = vadd.f32 %v4867_v2, %v13794_v30  ;;  %v4870_v6 = vadd.f32 %v12081_v3, %v4869_v43  ;;  %v5123_v63 = vpop.f32.mrb[200].mxu0  ;;  %v6891_v7 = vpop.f32.mrb[247].mxu1 }
 0x72b   :  { %v5124_v48 = vadd.f32 %v12389_v51, %v5123_v63  ;;  %v6934_v27 = vpop.f32.mrb[201].mxu0  ;;  %7021 = vmatmul.mubr.bf16.gmra.mrb[12].mxu1 %v5297_v54 }
 0x72c   :  { %v12408_v13 = vadd.f32 %v4870_v6, %v13795_v41  ;;  %v5126_v23 = vpop.f32.mrb[202].mxu0  ;;  %7024 = vmatprep.mubr.msk.bf16.mxu1 %vm7803_vm2, %v13553_v57  ;;  %v4971_v39 = vmax.f32 %v12402_v18, 0.0 }
 0x72d   :  { %v5127_v45 = vadd.f32 %v12389_v51, %v5126_v23  ;;  %v6935_v35 = vpop.f32.mrb[203].mxu0  ;;  %v5262_v2 = vmax.f32 %v5124_v48, 0.0 }
 0x72e   :  { %v13188_v20 = vmax.f32 %v12408_v13, 0.0 }
 0x72f   :  { %v5263_v28 = vmax.f32 %v5127_v45, 0.0 }
 0x730   :  { %v4995_v49 = vpack.c.bf16 %v13188_v20, %v4971_v39 }
 0x731   :  { %v5298_v54 = vpack.c.bf16 %v5263_v28, %v5262_v2 }
 0x732   :  { %v5131_v43 = vpop.f32.mrb[204].mxu0  ;;  %6981 = vmatmul.mubr.bf16.gmra.mrb[248].mxu0 %v4995_v49  ;;  %v13796_v49 = vmax.f32 %v11939_v14, 0.0  ;;  %v7333_v14 = vld [vmem:[%s12946_s8] sm:$0xff]  }
 0x733   :  { %v5132_v30 = vadd.f32 %v12389_v51, %v5131_v43  ;;  %v6938_v6 = vpop.f32.mrb[205].mxu0  ;;  %7025 = vmatmul.mubr.bf16.gmra.mrb[16].mxu1 %v5298_v54  ;;  %6984 = vmatprep.mubr.msk.bf16.mxu0 %vm7803_vm2, %v13553_v57 }
 0x734   :  { %v5134_v63 = vpop.f32.mrb[206].mxu0  ;;  %7028 = vmatprep.mubr.msk.bf16.mxu1 %vm7803_vm2, %v13553_v57  ;;  %7093 = vmatpush3.bf16.msra.mxu0 %v7333_v14 }
 0x735   :  { %v5135_v48 = vadd.f32 %v12389_v51, %v5134_v63  ;;  %v6939_v7 = vpop.f32.mrb[207].mxu0  ;;  %v5264_v27 = vmax.f32 %v5132_v30, 0.0  ;;  %v13797_v30 = vmax.f32 %v11944_v19, 0.0  ;;  %v7334_v19 = vld [vmem:[%s12946_s8 + $0x8] sm:$0xff]   ;;  %7094 = vmatprep.subr.bf16.mxu0 %v13553_v57 }
 0x737   :  { %v5265_v41 = vmax.f32 %v5135_v48, 0.0 }
 0x738   :  { %7095 = vmatpush3.bf16.msra.mxu0 %v7334_v19 }
 0x739   :  { %v5299_v23 = vpack.c.bf16 %v5265_v41, %v5264_v27  ;;  %7096 = vmatprep.subr.bf16.mxu0 %v13553_v57 }
 0x73b   :  { %7029 = vmatmul.mubr.bf16.gmra.mrb[20].mxu1 %v5299_v23 }
 0x73c   :  { %7032 = vmatprep.mubr.msk.bf16.mxu1 %vm7803_vm2, %v13553_v57 }
 0x747   :  { %v4874_v45 = vpop.f32.mrb[248].mxu1 }
 0x748   :  { %v4875_v35 = vadd.f32 %v12081_v3, %v4874_v45  ;;  %v6894_v2 = vpop.f32.mrb[249].mxu1 }
 0x749   :  { %v4877_v28 = vpop.f32.mrb[250].mxu1  ;;  %v13798_v2 = vmax.f32 %v11965_v36, 0.0 }
 0x74a   :  { %v12430_v54 = vadd.f32 %v4875_v35, %v13796_v49  ;;  %v4878_v43 = vadd.f32 %v12081_v3, %v4877_v28  ;;  %v6895_v6 = vpop.f32.mrb[251].mxu1 }
 0x74b   :  { %v13799_v6 = vmax.f32 %v11970_v24, 0.0  ;;  %v7336_v24 = vld [vmem:[%s12946_s8 + $0x18] sm:$0xff]  }
 0x74c   :  { %v12435_v63 = vadd.f32 %v4878_v43, %v13797_v30  ;;  %v13187_v48 = vmax.f32 %v12430_v54, 0.0 }
 0x74e   :  { %v13184_v7 = vmax.f32 %v12435_v63, 0.0 }
 0x750   :  { %v4996_v27 = vpack.c.bf16 %v13184_v7, %v13187_v48 }
 0x752   :  { %6985 = vmatmul.mubr.bf16.gmra.mrb[252].mxu0 %v4996_v27  ;;  %v7335_v27 = vld [vmem:[%s12946_s8 + $0x10] sm:$0xff]  }
 0x753   :  { %6988 = vmatprep.mubr.msk.bf16.mxu0 %vm7803_vm2, %v13553_v57  ;;  %7097 = vmatpush3.bf16.msra.mxu0 %v7335_v27  ;;  %v13800_v27 = vmax.f32 %v12007_v25, 0.0 }
 0x754   :  { %7098 = vmatprep.subr.bf16.mxu0 %v13553_v57 }
 0x757   :  { %7099 = vmatpush3.bf16.msra.mxu0 %v7336_v24 }
 0x758   :  { %7100 = vmatprep.subr.bf16.mxu0 %v13553_v57 }
 0x763   :  { %v4882_v41 = vpop.f32.mrb[252].mxu1 }
 0x764   :  { %v4883_v23 = vadd.f32 %v12081_v3, %v4882_v41  ;;  %v6898_v45 = vpop.f32.mrb[253].mxu1  ;;  %v7337_v41 = vld [vmem:[%s12946_s8 + $0x20] sm:$0xff]  }
 0x765   :  { %v4885_v35 = vpop.f32.mrb[254].mxu1  ;;  %7101 = vmatpush3.bf16.msra.mxu0 %v7337_v41  ;;  %v7339_v45 = vld [vmem:[%s12946_s8 + $0x30] sm:$0xff]  }
 0x766   :  { %v12456_v28 = vadd.f32 %v4883_v23, %v13798_v2  ;;  %v4886_v49 = vadd.f32 %v12081_v3, %v4885_v35  ;;  %v6899_v43 = vpop.f32.mrb[255].mxu1  ;;  %7102 = vmatprep.subr.bf16.mxu0 %v13553_v57  ;;  %v7338_v23 = vld [vmem:[%s12946_s8 + $0x28] sm:$0xff]   ;;  %v7340_v35 = vld [vmem:[%s12946_s8 + $0x38] sm:$0xff]  }
 0x768   :  { %v12461_v30 = vadd.f32 %v4886_v49, %v13799_v6  ;;  %v13183_v14 = vmax.f32 %v12456_v28, 0.0 }
 0x769   :  { %7103 = vmatpush3.bf16.msra.mxu0 %v7338_v23  ;;  %v13801_v23 = vmax.f32 %v12012_v15, 0.0 }
 0x76a   :  { %v13182_v19 = vmax.f32 %v12461_v30, 0.0  ;;  %7104 = vmatprep.subr.bf16.mxu0 %v13553_v57 }
 0x76c   :  { %v4997_v36 = vpack.c.bf16 %v13182_v19, %v13183_v14 }
 0x76d   :  { %7105 = vmatpush3.bf16.msra.mxu0 %v7339_v45 }
 0x76e   :  { %6989 = vmatmul.mubr.bf16.gmra.mrb[0].mxu0 %v4997_v36  ;;  %7106 = vmatprep.subr.bf16.mxu0 %v13553_v57 }
 0x76f   :  { %6992 = vmatprep.mubr.msk.bf16.mxu0 %vm7803_vm2, %v13553_v57 }
 0x771   :  { %7107 = vmatpush3.bf16.msra.mxu0 %v7340_v35 }
 0x783   :  { %v4890_v2 = vpop.f32.mrb[0].mxu1 }
 0x784   :  { %v4891_v49 = vadd.f32 %v12081_v3, %v4890_v2  ;;  %v6902_v43 = vpop.f32.mrb[1].mxu1 }
 0x785   :  { %v4893_v6 = vpop.f32.mrb[2].mxu1 }
 0x786   :  { %v12497_v36 = vadd.f32 %v4891_v49, %v13800_v27  ;;  %v4894_v24 = vadd.f32 %v12081_v3, %v4893_v6  ;;  %v6903_v41 = vpop.f32.mrb[3].mxu1 }
 0x788   :  { %v12502_v45 = vadd.f32 %v4894_v24, %v13801_v23  ;;  %v13186_v19 = vmax.f32 %v12497_v36, 0.0 }
 0x78a   :  { %v13185_v35 = vmax.f32 %v12502_v45, 0.0  ;;  %v5139_v14 = vpop.f32.mrb[208].mxu0 }
 0x78b   :  { %v5140_v2 = vadd.f32 %v12389_v51, %v5139_v14  ;;  %v6942_v43 = vpop.f32.mrb[209].mxu0 }
 0x78c   :  { %v4998_v25 = vpack.c.bf16 %v13185_v35, %v13186_v19  ;;  %v5142_v49 = vpop.f32.mrb[210].mxu0 }
 0x78d   :  { %v5143_v6 = vadd.f32 %v12389_v51, %v5142_v49  ;;  %v6943_v27 = vpop.f32.mrb[211].mxu0  ;;  %v5266_v15 = vmax.f32 %v5140_v2, 0.0 }
 0x78e   :  { %6993 = vmatmul.mubr.bf16.gmra.mrb[4].mxu0 %v4998_v25 }
 0x78f   :  { %v5267_v24 = vmax.f32 %v5143_v6, 0.0  ;;  %6996 = vmatprep.mubr.msk.bf16.mxu0 %vm7803_vm2, %v13553_v57 }
 0x791   :  { %v5300_v41 = vpack.c.bf16 %v5267_v24, %v5266_v15 }
 0x792   :  { %v5147_v23 = vpop.f32.mrb[212].mxu0 }
 0x793   :  { %v5148_v14 = vadd.f32 %v12389_v51, %v5147_v23  ;;  %v6946_v43 = vpop.f32.mrb[213].mxu0  ;;  %7033 = vmatmul.mubr.bf16.gmra.mrb[24].mxu1 %v5300_v41 }
 0x794   :  { %v5150_v7 = vpop.f32.mrb[214].mxu0  ;;  %7036 = vmatprep.mubr.msk.bf16.mxu1 %vm7803_vm2, %v13553_v57 }
 0x795   :  { %v5151_v35 = vadd.f32 %v12389_v51, %v5150_v7  ;;  %v6947_v49 = vpop.f32.mrb[215].mxu0  ;;  %v5268_v27 = vmax.f32 %v5148_v14, 0.0 }
 0x797   :  { %v5269_v25 = vmax.f32 %v5151_v35, 0.0 }
 0x799   :  { %v5301_v2 = vpack.c.bf16 %v5269_v25, %v5268_v27 }
 0x79a   :  { %v5155_v6 = vpop.f32.mrb[216].mxu0 }
 0x79b   :  { %v5156_v19 = vadd.f32 %v12389_v51, %v5155_v6  ;;  %v4898_v48 = vpop.f32.mrb[4].mxu1  ;;  %v6950_v15 = vpop.f32.mrb[217].mxu0  ;;  %7037 = vmatmul.mubr.bf16.gmra.mrb[28].mxu1 %v5301_v2 }
 0x79c   :  { %v4899_v24 = vadd.f32 %v12081_v3, %v4898_v48  ;;  %v6906_v23 = vpop.f32.mrb[5].mxu1  ;;  %v5158_v41 = vpop.f32.mrb[218].mxu0  ;;  %7040 = vmatprep.mubr.msk.bf16.mxu1 %vm7803_vm2, %v13553_v57  ;;  %v13802_v48 = vmax.f32 %v12040_v29, 0.0 }
 0x79d   :  { %v5159_v43 = vadd.f32 %v12389_v51, %v5158_v41  ;;  %v4901_v7 = vpop.f32.mrb[6].mxu1  ;;  %v6951_v49 = vpop.f32.mrb[219].mxu0  ;;  %v5270_v25 = vmax.f32 %v5156_v19, 0.0 }
 0x79e   :  { %v12525_v35 = vadd.f32 %v4899_v24, %v4311_v46  ;;  %v4902_v14 = vadd.f32 %v12081_v3, %v4901_v7  ;;  %v6907_v27 = vpop.f32.mrb[7].mxu1 }
 0x79f   :  { %v5271_v2 = vmax.f32 %v5159_v43, 0.0 }
 0x7a0   :  { %v12530_v6 = vadd.f32 %v4902_v14, %v13802_v48  ;;  %v13190_v23 = vmax.f32 %v12525_v35, 0.0 }
 0x7a1   :  { %v5302_v15 = vpack.c.bf16 %v5271_v2, %v5270_v25 }
 0x7a2   :  { %v13189_v41 = vmax.f32 %v12530_v6, 0.0  ;;  %v5163_v20 = vpop.f32.mrb[220].mxu0 }
 0x7a3   :  { %v5164_v49 = vadd.f32 %v12389_v51, %v5163_v20  ;;  %v6954_v22 = vpop.f32.mrb[221].mxu0  ;;  %7041 = vmatmul.mubr.bf16.gmra.mrb[32].mxu1 %v5302_v15 }
 0x7a4   :  { %v4999_v46 = vpack.c.bf16 %v13189_v41, %v13190_v23  ;;  %v5166_v3 = vpop.f32.mrb[222].mxu0  ;;  %7044 = vmatprep.mubr.msk.bf16.mxu1 %vm7803_vm2, %v13553_v57 }
 0x7a5   :  { %v5167_v29 = vadd.f32 %v12389_v51, %v5166_v3  ;;  %v6955_v19 = vpop.f32.mrb[223].mxu0  ;;  %v5272_v24 = vmax.f32 %v5164_v49, 0.0 }
 0x7a6   :  { %6997 = vmatmul.mubr.bf16.gmra.mrb[8].mxu0 %v4999_v46 }
 0x7a7   :  { %v5273_v43 = vmax.f32 %v5167_v29, 0.0  ;;  %7108 = vmatprep.mubr.msk.bf16.mxu0 %vm7803_vm2, %v13553_v57 }
 0x7a9   :  { %v5303_v20 = vpack.c.bf16 %v5273_v43, %v5272_v24 }
 0x7aa   :  { %v5171_v7 = vpop.f32.mrb[224].mxu0 }
 0x7ab   :  { %v5172_v14 = vadd.f32 %v12389_v51, %v5171_v7  ;;  %v6958_v27 = vpop.f32.mrb[225].mxu0  ;;  %7045 = vmatmul.mubr.bf16.gmra.mrb[36].mxu1 %v5303_v20 }
 0x7ac   :  { %v5174_v25 = vpop.f32.mrb[226].mxu0  ;;  %7048 = vmatprep.mubr.msk.bf16.mxu1 %vm7803_vm2, %v13553_v57 }
 0x7ad   :  { %v5175_v2 = vadd.f32 %v12389_v51, %v5174_v25  ;;  %v6959_v48 = vpop.f32.mrb[227].mxu0  ;;  %v5274_v15 = vmax.f32 %v5172_v14, 0.0 }
 0x7af   :  { %v5275_v22 = vmax.f32 %v5175_v2, 0.0 }
 0x7b1   :  { %v5304_v49 = vpack.c.bf16 %v5275_v22, %v5274_v15 }
 0x7b2   :  { %v5179_v46 = vpop.f32.mrb[228].mxu0 }
 0x7b3   :  { %v5180_v3 = vadd.f32 %v12389_v51, %v5179_v46  ;;  %v6962_v29 = vpop.f32.mrb[229].mxu0  ;;  %7049 = vmatmul.mubr.bf16.gmra.mrb[40].mxu1 %v5304_v49 }
 0x7b4   :  { %v5182_v19 = vpop.f32.mrb[230].mxu0  ;;  %7052 = vmatprep.mubr.msk.bf16.mxu1 %vm7803_vm2, %v13553_v57 }
 0x7b5   :  { %v5183_v24 = vadd.f32 %v12389_v51, %v5182_v19  ;;  %v6963_v43 = vpop.f32.mrb[231].mxu0  ;;  %v5276_v20 = vmax.f32 %v5180_v3, 0.0 }
 0x7b7   :  { %v5277_v7 = vmax.f32 %v5183_v24, 0.0 }
 0x7b9   :  { %v5305_v27 = vpack.c.bf16 %v5277_v7, %v5276_v20 }
 0x7ba   :  { %v5187_v25 = vpop.f32.mrb[232].mxu0 }
 0x7bb   :  { %v5188_v14 = vadd.f32 %v12389_v51, %v5187_v25  ;;  %v6966_v2 = vpop.f32.mrb[233].mxu0  ;;  %7053 = vmatmul.mubr.bf16.gmra.mrb[44].mxu1 %v5305_v27 }
 0x7bc   :  { %v5190_v48 = vpop.f32.mrb[234].mxu0  ;;  %7056 = vmatprep.mubr.msk.bf16.mxu1 %vm7803_vm2, %v13553_v57 }
 0x7bd   :  { %v5191_v15 = vadd.f32 %v12389_v51, %v5190_v48  ;;  %v6967_v22 = vpop.f32.mrb[235].mxu0  ;;  %v5278_v49 = vmax.f32 %v5188_v14, 0.0 }
 0x7bf   :  { %v5279_v46 = vmax.f32 %v5191_v15, 0.0 }
 0x7c1   :  { %v5306_v29 = vpack.c.bf16 %v5279_v46, %v5278_v49 }
 0x7c2   :  { %v5195_v19 = vpop.f32.mrb[236].mxu0 }
 0x7c3   :  { %v5196_v3 = vadd.f32 %v12389_v51, %v5195_v19  ;;  %v6970_v24 = vpop.f32.mrb[237].mxu0  ;;  %7057 = vmatmul.mubr.bf16.gmra.mrb[48].mxu1 %v5306_v29 }
 0x7c4   :  { %v5198_v43 = vpop.f32.mrb[238].mxu0  ;;  %7060 = vmatprep.mubr.msk.bf16.mxu1 %vm7803_vm2, %v13553_v57 }
 0x7c5   :  { %v5199_v20 = vadd.f32 %v12389_v51, %v5198_v43  ;;  %v6971_v7 = vpop.f32.mrb[239].mxu0  ;;  %v5280_v27 = vmax.f32 %v5196_v3, 0.0 }
 0x7c7   :  { %v5281_v25 = vmax.f32 %v5199_v20, 0.0 }
 0x7c9   :  { %v5307_v2 = vpack.c.bf16 %v5281_v25, %v5280_v27 }
 0x7ca   :  { %v5203_v48 = vpop.f32.mrb[240].mxu0 }
 0x7cb   :  { %v5204_v14 = vadd.f32 %v12389_v51, %v5203_v48  ;;  %v6974_v15 = vpop.f32.mrb[241].mxu0  ;;  %7061 = vmatmul.mubr.bf16.gmra.mrb[52].mxu1 %v5307_v2 }
 0x7cc   :  { %v5206_v22 = vpop.f32.mrb[242].mxu0  ;;  %7064 = vmatprep.mubr.msk.bf16.mxu1 %vm7803_vm2, %v13553_v57 }
 0x7cd   :  { %v5207_v49 = vadd.f32 %v12389_v51, %v5206_v22  ;;  %v6975_v46 = vpop.f32.mrb[243].mxu0  ;;  %v5282_v29 = vmax.f32 %v5204_v14, 0.0  ;;  %v12571_v14 = vld [vmem:[%s12945_s7 + $0x5] ss:$0 sm:$0xff] }
 0x7cf   :  { %v5283_v19 = vmax.f32 %v5207_v49, 0.0 }
 0x7d1   :  { %v5308_v24 = vpack.c.bf16 %v5283_v19, %v5282_v29  ;;  %v13803_v19 = vmax.f32 %v12088_v59, 0.0 }
 0x7d3   :  { %7065 = vmatmul.mubr.bf16.gmra.mrb[56].mxu1 %v5308_v24 }
 0x7d4   :  { %7068 = vmatprep.mubr.msk.bf16.mxu1 %vm7803_vm2, %v13553_v57 }
 0x7e9   :  { %v5211_v3 = vpop.f32.mrb[244].mxu0 }
 0x7ea   :  { %v5212_v43 = vadd.f32 %v12389_v51, %v5211_v3  ;;  %v6978_v20 = vpop.f32.mrb[245].mxu0 }
 0x7eb   :  { %v5214_v7 = vpop.f32.mrb[246].mxu0  ;;  %v13804_v20 = vmax.f32 %v12093_v10, 0.0  ;;  %v13805_v10 = vmax.f32 %v12111_v58, 0.0 }
 0x7ec   :  { %v5215_v27 = vadd.f32 %v12389_v51, %v5214_v7  ;;  %v6979_v25 = vpop.f32.mrb[247].mxu0  ;;  %v5284_v2 = vmax.f32 %v5212_v43, 0.0 }
 0x7ee   :  { %v5285_v48 = vmax.f32 %v5215_v27, 0.0 }
 0x7f0   :  { %v5309_v15 = vpack.c.bf16 %v5285_v48, %v5284_v2 }
 0x7f2   :  { %7069 = vmatmul.mubr.bf16.gmra.mrb[60].mxu1 %v5309_v15 }
 0x7f3   :  { %7072 = vmatprep.mubr.msk.bf16.mxu1 %vm7803_vm2, %v13553_v57 }
 0x7f5   :  { %v5422_v22 = vpop.f32.mrb[8].mxu1 }
 0x7f6   :  { %v5423_v49 = vadd.f32 %v12571_v14, %v5422_v22  ;;  %v7018_v46 = vpop.f32.mrb[9].mxu1 }
 0x7f7   :  { %v5425_v29 = vpop.f32.mrb[10].mxu1 }
 0x7f8   :  { %v5573_v24 = vadd.f32 %v5423_v49, %v13803_v19  ;;  %v5426_v3 = vadd.f32 %v12571_v14, %v5425_v29  ;;  %v7019_v43 = vpop.f32.mrb[11].mxu1 }
 0x7fa   :  { %v5574_v7 = vadd.f32 %v5426_v3, %v13804_v20  ;;  %v5611_v27 = vmax.f32 %v5573_v24, 0.0 }
 0x7fc   :  { %v5612_v25 = vmax.f32 %v5574_v7, 0.0 }
 0x7fe   :  { %v5649_v2 = vpack.c.bf16 %v5612_v25, %v5611_v27  ;;  %v5430_v48 = vpop.f32.mrb[12].mxu1 }
 0x7ff   :  { %v5431_v15 = vadd.f32 %v12571_v14, %v5430_v48  ;;  %v7022_v41 = vpop.f32.mrb[13].mxu1 }
 0x800   :  { %v5433_v23 = vpop.f32.mrb[14].mxu1  ;;  %7109 = vmatmul.mubr.bf16.vlgmr.msra.gmra.mrb[12].mxu0 %v5649_v2  ;;  %v13806_v2 = vmax.f32 %v12124_v26, 0.0 }
 0x801   :  { %v5575_v22 = vadd.f32 %v5431_v15, %v4945_v55  ;;  %v5434_v59 = vadd.f32 %v12571_v14, %v5433_v23  ;;  %v7023_v49 = vpop.f32.mrb[15].mxu1  ;;  %7112 = vmatprep.mubr.msk.bf16.mxu0 %vm7803_vm2, %v13553_v57 }
 0x802   :  { %v13807_v49 = vmax.f32 %v12131_v16, 0.0 }
 0x803   :  { %v5576_v46 = vadd.f32 %v5434_v59, %v13805_v10  ;;  %v5613_v29 = vmax.f32 %v5575_v22, 0.0 }
 0x805   :  { %v5614_v19 = vmax.f32 %v5576_v46, 0.0  ;;  %v5219_v24 = vpop.f32.mrb[248].mxu0 }
 0x806   :  { %v5220_v3 = vadd.f32 %v12389_v51, %v5219_v24  ;;  %v5438_v41 = vpop.f32.mrb[16].mxu1  ;;  %v6982_v43 = vpop.f32.mrb[249].mxu0 }
 0x807   :  { %v5650_v20 = vpack.c.bf16 %v5614_v19, %v5613_v29  ;;  %v5439_v34 = vadd.f32 %v12571_v14, %v5438_v41  ;;  %v7026_v55 = vpop.f32.mrb[17].mxu1  ;;  %v5222_v7 = vpop.f32.mrb[250].mxu0 }
 0x808   :  { %v5223_v23 = vadd.f32 %v12389_v51, %v5222_v7  ;;  %v5441_v27 = vpop.f32.mrb[18].mxu1  ;;  %v6983_v25 = vpop.f32.mrb[251].mxu0  ;;  %v5286_v22 = vmax.f32 %v5220_v3, 0.0  ;;  %v13809_v7 = vmax.f32 %v12151_v1, 0.0 }
 0x809   :  { %v5577_v58 = vadd.f32 %v5439_v34, %v13806_v2  ;;  %v5442_v48 = vadd.f32 %v12571_v14, %v5441_v27  ;;  %v7027_v15 = vpop.f32.mrb[19].mxu1  ;;  %7113 = vmatmul.mubr.bf16.gmra.mrb[16].mxu0 %v5650_v20  ;;  %v13808_v20 = vmax.f32 %v12144_v8, 0.0 }
 0x80a   :  { %v5287_v59 = vmax.f32 %v5223_v23, 0.0  ;;  %7116 = vmatprep.mubr.msk.bf16.mxu0 %vm7803_vm2, %v13553_v57 }
 0x80b   :  { %v5578_v10 = vadd.f32 %v5442_v48, %v13807_v49  ;;  %v5615_v29 = vmax.f32 %v5577_v58, 0.0 }
 0x80c   :  { %v5310_v46 = vpack.c.bf16 %v5287_v59, %v5286_v22 }
 0x80d   :  { %v5616_v19 = vmax.f32 %v5578_v10, 0.0 }
 0x80e   :  { %v5446_v24 = vpop.f32.mrb[20].mxu1  ;;  %7073 = vmatmul.mubr.bf16.gmra.mrb[64].mxu1 %v5310_v46 }
 0x80f   :  { %v5651_v41 = vpack.c.bf16 %v5616_v19, %v5615_v29  ;;  %v5447_v26 = vadd.f32 %v12571_v14, %v5446_v24  ;;  %v7030_v43 = vpop.f32.mrb[21].mxu1  ;;  %7076 = vmatprep.mubr.msk.bf16.mxu1 %vm7803_vm2, %v13553_v57 }
 0x810   :  { %v5449_v3 = vpop.f32.mrb[22].mxu1 }
 0x811   :  { %v5579_v34 = vadd.f32 %v5447_v26, %v13808_v20  ;;  %v5450_v55 = vadd.f32 %v12571_v14, %v5449_v3  ;;  %v7031_v16 = vpop.f32.mrb[23].mxu1  ;;  %7117 = vmatmul.mubr.bf16.gmra.mrb[20].mxu0 %v5651_v41 }
 0x812   :  { %7120 = vmatprep.mubr.msk.bf16.mxu0 %vm7803_vm2, %v13553_v57 }
 0x813   :  { %v5580_v23 = vadd.f32 %v5450_v55, %v13809_v7  ;;  %v5617_v27 = vmax.f32 %v5579_v34, 0.0 }
 0x815   :  { %v5618_v25 = vmax.f32 %v5580_v23, 0.0 }
 0x817   :  { %v5652_v2 = vpack.c.bf16 %v5618_v25, %v5617_v27 }
 0x819   :  { %7121 = vmatmul.mubr.bf16.gmra.mrb[24].mxu0 %v5652_v2 }
 0x81a   :  { %7124 = vmatprep.mubr.msk.bf16.mxu0 %vm7803_vm2, %v13553_v57 }
 0x825   :  { %v5227_v58 = vpop.f32.mrb[252].mxu0 }
 0x826   :  { %v5228_v8 = vadd.f32 %v12389_v51, %v5227_v58  ;;  %v6986_v48 = vpop.f32.mrb[253].mxu0 }
 0x827   :  { %v5230_v15 = vpop.f32.mrb[254].mxu0 }
 0x828   :  { %v5231_v22 = vadd.f32 %v12389_v51, %v5230_v15  ;;  %v6987_v59 = vpop.f32.mrb[255].mxu0  ;;  %v5288_v49 = vmax.f32 %v5228_v8, 0.0 }
 0x82a   :  { %v5289_v10 = vmax.f32 %v5231_v22, 0.0 }
 0x82c   :  { %v5311_v46 = vpack.c.bf16 %v5289_v10, %v5288_v49 }
 0x82e   :  { %7077 = vmatmul.mubr.bf16.gmra.mrb[68].mxu1 %v5311_v46 }
 0x82f   :  { %7080 = vmatprep.mubr.msk.bf16.mxu1 %vm7803_vm2, %v13553_v57 }
 0x841   :  { %v5235_v1 = vpop.f32.mrb[0].mxu0 }
 0x842   :  { %v5236_v29 = vadd.f32 %v12389_v51, %v5235_v1  ;;  %v6990_v19 = vpop.f32.mrb[1].mxu0 }
 0x843   :  { %v5238_v24 = vpop.f32.mrb[2].mxu0 }
 0x844   :  { %v5239_v41 = vadd.f32 %v12389_v51, %v5238_v24  ;;  %v6991_v26 = vpop.f32.mrb[3].mxu0  ;;  %v5290_v43 = vmax.f32 %v5236_v29, 0.0 }
 0x846   :  { %v5291_v3 = vmax.f32 %v5239_v41, 0.0 }
 0x848   :  { %v5312_v20 = vpack.c.bf16 %v5291_v3, %v5290_v43 }
 0x84a   :  { %7081 = vmatmul.mubr.bf16.gmra.mrb[72].mxu1 %v5312_v20 }
 0x84b   :  { %7084 = vmatprep.mubr.msk.bf16.mxu1 %vm7803_vm2, %v13553_v57 }
 0x861   :  { %v5243_v34 = vpop.f32.mrb[4].mxu0 }
 0x862   :  { %v5244_v55 = vadd.f32 %v12389_v51, %v5243_v34  ;;  %v6994_v16 = vpop.f32.mrb[5].mxu0 }
 0x863   :  { %v5246_v7 = vpop.f32.mrb[6].mxu0 }
 0x864   :  { %v5247_v23 = vadd.f32 %v12389_v51, %v5246_v7  ;;  %v6995_v27 = vpop.f32.mrb[7].mxu0  ;;  %v5292_v25 = vmax.f32 %v5244_v55, 0.0 }
 0x866   :  { %v5293_v2 = vmax.f32 %v5247_v23, 0.0  ;;  %v5454_v58 = vpop.f32.mrb[24].mxu1 }
 0x867   :  { %v5455_v8 = vadd.f32 %v12571_v14, %v5454_v58  ;;  %v7034_v48 = vpop.f32.mrb[25].mxu1 }
 0x868   :  { %v5313_v15 = vpack.c.bf16 %v5293_v2, %v5292_v25  ;;  %v5457_v22 = vpop.f32.mrb[26].mxu1 }
 0x869   :  { %v5581_v59 = vadd.f32 %v5455_v8, %v4951_v44  ;;  %v5458_v49 = vadd.f32 %v12571_v14, %v5457_v22  ;;  %v7035_v10 = vpop.f32.mrb[27].mxu1 }
 0x86a   :  { %7085 = vmatmul.mubr.bf16.gmra.mrb[76].mxu1 %v5313_v15 }
 0x86b   :  { %v5582_v46 = vadd.f32 %v5458_v49, %v4952_v33  ;;  %7088 = vmatprep.mubr.msk.bf16.mxu1 %vm7803_vm2, %v13553_v57  ;;  %v5619_v1 = vmax.f32 %v5581_v59, 0.0 }
 0x86d   :  { %v5620_v29 = vmax.f32 %v5582_v46, 0.0 }
 0x86e   :  { %v5462_v19 = vpop.f32.mrb[28].mxu1 }
 0x86f   :  { %v5653_v24 = vpack.c.bf16 %v5620_v29, %v5619_v1  ;;  %v5463_v41 = vadd.f32 %v12571_v14, %v5462_v19  ;;  %v7038_v26 = vpop.f32.mrb[29].mxu1 }
 0x870   :  { %v5465_v43 = vpop.f32.mrb[30].mxu1  ;;  %v13812_v26 = vmax.f32 %v12261_v0, 0.0 }
 0x871   :  { %v5583_v60 = vadd.f32 %v5463_v41, %v4953_v17  ;;  %v5466_v44 = vadd.f32 %v12571_v14, %v5465_v43  ;;  %v7039_v3 = vpop.f32.mrb[31].mxu1  ;;  %7125 = vmatmul.mubr.bf16.gmra.mrb[28].mxu0 %v5653_v24 }
 0x872   :  { %7128 = vmatprep.mubr.msk.bf16.mxu0 %vm7803_vm2, %v13553_v57 }
 0x873   :  { %v5584_v47 = vadd.f32 %v5466_v44, %v4954_v11  ;;  %v5621_v33 = vmax.f32 %v5583_v60, 0.0  ;;  %v13811_v11 = vmax.f32 %v12249_v50, 0.0 }
 0x875   :  { %v5622_v20 = vmax.f32 %v5584_v47, 0.0 }
 0x876   :  { %v5470_v34 = vpop.f32.mrb[32].mxu1 }
 0x877   :  { %v5654_v55 = vpack.c.bf16 %v5622_v20, %v5621_v33  ;;  %v5471_v16 = vadd.f32 %v12571_v14, %v5470_v34  ;;  %v7042_v7 = vpop.f32.mrb[33].mxu1 }
 0x878   :  { %v5473_v23 = vpop.f32.mrb[34].mxu1 }
 0x879   :  { %v5585_v17 = vadd.f32 %v5471_v16, %v13810_v32  ;;  %v5474_v27 = vadd.f32 %v12571_v14, %v5473_v23  ;;  %v5251_v25 = vpop.f32.mrb[8].mxu0  ;;  %v7043_v2 = vpop.f32.mrb[35].mxu1  ;;  %7129 = vmatmul.mubr.bf16.gmra.mrb[32].mxu0 %v5654_v55  ;;  %v13814_v16 = vmax.f32 %v12281_v62, 0.0  ;;  %v13816_v62 = vmax.f32 %v12299_v12, 0.0 }
 0x87a   :  { %v5252_v58 = vadd.f32 %v12389_v51, %v5251_v25  ;;  %v6998_v42 = vpop.f32.mrb[9].mxu0  ;;  %7132 = vmatprep.mubr.msk.bf16.mxu0 %vm7803_vm2, %v13553_v57  ;;  %v13818_v12 = vmax.f32 %v12317_v52, 0.0  ;;  %v13820_v52 = vmax.f32 %v12335_v9, 0.0  ;;  %v13822_v9 = vmax.f32 %v12353_v5, 0.0 }
 0x87b   :  { %v5586_v8 = vadd.f32 %v5474_v27, %v13811_v11  ;;  %v5254_v48 = vpop.f32.mrb[10].mxu0  ;;  %v5623_v56 = vmax.f32 %v5585_v17, 0.0 }
 0x87c   :  { %v5255_v15 = vadd.f32 %v12389_v51, %v5254_v48  ;;  %v6999_v22 = vpop.f32.mrb[11].mxu0  ;;  %v5294_v49 = vmax.f32 %v5252_v58, 0.0  ;;  %v13813_v51 = vmax.f32 %v12268_v31, 0.0  ;;  %v13815_v31 = vmax.f32 %v12288_v4, 0.0 }
 0x87d   :  { %v5624_v59 = vmax.f32 %v5586_v8, 0.0  ;;  %v13817_v4 = vmax.f32 %v12306_v21, 0.0  ;;  %v13819_v21 = vmax.f32 %v12324_v61, 0.0  ;;  %v13821_v61 = vmax.f32 %v12342_v40, 0.0 }
 0x87e   :  { %v5295_v10 = vmax.f32 %v5255_v15, 0.0  ;;  %v5478_v46 = vpop.f32.mrb[36].mxu1  ;;  %v13823_v40 = vmax.f32 %v12360_v38, 0.0  ;;  %v13825_v38 = vmax.f32 %v12378_v53, 0.0 }
 0x87f   :  { %v5655_v1 = vpack.c.bf16 %v5624_v59, %v5623_v56  ;;  %v5479_v29 = vadd.f32 %v12571_v14, %v5478_v46  ;;  %v7046_v19 = vpop.f32.mrb[37].mxu1 }
 0x880   :  { %v5314_v24 = vpack.c.bf16 %v5295_v10, %v5294_v49  ;;  %v5481_v41 = vpop.f32.mrb[38].mxu1 }
 0x881   :  { %v5587_v43 = vadd.f32 %v5479_v29, %v13812_v26  ;;  %v5482_v50 = vadd.f32 %v12571_v14, %v5481_v41  ;;  %v7047_v60 = vpop.f32.mrb[39].mxu1  ;;  %7133 = vmatmul.mubr.bf16.gmra.mrb[36].mxu0 %v5655_v1 }
 0x882   :  { %7089 = vmatmul.mubr.bf16.gmra.mrb[80].mxu1 %v5314_v24  ;;  %7136 = vmatprep.mubr.msk.bf16.mxu0 %vm7803_vm2, %v13553_v57 }
 0x883   :  { %v5588_v44 = vadd.f32 %v5482_v50, %v13813_v51  ;;  %v5625_v3 = vmax.f32 %v5587_v43, 0.0 }
 0x885   :  { %v5626_v47 = vmax.f32 %v5588_v44, 0.0 }
 0x886   :  { %v5486_v33 = vpop.f32.mrb[40].mxu1 }
 0x887   :  { %v5656_v20 = vpack.c.bf16 %v5626_v47, %v5625_v3  ;;  %v5487_v34 = vadd.f32 %v12571_v14, %v5486_v33  ;;  %v7050_v55 = vpop.f32.mrb[41].mxu1 }
 0x888   :  { %v5489_v0 = vpop.f32.mrb[42].mxu1 }
 0x889   :  { %v5589_v7 = vadd.f32 %v5487_v34, %v13814_v16  ;;  %v5490_v23 = vadd.f32 %v12571_v14, %v5489_v0  ;;  %v7051_v32 = vpop.f32.mrb[43].mxu1  ;;  %7137 = vmatmul.mubr.bf16.gmra.mrb[40].mxu0 %v5656_v20 }
 0x88a   :  { %7140 = vmatprep.mubr.msk.bf16.mxu0 %vm7803_vm2, %v13553_v57 }
 0x88b   :  { %v5590_v17 = vadd.f32 %v5490_v23, %v13815_v31  ;;  %v5627_v27 = vmax.f32 %v5589_v7, 0.0 }
 0x88d   :  { %v5628_v25 = vmax.f32 %v5590_v17, 0.0 }
 0x88e   :  { %v5494_v2 = vpop.f32.mrb[44].mxu1 }
 0x88f   :  { %v5657_v58 = vpack.c.bf16 %v5628_v25, %v5627_v27  ;;  %v5495_v42 = vadd.f32 %v12571_v14, %v5494_v2  ;;  %v7054_v11 = vpop.f32.mrb[45].mxu1 }
 0x890   :  { %v5497_v8 = vpop.f32.mrb[46].mxu1 }
 0x891   :  { %v5591_v48 = vadd.f32 %v5495_v42, %v13816_v62  ;;  %v5498_v15 = vadd.f32 %v12571_v14, %v5497_v8  ;;  %v7055_v22 = vpop.f32.mrb[47].mxu1  ;;  %7141 = vmatmul.mubr.bf16.gmra.mrb[44].mxu0 %v5657_v58 }
 0x892   :  { %7144 = vmatprep.mubr.msk.bf16.mxu0 %vm7803_vm2, %v13553_v57 }
 0x893   :  { %v5592_v56 = vadd.f32 %v5498_v15, %v13817_v4  ;;  %v5629_v59 = vmax.f32 %v5591_v48, 0.0  ;;  %v13824_v4 = vmax.f32 %v12373_v37, 0.0 }
 0x895   :  { %v5630_v49 = vmax.f32 %v5592_v56, 0.0 }
 0x896   :  { %v5502_v10 = vpop.f32.mrb[48].mxu1 }
 0x897   :  { %v5658_v46 = vpack.c.bf16 %v5630_v49, %v5629_v59  ;;  %v5503_v1 = vadd.f32 %v12571_v14, %v5502_v10  ;;  %v7058_v29 = vpop.f32.mrb[49].mxu1 }
 0x898   :  { %v5505_v19 = vpop.f32.mrb[50].mxu1 }
 0x899   :  { %v5593_v24 = vadd.f32 %v5503_v1, %v13818_v12  ;;  %v5506_v41 = vadd.f32 %v12571_v14, %v5505_v19  ;;  %v7059_v26 = vpop.f32.mrb[51].mxu1  ;;  %7145 = vmatmul.mubr.bf16.gmra.mrb[48].mxu0 %v5658_v46  ;;  %v12706_v19 = vld [vmem:[%s12947_s9] ss:$0 sm:$0xff] }
 0x89a   :  { %7148 = vmatprep.mubr.msk.bf16.mxu0 %vm7803_vm2, %v13553_v57 }
 0x89b   :  { %v5594_v43 = vadd.f32 %v5506_v41, %v13819_v21  ;;  %v5631_v50 = vmax.f32 %v5593_v24, 0.0 }
 0x89d   :  { %v5632_v60 = vmax.f32 %v5594_v43, 0.0 }
 0x89e   :  { %v5510_v51 = vpop.f32.mrb[52].mxu1 }
 0x89f   :  { %v5659_v44 = vpack.c.bf16 %v5632_v60, %v5631_v50  ;;  %v5511_v3 = vadd.f32 %v12571_v14, %v5510_v51  ;;  %v7062_v47 = vpop.f32.mrb[53].mxu1 }
 0x8a0   :  { %v5513_v33 = vpop.f32.mrb[54].mxu1 }
 0x8a1   :  { %v5595_v20 = vadd.f32 %v5511_v3, %v13820_v52  ;;  %v5514_v34 = vadd.f32 %v12571_v14, %v5513_v33  ;;  %v7063_v55 = vpop.f32.mrb[55].mxu1  ;;  %7149 = vmatmul.mubr.bf16.gmra.mrb[52].mxu0 %v5659_v44 }
 0x8a2   :  { %7152 = vmatprep.mubr.msk.bf16.mxu0 %vm7803_vm2, %v13553_v57 }
 0x8a3   :  { %v5596_v0 = vadd.f32 %v5514_v34, %v13821_v61  ;;  %v5633_v16 = vmax.f32 %v5595_v20, 0.0 }
 0x8a5   :  { %v5634_v7 = vmax.f32 %v5596_v0, 0.0 }
 0x8a6   :  { %v5518_v23 = vpop.f32.mrb[56].mxu1 }
 0x8a7   :  { %v5660_v32 = vpack.c.bf16 %v5634_v7, %v5633_v16  ;;  %v5519_v31 = vadd.f32 %v12571_v14, %v5518_v23  ;;  %v7066_v17 = vpop.f32.mrb[57].mxu1  ;;  %v13826_v7 = vmax.f32 %v12408_v13, 0.0 }
 0x8a8   :  { %v5521_v27 = vpop.f32.mrb[58].mxu1 }
 0x8a9   :  { %v5597_v25 = vadd.f32 %v5519_v31, %v13822_v9  ;;  %v5522_v2 = vadd.f32 %v12571_v14, %v5521_v27  ;;  %v7067_v58 = vpop.f32.mrb[59].mxu1  ;;  %7153 = vmatmul.mubr.bf16.gmra.mrb[56].mxu0 %v5660_v32 }
 0x8aa   :  { %7156 = vmatprep.mubr.msk.bf16.mxu0 %vm7803_vm2, %v13553_v57 }
 0x8ab   :  { %v5598_v42 = vadd.f32 %v5522_v2, %v13823_v40  ;;  %v5635_v11 = vmax.f32 %v5597_v25, 0.0 }
 0x8ad   :  { %v5636_v8 = vmax.f32 %v5598_v42, 0.0 }
 0x8af   :  { %v5661_v62 = vpack.c.bf16 %v5636_v8, %v5635_v11 }
 0x8b1   :  { %7157 = vmatmul.mubr.bf16.gmra.mrb[60].mxu0 %v5661_v62 }
 0x8b2   :  { %7160 = vmatprep.mubr.msk.bf16.mxu0 %vm7803_vm2, %v13553_v57 }
 0x8c5   :  { %v5526_v48 = vpop.f32.mrb[60].mxu1 }
 0x8c6   :  { %v5527_v5 = vadd.f32 %v12571_v14, %v5526_v48  ;;  %v7070_v15 = vpop.f32.mrb[61].mxu1  ;;  %v13827_v48 = vmax.f32 %v12430_v54, 0.0  ;;  %v13829_v54 = vmax.f32 %v12456_v28, 0.0  ;;  %v13831_v28 = vmax.f32 %v12497_v36, 0.0 }
 0x8c7   :  { %v5529_v22 = vpop.f32.mrb[62].mxu1 }
 0x8c8   :  { %v5599_v56 = vadd.f32 %v5527_v5, %v13824_v4  ;;  %v5530_v59 = vadd.f32 %v12571_v14, %v5529_v22  ;;  %v7071_v49 = vpop.f32.mrb[63].mxu1  ;;  %v13828_v4 = vmax.f32 %v12435_v63, 0.0  ;;  %v13830_v63 = vmax.f32 %v12461_v30, 0.0 }
 0x8c9   :  { %v13832_v30 = vmax.f32 %v12502_v45, 0.0 }
 0x8ca   :  { %v5600_v10 = vadd.f32 %v5530_v59, %v13825_v38  ;;  %v5637_v46 = vmax.f32 %v5599_v56, 0.0 }
 0x8cc   :  { %v5638_v1 = vmax.f32 %v5600_v10, 0.0 }
 0x8ce   :  { %v5662_v29 = vpack.c.bf16 %v5638_v1, %v5637_v46 }
 0x8d0   :  { %7161 = vmatmul.mubr.bf16.gmra.mrb[64].mxu0 %v5662_v29 }
 0x8d1   :  { %7164 = vmatprep.mubr.msk.bf16.mxu0 %vm7803_vm2, %v13553_v57 }
 0x8d3   :  { %v5773_v37 = vpop.f32.mrb[12].mxu0 }
 0x8d4   :  { %v5774_v12 = vadd.f32 %v12706_v19, %v5773_v37  ;;  %v7110_v24 = vpop.f32.mrb[13].mxu0 }
 0x8d5   :  { %v5776_v41 = vpop.f32.mrb[14].mxu0 }
 0x8d6   :  { %5925 = vst.msk [vmem:[%s12948_s10] sm:$0xff] %vm5924_vm6, %v5774_v12  ;;  %v5777_v53 = vadd.f32 %v12706_v19, %v5776_v41  ;;  %v7111_v26 = vpop.f32.mrb[15].mxu0 }
 0x8d8   :  { %5926 = vst.msk [vmem:[%s12948_s10 + $0x8] sm:$0xff] %vm5924_vm6, %v5777_v53 }
 0x8dc   :  { %v5781_v21 = vpop.f32.mrb[16].mxu0 }
 0x8dd   :  { %v5782_v43 = vadd.f32 %v12706_v19, %v5781_v21  ;;  %v7114_v50 = vpop.f32.mrb[17].mxu0 }
 0x8de   :  { %v5784_v60 = vpop.f32.mrb[18].mxu0 }
 0x8df   :  { %5927 = vst.msk [vmem:[%s12948_s10 + $0x10] sm:$0xff] %vm5924_vm6, %v5782_v43  ;;  %v5785_v51 = vadd.f32 %v12706_v19, %v5784_v60  ;;  %v7115_v44 = vpop.f32.mrb[19].mxu0 }
 0x8e1   :  { %5928 = vst.msk [vmem:[%s12948_s10 + $0x18] sm:$0xff] %vm5924_vm6, %v5785_v51  ;;  %v5534_v3 = vpop.f32.mrb[64].mxu1 }
 0x8e2   :  { %v5535_v47 = vadd.f32 %v12571_v14, %v5534_v3  ;;  %v7074_v33 = vpop.f32.mrb[65].mxu1 }
 0x8e3   :  { %v5537_v52 = vpop.f32.mrb[66].mxu1 }
 0x8e4   :  { %v5601_v20 = vadd.f32 %v5535_v47, %v4971_v39  ;;  %v5538_v34 = vadd.f32 %v12571_v14, %v5537_v52  ;;  %v5789_v55 = vpop.f32.mrb[20].mxu0  ;;  %v7075_v61 = vpop.f32.mrb[67].mxu1 }
 0x8e5   :  { %v5790_v0 = vadd.f32 %v12706_v19, %v5789_v55  ;;  %v7118_v16 = vpop.f32.mrb[21].mxu0 }
 0x8e6   :  { %v5602_v23 = vadd.f32 %v5538_v34, %v13826_v7  ;;  %v5792_v32 = vpop.f32.mrb[22].mxu0  ;;  %v5639_v39 = vmax.f32 %v5601_v20, 0.0 }
 0x8e7   :  { %5929 = vst.msk [vmem:[%s12948_s10 + $0x20] sm:$0xff] %vm5924_vm6, %v5790_v0  ;;  %v5793_v31 = vadd.f32 %v12706_v19, %v5792_v32  ;;  %v7119_v18 = vpop.f32.mrb[23].mxu0 }
 0x8e8   :  { %v5640_v17 = vmax.f32 %v5602_v23, 0.0 }
 0x8e9   :  { %5930 = vst.msk [vmem:[%s12948_s10 + $0x28] sm:$0xff] %vm5924_vm6, %v5793_v31 }
 0x8ea   :  { %v5663_v27 = vpack.c.bf16 %v5640_v17, %v5639_v39 }
 0x8ec   :  { %v5797_v9 = vpop.f32.mrb[24].mxu0  ;;  %7165 = vmatmul.mubr.bf16.gmra.mrb[68].mxu0 %v5663_v27 }
 0x8ed   :  { %v5798_v13 = vadd.f32 %v12706_v19, %v5797_v9  ;;  %v7122_v25 = vpop.f32.mrb[25].mxu0  ;;  %7168 = vmatprep.mubr.msk.bf16.mxu0 %vm7803_vm2, %v13553_v57 }
 0x8ee   :  { %v5800_v2 = vpop.f32.mrb[26].mxu0 }
 0x8ef   :  { %5931 = vst.msk [vmem:[%s12948_s10 + $0x30] sm:$0xff] %vm5924_vm6, %v5798_v13  ;;  %v5801_v58 = vadd.f32 %v12706_v19, %v5800_v2  ;;  %v7123_v40 = vpop.f32.mrb[27].mxu0 }
 0x8f1   :  { %5932 = vst.msk [vmem:[%s12948_s10 + $0x38] sm:$0xff] %vm5924_vm6, %v5801_v58 }
 0x901   :  { %v5542_v42 = vpop.f32.mrb[68].mxu1 }
 0x902   :  { %v5543_v11 = vadd.f32 %v12571_v14, %v5542_v42  ;;  %v7078_v8 = vpop.f32.mrb[69].mxu1 }
 0x903   :  { %v5545_v62 = vpop.f32.mrb[70].mxu1 }
 0x904   :  { %v5603_v5 = vadd.f32 %v5543_v11, %v13827_v48  ;;  %v5546_v15 = vadd.f32 %v12571_v14, %v5545_v62  ;;  %v7079_v22 = vpop.f32.mrb[71].mxu1  ;;  %v13833_v11 = vmax.f32 %v12525_v35, 0.0 }
 0x906   :  { %v5604_v56 = vadd.f32 %v5546_v15, %v13828_v4  ;;  %v5641_v59 = vmax.f32 %v5603_v5, 0.0  ;;  %v13834_v5 = vmax.f32 %v12530_v6, 0.0 }
 0x908   :  { %v5642_v49 = vmax.f32 %v5604_v56, 0.0 }
 0x90a   :  { %v5664_v38 = vpack.c.bf16 %v5642_v49, %v5641_v59 }
 0x90c   :  { %7169 = vmatmul.mubr.bf16.gmra.mrb[72].mxu0 %v5664_v38 }
 0x90d   :  { %7172 = vmatprep.mubr.msk.bf16.mxu0 %vm7803_vm2, %v13553_v57 }
 0x91d   :  { %v5550_v10 = vpop.f32.mrb[72].mxu1 }
 0x91e   :  { %v5551_v46 = vadd.f32 %v12571_v14, %v5550_v10  ;;  %v7082_v1 = vpop.f32.mrb[73].mxu1 }
 0x91f   :  { %v5553_v29 = vpop.f32.mrb[74].mxu1 }
 0x920   :  { %v5605_v37 = vadd.f32 %v5551_v46, %v13829_v54  ;;  %v5554_v12 = vadd.f32 %v12571_v14, %v5553_v29  ;;  %v7083_v24 = vpop.f32.mrb[75].mxu1 }
 0x922   :  { %v5606_v41 = vadd.f32 %v5554_v12, %v13830_v63  ;;  %v5643_v53 = vmax.f32 %v5605_v37, 0.0 }
 0x924   :  { %v5644_v26 = vmax.f32 %v5606_v41, 0.0 }
 0x926   :  { %v5665_v21 = vpack.c.bf16 %v5644_v26, %v5643_v53 }
 0x928   :  { %7173 = vmatmul.mubr.bf16.gmra.mrb[76].mxu0 %v5665_v21 }
 0x929   :  { %7176 = vmatprep.mubr.msk.bf16.mxu0 %vm7803_vm2, %v13553_v57 }
 0x93d   :  { %v5558_v43 = vpop.f32.mrb[76].mxu1 }
 0x93e   :  { %v5559_v50 = vadd.f32 %v12571_v14, %v5558_v43  ;;  %v7086_v60 = vpop.f32.mrb[77].mxu1 }
 0x93f   :  { %v5561_v51 = vpop.f32.mrb[78].mxu1 }
 0x940   :  { %v5607_v44 = vadd.f32 %v5559_v50, %v13831_v28  ;;  %v5562_v3 = vadd.f32 %v12571_v14, %v5561_v51  ;;  %v7087_v47 = vpop.f32.mrb[79].mxu1 }
 0x942   :  { %v5608_v33 = vadd.f32 %v5562_v3, %v13832_v30  ;;  %v5645_v52 = vmax.f32 %v5607_v44, 0.0 }
 0x944   :  { %v5646_v20 = vmax.f32 %v5608_v33, 0.0  ;;  %v5805_v34 = vpop.f32.mrb[28].mxu0 }
 0x945   :  { %v5806_v55 = vadd.f32 %v12706_v19, %v5805_v34  ;;  %v7126_v61 = vpop.f32.mrb[29].mxu0 }
 0x946   :  { %v5666_v0 = vpack.c.bf16 %v5646_v20, %v5645_v52  ;;  %v5808_v16 = vpop.f32.mrb[30].mxu0 }
 0x947   :  { %5933 = vst.msk [vmem:[%s12948_s10 + $0x40] sm:$0xff] %vm5924_vm6, %v5806_v55  ;;  %v5809_v36 = vadd.f32 %v12706_v19, %v5808_v16  ;;  %v7127_v7 = vpop.f32.mrb[31].mxu0 }
 0x948   :  { %7177 = vmatmul.mubr.bf16.gmra.mrb[80].mxu0 %v5666_v0 }
 0x949   :  { %5934 = vst.msk [vmem:[%s12948_s10 + $0x48] sm:$0xff] %vm5924_vm6, %v5809_v36  ;;  %7180 = vmatprep.mubr.msk.bf16.mxu0 %vm7803_vm2, %v13553_v57 }
 0x94c   :  { %v5813_v45 = vpop.f32.mrb[32].mxu0 }
 0x94d   :  { %v5814_v23 = vadd.f32 %v12706_v19, %v5813_v45  ;;  %v7130_v32 = vpop.f32.mrb[33].mxu0 }
 0x94e   :  { %v5816_v31 = vpop.f32.mrb[34].mxu0 }
 0x94f   :  { %5935 = vst.msk [vmem:[%s12948_s10 + $0x50] sm:$0xff] %vm5924_vm6, %v5814_v23  ;;  %v5817_v18 = vadd.f32 %v12706_v19, %v5816_v31  ;;  %v7131_v39 = vpop.f32.mrb[35].mxu0 }
 0x951   :  { %5936 = vst.msk [vmem:[%s12948_s10 + $0x58] sm:$0xff] %vm5924_vm6, %v5817_v18 }
 0x954   :  { %v5821_v17 = vpop.f32.mrb[36].mxu0 }
 0x955   :  { %v5822_v57 = vadd.f32 %v12706_v19, %v5821_v17  ;;  %v5566_v27 = vpop.f32.mrb[80].mxu1  ;;  %v7134_v9 = vpop.f32.mrb[37].mxu0 }
 0x956   :  { %v5567_v13 = vadd.f32 %v12571_v14, %v5566_v27  ;;  %v7090_v25 = vpop.f32.mrb[81].mxu1  ;;  %v5824_v2 = vpop.f32.mrb[38].mxu0 }
 0x957   :  { %5937 = vst.msk [vmem:[%s12948_s10 + $0x60] sm:$0xff] %vm5924_vm6, %v5822_v57  ;;  %v5825_v58 = vadd.f32 %v12706_v19, %v5824_v2  ;;  %v5569_v40 = vpop.f32.mrb[82].mxu1  ;;  %v7135_v42 = vpop.f32.mrb[39].mxu0 }
 0x958   :  { %v5609_v8 = vadd.f32 %v5567_v13, %v13833_v11  ;;  %v5570_v62 = vadd.f32 %v12571_v14, %v5569_v40  ;;  %v7091_v48 = vpop.f32.mrb[83].mxu1 }
 0x959   :  { %5938 = vst.msk [vmem:[%s12948_s10 + $0x68] sm:$0xff] %vm5924_vm6, %v5825_v58 }
 0x95a   :  { %v5610_v15 = vadd.f32 %v5570_v62, %v13834_v5  ;;  %v5647_v22 = vmax.f32 %v5609_v8, 0.0 }
 0x95c   :  { %v5648_v4 = vmax.f32 %v5610_v15, 0.0  ;;  %v5829_v56 = vpop.f32.mrb[40].mxu0 }
 0x95d   :  { %v5830_v59 = vadd.f32 %v12706_v19, %v5829_v56  ;;  %v7138_v49 = vpop.f32.mrb[41].mxu0 }
 0x95e   :  { %v5667_v38 = vpack.c.bf16 %v5648_v4, %v5647_v22  ;;  %v5832_v35 = vpop.f32.mrb[42].mxu0 }
 0x95f   :  { %5939 = vst.msk [vmem:[%s12948_s10 + $0x70] sm:$0xff] %vm5924_vm6, %v5830_v59  ;;  %v5833_v14 = vadd.f32 %v12706_v19, %v5832_v35  ;;  %v7139_v10 = vpop.f32.mrb[43].mxu0 }
 0x960   :  { %7181 = vmatmul.mubr.bf16.gmra.mrb[84].mxu0 %v5667_v38 }
 0x961   :  { %5940 = vst.msk [vmem:[%s12948_s10 + $0x78] sm:$0xff] %vm5924_vm6, %v5833_v14 }
 0x964   :  { %v5837_v6 = vpop.f32.mrb[44].mxu0 }
 0x965   :  { %v5838_v46 = vadd.f32 %v12706_v19, %v5837_v6  ;;  %v7142_v1 = vpop.f32.mrb[45].mxu0 }
 0x966   :  { %v5840_v29 = vpop.f32.mrb[46].mxu0 }
 0x967   :  { %5941 = vst.msk [vmem:[%s12948_s10 + $0x80] sm:$0xff] %vm5924_vm6, %v5838_v46  ;;  %v5841_v54 = vadd.f32 %v12706_v19, %v5840_v29  ;;  %v7143_v37 = vpop.f32.mrb[47].mxu0 }
 0x969   :  { %5942 = vst.msk [vmem:[%s12948_s10 + $0x88] sm:$0xff] %vm5924_vm6, %v5841_v54 }
 0x96c   :  { %v5845_v12 = vpop.f32.mrb[48].mxu0 }
 0x96d   :  { %v5846_v24 = vadd.f32 %v12706_v19, %v5845_v12  ;;  %v7146_v63 = vpop.f32.mrb[49].mxu0 }
 0x96e   :  { %v5848_v41 = vpop.f32.mrb[50].mxu0 }
 0x96f   :  { %5943 = vst.msk [vmem:[%s12948_s10 + $0x90] sm:$0xff] %vm5924_vm6, %v5846_v24  ;;  %v5849_v53 = vadd.f32 %v12706_v19, %v5848_v41  ;;  %v7147_v26 = vpop.f32.mrb[51].mxu0 }
 0x971   :  { %5944 = vst.msk [vmem:[%s12948_s10 + $0x98] sm:$0xff] %vm5924_vm6, %v5849_v53 }
 0x974   :  { %v5853_v21 = vpop.f32.mrb[52].mxu0 }
 0x975   :  { %v5854_v43 = vadd.f32 %v12706_v19, %v5853_v21  ;;  %v7150_v50 = vpop.f32.mrb[53].mxu0 }
 0x976   :  { %v5856_v60 = vpop.f32.mrb[54].mxu0 }
 0x977   :  { %5945 = vst.msk [vmem:[%s12948_s10 + $0xa0] sm:$0xff] %vm5924_vm6, %v5854_v43  ;;  %v5857_v51 = vadd.f32 %v12706_v19, %v5856_v60  ;;  %v7151_v28 = vpop.f32.mrb[55].mxu0 }
 0x979   :  { %5946 = vst.msk [vmem:[%s12948_s10 + $0xa8] sm:$0xff] %vm5924_vm6, %v5857_v51 }
 0x97c   :  { %v5861_v44 = vpop.f32.mrb[56].mxu0 }
 0x97d   :  { %v5862_v3 = vadd.f32 %v12706_v19, %v5861_v44  ;;  %v7154_v47 = vpop.f32.mrb[57].mxu0 }
 0x97e   :  { %v5864_v30 = vpop.f32.mrb[58].mxu0 }
 0x97f   :  { %5947 = vst.msk [vmem:[%s12948_s10 + $0xb0] sm:$0xff] %vm5924_vm6, %v5862_v3  ;;  %v5865_v33 = vadd.f32 %v12706_v19, %v5864_v30  ;;  %v7155_v52 = vpop.f32.mrb[59].mxu0 }
 0x981   :  { %5948 = vst.msk [vmem:[%s12948_s10 + $0xb8] sm:$0xff] %vm5924_vm6, %v5865_v33 }
 0x984   :  { %v5869_v20 = vpop.f32.mrb[60].mxu0 }
 0x985   :  { %v5870_v34 = vadd.f32 %v12706_v19, %v5869_v20  ;;  %v7158_v55 = vpop.f32.mrb[61].mxu0 }
 0x986   :  { %v5872_v61 = vpop.f32.mrb[62].mxu0 }
 0x987   :  { %5949 = vst.msk [vmem:[%s12948_s10 + $0xc0] sm:$0xff] %vm5924_vm6, %v5870_v34  ;;  %v5873_v0 = vadd.f32 %v12706_v19, %v5872_v61  ;;  %v7159_v16 = vpop.f32.mrb[63].mxu0 }
 0x989   :  { %5950 = vst.msk [vmem:[%s12948_s10 + $0xc8] sm:$0xff] %vm5924_vm6, %v5873_v0 }
 0x9a3   :  { %v5877_v36 = vpop.f32.mrb[64].mxu0 }
 0x9a4   :  { %v5878_v7 = vadd.f32 %v12706_v19, %v5877_v36  ;;  %v7162_v45 = vpop.f32.mrb[65].mxu0 }
 0x9a5   :  { %v5880_v23 = vpop.f32.mrb[66].mxu0 }
 0x9a6   :  { %5951 = vst.msk [vmem:[%s12948_s10 + $0xd0] sm:$0xff] %vm5924_vm6, %v5878_v7  ;;  %v5881_v32 = vadd.f32 %v12706_v19, %v5880_v23  ;;  %v7163_v31 = vpop.f32.mrb[67].mxu0 }
 0x9a8   :  { %5952 = vst.msk [vmem:[%s12948_s10 + $0xd8] sm:$0xff] %vm5924_vm6, %v5881_v32 }
 0x9bf   :  { %v5885_v18 = vpop.f32.mrb[68].mxu0 }
 0x9c0   :  { %v5886_v39 = vadd.f32 %v12706_v19, %v5885_v18  ;;  %v7166_v17 = vpop.f32.mrb[69].mxu0 }
 0x9c1   :  { %v5888_v57 = vpop.f32.mrb[70].mxu0 }
 0x9c2   :  { %5953 = vst.msk [vmem:[%s12948_s10 + $0xe0] sm:$0xff] %vm5924_vm6, %v5886_v39  ;;  %v5889_v27 = vadd.f32 %v12706_v19, %v5888_v57  ;;  %v7167_v9 = vpop.f32.mrb[71].mxu0 }
 0x9c4   :  { %5954 = vst.msk [vmem:[%s12948_s10 + $0xe8] sm:$0xff] %vm5924_vm6, %v5889_v27 }
 0x9df   :  { %v5893_v13 = vpop.f32.mrb[72].mxu0 }
 0x9e0   :  { %v5894_v25 = vadd.f32 %v12706_v19, %v5893_v13  ;;  %v7170_v2 = vpop.f32.mrb[73].mxu0 }
 0x9e1   :  { %v5896_v58 = vpop.f32.mrb[74].mxu0 }
 0x9e2   :  { %5955 = vst.msk [vmem:[%s12948_s10 + $0xf0] sm:$0xff] %vm5924_vm6, %v5894_v25  ;;  %v5897_v40 = vadd.f32 %v12706_v19, %v5896_v58  ;;  %v7171_v42 = vpop.f32.mrb[75].mxu0 }
 0x9e4   :  { %5956 = vst.msk [vmem:[%s12948_s10 + $0xf8] sm:$0xff] %vm5924_vm6, %v5897_v40 }
 0x9fb   :  { %v5901_v11 = vpop.f32.mrb[76].mxu0 }
 0x9fc   :  { %v5902_v8 = vadd.f32 %v12706_v19, %v5901_v11  ;;  %v7174_v62 = vpop.f32.mrb[77].mxu0 }
 0x9fd   :  { %v5904_v48 = vpop.f32.mrb[78].mxu0 }
 0x9fe   :  { %5957 = vst.msk [vmem:[%s12948_s10 + $0x100] sm:$0xff] %vm5924_vm6, %v5902_v8  ;;  %v5905_v5 = vadd.f32 %v12706_v19, %v5904_v48  ;;  %v7175_v15 = vpop.f32.mrb[79].mxu0 }
 0xa00   :  { %5958 = vst.msk [vmem:[%s12948_s10 + $0x108] sm:$0xff] %vm5924_vm6, %v5905_v5 }
 0xa1b   :  { %v5909_v22 = vpop.f32.mrb[80].mxu0 }
 0xa1c   :  { %v5910_v4 = vadd.f32 %v12706_v19, %v5909_v22  ;;  %v7178_v56 = vpop.f32.mrb[81].mxu0 }
 0xa1d   :  { %v5912_v59 = vpop.f32.mrb[82].mxu0 }
 0xa1e   :  { %5959 = vst.msk [vmem:[%s12948_s10 + $0x110] sm:$0xff] %vm5924_vm6, %v5910_v4  ;;  %v5913_v49 = vadd.f32 %v12706_v19, %v5912_v59  ;;  %v7179_v38 = vpop.f32.mrb[83].mxu0 }
 0xa20   :  { %5960 = vst.msk [vmem:[%s12948_s10 + $0x118] sm:$0xff] %vm5924_vm6, %v5913_v49 }
 0xa33   :  { %v5917_v35 = vpop.f32.mrb[84].mxu0 }
 0xa34   :  { %v5918_v14 = vadd.f32 %v12706_v19, %v5917_v35  ;;  %v7182_v10 = vpop.f32.mrb[85].mxu0 }
 0xa35   :  { %v5920_v6 = vpop.f32.mrb[86].mxu0 }
 0xa36   :  { %5961 = vst.msk [vmem:[%s12948_s10 + $0x120] sm:$0xff] %vm5924_vm6, %v5918_v14  ;;  %v5921_v46 = vadd.f32 %v12706_v19, %v5920_v6  ;;  %v7183_v1 = vpop.f32.mrb[87].mxu0 }
 0xa38   :  { %5962 = vst.msk [vmem:[%s12948_s10 + $0x128] sm:$0xff] %vm5924_vm6, %v5921_v46 }

</bundles_post_ra>
